<compile_context>
chip_gen: v6e
topology: v6e:2x2x1
jax: 0.10.0
libtpu: 0.0.40
codegen_flags: <defaults>
</compile_context>

<pallas_src>
import functools

import jax
import jax.numpy as jnp
from jax import lax
from jax.experimental import pallas as pl
from jax.experimental.pallas import tpu as pltpu


def _rcab_kernel(x_ref, w1_ref, b1_ref, w2_ref, b2_ref,
                 wd_ref, bd_ref, wu_ref, bu_ref,
                 o_ref, col_ref, pad_ref, *, W, res_scale):
    # Block shapes (static):
    #   x_ref / o_ref : (Bb, C, H*W)        float32  (lane dim = H*W, lane dense)
    #   w1_ref/w2_ref : (C, 9*C)            bfloat16 (im2col conv weights)
    #   b1_ref/b2_ref : (C, 1)              float32
    #   wd_ref        : (C, Cr)             float32  (1x1 "down" conv weight)
    #   bd_ref        : (1, Cr)             float32
    #   wu_ref        : (C, Cr)             float32  (1x1 "up" weight, transposed)
    #   bu_ref        : (C, 1)              float32
    #   col_ref       : (9*C, Bb*H*W)       bfloat16 VMEM im2col scratch (reused)
    #   pad_ref       : (3, C, H*W + 2*PAD) bfloat16 padded activation buffers
    Bb, C, HW = x_ref.shape
    HWP = pad_ref.shape[-1]
    PAD = (HWP - HW) // 2

    # Zero the two pad stripes once per grid step; everything afterwards only
    # writes the middle [PAD, PAD+HW) region, so they stay zero for both convs
    # and all Bb images.  Done every step (not pl.when(step==0)) so it remains
    # correct when the parallel grid axis is sharded across TensorCores.
    pad_ref[:, :, 0:PAD] = jnp.zeros((3, C, PAD), pad_ref.dtype)
    pad_ref[:, :, PAD + HW:HWP] = jnp.zeros((3, C, PAD), pad_ref.dtype)

    # Within-row column index for the +/-1 lane-shift boundary masks.
    lane_idx = lax.broadcasted_iota(jnp.int32, (1, HW), 1)
    if W & (W - 1) == 0:
        col_idx = lane_idx & (W - 1)
    else:
        col_idx = lane_idx % W
    not_col0 = col_idx != 0          # zeroes input column 0    -> used by dx=+1 taps
    not_colL = col_idx != (W - 1)    # zeroes input column W-1  -> used by dx=-1 taps

    def build_cols(act_bf16, img):
        # act_bf16: (C, HW) bf16 for one image.  Write base + 2 masked copies
        # (vsel) into the persistent padded scratch, then lane-shift-slice the
        # 9 taps straight into the im2col scratch -- bf16 end to end.
        pad_ref[0, :, PAD:PAD + HW] = act_bf16
        pad_ref[1, :, PAD:PAD + HW] = jnp.where(not_col0, act_bf16, 0).astype(pad_ref.dtype)
        pad_ref[2, :, PAD:PAD + HW] = jnp.where(not_colL, act_bf16, 0).astype(pad_ref.dtype)
        for ky in range(3):
            for kx in range(3):
                dy, dx = ky - 1, kx - 1
                buf = 0 if dx == 0 else (1 if dx == 1 else 2)
                off = PAD + dy * W + dx
                k = ky * 3 + kx
                col_ref[k * C:(k + 1) * C, img * HW:(img + 1) * HW] = (
                    pad_ref[buf, :, off:off + HW])

    def conv3x3(get_act_bf16, w_ref, b_ref):
        for b in range(Bb):
            build_cols(get_act_bf16(b), b)
        y = jnp.dot(w_ref[...], col_ref[...],
                    preferred_element_type=jnp.float32)          # (C, Bb*HW) f32
        return y + b_ref[...]                                    # bias (C, 1)

    # conv1 + ReLU (CNA mode, act='relu'); ReLU in f32, then one cast to bf16.
    y1 = conv3x3(lambda b: x_ref[b].astype(jnp.bfloat16), w1_ref, b1_ref)
    h1_bf = jnp.maximum(y1, 0.0).astype(jnp.bfloat16)            # (C, Bb*HW)

    # conv2 (no activation).
    res = conv3x3(lambda b: h1_bf[:, b * HW:(b + 1) * HW], w2_ref, b2_ref)

    # CALayer + residual, per image (all f32).
    for b in range(Bb):
        res_b = res[:, b * HW:(b + 1) * HW]                      # (C, HW)
        pooled = jnp.mean(res_b, axis=1, keepdims=True)          # (C, 1)
        d = jnp.sum(wd_ref[...] * pooled, axis=0, keepdims=True) + bd_ref[...]
        d = jnp.maximum(d, 0.0)                                  # (1, Cr)
        u = jnp.sum(wu_ref[...] * d, axis=1, keepdims=True) + bu_ref[...]   # (C, 1)
        gated = res_b * jax.nn.sigmoid(u)                        # channel attention
        if res_scale == 1.0:     # trace-time guard: skip the extra multiply
            out_b = x_ref[b] + gated
        else:
            out_b = x_ref[b] + res_scale * gated
        o_ref[b] = out_b.astype(o_ref.dtype)


def _pick_images_per_step(B, C, HW, col_budget_bytes=4 << 20):
    """Largest Bb dividing B with B//Bb >= 2 (keep both v7x TCs busy), under a
    byte budget for the (9C, Bb*HW) bf16 im2col scratch."""
    cap = max(1, col_budget_bytes // (9 * C * HW * 2))
    best = 1
    for bb in range(1, B + 1):
        if bb > cap:
            break
        if B % bb == 0 and B // bb >= 2:
            best = bb
    return best


def rcab_pallas(x_nchw, params, res_scale=1.0, images_per_step=None):
    """x_nchw: (B, C, H, W) float32 (PyTorch layout). Returns (B, C, H, W)."""
    w1, b1, w2, b2, wd, bd, wu, bu = params
    B, C, H, W = x_nchw.shape
    HW = H * W
    # TODO(synk): if H*W is not a multiple of 128, pad spatially in the wrapper
    # (and mask the pool denominator) to keep output stores lane-dense.

    # Flatten spatial so the kernel's lane dim is H*W (free reshape, no transpose).
    x_flat = x_nchw.reshape(B, C, HW)

    Bb = images_per_step or _pick_images_per_step(B, C, HW)
    assert B % Bb == 0, (B, Bb)

    # Lane-aligned zero padding covering the +/-(W+1) flat spatial shifts.
    PAD = ((W + 1 + 127) // 128) * 128

    # Conv weights HWIO (3,3,Cin,Cout) -> (Cout, 9*Cin) matching the im2col row
    # order (tap-major, channel-minor); bf16 MXU operands, f32 accumulation.
    def to_2d(w):
        return jnp.transpose(w, (3, 0, 1, 2)).reshape(C, 9 * C).astype(jnp.bfloat16)

    w1_2d, w2_2d = to_2d(w1), to_2d(w2)
    b1_c = b1.reshape(C, 1)
    b2_c = b2.reshape(C, 1)
    wu_t = wu.T                      # (C, Cr)
    bu_c = bu.reshape(C, 1)

    full = lambda a: pl.BlockSpec(a.shape, lambda i: (0,) * a.ndim)

    kernel = functools.partial(_rcab_kernel, W=W, res_scale=float(res_scale))

    out_flat = pl.pallas_call(
        kernel,
        out_shape=jax.ShapeDtypeStruct((B, C, HW), jnp.float32),
        grid_spec=pltpu.PrefetchScalarGridSpec(
            num_scalar_prefetch=0,
            grid=(B // Bb,),
            in_specs=[
                pl.BlockSpec((Bb, C, HW), lambda i: (i, 0, 0)),    # x
                full(w1_2d), full(b1_c),
                full(w2_2d), full(b2_c),
                full(wd), full(bd),
                full(wu_t), full(bu_c),
            ],
            out_specs=pl.BlockSpec((Bb, C, HW), lambda i: (i, 0, 0)),
            scratch_shapes=[
                pltpu.VMEM((9 * C, Bb * HW), jnp.bfloat16),        # im2col
                pltpu.VMEM((3, C, HW + 2 * PAD), jnp.bfloat16),    # padded act (+2 masked)
            ],
        ),
        compiler_params=pltpu.CompilerParams(
            dimension_semantics=("parallel",),   # shards batch steps over v7x's 2 TCs
            # Per-step footprint (double-buffered f32 in/out blocks + bf16
            # weights + bf16 im2col & padded scratch) is ~1.5 MiB at these
            # shapes; 32 MiB is ample and fits every chip's scoped-VMEM budget
            # (including v7x's 64 MiB physical VMEM).
            vmem_limit_bytes=32 * 1024 * 1024,
        ),
    )(x_flat, w1_2d, b1_c, w2_2d, b2_c, wd, bd, wu_t, bu_c)

    return out_flat.reshape(B, C, H, W)


def rcab_reference(x_nchw, params, res_scale=1.0):
    """Pure-JAX reference (mirrors the PyTorch forward)."""
    w1, b1, w2, b2, wd, bd, wu, bu = params
    x = jnp.transpose(x_nchw, (0, 2, 3, 1))   # NHWC
    dn = ('NHWC', 'HWIO', 'NHWC')

    def conv(inp, w, b):
        y = lax.conv_general_dilated(inp, w, (1, 1), 'SAME', dimension_numbers=dn)
        return y + b.reshape(1, 1, 1, -1)

    h1 = jnp.maximum(conv(x, w1, b1), 0.0)
    res = conv(h1, w2, b2)
    pooled = jnp.mean(res, axis=(1, 2), keepdims=True)          # (B,1,1,C)
    d = jnp.maximum(jnp.einsum('bijc,cd->bijd', pooled, wd) + bd.reshape(1, 1, 1, -1), 0.0)
    u = jnp.einsum('bijd,dc->bijc', d, wu) + bu.reshape(1, 1, 1, -1)
    res = res * jax.nn.sigmoid(u)
    out = x + res_scale * res
    return jnp.transpose(out, (0, 3, 1, 2))


def make_params(key, nf, reduction):
    cr = nf // reduction
    ks = jax.random.split(key, 8)
    scale3 = 1.0 / (3 * 3 * nf) ** 0.5
    scale1 = 1.0 / nf ** 0.5
    scale1r = 1.0 / max(cr, 1) ** 0.5
    w1 = jax.random.uniform(ks[0], (3, 3, nf, nf), jnp.float32, -scale3, scale3)
    b1 = jax.random.uniform(ks[1], (1, nf), jnp.float32, -scale3, scale3)
    w2 = jax.random.uniform(ks[2], (3, 3, nf, nf), jnp.float32, -scale3, scale3)
    b2 = jax.random.uniform(ks[3], (1, nf), jnp.float32, -scale3, scale3)
    wd = jax.random.uniform(ks[4], (nf, cr), jnp.float32, -scale1, scale1)
    bd = jax.random.uniform(ks[5], (1, cr), jnp.float32, -scale1, scale1)
    wu = jax.random.uniform(ks[6], (cr, nf), jnp.float32, -scale1r, scale1r)
    bu = jax.random.uniform(ks[7], (1, nf), jnp.float32, -scale1r, scale1r)
    return (w1, b1, w2, b2, wd, bd, wu, bu)


if __name__ == "__main__":
    NF, REDUCTION, H, W = 64, 16, 16, 16
    key = jax.random.PRNGKey(0)
    kx, kp = jax.random.split(key)
    params = make_params(kp, NF, REDUCTION)

    # Main case: B=4 -> Bb=2 images per grid step, 2 parallel grid steps.
    x4 = jax.random.normal(kx, (4, NF, H, W), jnp.float32)      # NCHW, like PyTorch
    out4 = jax.block_until_ready(rcab_pallas(x4, params, res_scale=1.0))
    ref4 = rcab_reference(x4, params, res_scale=1.0)
    assert out4.shape == x4.shape
    err4 = float(jnp.max(jnp.abs(out4 - ref4)))
    # bf16 MXU operands (weights + activations) with f32 accumulation => loosened tolerance.
    assert jnp.allclose(out4, ref4, rtol=2e-2, atol=2e-2), err4

    # Also exercise the Bb=1 path and the res_scale != 1 branch (B=2 -> 2 grid steps).
    x2 = x4[:2]
    out2 = jax.block_until_ready(rcab_pallas(x2, params, res_scale=0.5))
    ref2 = rcab_reference(x2, params, res_scale=0.5)
    err2 = float(jnp.max(jnp.abs(out2 - ref2)))
    assert jnp.allclose(out2, ref2, rtol=2e-2, atol=2e-2), err2

    print("KERNEL_OK")
</pallas_src>

<mosaic_0001>
module attributes {stable_mosaic.version = 11 : i64} {
  func.func @_rcab_kernel(%arg0: i32, %arg1: memref<2x64x256xf32, #tpu.memory_space<vmem>>, %arg2: memref<64x576xbf16, #tpu.memory_space<vmem>>, %arg3: memref<64x1xf32, #tpu.memory_space<vmem>>, %arg4: memref<64x576xbf16, #tpu.memory_space<vmem>>, %arg5: memref<64x1xf32, #tpu.memory_space<vmem>>, %arg6: memref<64x4xf32, #tpu.memory_space<vmem>>, %arg7: memref<1x4xf32, #tpu.memory_space<vmem>>, %arg8: memref<64x4xf32, #tpu.memory_space<vmem>>, %arg9: memref<64x1xf32, #tpu.memory_space<vmem>>, %arg10: memref<2x64x256xf32, #tpu.memory_space<vmem>>, %arg11: memref<576x512xbf16, #tpu.memory_space<vmem>>, %arg12: memref<3x64x512xbf16, #tpu.memory_space<vmem>>) attributes {dimension_semantics = [#tpu.dimension_semantics<parallel>], iteration_bounds = array<i64: 2>, scalar_prefetch = 0 : i64, scratch_operands = 2 : i64, tpu.core_type = #tpu.core_type<tc>, window_params = [{transform_indices = @transform_0, window_bounds = array<i64: 2, 64, 256>}, {pipeline_mode = #tpu.pipeline_mode<synchronous>, transform_indices = @transform_1, window_bounds = array<i64: 64, 576>}, {pipeline_mode = #tpu.pipeline_mode<synchronous>, transform_indices = @transform_2, window_bounds = array<i64: 64, 1>}, {pipeline_mode = #tpu.pipeline_mode<synchronous>, transform_indices = @transform_3, window_bounds = array<i64: 64, 576>}, {pipeline_mode = #tpu.pipeline_mode<synchronous>, transform_indices = @transform_4, window_bounds = array<i64: 64, 1>}, {pipeline_mode = #tpu.pipeline_mode<synchronous>, transform_indices = @transform_5, window_bounds = array<i64: 64, 4>}, {pipeline_mode = #tpu.pipeline_mode<synchronous>, transform_indices = @transform_6, window_bounds = array<i64: 1, 4>}, {pipeline_mode = #tpu.pipeline_mode<synchronous>, transform_indices = @transform_7, window_bounds = array<i64: 64, 4>}, {pipeline_mode = #tpu.pipeline_mode<synchronous>, transform_indices = @transform_8, window_bounds = array<i64: 64, 1>}, {transform_indices = @transform_9, window_bounds = array<i64: 2, 64, 256>}]} {
    %cst = arith.constant 0.000000e+00 : bf16
    %0 = vector.broadcast %cst : bf16 to vector<3x64x128xbf16>
    %c0 = arith.constant 0 : index
    %c0_0 = arith.constant 0 : index
    %c0_1 = arith.constant 0 : index
    %1 = vector.load %arg12[%c0, %c0_0, %c0_1] : memref<3x64x512xbf16, #tpu.memory_space<vmem>>, vector<3x64x128xbf16>
    tpu.vector_store %arg12[%c0, %c0_0, %c0_1], %0 {strides = array<i32>} : memref<3x64x512xbf16, #tpu.memory_space<vmem>>, vector<3x64x128xbf16>,
    %cst_2 = arith.constant 0.000000e+00 : bf16
    %2 = vector.broadcast %cst_2 : bf16 to vector<3x64x128xbf16>
    %c0_3 = arith.constant 0 : index
    %c0_4 = arith.constant 0 : index
    %c384 = arith.constant 384 : index
    %3 = vector.load %arg12[%c0_3, %c0_4, %c384] : memref<3x64x512xbf16, #tpu.memory_space<vmem>>, vector<3x64x128xbf16>
    tpu.vector_store %arg12[%c0_3, %c0_4, %c384], %2 {strides = array<i32>} : memref<3x64x512xbf16, #tpu.memory_space<vmem>>, vector<3x64x128xbf16>,
    %4 = tpu.iota {dimensions = array<i32: 1>} : vector<1x256xi32>
    %c15_i32 = arith.constant 15 : i32
    %5 = vector.broadcast %c15_i32 : i32 to vector<1x256xi32>
    %6 = arith.andi %4, %5 : vector<1x256xi32>
    %c0_i32 = arith.constant 0 : i32
    %7 = vector.broadcast %c0_i32 : i32 to vector<1x256xi32>
    %8 = arith.cmpi ne, %6, %7 : vector<1x256xi32>
    %c15_i32_5 = arith.constant 15 : i32
    %9 = vector.broadcast %c15_i32_5 : i32 to vector<1x256xi32>
    %10 = arith.cmpi ne, %6, %9 : vector<1x256xi32>
    %c0_6 = arith.constant 0 : index
    %c0_7 = arith.constant 0 : index
    %c0_8 = arith.constant 0 : index
    %11 = vector.load %arg1[%c0_6, %c0_7, %c0_8] : memref<2x64x256xf32, #tpu.memory_space<vmem>>, vector<1x64x256xf32>
    %12 = vector.shape_cast %11 : vector<1x64x256xf32> to vector<64x256xf32>
    %13 = arith.truncf %12 : vector<64x256xf32> to vector<64x256xbf16>
    %c0_9 = arith.constant 0 : index
    %c0_10 = arith.constant 0 : index
    %c128 = arith.constant 128 : index
    %14 = vector.load %arg12[%c0_9, %c0_10, %c128] : memref<3x64x512xbf16, #tpu.memory_space<vmem>>, vector<1x64x256xbf16>
    %15 = vector.shape_cast %14 : vector<1x64x256xbf16> to vector<64x256xbf16>
    %16 = vector.shape_cast %13 : vector<64x256xbf16> to vector<1x64x256xbf16>
    tpu.vector_store %arg12[%c0_9, %c0_10, %c128], %16 {strides = array<i32>} : memref<3x64x512xbf16, #tpu.memory_space<vmem>>, vector<1x64x256xbf16>,
    %c0_i32_11 = arith.constant 0 : i32
    %17 = arith.sitofp %c0_i32_11 : i32 to bf16
    %18 = vector.shape_cast %8 : vector<1x256xi1> to vector<1x256xi1>
    %19 = vector.broadcast %18 : vector<1x256xi1> to vector<64x256xi1>
    %20 = vector.broadcast %17 : bf16 to vector<64x256xbf16>
    %21 = arith.select %19, %13, %20 : vector<64x256xi1>, vector<64x256xbf16>
    %c1 = arith.constant 1 : index
    %c0_12 = arith.constant 0 : index
    %c128_13 = arith.constant 128 : index
    %22 = vector.load %arg12[%c1, %c0_12, %c128_13] : memref<3x64x512xbf16, #tpu.memory_space<vmem>>, vector<1x64x256xbf16>
    %23 = vector.shape_cast %22 : vector<1x64x256xbf16> to vector<64x256xbf16>
    %24 = vector.shape_cast %21 : vector<64x256xbf16> to vector<1x64x256xbf16>
    tpu.vector_store %arg12[%c1, %c0_12, %c128_13], %24 {strides = array<i32>} : memref<3x64x512xbf16, #tpu.memory_space<vmem>>, vector<1x64x256xbf16>,
    %c0_i32_14 = arith.constant 0 : i32
    %25 = arith.sitofp %c0_i32_14 : i32 to bf16
    %26 = vector.shape_cast %10 : vector<1x256xi1> to vector<1x256xi1>
    %27 = vector.broadcast %26 : vector<1x256xi1> to vector<64x256xi1>
    %28 = vector.broadcast %25 : bf16 to vector<64x256xbf16>
    %29 = arith.select %27, %13, %28 : vector<64x256xi1>, vector<64x256xbf16>
    %c2 = arith.constant 2 : index
    %c0_15 = arith.constant 0 : index
    %c128_16 = arith.constant 128 : index
    %30 = vector.load %arg12[%c2, %c0_15, %c128_16] : memref<3x64x512xbf16, #tpu.memory_space<vmem>>, vector<1x64x256xbf16>
    %31 = vector.shape_cast %30 : vector<1x64x256xbf16> to vector<64x256xbf16>
    %32 = vector.shape_cast %29 : vector<64x256xbf16> to vector<1x64x256xbf16>
    tpu.vector_store %arg12[%c2, %c0_15, %c128_16], %32 {strides = array<i32>} : memref<3x64x512xbf16, #tpu.memory_space<vmem>>, vector<1x64x256xbf16>,
    %c2_17 = arith.constant 2 : index
    %c0_18 = arith.constant 0 : index
    %c111 = arith.constant 111 : index
    %33 = vector.load %arg12[%c2_17, %c0_18, %c111] : memref<3x64x512xbf16, #tpu.memory_space<vmem>>, vector<1x64x256xbf16>
    %34 = vector.shape_cast %33 : vector<1x64x256xbf16> to vector<64x256xbf16>
    %c0_19 = arith.constant 0 : index
    %c0_20 = arith.constant 0 : index
    %35 = vector.load %arg11[%c0_19, %c0_20] : memref<576x512xbf16, #tpu.memory_space<vmem>>, vector<64x256xbf16>
    tpu.vector_store %arg11[%c0_19, %c0_20], %34 {strides = array<i32>} : memref<576x512xbf16, #tpu.memory_space<vmem>>, vector<64x256xbf16>,
    %c0_21 = arith.constant 0 : index
    %c0_22 = arith.constant 0 : index
    %c112 = arith.constant 112 : index
    %36 = vector.load %arg12[%c0_21, %c0_22, %c112] : memref<3x64x512xbf16, #tpu.memory_space<vmem>>, vector<1x64x256xbf16>
    %37 = vector.shape_cast %36 : vector<1x64x256xbf16> to vector<64x256xbf16>
    %c64 = arith.constant 64 : index
    %c0_23 = arith.constant 0 : index
    %38 = vector.load %arg11[%c64, %c0_23] : memref<576x512xbf16, #tpu.memory_space<vmem>>, vector<64x256xbf16>
    tpu.vector_store %arg11[%c64, %c0_23], %37 {strides = array<i32>} : memref<576x512xbf16, #tpu.memory_space<vmem>>, vector<64x256xbf16>,
    %c1_24 = arith.constant 1 : index
    %c0_25 = arith.constant 0 : index
    %c113 = arith.constant 113 : index
    %39 = vector.load %arg12[%c1_24, %c0_25, %c113] : memref<3x64x512xbf16, #tpu.memory_space<vmem>>, vector<1x64x256xbf16>
    %40 = vector.shape_cast %39 : vector<1x64x256xbf16> to vector<64x256xbf16>
    %c128_26 = arith.constant 128 : index
    %c0_27 = arith.constant 0 : index
    %41 = vector.load %arg11[%c128_26, %c0_27] : memref<576x512xbf16, #tpu.memory_space<vmem>>, vector<64x256xbf16>
    tpu.vector_store %arg11[%c128_26, %c0_27], %40 {strides = array<i32>} : memref<576x512xbf16, #tpu.memory_space<vmem>>, vector<64x256xbf16>,
    %c2_28 = arith.constant 2 : index
    %c0_29 = arith.constant 0 : index
    %c127 = arith.constant 127 : index
    %42 = vector.load %arg12[%c2_28, %c0_29, %c127] : memref<3x64x512xbf16, #tpu.memory_space<vmem>>, vector<1x64x256xbf16>
    %43 = vector.shape_cast %42 : vector<1x64x256xbf16> to vector<64x256xbf16>
    %c192 = arith.constant 192 : index
    %c0_30 = arith.constant 0 : index
    %44 = vector.load %arg11[%c192, %c0_30] : memref<576x512xbf16, #tpu.memory_space<vmem>>, vector<64x256xbf16>
    tpu.vector_store %arg11[%c192, %c0_30], %43 {strides = array<i32>} : memref<576x512xbf16, #tpu.memory_space<vmem>>, vector<64x256xbf16>,
    %c0_31 = arith.constant 0 : index
    %c0_32 = arith.constant 0 : index
    %c128_33 = arith.constant 128 : index
    %45 = vector.load %arg12[%c0_31, %c0_32, %c128_33] : memref<3x64x512xbf16, #tpu.memory_space<vmem>>, vector<1x64x256xbf16>
    %46 = vector.shape_cast %45 : vector<1x64x256xbf16> to vector<64x256xbf16>
    %c256 = arith.constant 256 : index
    %c0_34 = arith.constant 0 : index
    %47 = vector.load %arg11[%c256, %c0_34] : memref<576x512xbf16, #tpu.memory_space<vmem>>, vector<64x256xbf16>
    tpu.vector_store %arg11[%c256, %c0_34], %46 {strides = array<i32>} : memref<576x512xbf16, #tpu.memory_space<vmem>>, vector<64x256xbf16>,
    %c1_35 = arith.constant 1 : index
    %c0_36 = arith.constant 0 : index
    %c129 = arith.constant 129 : index
    %48 = vector.load %arg12[%c1_35, %c0_36, %c129] : memref<3x64x512xbf16, #tpu.memory_space<vmem>>, vector<1x64x256xbf16>
    %49 = vector.shape_cast %48 : vector<1x64x256xbf16> to vector<64x256xbf16>
    %c320 = arith.constant 320 : index
    %c0_37 = arith.constant 0 : index
    %50 = vector.load %arg11[%c320, %c0_37] : memref<576x512xbf16, #tpu.memory_space<vmem>>, vector<64x256xbf16>
    tpu.vector_store %arg11[%c320, %c0_37], %49 {strides = array<i32>} : memref<576x512xbf16, #tpu.memory_space<vmem>>, vector<64x256xbf16>,
    %c2_38 = arith.constant 2 : index
    %c0_39 = arith.constant 0 : index
    %c143 = arith.constant 143 : index
    %51 = vector.load %arg12[%c2_38, %c0_39, %c143] : memref<3x64x512xbf16, #tpu.memory_space<vmem>>, vector<1x64x256xbf16>
    %52 = vector.shape_cast %51 : vector<1x64x256xbf16> to vector<64x256xbf16>
    %c384_40 = arith.constant 384 : index
    %c0_41 = arith.constant 0 : index
    %53 = vector.load %arg11[%c384_40, %c0_41] : memref<576x512xbf16, #tpu.memory_space<vmem>>, vector<64x256xbf16>
    tpu.vector_store %arg11[%c384_40, %c0_41], %52 {strides = array<i32>} : memref<576x512xbf16, #tpu.memory_space<vmem>>, vector<64x256xbf16>,
    %c0_42 = arith.constant 0 : index
    %c0_43 = arith.constant 0 : index
    %c144 = arith.constant 144 : index
    %54 = vector.load %arg12[%c0_42, %c0_43, %c144] : memref<3x64x512xbf16, #tpu.memory_space<vmem>>, vector<1x64x256xbf16>
    %55 = vector.shape_cast %54 : vector<1x64x256xbf16> to vector<64x256xbf16>
    %c448 = arith.constant 448 : index
    %c0_44 = arith.constant 0 : index
    %56 = vector.load %arg11[%c448, %c0_44] : memref<576x512xbf16, #tpu.memory_space<vmem>>, vector<64x256xbf16>
    tpu.vector_store %arg11[%c448, %c0_44], %55 {strides = array<i32>} : memref<576x512xbf16, #tpu.memory_space<vmem>>, vector<64x256xbf16>,
    %c1_45 = arith.constant 1 : index
    %c0_46 = arith.constant 0 : index
    %c145 = arith.constant 145 : index
    %57 = vector.load %arg12[%c1_45, %c0_46, %c145] : memref<3x64x512xbf16, #tpu.memory_space<vmem>>, vector<1x64x256xbf16>
    %58 = vector.shape_cast %57 : vector<1x64x256xbf16> to vector<64x256xbf16>
    %c512 = arith.constant 512 : index
    %c0_47 = arith.constant 0 : index
    %59 = vector.load %arg11[%c512, %c0_47] : memref<576x512xbf16, #tpu.memory_space<vmem>>, vector<64x256xbf16>
    tpu.vector_store %arg11[%c512, %c0_47], %58 {strides = array<i32>} : memref<576x512xbf16, #tpu.memory_space<vmem>>, vector<64x256xbf16>,
    %c1_48 = arith.constant 1 : index
    %c0_49 = arith.constant 0 : index
    %c0_50 = arith.constant 0 : index
    %60 = vector.load %arg1[%c1_48, %c0_49, %c0_50] : memref<2x64x256xf32, #tpu.memory_space<vmem>>, vector<1x64x256xf32>
    %61 = vector.shape_cast %60 : vector<1x64x256xf32> to vector<64x256xf32>
    %62 = arith.truncf %61 : vector<64x256xf32> to vector<64x256xbf16>
    %c0_51 = arith.constant 0 : index
    %c0_52 = arith.constant 0 : index
    %c128_53 = arith.constant 128 : index
    %63 = vector.load %arg12[%c0_51, %c0_52, %c128_53] : memref<3x64x512xbf16, #tpu.memory_space<vmem>>, vector<1x64x256xbf16>
    %64 = vector.shape_cast %63 : vector<1x64x256xbf16> to vector<64x256xbf16>
    %65 = vector.shape_cast %62 : vector<64x256xbf16> to vector<1x64x256xbf16>
    tpu.vector_store %arg12[%c0_51, %c0_52, %c128_53], %65 {strides = array<i32>} : memref<3x64x512xbf16, #tpu.memory_space<vmem>>, vector<1x64x256xbf16>,
    %c0_i32_54 = arith.constant 0 : i32
    %66 = arith.sitofp %c0_i32_54 : i32 to bf16
    %67 = vector.shape_cast %8 : vector<1x256xi1> to vector<1x256xi1>
    %68 = vector.broadcast %67 : vector<1x256xi1> to vector<64x256xi1>
    %69 = vector.broadcast %66 : bf16 to vector<64x256xbf16>
    %70 = arith.select %68, %62, %69 : vector<64x256xi1>, vector<64x256xbf16>
    %c1_55 = arith.constant 1 : index
    %c0_56 = arith.constant 0 : index
    %c128_57 = arith.constant 128 : index
    %71 = vector.load %arg12[%c1_55, %c0_56, %c128_57] : memref<3x64x512xbf16, #tpu.memory_space<vmem>>, vector<1x64x256xbf16>
    %72 = vector.shape_cast %71 : vector<1x64x256xbf16> to vector<64x256xbf16>
    %73 = vector.shape_cast %70 : vector<64x256xbf16> to vector<1x64x256xbf16>
    tpu.vector_store %arg12[%c1_55, %c0_56, %c128_57], %73 {strides = array<i32>} : memref<3x64x512xbf16, #tpu.memory_space<vmem>>, vector<1x64x256xbf16>,
    %c0_i32_58 = arith.constant 0 : i32
    %74 = arith.sitofp %c0_i32_58 : i32 to bf16
    %75 = vector.shape_cast %10 : vector<1x256xi1> to vector<1x256xi1>
    %76 = vector.broadcast %75 : vector<1x256xi1> to vector<64x256xi1>
    %77 = vector.broadcast %74 : bf16 to vector<64x256xbf16>
    %78 = arith.select %76, %62, %77 : vector<64x256xi1>, vector<64x256xbf16>
    %c2_59 = arith.constant 2 : index
    %c0_60 = arith.constant 0 : index
    %c128_61 = arith.constant 128 : index
    %79 = vector.load %arg12[%c2_59, %c0_60, %c128_61] : memref<3x64x512xbf16, #tpu.memory_space<vmem>>, vector<1x64x256xbf16>
    %80 = vector.shape_cast %79 : vector<1x64x256xbf16> to vector<64x256xbf16>
    %81 = vector.shape_cast %78 : vector<64x256xbf16> to vector<1x64x256xbf16>
    tpu.vector_store %arg12[%c2_59, %c0_60, %c128_61], %81 {strides = array<i32>} : memref<3x64x512xbf16, #tpu.memory_space<vmem>>, vector<1x64x256xbf16>,
    %c2_62 = arith.constant 2 : index
    %c0_63 = arith.constant 0 : index
    %c111_64 = arith.constant 111 : index
    %82 = vector.load %arg12[%c2_62, %c0_63, %c111_64] : memref<3x64x512xbf16, #tpu.memory_space<vmem>>, vector<1x64x256xbf16>
    %83 = vector.shape_cast %82 : vector<1x64x256xbf16> to vector<64x256xbf16>
    %c0_65 = arith.constant 0 : index
    %c256_66 = arith.constant 256 : index
    %84 = vector.load %arg11[%c0_65, %c256_66] : memref<576x512xbf16, #tpu.memory_space<vmem>>, vector<64x256xbf16>
    tpu.vector_store %arg11[%c0_65, %c256_66], %83 {strides = array<i32>} : memref<576x512xbf16, #tpu.memory_space<vmem>>, vector<64x256xbf16>,
    %c0_67 = arith.constant 0 : index
    %c0_68 = arith.constant 0 : index
    %c112_69 = arith.constant 112 : index
    %85 = vector.load %arg12[%c0_67, %c0_68, %c112_69] : memref<3x64x512xbf16, #tpu.memory_space<vmem>>, vector<1x64x256xbf16>
    %86 = vector.shape_cast %85 : vector<1x64x256xbf16> to vector<64x256xbf16>
    %c64_70 = arith.constant 64 : index
    %c256_71 = arith.constant 256 : index
    %87 = vector.load %arg11[%c64_70, %c256_71] : memref<576x512xbf16, #tpu.memory_space<vmem>>, vector<64x256xbf16>
    tpu.vector_store %arg11[%c64_70, %c256_71], %86 {strides = array<i32>} : memref<576x512xbf16, #tpu.memory_space<vmem>>, vector<64x256xbf16>,
    %c1_72 = arith.constant 1 : index
    %c0_73 = arith.constant 0 : index
    %c113_74 = arith.constant 113 : index
    %88 = vector.load %arg12[%c1_72, %c0_73, %c113_74] : memref<3x64x512xbf16, #tpu.memory_space<vmem>>, vector<1x64x256xbf16>
    %89 = vector.shape_cast %88 : vector<1x64x256xbf16> to vector<64x256xbf16>
    %c128_75 = arith.constant 128 : index
    %c256_76 = arith.constant 256 : index
    %90 = vector.load %arg11[%c128_75, %c256_76] : memref<576x512xbf16, #tpu.memory_space<vmem>>, vector<64x256xbf16>
    tpu.vector_store %arg11[%c128_75, %c256_76], %89 {strides = array<i32>} : memref<576x512xbf16, #tpu.memory_space<vmem>>, vector<64x256xbf16>,
    %c2_77 = arith.constant 2 : index
    %c0_78 = arith.constant 0 : index
    %c127_79 = arith.constant 127 : index
    %91 = vector.load %arg12[%c2_77, %c0_78, %c127_79] : memref<3x64x512xbf16, #tpu.memory_space<vmem>>, vector<1x64x256xbf16>
    %92 = vector.shape_cast %91 : vector<1x64x256xbf16> to vector<64x256xbf16>
    %c192_80 = arith.constant 192 : index
    %c256_81 = arith.constant 256 : index
    %93 = vector.load %arg11[%c192_80, %c256_81] : memref<576x512xbf16, #tpu.memory_space<vmem>>, vector<64x256xbf16>
    tpu.vector_store %arg11[%c192_80, %c256_81], %92 {strides = array<i32>} : memref<576x512xbf16, #tpu.memory_space<vmem>>, vector<64x256xbf16>,
    %c0_82 = arith.constant 0 : index
    %c0_83 = arith.constant 0 : index
    %c128_84 = arith.constant 128 : index
    %94 = vector.load %arg12[%c0_82, %c0_83, %c128_84] : memref<3x64x512xbf16, #tpu.memory_space<vmem>>, vector<1x64x256xbf16>
    %95 = vector.shape_cast %94 : vector<1x64x256xbf16> to vector<64x256xbf16>
    %c256_85 = arith.constant 256 : index
    %c256_86 = arith.constant 256 : index
    %96 = vector.load %arg11[%c256_85, %c256_86] : memref<576x512xbf16, #tpu.memory_space<vmem>>, vector<64x256xbf16>
    tpu.vector_store %arg11[%c256_85, %c256_86], %95 {strides = array<i32>} : memref<576x512xbf16, #tpu.memory_space<vmem>>, vector<64x256xbf16>,
    %c1_87 = arith.constant 1 : index
    %c0_88 = arith.constant 0 : index
    %c129_89 = arith.constant 129 : index
    %97 = vector.load %arg12[%c1_87, %c0_88, %c129_89] : memref<3x64x512xbf16, #tpu.memory_space<vmem>>, vector<1x64x256xbf16>
    %98 = vector.shape_cast %97 : vector<1x64x256xbf16> to vector<64x256xbf16>
    %c320_90 = arith.constant 320 : index
    %c256_91 = arith.constant 256 : index
    %99 = vector.load %arg11[%c320_90, %c256_91] : memref<576x512xbf16, #tpu.memory_space<vmem>>, vector<64x256xbf16>
    tpu.vector_store %arg11[%c320_90, %c256_91], %98 {strides = array<i32>} : memref<576x512xbf16, #tpu.memory_space<vmem>>, vector<64x256xbf16>,
    %c2_92 = arith.constant 2 : index
    %c0_93 = arith.constant 0 : index
    %c143_94 = arith.constant 143 : index
    %100 = vector.load %arg12[%c2_92, %c0_93, %c143_94] : memref<3x64x512xbf16, #tpu.memory_space<vmem>>, vector<1x64x256xbf16>
    %101 = vector.shape_cast %100 : vector<1x64x256xbf16> to vector<64x256xbf16>
    %c384_95 = arith.constant 384 : index
    %c256_96 = arith.constant 256 : index
    %102 = vector.load %arg11[%c384_95, %c256_96] : memref<576x512xbf16, #tpu.memory_space<vmem>>, vector<64x256xbf16>
    tpu.vector_store %arg11[%c384_95, %c256_96], %101 {strides = array<i32>} : memref<576x512xbf16, #tpu.memory_space<vmem>>, vector<64x256xbf16>,
    %c0_97 = arith.constant 0 : index
    %c0_98 = arith.constant 0 : index
    %c144_99 = arith.constant 144 : index
    %103 = vector.load %arg12[%c0_97, %c0_98, %c144_99] : memref<3x64x512xbf16, #tpu.memory_space<vmem>>, vector<1x64x256xbf16>
    %104 = vector.shape_cast %103 : vector<1x64x256xbf16> to vector<64x256xbf16>
    %c448_100 = arith.constant 448 : index
    %c256_101 = arith.constant 256 : index
    %105 = vector.load %arg11[%c448_100, %c256_101] : memref<576x512xbf16, #tpu.memory_space<vmem>>, vector<64x256xbf16>
    tpu.vector_store %arg11[%c448_100, %c256_101], %104 {strides = array<i32>} : memref<576x512xbf16, #tpu.memory_space<vmem>>, vector<64x256xbf16>,
    %c1_102 = arith.constant 1 : index
    %c0_103 = arith.constant 0 : index
    %c145_104 = arith.constant 145 : index
    %106 = vector.load %arg12[%c1_102, %c0_103, %c145_104] : memref<3x64x512xbf16, #tpu.memory_space<vmem>>, vector<1x64x256xbf16>
    %107 = vector.shape_cast %106 : vector<1x64x256xbf16> to vector<64x256xbf16>
    %c512_105 = arith.constant 512 : index
    %c256_106 = arith.constant 256 : index
    %108 = vector.load %arg11[%c512_105, %c256_106] : memref<576x512xbf16, #tpu.memory_space<vmem>>, vector<64x256xbf16>
    tpu.vector_store %arg11[%c512_105, %c256_106], %107 {strides = array<i32>} : memref<576x512xbf16, #tpu.memory_space<vmem>>, vector<64x256xbf16>,
    %c0_107 = arith.constant 0 : index
    %c0_108 = arith.constant 0 : index
    %109 = vector.load %arg2[%c0_107, %c0_108] : memref<64x576xbf16, #tpu.memory_space<vmem>>, vector<64x576xbf16>
    %c0_109 = arith.constant 0 : index
    %c0_110 = arith.constant 0 : index
    %110 = vector.load %arg11[%c0_109, %c0_110] : memref<576x512xbf16, #tpu.memory_space<vmem>>, vector<576x512xbf16>
    %cst_111 = arith.constant dense<0.000000e+00> : vector<64x512xf32>
    %111 = tpu.matmul %109, %110, %cst_111 {dimension_numbers = #tpu.dot_dimension_numbers<[1], [0], [0], [1], [0, 0, 1, 1], [], []>} : vector<64x576xbf16>, vector<576x512xbf16>, vector<64x512xf32> -> vector<64x512xf32>
    %c0_112 = arith.constant 0 : index
    %c0_113 = arith.constant 0 : index
    %112 = vector.load %arg3[%c0_112, %c0_113] : memref<64x1xf32, #tpu.memory_space<vmem>>, vector<64x1xf32>
    %113 = vector.broadcast %112 : vector<64x1xf32> to vector<64x512xf32>
    %114 = arith.addf %111, %113 : vector<64x512xf32>
    %cst_114 = arith.constant 0.000000e+00 : f32
    %115 = vector.broadcast %cst_114 : f32 to vector<64x512xf32>
    %116 = arith.maximumf %114, %115 : vector<64x512xf32>
    %117 = arith.truncf %116 : vector<64x512xf32> to vector<64x512xbf16>
    %118 = vector.extract_strided_slice %117 {offsets = [0, 0], sizes = [64, 256], strides = [1, 1]} : vector<64x512xbf16> to vector<64x256xbf16>
    %c0_115 = arith.constant 0 : index
    %c0_116 = arith.constant 0 : index
    %c128_117 = arith.constant 128 : index
    %119 = vector.load %arg12[%c0_115, %c0_116, %c128_117] : memref<3x64x512xbf16, #tpu.memory_space<vmem>>, vector<1x64x256xbf16>
    %120 = vector.shape_cast %119 : vector<1x64x256xbf16> to vector<64x256xbf16>
    %121 = vector.shape_cast %118 : vector<64x256xbf16> to vector<1x64x256xbf16>
    tpu.vector_store %arg12[%c0_115, %c0_116, %c128_117], %121 {strides = array<i32>} : memref<3x64x512xbf16, #tpu.memory_space<vmem>>, vector<1x64x256xbf16>,
    %c0_i32_118 = arith.constant 0 : i32
    %122 = arith.sitofp %c0_i32_118 : i32 to bf16
    %123 = vector.shape_cast %8 : vector<1x256xi1> to vector<1x256xi1>
    %124 = vector.broadcast %123 : vector<1x256xi1> to vector<64x256xi1>
    %125 = vector.broadcast %122 : bf16 to vector<64x256xbf16>
    %126 = arith.select %124, %118, %125 : vector<64x256xi1>, vector<64x256xbf16>
    %c1_119 = arith.constant 1 : index
    %c0_120 = arith.constant 0 : index
    %c128_121 = arith.constant 128 : index
    %127 = vector.load %arg12[%c1_119, %c0_120, %c128_121] : memref<3x64x512xbf16, #tpu.memory_space<vmem>>, vector<1x64x256xbf16>
    %128 = vector.shape_cast %127 : vector<1x64x256xbf16> to vector<64x256xbf16>
    %129 = vector.shape_cast %126 : vector<64x256xbf16> to vector<1x64x256xbf16>
    tpu.vector_store %arg12[%c1_119, %c0_120, %c128_121], %129 {strides = array<i32>} : memref<3x64x512xbf16, #tpu.memory_space<vmem>>, vector<1x64x256xbf16>,
    %c0_i32_122 = arith.constant 0 : i32
    %130 = arith.sitofp %c0_i32_122 : i32 to bf16
    %131 = vector.shape_cast %10 : vector<1x256xi1> to vector<1x256xi1>
    %132 = vector.broadcast %131 : vector<1x256xi1> to vector<64x256xi1>
    %133 = vector.broadcast %130 : bf16 to vector<64x256xbf16>
    %134 = arith.select %132, %118, %133 : vector<64x256xi1>, vector<64x256xbf16>
    %c2_123 = arith.constant 2 : index
    %c0_124 = arith.constant 0 : index
    %c128_125 = arith.constant 128 : index
    %135 = vector.load %arg12[%c2_123, %c0_124, %c128_125] : memref<3x64x512xbf16, #tpu.memory_space<vmem>>, vector<1x64x256xbf16>
    %136 = vector.shape_cast %135 : vector<1x64x256xbf16> to vector<64x256xbf16>
    %137 = vector.shape_cast %134 : vector<64x256xbf16> to vector<1x64x256xbf16>
    tpu.vector_store %arg12[%c2_123, %c0_124, %c128_125], %137 {strides = array<i32>} : memref<3x64x512xbf16, #tpu.memory_space<vmem>>, vector<1x64x256xbf16>,
    %c2_126 = arith.constant 2 : index
    %c0_127 = arith.constant 0 : index
    %c111_128 = arith.constant 111 : index
    %138 = vector.load %arg12[%c2_126, %c0_127, %c111_128] : memref<3x64x512xbf16, #tpu.memory_space<vmem>>, vector<1x64x256xbf16>
    %139 = vector.shape_cast %138 : vector<1x64x256xbf16> to vector<64x256xbf16>
    %c0_129 = arith.constant 0 : index
    %c0_130 = arith.constant 0 : index
    %140 = vector.load %arg11[%c0_129, %c0_130] : memref<576x512xbf16, #tpu.memory_space<vmem>>, vector<64x256xbf16>
    tpu.vector_store %arg11[%c0_129, %c0_130], %139 {strides = array<i32>} : memref<576x512xbf16, #tpu.memory_space<vmem>>, vector<64x256xbf16>,
    %c0_131 = arith.constant 0 : index
    %c0_132 = arith.constant 0 : index
    %c112_133 = arith.constant 112 : index
    %141 = vector.load %arg12[%c0_131, %c0_132, %c112_133] : memref<3x64x512xbf16, #tpu.memory_space<vmem>>, vector<1x64x256xbf16>
    %142 = vector.shape_cast %141 : vector<1x64x256xbf16> to vector<64x256xbf16>
    %c64_134 = arith.constant 64 : index
    %c0_135 = arith.constant 0 : index
    %143 = vector.load %arg11[%c64_134, %c0_135] : memref<576x512xbf16, #tpu.memory_space<vmem>>, vector<64x256xbf16>
    tpu.vector_store %arg11[%c64_134, %c0_135], %142 {strides = array<i32>} : memref<576x512xbf16, #tpu.memory_space<vmem>>, vector<64x256xbf16>,
    %c1_136 = arith.constant 1 : index
    %c0_137 = arith.constant 0 : index
    %c113_138 = arith.constant 113 : index
    %144 = vector.load %arg12[%c1_136, %c0_137, %c113_138] : memref<3x64x512xbf16, #tpu.memory_space<vmem>>, vector<1x64x256xbf16>
    %145 = vector.shape_cast %144 : vector<1x64x256xbf16> to vector<64x256xbf16>
    %c128_139 = arith.constant 128 : index
    %c0_140 = arith.constant 0 : index
    %146 = vector.load %arg11[%c128_139, %c0_140] : memref<576x512xbf16, #tpu.memory_space<vmem>>, vector<64x256xbf16>
    tpu.vector_store %arg11[%c128_139, %c0_140], %145 {strides = array<i32>} : memref<576x512xbf16, #tpu.memory_space<vmem>>, vector<64x256xbf16>,
    %c2_141 = arith.constant 2 : index
    %c0_142 = arith.constant 0 : index
    %c127_143 = arith.constant 127 : index
    %147 = vector.load %arg12[%c2_141, %c0_142, %c127_143] : memref<3x64x512xbf16, #tpu.memory_space<vmem>>, vector<1x64x256xbf16>
    %148 = vector.shape_cast %147 : vector<1x64x256xbf16> to vector<64x256xbf16>
    %c192_144 = arith.constant 192 : index
    %c0_145 = arith.constant 0 : index
    %149 = vector.load %arg11[%c192_144, %c0_145] : memref<576x512xbf16, #tpu.memory_space<vmem>>, vector<64x256xbf16>
    tpu.vector_store %arg11[%c192_144, %c0_145], %148 {strides = array<i32>} : memref<576x512xbf16, #tpu.memory_space<vmem>>, vector<64x256xbf16>,
    %c0_146 = arith.constant 0 : index
    %c0_147 = arith.constant 0 : index
    %c128_148 = arith.constant 128 : index
    %150 = vector.load %arg12[%c0_146, %c0_147, %c128_148] : memref<3x64x512xbf16, #tpu.memory_space<vmem>>, vector<1x64x256xbf16>
    %151 = vector.shape_cast %150 : vector<1x64x256xbf16> to vector<64x256xbf16>
    %c256_149 = arith.constant 256 : index
    %c0_150 = arith.constant 0 : index
    %152 = vector.load %arg11[%c256_149, %c0_150] : memref<576x512xbf16, #tpu.memory_space<vmem>>, vector<64x256xbf16>
    tpu.vector_store %arg11[%c256_149, %c0_150], %151 {strides = array<i32>} : memref<576x512xbf16, #tpu.memory_space<vmem>>, vector<64x256xbf16>,
    %c1_151 = arith.constant 1 : index
    %c0_152 = arith.constant 0 : index
    %c129_153 = arith.constant 129 : index
    %153 = vector.load %arg12[%c1_151, %c0_152, %c129_153] : memref<3x64x512xbf16, #tpu.memory_space<vmem>>, vector<1x64x256xbf16>
    %154 = vector.shape_cast %153 : vector<1x64x256xbf16> to vector<64x256xbf16>
    %c320_154 = arith.constant 320 : index
    %c0_155 = arith.constant 0 : index
    %155 = vector.load %arg11[%c320_154, %c0_155] : memref<576x512xbf16, #tpu.memory_space<vmem>>, vector<64x256xbf16>
    tpu.vector_store %arg11[%c320_154, %c0_155], %154 {strides = array<i32>} : memref<576x512xbf16, #tpu.memory_space<vmem>>, vector<64x256xbf16>,
    %c2_156 = arith.constant 2 : index
    %c0_157 = arith.constant 0 : index
    %c143_158 = arith.constant 143 : index
    %156 = vector.load %arg12[%c2_156, %c0_157, %c143_158] : memref<3x64x512xbf16, #tpu.memory_space<vmem>>, vector<1x64x256xbf16>
    %157 = vector.shape_cast %156 : vector<1x64x256xbf16> to vector<64x256xbf16>
    %c384_159 = arith.constant 384 : index
    %c0_160 = arith.constant 0 : index
    %158 = vector.load %arg11[%c384_159, %c0_160] : memref<576x512xbf16, #tpu.memory_space<vmem>>, vector<64x256xbf16>
    tpu.vector_store %arg11[%c384_159, %c0_160], %157 {strides = array<i32>} : memref<576x512xbf16, #tpu.memory_space<vmem>>, vector<64x256xbf16>,
    %c0_161 = arith.constant 0 : index
    %c0_162 = arith.constant 0 : index
    %c144_163 = arith.constant 144 : index
    %159 = vector.load %arg12[%c0_161, %c0_162, %c144_163] : memref<3x64x512xbf16, #tpu.memory_space<vmem>>, vector<1x64x256xbf16>
    %160 = vector.shape_cast %159 : vector<1x64x256xbf16> to vector<64x256xbf16>
    %c448_164 = arith.constant 448 : index
    %c0_165 = arith.constant 0 : index
    %161 = vector.load %arg11[%c448_164, %c0_165] : memref<576x512xbf16, #tpu.memory_space<vmem>>, vector<64x256xbf16>
    tpu.vector_store %arg11[%c448_164, %c0_165], %160 {strides = array<i32>} : memref<576x512xbf16, #tpu.memory_space<vmem>>, vector<64x256xbf16>,
    %c1_166 = arith.constant 1 : index
    %c0_167 = arith.constant 0 : index
    %c145_168 = arith.constant 145 : index
    %162 = vector.load %arg12[%c1_166, %c0_167, %c145_168] : memref<3x64x512xbf16, #tpu.memory_space<vmem>>, vector<1x64x256xbf16>
    %163 = vector.shape_cast %162 : vector<1x64x256xbf16> to vector<64x256xbf16>
    %c512_169 = arith.constant 512 : index
    %c0_170 = arith.constant 0 : index
    %164 = vector.load %arg11[%c512_169, %c0_170] : memref<576x512xbf16, #tpu.memory_space<vmem>>, vector<64x256xbf16>
    tpu.vector_store %arg11[%c512_169, %c0_170], %163 {strides = array<i32>} : memref<576x512xbf16, #tpu.memory_space<vmem>>, vector<64x256xbf16>,
    %165 = vector.extract_strided_slice %117 {offsets = [0, 256], sizes = [64, 256], strides = [1, 1]} : vector<64x512xbf16> to vector<64x256xbf16>
    %c0_171 = arith.constant 0 : index
    %c0_172 = arith.constant 0 : index
    %c128_173 = arith.constant 128 : index
    %166 = vector.load %arg12[%c0_171, %c0_172, %c128_173] : memref<3x64x512xbf16, #tpu.memory_space<vmem>>, vector<1x64x256xbf16>
    %167 = vector.shape_cast %166 : vector<1x64x256xbf16> to vector<64x256xbf16>
    %168 = vector.shape_cast %165 : vector<64x256xbf16> to vector<1x64x256xbf16>
    tpu.vector_store %arg12[%c0_171, %c0_172, %c128_173], %168 {strides = array<i32>} : memref<3x64x512xbf16, #tpu.memory_space<vmem>>, vector<1x64x256xbf16>,
    %c0_i32_174 = arith.constant 0 : i32
    %169 = arith.sitofp %c0_i32_174 : i32 to bf16
    %170 = vector.shape_cast %8 : vector<1x256xi1> to vector<1x256xi1>
    %171 = vector.broadcast %170 : vector<1x256xi1> to vector<64x256xi1>
    %172 = vector.broadcast %169 : bf16 to vector<64x256xbf16>
    %173 = arith.select %171, %165, %172 : vector<64x256xi1>, vector<64x256xbf16>
    %c1_175 = arith.constant 1 : index
    %c0_176 = arith.constant 0 : index
    %c128_177 = arith.constant 128 : index
    %174 = vector.load %arg12[%c1_175, %c0_176, %c128_177] : memref<3x64x512xbf16, #tpu.memory_space<vmem>>, vector<1x64x256xbf16>
    %175 = vector.shape_cast %174 : vector<1x64x256xbf16> to vector<64x256xbf16>
    %176 = vector.shape_cast %173 : vector<64x256xbf16> to vector<1x64x256xbf16>
    tpu.vector_store %arg12[%c1_175, %c0_176, %c128_177], %176 {strides = array<i32>} : memref<3x64x512xbf16, #tpu.memory_space<vmem>>, vector<1x64x256xbf16>,
    %c0_i32_178 = arith.constant 0 : i32
    %177 = arith.sitofp %c0_i32_178 : i32 to bf16
    %178 = vector.shape_cast %10 : vector<1x256xi1> to vector<1x256xi1>
    %179 = vector.broadcast %178 : vector<1x256xi1> to vector<64x256xi1>
    %180 = vector.broadcast %177 : bf16 to vector<64x256xbf16>
    %181 = arith.select %179, %165, %180 : vector<64x256xi1>, vector<64x256xbf16>
    %c2_179 = arith.constant 2 : index
    %c0_180 = arith.constant 0 : index
    %c128_181 = arith.constant 128 : index
    %182 = vector.load %arg12[%c2_179, %c0_180, %c128_181] : memref<3x64x512xbf16, #tpu.memory_space<vmem>>, vector<1x64x256xbf16>
    %183 = vector.shape_cast %182 : vector<1x64x256xbf16> to vector<64x256xbf16>
    %184 = vector.shape_cast %181 : vector<64x256xbf16> to vector<1x64x256xbf16>
    tpu.vector_store %arg12[%c2_179, %c0_180, %c128_181], %184 {strides = array<i32>} : memref<3x64x512xbf16, #tpu.memory_space<vmem>>, vector<1x64x256xbf16>,
    %c2_182 = arith.constant 2 : index
    %c0_183 = arith.constant 0 : index
    %c111_184 = arith.constant 111 : index
    %185 = vector.load %arg12[%c2_182, %c0_183, %c111_184] : memref<3x64x512xbf16, #tpu.memory_space<vmem>>, vector<1x64x256xbf16>
    %186 = vector.shape_cast %185 : vector<1x64x256xbf16> to vector<64x256xbf16>
    %c0_185 = arith.constant 0 : index
    %c256_186 = arith.constant 256 : index
    %187 = vector.load %arg11[%c0_185, %c256_186] : memref<576x512xbf16, #tpu.memory_space<vmem>>, vector<64x256xbf16>
    tpu.vector_store %arg11[%c0_185, %c256_186], %186 {strides = array<i32>} : memref<576x512xbf16, #tpu.memory_space<vmem>>, vector<64x256xbf16>,
    %c0_187 = arith.constant 0 : index
    %c0_188 = arith.constant 0 : index
    %c112_189 = arith.constant 112 : index
    %188 = vector.load %arg12[%c0_187, %c0_188, %c112_189] : memref<3x64x512xbf16, #tpu.memory_space<vmem>>, vector<1x64x256xbf16>
    %189 = vector.shape_cast %188 : vector<1x64x256xbf16> to vector<64x256xbf16>
    %c64_190 = arith.constant 64 : index
    %c256_191 = arith.constant 256 : index
    %190 = vector.load %arg11[%c64_190, %c256_191] : memref<576x512xbf16, #tpu.memory_space<vmem>>, vector<64x256xbf16>
    tpu.vector_store %arg11[%c64_190, %c256_191], %189 {strides = array<i32>} : memref<576x512xbf16, #tpu.memory_space<vmem>>, vector<64x256xbf16>,
    %c1_192 = arith.constant 1 : index
    %c0_193 = arith.constant 0 : index
    %c113_194 = arith.constant 113 : index
    %191 = vector.load %arg12[%c1_192, %c0_193, %c113_194] : memref<3x64x512xbf16, #tpu.memory_space<vmem>>, vector<1x64x256xbf16>
    %192 = vector.shape_cast %191 : vector<1x64x256xbf16> to vector<64x256xbf16>
    %c128_195 = arith.constant 128 : index
    %c256_196 = arith.constant 256 : index
    %193 = vector.load %arg11[%c128_195, %c256_196] : memref<576x512xbf16, #tpu.memory_space<vmem>>, vector<64x256xbf16>
    tpu.vector_store %arg11[%c128_195, %c256_196], %192 {strides = array<i32>} : memref<576x512xbf16, #tpu.memory_space<vmem>>, vector<64x256xbf16>,
    %c2_197 = arith.constant 2 : index
    %c0_198 = arith.constant 0 : index
    %c127_199 = arith.constant 127 : index
    %194 = vector.load %arg12[%c2_197, %c0_198, %c127_199] : memref<3x64x512xbf16, #tpu.memory_space<vmem>>, vector<1x64x256xbf16>
    %195 = vector.shape_cast %194 : vector<1x64x256xbf16> to vector<64x256xbf16>
    %c192_200 = arith.constant 192 : index
    %c256_201 = arith.constant 256 : index
    %196 = vector.load %arg11[%c192_200, %c256_201] : memref<576x512xbf16, #tpu.memory_space<vmem>>, vector<64x256xbf16>
    tpu.vector_store %arg11[%c192_200, %c256_201], %195 {strides = array<i32>} : memref<576x512xbf16, #tpu.memory_space<vmem>>, vector<64x256xbf16>,
    %c0_202 = arith.constant 0 : index
    %c0_203 = arith.constant 0 : index
    %c128_204 = arith.constant 128 : index
    %197 = vector.load %arg12[%c0_202, %c0_203, %c128_204] : memref<3x64x512xbf16, #tpu.memory_space<vmem>>, vector<1x64x256xbf16>
    %198 = vector.shape_cast %197 : vector<1x64x256xbf16> to vector<64x256xbf16>
    %c256_205 = arith.constant 256 : index
    %c256_206 = arith.constant 256 : index
    %199 = vector.load %arg11[%c256_205, %c256_206] : memref<576x512xbf16, #tpu.memory_space<vmem>>, vector<64x256xbf16>
    tpu.vector_store %arg11[%c256_205, %c256_206], %198 {strides = array<i32>} : memref<576x512xbf16, #tpu.memory_space<vmem>>, vector<64x256xbf16>,
    %c1_207 = arith.constant 1 : index
    %c0_208 = arith.constant 0 : index
    %c129_209 = arith.constant 129 : index
    %200 = vector.load %arg12[%c1_207, %c0_208, %c129_209] : memref<3x64x512xbf16, #tpu.memory_space<vmem>>, vector<1x64x256xbf16>
    %201 = vector.shape_cast %200 : vector<1x64x256xbf16> to vector<64x256xbf16>
    %c320_210 = arith.constant 320 : index
    %c256_211 = arith.constant 256 : index
    %202 = vector.load %arg11[%c320_210, %c256_211] : memref<576x512xbf16, #tpu.memory_space<vmem>>, vector<64x256xbf16>
    tpu.vector_store %arg11[%c320_210, %c256_211], %201 {strides = array<i32>} : memref<576x512xbf16, #tpu.memory_space<vmem>>, vector<64x256xbf16>,
    %c2_212 = arith.constant 2 : index
    %c0_213 = arith.constant 0 : index
    %c143_214 = arith.constant 143 : index
    %203 = vector.load %arg12[%c2_212, %c0_213, %c143_214] : memref<3x64x512xbf16, #tpu.memory_space<vmem>>, vector<1x64x256xbf16>
    %204 = vector.shape_cast %203 : vector<1x64x256xbf16> to vector<64x256xbf16>
    %c384_215 = arith.constant 384 : index
    %c256_216 = arith.constant 256 : index
    %205 = vector.load %arg11[%c384_215, %c256_216] : memref<576x512xbf16, #tpu.memory_space<vmem>>, vector<64x256xbf16>
    tpu.vector_store %arg11[%c384_215, %c256_216], %204 {strides = array<i32>} : memref<576x512xbf16, #tpu.memory_space<vmem>>, vector<64x256xbf16>,
    %c0_217 = arith.constant 0 : index
    %c0_218 = arith.constant 0 : index
    %c144_219 = arith.constant 144 : index
    %206 = vector.load %arg12[%c0_217, %c0_218, %c144_219] : memref<3x64x512xbf16, #tpu.memory_space<vmem>>, vector<1x64x256xbf16>
    %207 = vector.shape_cast %206 : vector<1x64x256xbf16> to vector<64x256xbf16>
    %c448_220 = arith.constant 448 : index
    %c256_221 = arith.constant 256 : index
    %208 = vector.load %arg11[%c448_220, %c256_221] : memref<576x512xbf16, #tpu.memory_space<vmem>>, vector<64x256xbf16>
    tpu.vector_store %arg11[%c448_220, %c256_221], %207 {strides = array<i32>} : memref<576x512xbf16, #tpu.memory_space<vmem>>, vector<64x256xbf16>,
    %c1_222 = arith.constant 1 : index
    %c0_223 = arith.constant 0 : index
    %c145_224 = arith.constant 145 : index
    %209 = vector.load %arg12[%c1_222, %c0_223, %c145_224] : memref<3x64x512xbf16, #tpu.memory_space<vmem>>, vector<1x64x256xbf16>
    %210 = vector.shape_cast %209 : vector<1x64x256xbf16> to vector<64x256xbf16>
    %c512_225 = arith.constant 512 : index
    %c256_226 = arith.constant 256 : index
    %211 = vector.load %arg11[%c512_225, %c256_226] : memref<576x512xbf16, #tpu.memory_space<vmem>>, vector<64x256xbf16>
    tpu.vector_store %arg11[%c512_225, %c256_226], %210 {strides = array<i32>} : memref<576x512xbf16, #tpu.memory_space<vmem>>, vector<64x256xbf16>,
    %c0_227 = arith.constant 0 : index
    %c0_228 = arith.constant 0 : index
    %212 = vector.load %arg4[%c0_227, %c0_228] : memref<64x576xbf16, #tpu.memory_space<vmem>>, vector<64x576xbf16>
    %c0_229 = arith.constant 0 : index
    %c0_230 = arith.constant 0 : index
    %213 = vector.load %arg11[%c0_229, %c0_230] : memref<576x512xbf16, #tpu.memory_space<vmem>>, vector<576x512xbf16>
    %cst_231 = arith.constant dense<0.000000e+00> : vector<64x512xf32>
    %214 = tpu.matmul %212, %213, %cst_231 {dimension_numbers = #tpu.dot_dimension_numbers<[1], [0], [0], [1], [0, 0, 1, 1], [], []>} : vector<64x576xbf16>, vector<576x512xbf16>, vector<64x512xf32> -> vector<64x512xf32>
    %c0_232 = arith.constant 0 : index
    %c0_233 = arith.constant 0 : index
    %215 = vector.load %arg5[%c0_232, %c0_233] : memref<64x1xf32, #tpu.memory_space<vmem>>, vector<64x1xf32>
    %216 = vector.broadcast %215 : vector<64x1xf32> to vector<64x512xf32>
    %217 = arith.addf %214, %216 : vector<64x512xf32>
    %218 = vector.extract_strided_slice %217 {offsets = [0, 0], sizes = [64, 256], strides = [1, 1]} : vector<64x512xf32> to vector<64x256xf32>
    %cst_234 = arith.constant dense<0.000000e+00> : vector<64xf32>
    %219 = vector.multi_reduction <add>, %218, %cst_234 [1] : vector<64x256xf32> to vector<64xf32>
    %220 = vector.shape_cast %219 : vector<64xf32> to vector<64x1xf32>
    %cst_235 = arith.constant 2.560000e+02 : f32
    %221 = vector.broadcast %cst_235 : f32 to vector<64x1xf32>
    %222 = arith.divf %220, %221 : vector<64x1xf32>
    %c0_236 = arith.constant 0 : index
    %c0_237 = arith.constant 0 : index
    %223 = vector.load %arg6[%c0_236, %c0_237] : memref<64x4xf32, #tpu.memory_space<vmem>>, vector<64x4xf32>
    %224 = vector.broadcast %222 : vector<64x1xf32> to vector<64x4xf32>
    %225 = arith.mulf %223, %224 : vector<64x4xf32>
    %cst_238 = arith.constant dense<0.000000e+00> : vector<4xf32>
    %226 = vector.multi_reduction <add>, %225, %cst_238 [0] : vector<64x4xf32> to vector<4xf32>
    %227 = vector.shape_cast %226 : vector<4xf32> to vector<1x4xf32>
    %c0_239 = arith.constant 0 : index
    %c0_240 = arith.constant 0 : index
    %228 = vector.load %arg7[%c0_239, %c0_240] : memref<1x4xf32, #tpu.memory_space<vmem>>, vector<1x4xf32>
    %229 = arith.addf %227, %228 : vector<1x4xf32>
    %cst_241 = arith.constant 0.000000e+00 : f32
    %230 = vector.broadcast %cst_241 : f32 to vector<1x4xf32>
    %231 = arith.maximumf %229, %230 : vector<1x4xf32>
    %c0_242 = arith.constant 0 : index
    %c0_243 = arith.constant 0 : index
    %232 = vector.load %arg8[%c0_242, %c0_243] : memref<64x4xf32, #tpu.memory_space<vmem>>, vector<64x4xf32>
    %233 = vector.broadcast %231 : vector<1x4xf32> to vector<64x4xf32>
    %234 = arith.mulf %232, %233 : vector<64x4xf32>
    %cst_244 = arith.constant dense<0.000000e+00> : vector<64xf32>
    %235 = vector.multi_reduction <add>, %234, %cst_244 [1] : vector<64x4xf32> to vector<64xf32>
    %236 = vector.shape_cast %235 : vector<64xf32> to vector<64x1xf32>
    %c0_245 = arith.constant 0 : index
    %c0_246 = arith.constant 0 : index
    %237 = vector.load %arg9[%c0_245, %c0_246] : memref<64x1xf32, #tpu.memory_space<vmem>>, vector<64x1xf32>
    %238 = arith.addf %236, %237 : vector<64x1xf32>
    %239 = arith.negf %238 : vector<64x1xf32>
    %240 = math.exp %239 : vector<64x1xf32>
    %cst_247 = arith.constant 1.000000e+00 : f32
    %241 = vector.broadcast %cst_247 : f32 to vector<64x1xf32>
    %242 = arith.addf %241, %240 : vector<64x1xf32>
    %243 = arith.divf %241, %242 : vector<64x1xf32>
    %244 = vector.broadcast %243 : vector<64x1xf32> to vector<64x256xf32>
    %245 = arith.mulf %218, %244 : vector<64x256xf32>
    %c0_248 = arith.constant 0 : index
    %c0_249 = arith.constant 0 : index
    %c0_250 = arith.constant 0 : index
    %246 = vector.load %arg1[%c0_248, %c0_249, %c0_250] : memref<2x64x256xf32, #tpu.memory_space<vmem>>, vector<1x64x256xf32>
    %247 = vector.shape_cast %246 : vector<1x64x256xf32> to vector<64x256xf32>
    %248 = arith.addf %247, %245 : vector<64x256xf32>
    %c0_251 = arith.constant 0 : index
    %c0_252 = arith.constant 0 : index
    %c0_253 = arith.constant 0 : index
    %249 = vector.load %arg10[%c0_251, %c0_252, %c0_253] : memref<2x64x256xf32, #tpu.memory_space<vmem>>, vector<1x64x256xf32>
    %250 = vector.shape_cast %249 : vector<1x64x256xf32> to vector<64x256xf32>
    %251 = vector.shape_cast %248 : vector<64x256xf32> to vector<1x64x256xf32>
    tpu.vector_store %arg10[%c0_251, %c0_252, %c0_253], %251 {strides = array<i32>} : memref<2x64x256xf32, #tpu.memory_space<vmem>>, vector<1x64x256xf32>,
    %252 = vector.extract_strided_slice %217 {offsets = [0, 256], sizes = [64, 256], strides = [1, 1]} : vector<64x512xf32> to vector<64x256xf32>
    %cst_254 = arith.constant dense<0.000000e+00> : vector<64xf32>
    %253 = vector.multi_reduction <add>, %252, %cst_254 [1] : vector<64x256xf32> to vector<64xf32>
    %254 = vector.shape_cast %253 : vector<64xf32> to vector<64x1xf32>
    %cst_255 = arith.constant 2.560000e+02 : f32
    %255 = vector.broadcast %cst_255 : f32 to vector<64x1xf32>
    %256 = arith.divf %254, %255 : vector<64x1xf32>
    %c0_256 = arith.constant 0 : index
    %c0_257 = arith.constant 0 : index
    %257 = vector.load %arg6[%c0_256, %c0_257] : memref<64x4xf32, #tpu.memory_space<vmem>>, vector<64x4xf32>
    %258 = vector.broadcast %256 : vector<64x1xf32> to vector<64x4xf32>
    %259 = arith.mulf %257, %258 : vector<64x4xf32>
    %cst_258 = arith.constant dense<0.000000e+00> : vector<4xf32>
    %260 = vector.multi_reduction <add>, %259, %cst_258 [0] : vector<64x4xf32> to vector<4xf32>
    %261 = vector.shape_cast %260 : vector<4xf32> to vector<1x4xf32>
    %c0_259 = arith.constant 0 : index
    %c0_260 = arith.constant 0 : index
    %262 = vector.load %arg7[%c0_259, %c0_260] : memref<1x4xf32, #tpu.memory_space<vmem>>, vector<1x4xf32>
    %263 = arith.addf %261, %262 : vector<1x4xf32>
    %cst_261 = arith.constant 0.000000e+00 : f32
    %264 = vector.broadcast %cst_261 : f32 to vector<1x4xf32>
    %265 = arith.maximumf %263, %264 : vector<1x4xf32>
    %c0_262 = arith.constant 0 : index
    %c0_263 = arith.constant 0 : index
    %266 = vector.load %arg8[%c0_262, %c0_263] : memref<64x4xf32, #tpu.memory_space<vmem>>, vector<64x4xf32>
    %267 = vector.broadcast %265 : vector<1x4xf32> to vector<64x4xf32>
    %268 = arith.mulf %266, %267 : vector<64x4xf32>
    %cst_264 = arith.constant dense<0.000000e+00> : vector<64xf32>
    %269 = vector.multi_reduction <add>, %268, %cst_264 [1] : vector<64x4xf32> to vector<64xf32>
    %270 = vector.shape_cast %269 : vector<64xf32> to vector<64x1xf32>
    %c0_265 = arith.constant 0 : index
    %c0_266 = arith.constant 0 : index
    %271 = vector.load %arg9[%c0_265, %c0_266] : memref<64x1xf32, #tpu.memory_space<vmem>>, vector<64x1xf32>
    %272 = arith.addf %270, %271 : vector<64x1xf32>
    %273 = arith.negf %272 : vector<64x1xf32>
    %274 = math.exp %273 : vector<64x1xf32>
    %cst_267 = arith.constant 1.000000e+00 : f32
    %275 = vector.broadcast %cst_267 : f32 to vector<64x1xf32>
    %276 = arith.addf %275, %274 : vector<64x1xf32>
    %277 = arith.divf %275, %276 : vector<64x1xf32>
    %278 = vector.broadcast %277 : vector<64x1xf32> to vector<64x256xf32>
    %279 = arith.mulf %252, %278 : vector<64x256xf32>
    %c1_268 = arith.constant 1 : index
    %c0_269 = arith.constant 0 : index
    %c0_270 = arith.constant 0 : index
    %280 = vector.load %arg1[%c1_268, %c0_269, %c0_270] : memref<2x64x256xf32, #tpu.memory_space<vmem>>, vector<1x64x256xf32>
    %281 = vector.shape_cast %280 : vector<1x64x256xf32> to vector<64x256xf32>
    %282 = arith.addf %281, %279 : vector<64x256xf32>
    %c1_271 = arith.constant 1 : index
    %c0_272 = arith.constant 0 : index
    %c0_273 = arith.constant 0 : index
    %283 = vector.load %arg10[%c1_271, %c0_272, %c0_273] : memref<2x64x256xf32, #tpu.memory_space<vmem>>, vector<1x64x256xf32>
    %284 = vector.shape_cast %283 : vector<1x64x256xf32> to vector<64x256xf32>
    %285 = vector.shape_cast %282 : vector<64x256xf32> to vector<1x64x256xf32>
    tpu.vector_store %arg10[%c1_271, %c0_272, %c0_273], %285 {strides = array<i32>} : memref<2x64x256xf32, #tpu.memory_space<vmem>>, vector<1x64x256xf32>,
    return
  }
  func.func @transform_0(%arg0: i32) -> (i32, i32, i32) {
    %c0_i32 = arith.constant 0 : i32
    %c0_i32_0 = arith.constant 0 : i32
    %c0_i32_1 = arith.constant 0 : i32
    return %arg0, %c0_i32, %c0_i32_0 : i32, i32, i32
  }
  func.func @transform_1(%arg0: i32) -> (i32, i32) {
    %c0_i32 = arith.constant 0 : i32
    %c0_i32_0 = arith.constant 0 : i32
    %c0_i32_1 = arith.constant 0 : i32
    return %c0_i32, %c0_i32_0 : i32, i32
  }
  func.func @transform_2(%arg0: i32) -> (i32, i32) {
    %c0_i32 = arith.constant 0 : i32
    %c0_i32_0 = arith.constant 0 : i32
    %c0_i32_1 = arith.constant 0 : i32
    return %c0_i32, %c0_i32_0 : i32, i32
  }
  func.func @transform_3(%arg0: i32) -> (i32, i32) {
    %c0_i32 = arith.constant 0 : i32
    %c0_i32_0 = arith.constant 0 : i32
    %c0_i32_1 = arith.constant 0 : i32
    return %c0_i32, %c0_i32_0 : i32, i32
  }
  func.func @transform_4(%arg0: i32) -> (i32, i32) {
    %c0_i32 = arith.constant 0 : i32
    %c0_i32_0 = arith.constant 0 : i32
    %c0_i32_1 = arith.constant 0 : i32
    return %c0_i32, %c0_i32_0 : i32, i32
  }
  func.func @transform_5(%arg0: i32) -> (i32, i32) {
    %c0_i32 = arith.constant 0 : i32
    %c0_i32_0 = arith.constant 0 : i32
    %c0_i32_1 = arith.constant 0 : i32
    return %c0_i32, %c0_i32_0 : i32, i32
  }
  func.func @transform_6(%arg0: i32) -> (i32, i32) {
    %c0_i32 = arith.constant 0 : i32
    %c0_i32_0 = arith.constant 0 : i32
    %c0_i32_1 = arith.constant 0 : i32
    return %c0_i32, %c0_i32_0 : i32, i32
  }
  func.func @transform_7(%arg0: i32) -> (i32, i32) {
    %c0_i32 = arith.constant 0 : i32
    %c0_i32_0 = arith.constant 0 : i32
    %c0_i32_1 = arith.constant 0 : i32
    return %c0_i32, %c0_i32_0 : i32, i32
  }
  func.func @transform_8(%arg0: i32) -> (i32, i32) {
    %c0_i32 = arith.constant 0 : i32
    %c0_i32_0 = arith.constant 0 : i32
    %c0_i32_1 = arith.constant 0 : i32
    return %c0_i32, %c0_i32_0 : i32, i32
  }
  func.func @transform_9(%arg0: i32) -> (i32, i32, i32) {
    %c0_i32 = arith.constant 0 : i32
    %c0_i32_0 = arith.constant 0 : i32
    %c0_i32_1 = arith.constant 0 : i32
    return %arg0, %c0_i32, %c0_i32_0 : i32, i32, i32
  }
}

</mosaic_0001>

<bundles_post_ra>
// kernel: tpu_custom_call.1
= control target key start
LH: loop header
LB: loop body
LE: loop exit
PB: predicated region body
PF: predicated region fallthrough
CT: control target
= control target key end

     0   :  { %14 = vsyncpa [#allocation5], 0  ;;  %s12855_s0 = inlined_call_operand.hbm [shape: f32[4,64,256], index: 0, kind: input, shape index: {}]   ;;  %s12856_s1 = inlined_call_operand.vmem [shape: bf16[64,576], index: 1, kind: input, shape index: {}]   ;;  %s12857_s2 = inlined_call_operand.vmem [shape: f32[64,1], index: 2, kind: input, shape index: {}]   ;;  %s12858_s3 = inlined_call_operand.vmem [shape: bf16[64,576], index: 3, kind: input, shape index: {}]   ;;  %s12859_s4 = inlined_call_operand.vmem [shape: f32[64,1], index: 4, kind: input, shape index: {}]   ;;  %s12860_s5 = inlined_call_operand.vmem [shape: f32[64,4], index: 5, kind: input, shape index: {}]   ;;  %s12861_s6 = inlined_call_operand.vmem [shape: f32[1,4], index: 6, kind: input, shape index: {}]   ;;  %s12862_s7 = inlined_call_operand.vmem [shape: f32[64,4], index: 7, kind: input, shape index: {}]   ;;  %s12863_s8 = inlined_call_operand.vmem [shape: f32[64,1], index: 8, kind: input, shape index: {}]   ;;  %s12864_s9 = inlined_call_operand.hbm [shape: f32[4,64,256], index: 9, kind: output, shape index: {}]  }
   0x1   :  { %16 = vsyncpa [#allocation5 + $0x1], 0 }
   0x2   :  { %17 = vsyncpa [#allocation6], 0 }
   0x3   :  { %19 = vsyncpa [#allocation6 + $0x1], 0  ;;  %s9450_s30 = smov 0   ;;  %s9452_s10 = smov 0  }
   0x4   :  { %s9454_s11 = smov 0   ;;  %s9456_s12 = smov 0  }
   0x5 LB: > { %12910 = sst [smem:[#allocation10_spill]] %s9380_s11  ;;  %s9471_s13 = sadd.s32 4294967295, %s9384_s12   ;;  %s9384_s12 = sphi %s9456_s12, %s13018_s12   ;;  %s9380_s11 = sphi %s9454_s11, %s13015_s11   ;;  %s9376_s10 = sphi %s9452_s10, %s13017_s10   ;;  %s9372_s30 = sphi %s9450_s30, %s13016_s30  }
   0x6   : > { %s8474_s14 = sadd.s32 4294967294, %s9384_s12   ;;  %s9475_s15 = sadd.s32 1, %s9384_s12  }
   0x7   : > { %s32_s16 = sadd.s32 1, %s9380_s11  ;;  %s29_s17 = ssub.s32 %s9384_s12, %s9475_s15 }
   0x8   : > { %p39_p0 = scmp.ne.s32.totalorder %s9380_s11, %s9376_s10  ;;  %p30_p1 = scmp.eq.s32.totalorder %s29_s17, 0 }
   0x9   : > { %p40_p2 = scmp.eq.s32.totalorder %s9384_s12, 0  ;;  %p45_p3 = scmp.ne.s32.totalorder %s9376_s10, %s9372_s30 }
   0xa   : > { %p46_p4 = scmp.eq.s32.totalorder %s9471_s13, 0  ;;  %p237_p7 = scmp.eq.s32.totalorder %s9471_s13, 1 }
   0xb   : > { %s9487_s18 = scalar_select %p30_p1, %s9380_s11, %s32_s16  }
   0xc   : > { %p9489_p5 = por %p40_p2, %p39_p0  ;;  %p9493_p6 = por %p46_p4, %p45_p3 }
   0xd   : > { %12911 = sst [smem:[#allocation11_spill]] %s9487_s18  ;;  %p243_p8 = scmp.eq.s32.totalorder %s8474_s14, 1 }
   0xe   : > { %s12913_s20 = scalar_select %p9493_p6, 1, 0 }
   0xf   : > { %p9042_p10 = scmp.lt.s32.totalorder %s9384_s12, 2  ;;  %p9500_p11 = por %p237_p7, %p39_p0 }
  0x10   : > { %p9504_p12 = por %p243_p8, %p45_p3  ;;  %s287_s23 = sand.u32 1, %s9380_s11  }
  0x11   : > { %s12914_s21 = scalar_select %p9500_p11, 1, 0 }
  0x12   : > { %s12915_s22 = scalar_select %p9504_p12, 1, 0 }
  0x13   : > { %s8995_s24 = sshll.u32 %s9384_s12, 12  ;;  %s8477_s25 = sshll.u32 %s287_s23, 8 }
  0x14   : > { %s9513_s28 = scalar_lea.hbm %s12855_s0, %s8995_s24  ;;  %s291_s29 = scalar_lea.vmem [#allocation4], %s8477_s25 }
  0x15   : > { %s299_s14 = sshll.u32 %s291_s29, 4  ;;  %p9517_p13 = pnand %p9042_p10, %p9489_p5  ;;  %s9521_s14 = int_to_ptr.vmem [resolvable:$true] %s299_s14 }
  0x16   : > { %s9523_s17 = scalar_lea.sflag [#allocation5], %s287_s23  ;;  %s9292_s18 = scalar_lea.hbm %s9513_s28, 4096 }
  0x17   : > { %p9293_p0 = scmp.ne.s32.totalorder %s9513_s28, %s9292_s18  ;;  %p9294_p1 = pneg %p9517_p13 }
  0x18   : > { %s9297_s25 = scalar_lea.hbm %s12855_s0, 8192  ;;  %p9298_p4 = scmp.lt.s32.totalorder %s9513_s28, %s12855_s0 }
  0x19   : > { %p9295_p2 = pnand %p9294_p1, %p9293_p0  ;;  %p9299_p5 = scmp.lt.s32.totalorder %s9297_s25, %s9292_s18 }
  0x1b   : > { %p9296_p3 = pneg %p9295_p2  ;;  %p9300_p7 = por %p9299_p5, %p9298_p4 }
  0x1d   : > { %p9301_p8 = pnand %p9300_p7, %p9296_p3 }
  0x1f   : > { %9304 = shalt.err (!%p9301_p8)
}
  0x20   : > { %s9305_s23 = scalar_lea.vmem %s9521_s14, 4096  ;;  %s9386_s29 = smov [#allocation4]  }
  0x21   : > { %p9306_p10 = scmp.ne.s32.totalorder %s9521_s14, %s9305_s23  ;;  %s9310_s11 = sshll.u32 %s9386_s29, 4  ;;  %s9311_s11 = int_to_ptr.vmem [resolvable:$false] %s9310_s11 }
  0x22   : > { %s9312_s24 = scalar_lea.vmem %s9311_s11, 8192  ;;  %p9313_p2 = scmp.lt.s32.totalorder %s9521_s14, %s9311_s11 }
  0x23   : > { %p9308_p9 = pnand %p9306_p10, %p9294_p1  ;;  %p9314_p12 = scmp.lt.s32.totalorder %s9312_s24, %s9305_s23 }
  0x25   : > { %p9309_p0 = pneg %p9308_p9  ;;  %p9315_p11 = por %p9314_p12, %p9313_p2 }
  0x27   : > { %p9316_p6 = pnand %p9315_p11, %p9309_p0 }
  0x29   : > { %9319 = shalt.err (!%p9316_p6)
}
  0x2a   : > { %s9387_s18 = smov 256   ;;  %s9388_s26 = smov 16  }
  0x2b   : > { %9037 = dma.hbm_to_vmem [thread:$0]  (!%p9517_p13), %s9513_s28, 4096, %s9521_s14, %s9523_s17, %s9387_s18, %s9387_s18, %s9388_s26  }
  0x2c   : > { %p8481_p9 = scmp.ge.s32.totalorder %s9384_s12, 1  ;;  %p307_p1 = scmp.lt.s32.totalorder %s9384_s12, 3 }
  0x2e   : > { %p308_p3 = pnand %p8481_p9, %p307_p1 }
  0x30   : > { %311 = sbr.rel (%p308_p3) target bundleno = 2150 (0x866), region = 56 }
  0x35   : > { %s9547_s11 = sand.u32 1, %s9376_s10   ;;  %p12917_p6 = scmp.ne.s32.totalorder %s12913_s20, 0 }
  0x36   : > { %s12896_s25 = sshll.u32 %s9547_s11, 8  ;;  %s314_s19 = scalar_lea.sflag [#allocation5], %s9547_s11 }
  0x37   : > { %s9553_s27 = scalar_lea.vmem [#allocation4], %s12896_s25 }
  0x38   : > { %9363 = dma.done.wait (%p12917_p6), %s314_s19, 4096  }
  0x39   : > { %9365 = vsyncadd (%p12917_p6), %s314_s19, 4294963200  ;;  %v405_v0 = vlaneseq  ;;  %v12868_v1 = vmov 0   ;;  %v414_v8 = vld [vmem:[%s9553_s27] sm:$0xff]  ;;  %v415_v9 = vld [vmem:[%s9553_s27 + $0x8] sm:$0xff]  ;;  %v12939_v44 = vmov 0  ;;  %s9390_s20 = smov 17  }
  0x3a   : > { %374 = vst [vmem:[#allocation3 + $0x110] sm:$0xf] %v12868_v1  ;;  %357 = vst [vmem:[#allocation3] sm:$0xf] %v12868_v1  ;;  %9089 = vset.pattern.permute.xlu1 %v12868_v1  ;;  %9088 = vset.pattern.permute.xlu0 %v12868_v1  ;;  %v416_v10 = vld [vmem:[%s9553_s27 + $0x10] sm:$0xff]  ;;  %v417_v13 = vld [vmem:[%s9553_s27 + $0x18] sm:$0xff]  ;;  %v9625_v16 = vpack.c.bf16 %v415_v9, %v414_v8 }
  0x3b   : > { %358 = vst [vmem:[#allocation3 + $0x10] sm:$0xf] %v12868_v1  ;;  %359 = vst [vmem:[#allocation3 + $0x20] sm:$0xf] %v12868_v1  ;;  %v406_v2 = vand.u32 127, %v405_v0  ;;  %v9609_v3 = vshrl.u32 %v405_v0, 7  ;;  %v9631_v18 = vpack.c.bf16 %v416_v10, %v414_v8  ;;  %v9633_v19 = vpack.c.bf16 %v417_v13, %v415_v9 }
  0x3c   : > { %360 = vst [vmem:[#allocation3 + $0x30] sm:$0xf] %v12868_v1  ;;  %361 = vst [vmem:[#allocation3 + $0x40] sm:$0xf] %v12868_v1  ;;  %v418_v14 = vld [vmem:[%s9553_s27 + $0x20] sm:$0xff]  ;;  %v419_v15 = vld [vmem:[%s9553_s27 + $0x28] sm:$0xff]  ;;  %v9639_v22 = vpack.c.bf16 %v417_v13, %v416_v10 }
  0x3d   : > { %362 = vst [vmem:[#allocation3 + $0x50] sm:$0xf] %v12868_v1  ;;  %363 = vst [vmem:[#allocation3 + $0x60] sm:$0xf] %v12868_v1  ;;  %v407_v4 = vadd.s32 128, %v406_v2  ;;  %v408_v5 = vand.u32 15, %v406_v2  ;;  %v9641_v23 = vpack.c.bf16 %v419_v15, %v418_v14 }
  0x3e   : > { %364 = vst [vmem:[#allocation3 + $0x70] sm:$0xf] %v12868_v1  ;;  %365 = vst [vmem:[#allocation3 + $0x80] sm:$0xf] %v12868_v1  ;;  %v9619_v11 = vsub.s32 0, %v9609_v3  ;;  %v498_v12 = vsub.s32 4, %v9609_v3 }
  0x3f   : > { %366 = vst [vmem:[#allocation3 + $0x90] sm:$0xf] %v12868_v1  ;;  %367 = vst [vmem:[#allocation3 + $0xa0] sm:$0xf] %v12868_v1  ;;  %v409_v6 = vand.u32 15, %v407_v4  ;;  %vm9611_vm0 = vcmp.ne.s32.totalorder %v408_v5, 15 }
  0x40   : > { %368 = vst [vmem:[#allocation3 + $0xb0] sm:$0xf] %v12868_v1  ;;  %369 = vst [vmem:[#allocation3 + $0xc0] sm:$0xf] %v12868_v1  ;;  %vm9627_vm2 = vcmp.ne.s32.totalorder %v408_v5, 0  ;;  %v420_v20 = vld [vmem:[%s9553_s27 + $0x30] sm:$0xff] }
  0x41   : > { %370 = vst [vmem:[#allocation3 + $0xd0] sm:$0xf] %v12868_v1  ;;  %371 = vst [vmem:[#allocation3 + $0xe0] sm:$0xf] %v12868_v1  ;;  %vm413_vm1 = vcmp.ne.s32.totalorder %v409_v6, 15  ;;  %v421_v21 = vld [vmem:[%s9553_s27 + $0x38] sm:$0xff]  ;;  %v9644_v25 = vpack.c.bf16 %v420_v20, %v418_v14 }
  0x42   : > { %372 = vst [vmem:[#allocation3 + $0xf0] sm:$0xf] %v12868_v1  ;;  %373 = vst [vmem:[#allocation3 + $0x100] sm:$0xf] %v12868_v1  ;;  %v9646_v26 = vpack.c.bf16 %v421_v21, %v419_v15  ;;  %v422_v27 = vld [vmem:[%s9553_s27 + $0x40] sm:$0xff]  ;;  %v423_v28 = vld [vmem:[%s9553_s27 + $0x48] sm:$0xff]  ;;  %v9652_v30 = vpack.c.bf16 %v421_v21, %v420_v20 }
  0x43   : > { %375 = vst [vmem:[#allocation3 + $0x120] sm:$0xf] %v12868_v1  ;;  %376 = vst [vmem:[#allocation3 + $0x130] sm:$0xf] %v12868_v1  ;;  %v424_v29 = vld [vmem:[%s9553_s27 + $0x50] sm:$0xff]  ;;  %v425_v33 = vld [vmem:[%s9553_s27 + $0x58] sm:$0xff]  ;;  %v9664_v36 = vpack.c.bf16 %v423_v28, %v422_v27 }
  0x44   : > { %377 = vst [vmem:[#allocation3 + $0x140] sm:$0xf] %v12868_v1  ;;  %378 = vst [vmem:[#allocation3 + $0x150] sm:$0xf] %v12868_v1  ;;  %v426_v34 = vld [vmem:[%s9553_s27 + $0x60] sm:$0xff]  ;;  %v427_v35 = vld [vmem:[%s9553_s27 + $0x68] sm:$0xff]  ;;  %v9670_v38 = vpack.c.bf16 %v424_v29, %v422_v27  ;;  %v9672_v39 = vpack.c.bf16 %v425_v33, %v423_v28  ;;  %v9677_v42 = vpack.c.bf16 %v425_v33, %v424_v29 }
  0x45   : > { %379 = vst [vmem:[#allocation3 + $0x160] sm:$0xf] %v12868_v1  ;;  %380 = vst [vmem:[#allocation3 + $0x170] sm:$0xf] %v12868_v1  ;;  %vm9666_vm4 = vcmp.ne.s32.totalorder %v409_v6, 0  ;;  %v428_v40 = vld [vmem:[%s9553_s27 + $0x70] sm:$0xff]  ;;  %v9679_v43 = vpack.c.bf16 %v427_v35, %v426_v34 }
  0x46   : > { %381 = vst [vmem:[#allocation3 + $0xc] sm:$0xf] %v12868_v1  ;;  %382 = vst [vmem:[#allocation3 + $0x1c] sm:$0xf] %v12868_v1  ;;  %v429_v41 = vld [vmem:[%s9553_s27 + $0x78] sm:$0xff]  ;;  %v9686_v45 = vpack.c.bf16 %v428_v40, %v426_v34  ;;  %s12901_s28 = smov 16  }
  0x47   : > { %383 = vst [vmem:[#allocation3 + $0x2c] sm:$0xf] %v12868_v1  ;;  %384 = vst [vmem:[#allocation3 + $0x3c] sm:$0xf] %v12868_v1  ;;  %v9688_v46 = vpack.c.bf16 %v429_v41, %v427_v35  ;;  %v9741_v63 = vpack.c.bf16 %v429_v41, %v428_v40  ;;  %s12904_s14 = smov 15   ;;  %s9393_s16 = smov 1  }
  0x48   : > { %385 = vst [vmem:[#allocation3 + $0x4c] sm:$0xf] %v12868_v1  ;;  %386 = vst [vmem:[#allocation3 + $0x5c] sm:$0xf] %v12868_v1  ;;  %s9394_s17 = smov 127   ;;  %s12899_s23 = smov 113  }
  0x49   : > { %387 = vst [vmem:[#allocation3 + $0x6c] sm:$0xf] %v12868_v1  ;;  %388 = vst [vmem:[#allocation3 + $0x7c] sm:$0xf] %v12868_v1  ;;  %vm712_vm10 = vcmask 1043456   ;;  %vm827_vm11 = vcmask 130048  }
  0x4a   : > { %389 = vst [vmem:[#allocation3 + $0x8c] sm:$0xf] %v12868_v1  ;;  %390 = vst [vmem:[#allocation3 + $0x9c] sm:$0xf] %v12868_v1  ;;  %vm714_vm12 = vcmask 138240   ;;  %s12902_s29 = smov 112  }
  0x4b   : > { %391 = vst [vmem:[#allocation3 + $0xac] sm:$0xf] %v12868_v1  ;;  %392 = vst [vmem:[#allocation3 + $0xbc] sm:$0xf] %v12868_v1  ;;  %s12897_s24 = smov 111   ;;  %vm1053_vm13 = vcmask 7168  }
  0x4c   : > { %393 = vst [vmem:[#allocation3 + $0xcc] sm:$0xf] %v12868_v1  ;;  %394 = vst [vmem:[#allocation3 + $0xdc] sm:$0xf] %v12868_v1  ;;  %vm940_vm14 = vcmask 121856   ;;  %vm1182_vm15 = vcmask 1039360  }
  0x4d   : > { %395 = vst [vmem:[#allocation3 + $0xec] sm:$0xf] %v12868_v1  ;;  %396 = vst [vmem:[#allocation3 + $0xfc] sm:$0xf] %v12868_v1  ;;  %s9029_s25 = sshll.u32 %s9471_s13, 12  ;;  %p13010_p12 = scmp.ne.s32.totalorder %s12914_s21, 0 }
  0x4e   : > { %397 = vst [vmem:[#allocation3 + $0x10c] sm:$0xf] %v12868_v1  ;;  %398 = vst [vmem:[#allocation3 + $0x11c] sm:$0xf] %v12868_v1 }
  0x4f   : > { %399 = vst [vmem:[#allocation3 + $0x12c] sm:$0xf] %v12868_v1  ;;  %400 = vst [vmem:[#allocation3 + $0x13c] sm:$0xf] %v12868_v1 }
  0x50   : > { %401 = vst [vmem:[#allocation3 + $0x14c] sm:$0xf] %v12868_v1  ;;  %402 = vst [vmem:[#allocation3 + $0x15c] sm:$0xf] %v12868_v1 }
  0x51   : > { %403 = vst [vmem:[#allocation3 + $0x16c] sm:$0xf] %v12868_v1  ;;  %404 = vst [vmem:[#allocation3 + $0x17c] sm:$0xf] %v12868_v1 }
  0x52   : > { %12920 = vst [vmem:[#allocation12_spill] sm:$0xff] %v9619_v11  ;;  %12921 = vst [vmem:[#allocation13_spill] sm:$0xff] %v9625_v16 }
  0x53   : > { %12924 = vst [vmem:[#allocation14_spill] sm:$0xff] %v9631_v18  ;;  %12925 = vst [vmem:[#allocation15_spill] sm:$0xff] %v9633_v19 }
  0x54   : > { %vm563_vm3 = vmpackc.low %vm413_vm1, %vm9611_vm0  ;;  %12926 = vst [vmem:[#allocation16_spill] sm:$0xff] %v9639_v22  ;;  %vm1408_vm0 = vcmask 916480   ;;  %vm1295_vm1 = vcmask 924672  }
  0x55   : > { %12927 = vst [vmem:[#allocation17_spill] sm:$0xff] %v9641_v23  ;;  %v564_v24 = vsel %vm563_vm3, 65537, %v12868_v1  ;;  %12928 = vst [vmem:[#allocation18_spill] sm:$0xff] %v9644_v25  ;;  %vm3686_vm3 = vcmask 523264  }
  0x56   : > { %12929 = vst [vmem:[#allocation19_spill] sm:$0xff] %v9646_v26  ;;  %478 = vst [vmem:[#allocation3 + $0x4] sm:$0xff] %v9625_v16  ;;  %v568_v31 = vrot.slane %v564_v24, %v9619_v11  ;;  %v9657_v32 = vrot.slane %v564_v24, %v498_v12  ;;  %v8521_v16 = vld [vmem:[%s9553_s27 + $0xe8] sm:$0xff] }
  0x57   : > { %12930 = vst [vmem:[#allocation20_spill] sm:$0xff] %v9652_v30  ;;  %479 = vst [vmem:[#allocation3 + $0x14] sm:$0xff] %v9639_v22 }
  0x58   : > { %12931 = vst [vmem:[#allocation21_spill] sm:$0xff] %v9657_v32  ;;  %480 = vst [vmem:[#allocation3 + $0x24] sm:$0xff] %v9641_v23  ;;  %vm9681_vm5 = vcmp.ne.s16.totalorder %v568_v31, 0  ;;  %vm574_vm6 = vcmp.ne.s16.totalorder %v9657_v32, 0 }
  0x59   : > { %12932 = vst [vmem:[#allocation22_spill] sm:$0xff] %v9664_v36  ;;  %12935 = vst [vmem:[#allocation23_spill] sm:$0xff] %v9670_v38  ;;  %v12940_v44 = vsel %vm9681_vm5, 4294967295, %v12939_v44  ;;  %v575_v47 = vsel %vm9681_vm5, %v9631_v18, 0  ;;  %v576_v48 = vsel %vm574_vm6, %v9633_v19, 0  ;;  %v577_v49 = vsel %vm9681_vm5, %v9644_v25, 0 }
  0x5a   : > { %12936 = vst [vmem:[#allocation24_spill] sm:$0xff] %v9672_v39  ;;  %481 = vst [vmem:[#allocation3 + $0x34] sm:$0xff] %v9652_v30  ;;  %v578_v50 = vsel %vm574_vm6, %v9646_v26, 0  ;;  %v9709_v51 = vcombine.high %v575_v47, %v576_v48  ;;  %v9711_v52 = vcombine.low %v575_v47, %v576_v48  ;;  %v579_v55 = vsel %vm9681_vm5, %v9670_v38, 0 }
  0x5b   : > { %12937 = vst [vmem:[#allocation25_spill] sm:$0xff] %v9677_v42  ;;  %12938 = vst [vmem:[#allocation26_spill] sm:$0xff] %v9679_v43  ;;  %v9713_v53 = vcombine.low %v577_v49, %v578_v50  ;;  %v9715_v54 = vcombine.high %v577_v49, %v578_v50  ;;  %v580_v56 = vsel %vm574_vm6, %v9672_v39, 0  ;;  %v581_v57 = vsel %vm9681_vm5, %v9686_v45, 0 }
  0x5c   : > { %12941 = vst [vmem:[#allocation27_spill] sm:$0xff] %v12940_v44  ;;  %12942 = vst [vmem:[#allocation28_spill] sm:$0xff] %v9686_v45  ;;  %v582_v58 = vsel %vm574_vm6, %v9688_v46, 0  ;;  %v9733_v59 = vcombine.low %v579_v55, %v580_v56  ;;  %v9735_v60 = vcombine.high %v579_v55, %v580_v56 }
  0x5d   : > { %12943 = vst [vmem:[#allocation29_spill] sm:$0xff] %v9688_v46  ;;  %482 = vst [vmem:[#allocation3 + $0x44] sm:$0xff] %v9664_v36  ;;  %v9737_v61 = vcombine.low %v581_v57, %v582_v58  ;;  %v9739_v62 = vcombine.high %v581_v57, %v582_v58  ;;  %v8520_v36 = vld [vmem:[%s9553_s27 + $0xe0] sm:$0xff] }
  0x5e   : > { %483 = vst [vmem:[#allocation3 + $0x54] sm:$0xff] %v9677_v42  ;;  %484 = vst [vmem:[#allocation3 + $0x64] sm:$0xff] %v9679_v43  ;;  %v8523_v43 = vld [vmem:[%s9553_s27 + $0xf8] sm:$0xff]  ;;  %v9010_v44 = vpack.c.bf16 %v8521_v16, %v8520_v36 }
  0x5f   : > { %vm490_vm7 = vmpackc.low %vm9666_vm4, %vm9627_vm2  ;;  %625 = vst [vmem:[#allocation3 + $0x114] sm:$0xff] %v9709_v51  ;;  %vm1521_vm2 = vcmask 908288   ;;  %vm7864_vm4 = vcmask 31744  }
  0x60   : > { %624 = vst [vmem:[#allocation3 + $0x104] sm:$0xff] %v9711_v52  ;;  %626 = vst [vmem:[#allocation3 + $0x124] sm:$0xff] %v9713_v53  ;;  %v491_v0 = vsel %vm490_vm7, 65537, %v12868_v1  ;;  %v9895_v1 = vld [vmem:[%s9553_s27 + $0xa8] sm:$0xff] }
  0x61   : > { %627 = vst [vmem:[#allocation3 + $0x134] sm:$0xff] %v9715_v54  ;;  %12944 = vst [vmem:[#allocation30_spill] sm:$0xff] %v9733_v59  ;;  %v495_v2 = vrot.slane %v491_v0, %v9619_v11  ;;  %v9756_v4 = vrot.slane %v491_v0, %v498_v12  ;;  %v747_v0 = vld [vmem:[#allocation3 + $0x8] sm:$0xf]  ;;  %v9898_v11 = vld [vmem:[%s9553_s27 + $0xb8] sm:$0xff] }
  0x62   : > { %12945 = vst [vmem:[#allocation31_spill] sm:$0xff] %v9735_v60  ;;  %12946 = vst [vmem:[#allocation32_spill] sm:$0xff] %v9737_v61 }
  0x63   : > { %12947 = vst [vmem:[#allocation33_spill] sm:$0xff] %v9739_v62  ;;  %12948 = vst [vmem:[#allocation34_spill] sm:$0xff] %v9741_v63  ;;  %vm9759_vm8 = vcmp.ne.s16.totalorder %v495_v2, 0  ;;  %vm501_vm9 = vcmp.ne.s16.totalorder %v9756_v4, 0  ;;  %v746_v2 = vld [vmem:[#allocation3] sm:$0xff] }
  0x64   : > { %628 = vst [vmem:[#allocation3 + $0x144] sm:$0xff] %v9733_v59  ;;  %629 = vst [vmem:[#allocation3 + $0x154] sm:$0xff] %v9735_v60  ;;  %v502_v6 = vsel %vm9759_vm8, %v9631_v18, 0  ;;  %v504_v7 = vsel %vm9759_vm8, %v9644_v25, 0  ;;  %v506_v3 = vsel %vm9759_vm8, %v9670_v38, 0  ;;  %v503_v8 = vsel %vm501_vm9, %v9633_v19, 0 }
  0x65   : > { %630 = vst [vmem:[#allocation3 + $0x164] sm:$0xff] %v9737_v61  ;;  %631 = vst [vmem:[#allocation3 + $0x174] sm:$0xff] %v9739_v62  ;;  %v505_v9 = vsel %vm501_vm9, %v9646_v26, 0  ;;  %v507_v10 = vsel %vm501_vm9, %v9672_v39, 0  ;;  %v508_v12 = vsel %vm9759_vm8, %v9686_v45, 0  ;;  %v9789_v15 = vcombine.low %v502_v6, %v503_v8  ;;  %v756_v18 = vld [vmem:[#allocation3 + $0x50] sm:$0xff] }
  0x66   : > { %485 = vst [vmem:[#allocation3 + $0x74] sm:$0xff] %v9741_v63  ;;  %v9785_v13 = vld [vmem:[#allocation3 + $0x110] sm:$0xff]  ;;  %v9791_v17 = vcombine.high %v502_v6, %v503_v8  ;;  %v9793_v20 = vcombine.low %v504_v7, %v505_v9  ;;  %v9795_v21 = vcombine.high %v504_v7, %v505_v9  ;;  %v9801_v24 = vcombine.low %v506_v3, %v507_v10  ;;  %v635_v29 = vld [vmem:[#allocation3 + $0x118] sm:$0xf]  ;;  %v9861_v9 = vld [vmem:[%s9553_s27 + $0x88] sm:$0xff] }
  0x67   : > { %v9787_v14 = vld [vmem:[#allocation3 + $0x100] sm:$0xff]  ;;  %668 = vrot.lane.b32.xlu1 %v9785_v13, %s9390_s20  ;;  %v9803_v27 = vcombine.high %v506_v3, %v507_v10  ;;  %v509_v28 = vsel %vm501_vm9, %v9688_v46, 0  ;;  %v633_v31 = vld [vmem:[#allocation3 + $0x108] sm:$0xf]  ;;  %551 = vst [vmem:[#allocation3 + $0x84] sm:$0xff] %v9789_v15  ;;  %v748_v7 = vld [vmem:[#allocation3 + $0x10] sm:$0xff] }
  0x68   : > { %664 = vrot.lane.b32.xlu0 %v9787_v14, %s9390_s20  ;;  %552 = vst [vmem:[#allocation3 + $0x94] sm:$0xff] %v9791_v17  ;;  %553 = vst [vmem:[#allocation3 + $0xa4] sm:$0xff] %v9793_v20  ;;  %v9812_v33 = vcombine.low %v508_v12, %v509_v28  ;;  %v9814_v34 = vcombine.high %v508_v12, %v509_v28  ;;  %v637_v35 = vld [vmem:[#allocation3 + $0x128] sm:$0xf]  ;;  %v9822_v37 = vld [vmem:[#allocation3 + $0x120] sm:$0xff] }
  0x69   : > { %554 = vst [vmem:[#allocation3 + $0xb4] sm:$0xff] %v9795_v21  ;;  %555 = vst [vmem:[#allocation3 + $0xc4] sm:$0xff] %v9801_v24  ;;  %v639_v40 = vld [vmem:[#allocation3 + $0x138] sm:$0xf]  ;;  %v9827_v41 = vld [vmem:[#allocation3 + $0x130] sm:$0xff] }
  0x6a   : > { %556 = vst [vmem:[#allocation3 + $0xd4] sm:$0xff] %v9803_v27  ;;  %557 = vst [vmem:[#allocation3 + $0xe4] sm:$0xff] %v9812_v33  ;;  %v749_v6 = vld [vmem:[#allocation3 + $0x18] sm:$0xf]  ;;  %v9855_v3 = vld [vmem:[%s9553_s27 + $0x80] sm:$0xff] }
  0x6b   : > { %558 = vst [vmem:[#allocation3 + $0xf4] sm:$0xff] %v9814_v34  ;;  %670 = vrot.lane.b32.xlu1 %v635_v29, %s9390_s20  ;;  %v641_v47 = vld [vmem:[#allocation3 + $0x148] sm:$0xf]  ;;  %v9832_v48 = vld [vmem:[#allocation3 + $0x140] sm:$0xff]  ;;  %v643_v49 = vld [vmem:[#allocation3 + $0x158] sm:$0xf]  ;;  %v9004_v32 = vpack.c.bf16 %v9861_v9, %v9855_v3 }
  0x6c   : > { %666 = vrot.lane.b32.xlu0 %v633_v31, %s9390_s20  ;;  %v9837_v50 = vld [vmem:[#allocation3 + $0x150] sm:$0xff]  ;;  %v645_v55 = vld [vmem:[#allocation3 + $0x168] sm:$0xf]  ;;  %v9842_v56 = vld [vmem:[#allocation3 + $0x160] sm:$0xff] }
  0x6d   : > { %v647_v57 = vld [vmem:[#allocation3 + $0x178] sm:$0xf]  ;;  %v9847_v58 = vld [vmem:[#allocation3 + $0x170] sm:$0xff]  ;;  %v751_v29 = vld [vmem:[#allocation3 + $0x28] sm:$0xf]  ;;  %1618 = vst [vmem:[#allocation3 + $0x4] sm:$0xff] %v9004_v32 }
  0x6e   : > { %v9858_v8 = vld [vmem:[%s9553_s27 + $0x90] sm:$0xff]  ;;  %v9864_v10 = vld [vmem:[%s9553_s27 + $0x98] sm:$0xff]  ;;  %v750_v31 = vld [vmem:[#allocation3 + $0x20] sm:$0xff] }
  0x6f   : > { %674 = vrot.lane.b32.xlu1 %v637_v35, %s9390_s20  ;;  %v9868_v12 = vpack.c.bf16 %v9858_v8, %v9855_v3  ;;  %v9874_v28 = vpack.c.bf16 %v9864_v10, %v9861_v9  ;;  %v9918_v25 = vld [vmem:[#allocation3 + $0x128] sm:$0xf]  ;;  %v9920_v26 = vld [vmem:[#allocation3 + $0x138] sm:$0xf]  ;;  %v9923_v38 = vld [vmem:[%s9553_s27 + $0xc0] sm:$0xff] }
  0x70   : > { %672 = vrot.lane.b32.xlu0 %v9822_v37, %s9390_s20  ;;  %v8517_v39 = vld [vmem:[%s9553_s27 + $0xc8] sm:$0xff]  ;;  %v9927_v45 = vld [vmem:[%s9553_s27 + $0xd0] sm:$0xff]  ;;  %v9930_v46 = vld [vmem:[%s9553_s27 + $0xd8] sm:$0xff] }
  0x71   : > { %v1682_v35 = vsel %vm9681_vm5, %v9868_v12, 0  ;;  %v9947_v30 = vld [vmem:[#allocation3 + $0x148] sm:$0xf]  ;;  %v9949_v23 = vld [vmem:[#allocation3 + $0x158] sm:$0xf]  ;;  %v760_v42 = vld [vmem:[#allocation3 + $0x70] sm:$0xff]  ;;  %v9009_v32 = vpack.c.bf16 %v9930_v46, %v9927_v45 }
  0x72   : > { %v8522_v63 = vld [vmem:[%s9553_s27 + $0xf0] sm:$0xff]  ;;  %v862_v60 = vld [vmem:[#allocation3 + $0x98] sm:$0xf]  ;;  %v10012_v3 = vsel %vm501_vm9, %v9874_v28, 0 }
  0x73   : > { %678 = vrot.lane.b32.xlu1 %v639_v40, %s9390_s20  ;;  %v1683_v40 = vsel %vm574_vm6, %v9874_v28, 0  ;;  %v9957_v62 = vpack.c.bf16 %v8522_v63, %v8520_v36  ;;  %v861_v59 = vld [vmem:[#allocation3 + $0x90] sm:$0xff]  ;;  %v868_v36 = vld [vmem:[#allocation3 + $0xc8] sm:$0xf]  ;;  %v1106_v28 = vld [vmem:[#allocation3 + $0xac] sm:$0xf] }
  0x74   : > { %676 = vrot.lane.b32.xlu0 %v9827_v41, %s9390_s20 }
  0x77   : > { %682 = vrot.lane.b32.xlu1 %v641_v47, %s9390_s20  ;;  %v8540_v47 = vcombine.low %v1682_v35, %v1683_v40 }
  0x78   : > { %680 = vrot.lane.b32.xlu0 %v9832_v48, %s9390_s20 }
  0x7b   : > { %686 = vrot.lane.b32.xlu1 %v643_v49, %s9390_s20  ;;  %v8541_v49 = vcombine.high %v1682_v35, %v1683_v40  ;;  %v755_v35 = vld [vmem:[#allocation3 + $0x48] sm:$0xf]  ;;  %v754_v40 = vld [vmem:[#allocation3 + $0x40] sm:$0xff] }
  0x7c   : > { %684 = vrot.lane.b32.xlu0 %v9837_v50, %s9390_s20 }
  0x7f   : > { %690 = vrot.lane.b32.xlu1 %v645_v55, %s9390_s20  ;;  %v9884_v55 = vld [vmem:[#allocation3 + $0x108] sm:$0xf] }
  0x80   : > { %688 = vrot.lane.b32.xlu0 %v9842_v56, %s9390_s20  ;;  %1730 = vst [vmem:[#allocation3 + $0x104] sm:$0xff] %v8540_v47 }
  0x83   : > { %694 = vrot.lane.b32.xlu1 %v647_v57, %s9390_s20  ;;  %v9886_v57 = vld [vmem:[#allocation3 + $0x118] sm:$0xf] }
  0x84   : > { %692 = vrot.lane.b32.xlu0 %v9847_v58, %s9390_s20  ;;  %1731 = vst [vmem:[#allocation3 + $0x114] sm:$0xff] %v8541_v49 }
  0x87   : > { %780 = vrot.lane.b32.xlu1 %v747_v0, %s12901_s28  ;;  %v753_v0 = vld [vmem:[#allocation3 + $0x38] sm:$0xf] }
  0x88   : > { %778 = vrot.lane.b32.xlu0 %v746_v2, %s12901_s28  ;;  %v752_v2 = vld [vmem:[#allocation3 + $0x30] sm:$0xff] }
  0x8b   : > { %784 = vrot.lane.b32.xlu1 %v749_v6, %s12901_s28  ;;  %v9889_v6 = vld [vmem:[%s9553_s27 + $0xa0] sm:$0xff] }
  0x8c   : > { %782 = vrot.lane.b32.xlu0 %v748_v7, %s12901_s28  ;;  %v9892_v7 = vld [vmem:[%s9553_s27 + $0xb0] sm:$0xff] }
  0x8f   : > { %788 = vrot.lane.b32.xlu1 %v751_v29, %s12901_s28  ;;  %v9902_v29 = vpack.c.bf16 %v9892_v7, %v9889_v6 }
  0x90   : > { %786 = vrot.lane.b32.xlu0 %v750_v31, %s12901_s28  ;;  %v9908_v31 = vpack.c.bf16 %v9898_v11, %v9895_v1 }
  0x91   : > { %v1684_v47 = vsel %vm9681_vm5, %v9902_v29, 0 }
  0x92   : > { %v1685_v49 = vsel %vm574_vm6, %v9908_v31, 0 }
  0x93   : > { %792 = vrot.lane.b32.xlu1 %v753_v0, %s12901_s28  ;;  %v757_v0 = vld [vmem:[#allocation3 + $0x58] sm:$0xf]  ;;  %v8543_v19 = vcombine.high %v1684_v47, %v1685_v49 }
  0x94   : > { %790 = vrot.lane.b32.xlu0 %v752_v2, %s12901_s28  ;;  %v8542_v2 = vcombine.low %v1684_v47, %v1685_v49  ;;  %v9934_v47 = vpack.c.bf16 %v9927_v45, %v9923_v38  ;;  %v759_v49 = vld [vmem:[#allocation3 + $0x68] sm:$0xf]  ;;  %1623 = vst [vmem:[#allocation3 + $0x54] sm:$0xff] %v9009_v32  ;;  %v9007_v45 = vpack.c.bf16 %v9898_v11, %v9892_v7  ;;  %v10007_v11 = vsel %vm9759_vm8, %v9868_v12, 0  ;;  %v1116_v32 = vld [vmem:[#allocation3 + $0xfc] sm:$0xf] }
  0x95   : > { %1733 = vst [vmem:[#allocation3 + $0x134] sm:$0xff] %v8543_v19 }
  0x96   : > { %1732 = vst [vmem:[#allocation3 + $0x124] sm:$0xff] %v8542_v2  ;;  %v1686_v19 = vsel %vm9681_vm5, %v9934_v47, 0  ;;  %v758_v2 = vld [vmem:[#allocation3 + $0x60] sm:$0xff]  ;;  %1621 = vst [vmem:[#allocation3 + $0x34] sm:$0xff] %v9007_v45 }
  0x97   : > { %796 = vrot.lane.b32.xlu1 %v755_v35, %s12901_s28  ;;  %v9937_v35 = vpack.c.bf16 %v9930_v46, %v8517_v39  ;;  %1624 = vst [vmem:[#allocation3 + $0x64] sm:$0xff] %v9010_v44  ;;  %v867_v44 = vld [vmem:[#allocation3 + $0xc0] sm:$0xff]  ;;  %v874_v46 = vld [vmem:[#allocation3 + $0xf8] sm:$0xf] }
  0x98   : > { %794 = vrot.lane.b32.xlu0 %v754_v40, %s12901_s28 }
  0x99   : > { %v1687_v40 = vsel %vm574_vm6, %v9937_v35, 0 }
  0x9a   : > { %v8544_v22 = vcombine.low %v1686_v19, %v1687_v40 }
  0x9b   : > { %800 = vrot.lane.b32.xlu1 %v757_v0, %s12901_s28  ;;  %v8545_v0 = vcombine.high %v1686_v19, %v1687_v40  ;;  %v9961_v19 = vpack.c.bf16 %v8523_v43, %v8521_v16  ;;  %v859_v40 = vld [vmem:[#allocation3 + $0x80] sm:$0xff]  ;;  %v9008_v16 = vpack.c.bf16 %v8517_v39, %v9923_v38  ;;  %v9006_v38 = vpack.c.bf16 %v9895_v1, %v9889_v6  ;;  %v872_v39 = vld [vmem:[#allocation3 + $0xe8] sm:$0xf] }
  0x9c   : > { %798 = vrot.lane.b32.xlu0 %v756_v18, %s12901_s28  ;;  %1734 = vst [vmem:[#allocation3 + $0x144] sm:$0xff] %v8544_v22  ;;  %v761_v18 = vld [vmem:[#allocation3 + $0x78] sm:$0xf]  ;;  %v860_v22 = vld [vmem:[#allocation3 + $0x88] sm:$0xf]  ;;  %v9005_v1 = vpack.c.bf16 %v9864_v10, %v9858_v8  ;;  %v8532_v8 = vcombine.low %v10007_v11, %v10012_v3 }
  0x9d   : > { %1735 = vst [vmem:[#allocation3 + $0x154] sm:$0xff] %v8545_v0  ;;  %1622 = vst [vmem:[#allocation3 + $0x44] sm:$0xff] %v9008_v16  ;;  %v1633_v10 = vsel %vm501_vm9, %v9961_v19, 0  ;;  %v10111_v16 = vld [vmem:[#allocation3 + $0xc4] sm:$0xff] }
  0x9e   : > { %1620 = vst [vmem:[#allocation3 + $0x24] sm:$0xff] %v9006_v38  ;;  %1619 = vst [vmem:[#allocation3 + $0x14] sm:$0xff] %v9005_v1  ;;  %v1219_v1 = vld [vmem:[#allocation3 + $0x12c] sm:$0xf] }
  0x9f   : > { %804 = vrot.lane.b32.xlu1 %v759_v49, %s12901_s28  ;;  %v1688_v49 = vsel %vm9681_vm5, %v9957_v62, 0  ;;  %1674 = vst [vmem:[#allocation3 + $0x84] sm:$0xff] %v8532_v8  ;;  %v10146_v8 = vld [vmem:[#allocation3 + $0xa4] sm:$0xff] }
  0xa0   : > { %802 = vrot.lane.b32.xlu0 %v758_v2, %s12901_s28  ;;  %v1689_v2 = vsel %vm574_vm6, %v9961_v19, 0  ;;  %v1108_v19 = vld [vmem:[#allocation3 + $0xbc] sm:$0xf] }
  0xa1   : > { %v8546_v0 = vcombine.low %v1688_v49, %v1689_v2  ;;  %v8547_v61 = vcombine.high %v1688_v49, %v1689_v2  ;;  %v9011_v49 = vpack.c.bf16 %v8523_v43, %v8522_v63  ;;  %v866_v2 = vld [vmem:[#allocation3 + $0xb8] sm:$0xf]  ;;  %v873_v63 = vld [vmem:[#allocation3 + $0xf0] sm:$0xff] }
  0xa2   : > { %v870_v43 = vld [vmem:[#allocation3 + $0xd8] sm:$0xf] }
  0xa3   : > { %808 = vrot.lane.b32.xlu1 %v761_v18, %s12901_s28  ;;  %v9973_v18 = vld [vmem:[#allocation3 + $0x178] sm:$0xf]  ;;  %1625 = vst [vmem:[#allocation3 + $0x74] sm:$0xff] %v9011_v49  ;;  %v1112_v49 = vld [vmem:[#allocation3 + $0xdc] sm:$0xf] }
  0xa4   : > { %806 = vrot.lane.b32.xlu0 %v760_v42, %s12901_s28  ;;  %v9971_v42 = vld [vmem:[#allocation3 + $0x168] sm:$0xf]  ;;  %1737 = vst [vmem:[#allocation3 + $0x174] sm:$0xff] %v8547_v61  ;;  %v865_v61 = vld [vmem:[#allocation3 + $0xb0] sm:$0xff] }
  0xa5   : > { %1736 = vst [vmem:[#allocation3 + $0x164] sm:$0xff] %v8546_v0 }
  0xa7   : > { %893 = vrot.lane.b32.xlu1 %v860_v22, %s12904_s14  ;;  %v864_v22 = vld [vmem:[#allocation3 + $0xa8] sm:$0xf] }
  0xa8   : > { %891 = vrot.lane.b32.xlu0 %v859_v40, %s12904_s14  ;;  %v863_v40 = vld [vmem:[#allocation3 + $0xa0] sm:$0xff] }
  0xab   : > { %897 = vrot.lane.b32.xlu1 %v862_v60, %s12904_s14  ;;  %v871_v60 = vld [vmem:[#allocation3 + $0xe0] sm:$0xff] }
  0xac   : > { %895 = vrot.lane.b32.xlu0 %v861_v59, %s12904_s14  ;;  %v869_v59 = vld [vmem:[#allocation3 + $0xd0] sm:$0xff] }
  0xaf   : > { %901 = vrot.lane.b32.xlu1 %v864_v22, %s12904_s14 }
  0xb0   : > { %899 = vrot.lane.b32.xlu0 %v863_v40, %s12904_s14  ;;  %v1631_v40 = vsel %vm501_vm9, %v9937_v35, 0 }
  0xb3   : > { %905 = vrot.lane.b32.xlu1 %v866_v2, %s12904_s14 }
  0xb4   : > { %903 = vrot.lane.b32.xlu0 %v865_v61, %s12904_s14 }
  0xb7   : > { %909 = vrot.lane.b32.xlu1 %v868_v36, %s12904_s14 }
  0xb8   : > { %907 = vrot.lane.b32.xlu0 %v867_v44, %s12904_s14  ;;  %v10120_v44 = vld [vmem:[#allocation3 + $0xd4] sm:$0xff] }
  0xbb   : > { %913 = vrot.lane.b32.xlu1 %v870_v43, %s12904_s14 }
  0xbc   : > { %911 = vrot.lane.b32.xlu0 %v869_v59, %s12904_s14 }
  0xbf   : > { %917 = vrot.lane.b32.xlu1 %v872_v39, %s12904_s14 }
  0xc0   : > { %915 = vrot.lane.b32.xlu0 %v871_v60, %s12904_s14 }
  0xc3   : > { %921 = vrot.lane.b32.xlu1 %v874_v46, %s12904_s14  ;;  %v1628_v46 = vsel %vm9759_vm8, %v9902_v29, 0  ;;  %v1221_v29 = vld [vmem:[#allocation3 + $0x13c] sm:$0xf] }
  0xc4   : > { %919 = vrot.lane.b32.xlu0 %v873_v63, %s12904_s14 }
  0xc7   : > { %1006 = vrot.lane.b32.xlu1 %v9884_v55, %s9393_s16  ;;  %v10076_v55 = vld [vmem:[#allocation3 + $0xe4] sm:$0xff] }
  0xc8   : > { %1004 = vrot.lane.b32.xlu0 %v9787_v14, %s9393_s16 }
  0xcb   : > { %1010 = vrot.lane.b32.xlu1 %v9886_v57, %s9393_s16 }
  0xcc   : > { %1008 = vrot.lane.b32.xlu0 %v9785_v13, %s9393_s16 }
  0xcf   : > { %1014 = vrot.lane.b32.xlu1 %v9918_v25, %s9393_s16 }
  0xd0   : > { %1012 = vrot.lane.b32.xlu0 %v9822_v37, %s9393_s16 }
  0xd3   : > { %1018 = vrot.lane.b32.xlu1 %v9920_v26, %s9393_s16 }
  0xd4   : > { %1016 = vrot.lane.b32.xlu0 %v9827_v41, %s9393_s16 }
  0xd7   : > { %1022 = vrot.lane.b32.xlu1 %v9947_v30, %s9393_s16 }
  0xd8   : > { %1020 = vrot.lane.b32.xlu0 %v9832_v48, %s9393_s16 }
  0xd9   : > { %v10032_v13 = vpop.permute.xlu1 %668 }
  0xda   : > { %v10034_v14 = vpop.permute.xlu0 %664 }
  0xdb   : > { %1026 = vrot.lane.b32.xlu1 %v9949_v23, %s9393_s16  ;;  %v1102_v23 = vld [vmem:[#allocation3 + $0x8c] sm:$0xf] }
  0xdc   : > { %1024 = vrot.lane.b32.xlu0 %v9837_v50, %s9393_s16  ;;  %v1104_v50 = vld [vmem:[#allocation3 + $0x9c] sm:$0xf] }
  0xdd   : > { %v10040_v25 = vpop.permute.xlu1 %670 }
  0xde   : > { %v10042_v26 = vpop.permute.xlu0 %666 }
  0xdf   : > { %1030 = vrot.lane.b32.xlu1 %v9971_v42, %s9393_s16  ;;  %v1110_v42 = vld [vmem:[#allocation3 + $0xcc] sm:$0xf] }
  0xe0   : > { %1028 = vrot.lane.b32.xlu0 %v9842_v56, %s9393_s16 }
  0xe1   : > { %v10048_v30 = vpop.permute.xlu1 %674 }
  0xe2   : > { %v10050_v37 = vpop.permute.xlu0 %672 }
  0xe3   : > { %1034 = vrot.lane.b32.xlu1 %v9973_v18, %s9393_s16 }
  0xe4   : > { %1032 = vrot.lane.b32.xlu0 %v9847_v58, %s9393_s16  ;;  %v1632_v58 = vsel %vm9759_vm8, %v9957_v62, 0  ;;  %v10082_v62 = vld [vmem:[#allocation3 + $0xf4] sm:$0xff] }
  0xe5   : > { %v10056_v41 = vpop.permute.xlu1 %678  ;;  %v8538_v12 = vcombine.low %v1632_v58, %v1633_v10  ;;  %v8539_v7 = vcombine.high %v1632_v58, %v1633_v10  ;;  %v10148_v58 = vld [vmem:[#allocation3 + $0xb4] sm:$0xff] }
  0xe6   : > { %v10058_v48 = vpop.permute.xlu0 %676 }
  0xe7   : > { %1135 = vrot.lane.b32.xlu1 %v1102_v23, %s9394_s17  ;;  %1680 = vst [vmem:[#allocation3 + $0xe4] sm:$0xff] %v8538_v12  ;;  %1681 = vst [vmem:[#allocation3 + $0xf4] sm:$0xff] %v8539_v7 }
  0xe8   : > { %1133 = vrot.lane.b32.xlu0 %v9789_v15, %s9394_s17 }
  0xe9   : > { %v10063_v56 = vpop.permute.xlu1 %682 }
  0xea   : > { %v10065_v9 = vpop.permute.xlu0 %680 }
  0xeb   : > { %1139 = vrot.lane.b32.xlu1 %v1104_v50, %s9394_s17 }
  0xec   : > { %1137 = vrot.lane.b32.xlu0 %v9791_v17, %s9394_s17 }
  0xed   : > { %v10078_v57 = vpop.permute.xlu1 %686 }
  0xee   : > { %v10080_v6 = vpop.permute.xlu0 %684 }
  0xef   : > { %1143 = vrot.lane.b32.xlu1 %v1106_v28, %s9394_s17 }
  0xf0   : > { %1141 = vrot.lane.b32.xlu0 %v9793_v20, %s9394_s17  ;;  %v1630_v20 = vsel %vm9759_vm8, %v9934_v47, 0 }
  0xf1   : > { %v10087_v17 = vpop.permute.xlu1 %690  ;;  %v8537_v35 = vcombine.high %v1630_v20, %v1631_v40 }
  0xf2   : > { %v10089_v0 = vpop.permute.xlu0 %688 }
  0xf3   : > { %1147 = vrot.lane.b32.xlu1 %v1108_v19, %s9394_s17  ;;  %1679 = vst [vmem:[#allocation3 + $0xd4] sm:$0xff] %v8537_v35 }
  0xf4   : > { %1145 = vrot.lane.b32.xlu0 %v9795_v21, %s9394_s17  ;;  %v8536_v21 = vcombine.low %v1630_v20, %v1631_v40  ;;  %v1223_v20 = vld [vmem:[#allocation3 + $0x14c] sm:$0xf] }
  0xf5   : > { %v10094_v18 = vpop.permute.xlu1 %694 }
  0xf6   : > { %v10096_v22 = vpop.permute.xlu0 %692  ;;  %1678 = vst [vmem:[#allocation3 + $0xc4] sm:$0xff] %v8536_v21 }
  0xf7   : > { %1151 = vrot.lane.b32.xlu1 %v1110_v42, %s9394_s17 }
  0xf8   : > { %1149 = vrot.lane.b32.xlu0 %v9801_v24, %s9394_s17  ;;  %v1114_v24 = vld [vmem:[#allocation3 + $0xec] sm:$0xf] }
  0xf9   : > { %v10107_v2 = vpop.permute.xlu1 %780 }
  0xfa   : > { %v10109_v61 = vpop.permute.xlu0 %778 }
  0xfb   : > { %1155 = vrot.lane.b32.xlu1 %v1112_v49, %s9394_s17 }
  0xfc   : > { %1153 = vrot.lane.b32.xlu0 %v9803_v27, %s9394_s17  ;;  %v1215_v27 = vld [vmem:[#allocation3 + $0x10c] sm:$0xf] }
  0xfd   : > { %v10116_v47 = vpop.permute.xlu1 %784 }
  0xfe   : > { %v10118_v36 = vpop.permute.xlu0 %782 }
  0xff   : > { %1159 = vrot.lane.b32.xlu1 %v1114_v24, %s9394_s17 }
 0x100   : > { %1157 = vrot.lane.b32.xlu0 %v9812_v33, %s9394_s17  ;;  %v1217_v33 = vld [vmem:[#allocation3 + $0x11c] sm:$0xf] }
 0x101   : > { %v10125_v43 = vpop.permute.xlu1 %788 }
 0x102   : > { %v10127_v59 = vpop.permute.xlu0 %786 }
 0x103   : > { %1163 = vrot.lane.b32.xlu1 %v1116_v32, %s9394_s17 }
 0x104   : > { %1161 = vrot.lane.b32.xlu0 %v9814_v34, %s9394_s17  ;;  %v1629_v34 = vsel %vm501_vm9, %v9908_v31, 0 }
 0x105   : > { %v793_v38 = vpop.permute.xlu1 %792  ;;  %v8534_v63 = vcombine.low %v1628_v46, %v1629_v34  ;;  %v8535_v50 = vcombine.high %v1628_v46, %v1629_v34  ;;  %v1225_v46 = vld [vmem:[#allocation3 + $0x15c] sm:$0xf] }
 0x106   : > { %v10132_v39 = vpop.permute.xlu0 %790  ;;  %v817_v40 = vrot.slane %v793_v38, 4  ;;  %v814_v38 = vrot.slane %v10127_v59, 4 }
 0x107   : > { %1248 = vrot.lane.b32.xlu1 %v1215_v27, %s12899_s23  ;;  %1676 = vst [vmem:[#allocation3 + $0xa4] sm:$0xff] %v8534_v63  ;;  %1677 = vst [vmem:[#allocation3 + $0xb4] sm:$0xff] %v8535_v50  ;;  %v813_v63 = vrot.slane %v10116_v47, 4  ;;  %v12952_v47 = vld [vmem:[#allocation31_spill] sm:$0xff] }
 0x108   : > { %1246 = vrot.lane.b32.xlu0 %v9711_v52, %s12899_s23 }
 0x109   : > { %v797_v60 = vpop.permute.xlu1 %796 }
 0x10a   : > { %v795_v45 = vpop.permute.xlu0 %794  ;;  %v819_v19 = vrot.slane %v797_v60, 4 }
 0x10b   : > { %1252 = vrot.lane.b32.xlu1 %v1217_v33, %s12899_s23  ;;  %v818_v42 = vrot.slane %v795_v45, 4  ;;  %v815_v33 = vrot.slane %v10125_v43, 4  ;;  %v812_v43 = vrot.slane %v10118_v36, 4 }
 0x10c   : > { %1250 = vrot.lane.b32.xlu0 %v9709_v51, %s12899_s23 }
 0x10d   : > { %v801_v52 = vpop.permute.xlu1 %800  ;;  %v835_v60 = vsel %vm712_vm10, %v818_v42, %v819_v19  ;;  %v810_v19 = vrot.slane %v10109_v61, 4  ;;  %v831_v42 = vsel %vm712_vm10, %v814_v38, %v815_v33  ;;  %v1229_v33 = vld [vmem:[#allocation3 + $0x17c] sm:$0xf] }
 0x10e   : > { %v799_v23 = vpop.permute.xlu0 %798  ;;  %v821_v51 = vrot.slane %v801_v52, 4 }
 0x10f   : > { %1256 = vrot.lane.b32.xlu1 %v1219_v1, %s12899_s23  ;;  %v820_v12 = vrot.slane %v799_v23, 4 }
 0x110   : > { %1254 = vrot.lane.b32.xlu0 %v9713_v53, %s12899_s23  ;;  %v816_v53 = vrot.slane %v10132_v39, 4 }
 0x111   : > { %v805_v31 = vpop.permute.xlu1 %804  ;;  %v837_v24 = vsel %vm712_vm10, %v820_v12, %v821_v51 }
 0x112   : > { %v803_v10 = vpop.permute.xlu0 %802  ;;  %v823_v28 = vrot.slane %v805_v31, 4  ;;  %v838_v1 = vsel %vm827_vm11, %v799_v23, %v837_v24  ;;  %v833_v51 = vsel %vm712_vm10, %v816_v53, %v817_v40  ;;  %v8533_v23 = vcombine.high %v10007_v11, %v10012_v3  ;;  %v1227_v40 = vld [vmem:[#allocation3 + $0x16c] sm:$0xf]  ;;  %v10185_v53 = vld [vmem:[#allocation3 + $0x94] sm:$0xff] }
 0x113   : > { %v822_v7 = vrot.slane %v803_v10, 4  ;;  %1260 = vrot.lane.b32.xlu1 %v1221_v29, %s12899_s23  ;;  %v711_v11 = vrot.slane %v10094_v18, 4  ;;  %v710_v3 = vrot.slane %v10096_v22, 4  ;;  %v832_v24 = vsel %vm827_vm11, %v10127_v59, %v831_v42 }
 0x114   : > { %1258 = vrot.lane.b32.xlu0 %v9715_v54, %s12899_s23  ;;  %v12951_v54 = vld [vmem:[#allocation30_spill] sm:$0xff]  ;;  %1675 = vst [vmem:[#allocation3 + $0x94] sm:$0xff] %v8533_v23 }
 0x115   : > { %v809_v49 = vpop.permute.xlu1 %808  ;;  %v839_v27 = vsel %vm712_vm10, %v822_v7, %v823_v28  ;;  %v836_v7 = vsel %vm827_vm11, %v795_v45, %v835_v60  ;;  %v834_v45 = vsel %vm827_vm11, %v10132_v39, %v833_v51  ;;  %v12953_v39 = vld [vmem:[#allocation32_spill] sm:$0xff]  ;;  %v12955_v23 = vld [vmem:[#allocation26_spill] sm:$0xff] }
 0x116   : > { %v807_v21 = vpop.permute.xlu0 %806  ;;  %v825_v35 = vrot.slane %v809_v49, 4  ;;  %v840_v29 = vsel %vm827_vm11, %v803_v10, %v839_v27  ;;  %v811_v10 = vrot.slane %v10107_v2, 4  ;;  %v829_v2 = vsel %vm712_vm10, %v812_v43, %v813_v63 }
 0x117   : > { %v824_v32 = vrot.slane %v807_v21, 4  ;;  %1264 = vrot.lane.b32.xlu1 %v1223_v20, %s12899_s23  ;;  %v8593_v20 = vcombine.high %v836_v7, %v838_v1  ;;  %v708_v27 = vrot.slane %v10089_v0, 4  ;;  %v830_v38 = vsel %vm827_vm11, %v10118_v36, %v829_v2  ;;  %v12954_v36 = vld [vmem:[#allocation33_spill] sm:$0xff] }
 0x118   : > { %1262 = vrot.lane.b32.xlu0 %v12951_v54, %s12899_s23  ;;  %v826_v18 = vsel %vm712_vm10, %v810_v19, %v811_v10  ;;  %v8589_v54 = vcombine.high %v832_v24, %v834_v45  ;;  %v701_v19 = vrot.slane %v10048_v30, 4  ;;  %v697_v2 = vrot.slane %v10042_v26, 4  ;;  %v1342_v26 = vld [vmem:[#allocation3 + $0x7c] sm:$0xf] }
 0x119   : > { %v841_v34 = vsel %vm712_vm10, %v824_v32, %v825_v35  ;;  %v10168_v52 = vpop.permute.xlu1 %893  ;;  %v8592_v35 = vcombine.low %v836_v7, %v838_v1  ;;  %v709_v32 = vrot.slane %v10087_v17, 4  ;;  %v728_v17 = vsel %vm712_vm10, %v710_v3, %v711_v11 }
 0x11a   : > { %v10170_v50 = vpop.permute.xlu0 %891  ;;  %v842_v31 = vsel %vm827_vm11, %v807_v21, %v841_v34  ;;  %v706_v34 = vrot.slane %v10080_v6, 4  ;;  %v828_v63 = vsel %vm827_vm11, %v10109_v61, %v826_v18  ;;  %v8588_v1 = vcombine.low %v832_v24, %v834_v45 }
 0x11b   : > { %v8597_v12 = vcombine.high %v840_v29, %v842_v31  ;;  %v8596_v28 = vcombine.low %v840_v29, %v842_v31  ;;  %1268 = vrot.lane.b32.xlu1 %v1225_v46, %s12899_s23  ;;  %v707_v46 = vrot.slane %v10078_v57, 4  ;;  %v705_v29 = vrot.slane %v10063_v56, 4 }
 0x11c   : > { %1266 = vrot.lane.b32.xlu0 %v12952_v47, %s12899_s23  ;;  %v704_v31 = vrot.slane %v10065_v9, 4  ;;  %v726_v57 = vsel %vm712_vm10, %v708_v27, %v709_v32  ;;  %v8585_v43 = vcombine.high %v828_v63, %v830_v38  ;;  %v729_v51 = vsel %vm714_vm12, %v10096_v22, %v728_v17  ;;  %v12956_v22 = vld [vmem:[#allocation13_spill] sm:$0xff] }
 0x11d   : > { %3699 = vmatprep.subr.bf16.mxu0 %v8597_v12  ;;  %v10189_v49 = vpop.permute.xlu1 %897  ;;  %v702_v7 = vrot.slane %v10058_v48, 4  ;;  %v724_v47 = vsel %vm712_vm10, %v706_v34, %v707_v46  ;;  %v727_v56 = vsel %vm714_vm12, %v10089_v0, %v726_v57  ;;  %v8584_v10 = vcombine.low %v828_v63, %v830_v38  ;;  %v12958_v34 = vld [vmem:[#allocation22_spill] sm:$0xff]  ;;  %v1336_v63 = vld [vmem:[#allocation3 + $0x4c] sm:$0xf] }
 0x11e   : > { %3700 = vmatpush1.bf16.msra.mxu0 %v8596_v28  ;;  %v10191_v21 = vpop.permute.xlu0 %895  ;;  %v703_v28 = vrot.slane %v10056_v41, 4  ;;  %v700_v41 = vrot.slane %v10050_v37, 4  ;;  %v722_v42 = vsel %vm712_vm10, %v704_v31, %v705_v29  ;;  %v725_v45 = vsel %vm714_vm12, %v10080_v6, %v724_v47  ;;  %v1332_v47 = vld [vmem:[#allocation3 + $0x2c] sm:$0xf] }
 0x11f   : > { %3701 = vmatprep.subr.bf16.mxu0 %v8593_v20  ;;  %1272 = vrot.lane.b32.xlu1 %v1227_v40, %s12899_s23  ;;  %v8581_v20 = vcombine.high %v727_v56, %v729_v51  ;;  %v1340_v40 = vld [vmem:[#allocation3 + $0x6c] sm:$0xf]  ;;  %v699_v3 = vrot.slane %v10040_v25, 4  ;;  %v723_v24 = vsel %vm714_vm12, %v10065_v9, %v722_v42  ;;  %v8580_v6 = vcombine.low %v727_v56, %v729_v51  ;;  %v1338_v51 = vld [vmem:[#allocation3 + $0x5c] sm:$0xf] }
 0x120   : > { %1270 = vrot.lane.b32.xlu0 %v12953_v39, %s12899_s23  ;;  %v720_v30 = vsel %vm712_vm10, %v702_v7, %v703_v28  ;;  %v12957_v39 = vld [vmem:[#allocation34_spill] sm:$0xff]  ;;  %v696_v32 = vrot.slane %v10034_v14, 4  ;;  %v718_v25 = vsel %vm712_vm10, %v700_v41, %v701_v19  ;;  %v8577_v27 = vcombine.high %v723_v24, %v725_v45  ;;  %v1334_v19 = vld [vmem:[#allocation3 + $0x3c] sm:$0xf] }
 0x121   : > { %v10206_v60 = vpop.permute.xlu1 %901  ;;  %v721_v18 = vsel %vm714_vm12, %v10058_v48, %v720_v30  ;;  %v719_v46 = vsel %vm714_vm12, %v10050_v37, %v718_v25  ;;  %v8576_v17 = vcombine.low %v723_v24, %v725_v45  ;;  %v12959_v37 = vld [vmem:[#allocation25_spill] sm:$0xff]  ;;  %v1858_v25 = vld [vmem:[#allocation3 + $0x40] sm:$0xff] }
 0x122   : > { %3702 = vmatpush1.bf16.msra.mxu0 %v8592_v35  ;;  %v10208_v59 = vpop.permute.xlu0 %899  ;;  %v698_v35 = vrot.slane %v10032_v13, 4  ;;  %v713_v38 = vsel %vm712_vm10, %v696_v32, %v697_v2  ;;  %v8573_v48 = vcombine.high %v719_v46, %v721_v18  ;;  %v8572_v57 = vcombine.low %v719_v46, %v721_v18  ;;  %v1862_v2 = vld [vmem:[#allocation3 + $0x60] sm:$0xff] }
 0x123   : > { %3703 = vmatprep.subr.bf16.mxu0 %v8589_v54  ;;  %1276 = vrot.lane.b32.xlu1 %v1229_v33, %s12899_s23  ;;  %v715_v29 = vsel %vm714_vm12, %v10034_v14, %v713_v38  ;;  %v12960_v14 = vld [vmem:[#allocation17_spill] sm:$0xff] }
 0x124   : > { %1274 = vrot.lane.b32.xlu0 %v12954_v36, %s12899_s23  ;;  %v716_v33 = vsel %vm712_vm10, %v698_v35, %v699_v3  ;;  %v12962_v3 = vld [vmem:[#allocation16_spill] sm:$0xff]  ;;  %v1859_v38 = vld [vmem:[#allocation3 + $0x48] sm:$0xf] }
 0x125   : > { %v10223_v12 = vpop.permute.xlu1 %905  ;;  %v717_v31 = vsel %vm714_vm12, %v10032_v13, %v716_v33  ;;  %v9092_v33 = vld [vmem:[%s12856_s1 + $0xc] ss:$20 sps:$4 sm:$0xff]  }
 0x126   : > { %3704 = vmatpush1.bf16.msra.mxu0 %v8588_v1  ;;  %v10225_v61 = vpop.permute.xlu0 %903  ;;  %v8568_v13 = vcombine.low %v715_v29, %v717_v31  ;;  %3804 = vmatprep.mubr.bf16.mxu1 %v9092_v33 }
 0x127   : > { %3705 = vmatprep.subr.bf16.mxu0 %v8585_v43  ;;  %1383 = vrot.lane.b32.xlu1 %v12955_v23, %s12902_s29  ;;  %v8569_v43 = vcombine.high %v715_v29, %v717_v31 }
 0x128   : > { %1359 = vrot.lane.b32.xlu0 %v12956_v22, %s12902_s29  ;;  %v12961_v22 = vld [vmem:[#allocation20_spill] sm:$0xff] }
 0x129   : > { %v10241_v0 = vpop.permute.xlu1 %909 }
 0x12a   : > { %3706 = vmatpush1.bf16.msra.mxu0 %v8584_v10  ;;  %v10243_v11 = vpop.permute.xlu0 %907  ;;  %v1328_v10 = vld [vmem:[#allocation3 + $0xc] sm:$0xf] }
 0x12b   : > { %3707 = vmatprep.subr.bf16.mxu0 %v8581_v20  ;;  %1387 = vrot.lane.b32.xlu1 %v12957_v39, %s12902_s29  ;;  %v1330_v20 = vld [vmem:[#allocation3 + $0x1c] sm:$0xf]  ;;  %v1864_v39 = vld [vmem:[#allocation3 + $0x70] sm:$0xff] }
 0x12c   : > { %1385 = vrot.lane.b32.xlu0 %v1340_v40, %s12902_s29 }
 0x12d   : > { %v10258_v54 = vpop.permute.xlu1 %913 }
 0x12e   : > { %3708 = vmatpush1.bf16.msra.mxu0 %v8580_v6  ;;  %v10260_v9 = vpop.permute.xlu0 %911  ;;  %v1863_v6 = vld [vmem:[#allocation3 + $0x68] sm:$0xf] }
 0x12f   : > { %3709 = vmatprep.subr.bf16.mxu0 %v8577_v27  ;;  %1375 = vrot.lane.b32.xlu1 %v12958_v34, %s12902_s29  ;;  %v1865_v27 = vld [vmem:[#allocation3 + $0x78] sm:$0xf] }
 0x130   : > { %1389 = vrot.lane.b32.xlu0 %v1342_v26, %s12902_s29 }
 0x131   : > { %v10269_v36 = vpop.permute.xlu1 %917 }
 0x132   : > { %3710 = vmatpush1.bf16.msra.mxu0 %v8576_v17  ;;  %v10271_v1 = vpop.permute.xlu0 %915 }
 0x133   : > { %3711 = vmatprep.subr.bf16.mxu0 %v8573_v48  ;;  %1379 = vrot.lane.b32.xlu1 %v12959_v37, %s12902_s29 }
 0x134   : > { %1377 = vrot.lane.b32.xlu0 %v1336_v63, %s12902_s29 }
 0x135   : > { %v10280_v28 = vpop.permute.xlu1 %921 }
 0x136   : > { %3712 = vmatpush1.bf16.msra.mxu0 %v8572_v57  ;;  %v10282_v7 = vpop.permute.xlu0 %919  ;;  %v1854_v57 = vld [vmem:[#allocation3 + $0x20] sm:$0xff] }
 0x137   : > { %3713 = vmatprep.subr.bf16.mxu0 %v8569_v43  ;;  %1367 = vrot.lane.b32.xlu1 %v12960_v14, %s12902_s29  ;;  %v1861_v43 = vld [vmem:[#allocation3 + $0x58] sm:$0xf] }
 0x138   : > { %1381 = vrot.lane.b32.xlu0 %v1338_v51, %s12902_s29 }
 0x139   : > { %v10287_v56 = vpop.permute.xlu1 %1006 }
 0x13a   : > { %3714 = vmatpush1.bf16.msra.mxu0 %v8568_v13  ;;  %v10289_v23 = vpop.permute.xlu0 %1004 }
 0x13b   : > { %1371 = vrot.lane.b32.xlu1 %v12961_v22, %s12902_s29 }
 0x13c   : > { %1369 = vrot.lane.b32.xlu0 %v1332_v47, %s12902_s29 }
 0x13d   : > { %v10294_v41 = vpop.permute.xlu1 %1010 }
 0x13e   : > { %v10296_v42 = vpop.permute.xlu0 %1008 }
 0x13f   : > { %1361 = vrot.lane.b32.xlu1 %v1328_v10, %s12902_s29 }
 0x140   : > { %1373 = vrot.lane.b32.xlu0 %v1334_v19, %s12902_s29 }
 0x141   : > { %v10300_v40 = vpop.permute.xlu1 %1014 }
 0x142   : > { %v10302_v45 = vpop.permute.xlu0 %1012 }
 0x143   : > { %1365 = vrot.lane.b32.xlu1 %v1330_v20, %s12902_s29 }
 0x144   : > { %1363 = vrot.lane.b32.xlu0 %v12962_v3, %s12902_s29  ;;  %v1041_v3 = vrot.slane %v10300_v40, 4  ;;  %v1038_v40 = vrot.slane %v10296_v42, 4 }
 0x145   : > { %v1019_v30 = vpop.permute.xlu1 %1018 }
 0x146   : > { %v10307_v24 = vpop.permute.xlu0 %1016  ;;  %v1043_v51 = vrot.slane %v1019_v30, 4 }
 0x147   : > { %1906 = vrot.lane.b32.xlu1 %v1862_v2, %s12901_s28  ;;  %v1042_v14 = vrot.slane %v10307_v24, 4  ;;  %v1040_v2 = vrot.slane %v10302_v45, 4 }
 0x148   : > { %1472 = vrot.lane.b32.xlu0 %v9789_v15, %s12897_s24  ;;  %v1860_v15 = vld [vmem:[#allocation3 + $0x50] sm:$0xff] }
 0x149   : > { %v1023_v35 = vpop.permute.xlu1 %1022 }
 0x14a   : > { %v1021_v32 = vpop.permute.xlu0 %1020  ;;  %v1045_v31 = vrot.slane %v1023_v35, 4  ;;  %v1855_v35 = vld [vmem:[#allocation3 + $0x28] sm:$0xf] }
 0x14b   : > { %1910 = vrot.lane.b32.xlu1 %v1864_v39, %s12901_s28  ;;  %v1044_v37 = vrot.slane %v1021_v32, 4 }
 0x14c   : > { %1908 = vrot.lane.b32.xlu0 %v1863_v6, %s12901_s28  ;;  %v1856_v6 = vld [vmem:[#allocation3 + $0x30] sm:$0xff] }
 0x14d   : > { %v1027_v26 = vpop.permute.xlu1 %1026  ;;  %v1061_v30 = vsel %vm712_vm10, %v1044_v37, %v1045_v31  ;;  %v1857_v31 = vld [vmem:[#allocation3 + $0x38] sm:$0xf]  ;;  %v1850_v37 = vld [vmem:[#allocation3] sm:$0xff] }
 0x14e   : > { %v1025_v18 = vpop.permute.xlu0 %1024  ;;  %v1047_v17 = vrot.slane %v1027_v26, 4 }
 0x14f   : > { %1898 = vrot.lane.b32.xlu1 %v1858_v25, %s12901_s28  ;;  %v1046_v48 = vrot.slane %v1025_v18, 4  ;;  %v1039_v25 = vrot.slane %v10294_v41, 4  ;;  %v1037_v41 = vrot.slane %v10287_v56, 4  ;;  %v937_v56 = vrot.slane %v10282_v7, 4 }
 0x150   : > { %1912 = vrot.lane.b32.xlu0 %v1865_v27, %s12901_s28 }
 0x151   : > { %v1031_v46 = vpop.permute.xlu1 %1030  ;;  %v1063_v22 = vsel %vm712_vm10, %v1046_v48, %v1047_v17 }
 0x152   : > { %v1029_v34 = vpop.permute.xlu0 %1028  ;;  %v1049_v63 = vrot.slane %v1031_v46, 4  ;;  %v1064_v27 = vsel %vm1053_vm13, %v1025_v18, %v1063_v22  ;;  %v1059_v46 = vsel %vm712_vm10, %v1042_v14, %v1043_v51  ;;  %v1036_v18 = vrot.slane %v10289_v23, 4 }
 0x153   : > { %v1048_v29 = vrot.slane %v1029_v34, 4  ;;  %1902 = vrot.lane.b32.xlu1 %v1860_v15, %s12901_s28  ;;  %v938_v51 = vrot.slane %v10280_v28, 4  ;;  %v1055_v14 = vsel %vm712_vm10, %v1038_v40, %v1039_v25  ;;  %v935_v22 = vrot.slane %v10271_v1, 4 }
 0x154   : > { %1900 = vrot.lane.b32.xlu0 %v1859_v38, %s12901_s28  ;;  %v931_v25 = vrot.slane %v10243_v11, 4 }
 0x155   : > { %v1035_v13 = vpop.permute.xlu1 %1034  ;;  %v1065_v10 = vsel %vm712_vm10, %v1048_v29, %v1049_v63  ;;  %v1062_v63 = vsel %vm1053_vm13, %v1021_v32, %v1061_v30  ;;  %v934_v30 = vrot.slane %v10258_v54, 4 }
 0x156   : > { %v1033_v47 = vpop.permute.xlu0 %1032  ;;  %v1051_v19 = vrot.slane %v1035_v13, 4  ;;  %v1066_v26 = vsel %vm1053_vm13, %v1029_v34, %v1065_v10  ;;  %v1057_v34 = vsel %vm712_vm10, %v1040_v2, %v1041_v3  ;;  %v8625_v29 = vcombine.high %v1062_v63, %v1064_v27 }
 0x157   : > { %v1050_v20 = vrot.slane %v1033_v47, 4  ;;  %1890 = vrot.lane.b32.xlu1 %v1854_v57, %s12901_s28  ;;  %v1060_v57 = vsel %vm1053_vm13, %v10307_v24, %v1059_v46  ;;  %v1058_v13 = vsel %vm1053_vm13, %v10302_v45, %v1057_v34  ;;  %v8624_v24 = vcombine.low %v1062_v63, %v1064_v27  ;;  %v10395_v63 = vld [vmem:[%s12856_s1 + $0x4] ss:$20 sps:$4 sm:$0xff]  }
 0x158   : > { %1904 = vrot.lane.b32.xlu0 %v1861_v43, %s12901_s28  ;;  %v1052_v10 = vsel %vm712_vm10, %v1036_v18, %v1037_v41  ;;  %v8621_v28 = vcombine.high %v1058_v13, %v1060_v57  ;;  %v1056_v3 = vsel %vm1053_vm13, %v10296_v42, %v1055_v14  ;;  %v8620_v42 = vcombine.low %v1058_v13, %v1060_v57 }
 0x159   : > { %v1067_v39 = vsel %vm712_vm10, %v1050_v20, %v1051_v19  ;;  %v10334_v15 = vpop.permute.xlu1 %1135  ;;  %v1851_v19 = vld [vmem:[#allocation3 + $0x8] sm:$0xf]  ;;  %v1852_v20 = vld [vmem:[#allocation3 + $0x10] sm:$0xff]  ;;  %v930_v46 = vrot.slane %v10223_v12, 4  ;;  %v928_v12 = vrot.slane %v10206_v60, 4  ;;  %v927_v41 = vrot.slane %v10208_v59, 4  ;;  %3731 = vmatprep.mubr.bf16.mxu0 %v10395_v63 }
 0x15a   : > { %v1068_v33 = vsel %vm1053_vm13, %v1033_v47, %v1067_v39  ;;  %v10336_v38 = vpop.permute.xlu0 %1133  ;;  %v936_v47 = vrot.slane %v10269_v36, 4  ;;  %v933_v39 = vrot.slane %v10260_v9, 4  ;;  %v954_v36 = vsel %vm712_vm10, %v937_v56, %v938_v51 }
 0x15b   : > { %v8629_v17 = vcombine.high %v1066_v26, %v1068_v33  ;;  %v8628_v48 = vcombine.low %v1066_v26, %v1068_v33  ;;  %1894 = vrot.lane.b32.xlu1 %v1856_v6, %s12901_s28  ;;  %v1054_v6 = vsel %vm1053_vm13, %v10289_v23, %v1052_v10  ;;  %v1853_v26 = vld [vmem:[#allocation3 + $0x18] sm:$0xf]  ;;  %v955_v33 = vsel %vm940_vm14, %v10282_v7, %v954_v36 }
 0x15c   : > { %1892 = vrot.lane.b32.xlu0 %v1855_v35, %s12901_s28  ;;  %v932_v35 = vrot.slane %v10241_v0, 4  ;;  %v952_v54 = vsel %vm712_vm10, %v935_v22, %v936_v47  ;;  %v8617_v27 = vcombine.high %v1054_v6, %v1056_v3  ;;  %v950_v0 = vsel %vm712_vm10, %v933_v39, %v934_v30  ;;  %v10418_v47 = vld [vmem:[#allocation3 + $0x160] sm:$0xff] }
 0x15d   : > { %3715 = vmatprep.subr.bf16.mxu0 %v8629_v17  ;;  %v10348_v43 = vpop.permute.xlu1 %1139  ;;  %v929_v17 = vrot.slane %v10225_v61, 4  ;;  %v8616_v7 = vcombine.low %v1054_v6, %v1056_v3  ;;  %v925_v60 = vrot.slane %v10191_v21, 4  ;;  %v924_v56 = vrot.slane %v10168_v52, 4  ;;  %v1751_v3 = vld [vmem:[#allocation3 + $0x168] sm:$0xf] }
 0x15e   : > { %3716 = vmatpush2.bf16.msra.mxu0 %v8628_v48  ;;  %v10350_v32 = vpop.permute.xlu0 %1137  ;;  %v953_v48 = vsel %vm940_vm14, %v10271_v1, %v952_v54  ;;  %v948_v18 = vsel %vm712_vm10, %v931_v25, %v932_v35  ;;  %v951_v1 = vsel %vm940_vm14, %v10260_v9, %v950_v0  ;;  %v923_v14 = vrot.slane %v10170_v50, 4 }
 0x15f   : > { %3717 = vmatprep.subr.bf16.mxu0 %v8625_v29  ;;  %1882 = vrot.lane.b32.xlu1 %v1850_v37, %s12901_s28  ;;  %v8613_v34 = vcombine.high %v953_v48, %v955_v33  ;;  %v1453_v29 = vld [vmem:[#allocation3 + $0xec] sm:$0xf]  ;;  %v926_v37 = vrot.slane %v10189_v49, 4  ;;  %v946_v57 = vsel %vm712_vm10, %v929_v17, %v930_v46  ;;  %v949_v51 = vsel %vm940_vm14, %v10243_v11, %v948_v18 }
 0x160   : > { %1896 = vrot.lane.b32.xlu0 %v1857_v31, %s12901_s28  ;;  %v8612_v9 = vcombine.low %v953_v48, %v955_v33  ;;  %v944_v49 = vsel %vm712_vm10, %v927_v41, %v928_v12  ;;  %v8609_v13 = vcombine.high %v949_v51, %v951_v1  ;;  %v947_v22 = vsel %vm940_vm14, %v10225_v61, %v946_v57  ;;  %v10429_v61 = vld [vmem:[#allocation3 + $0x170] sm:$0xff]  ;;  %v1753_v33 = vld [vmem:[#allocation3 + $0x178] sm:$0xf] }
 0x161   : > { %v10364_v2 = vpop.permute.xlu1 %1143  ;;  %v8608_v52 = vcombine.low %v949_v51, %v951_v1  ;;  %v1449_v1 = vld [vmem:[#allocation3 + $0xcc] sm:$0xf] }
 0x162   : > { %3718 = vmatpush2.bf16.msra.mxu0 %v8624_v24  ;;  %v10366_v45 = vpop.permute.xlu0 %1141  ;;  %v1455_v24 = vld [vmem:[#allocation3 + $0xfc] sm:$0xf] }
 0x163   : > { %3719 = vmatprep.subr.bf16.mxu0 %v8621_v28  ;;  %1886 = vrot.lane.b32.xlu1 %v1852_v20, %s12901_s28  ;;  %v942_v28 = vsel %vm712_vm10, %v925_v60, %v926_v37  ;;  %v9093_v37 = vld [vmem:[%s12856_s1] ss:$20 sps:$4 sm:$0xff]   ;;  %v1168_v60 = vrot.slane %v10348_v43, 4 }
 0x164   : > { %1884 = vrot.lane.b32.xlu0 %v1851_v19, %s12901_s28  ;;  %v939_v19 = vsel %vm712_vm10, %v923_v14, %v924_v56  ;;  %v943_v30 = vsel %vm940_vm14, %v10191_v21, %v942_v28  ;;  %v1167_v56 = vrot.slane %v10350_v32, 4  ;;  %v1451_v28 = vld [vmem:[#allocation3 + $0xdc] sm:$0xf] }
 0x165   : > { %v10380_v40 = vpop.permute.xlu1 %1147  ;;  %v941_v25 = vsel %vm940_vm14, %v10170_v50, %v939_v19 }
 0x166   : > { %3720 = vmatpush2.bf16.msra.mxu0 %v8620_v42  ;;  %v10382_v23 = vpop.permute.xlu0 %1145  ;;  %v1172_v46 = vrot.slane %v10380_v40, 4  ;;  %v8600_v18 = vcombine.low %v941_v25, %v943_v30  ;;  %v1170_v40 = vrot.slane %v10364_v2, 4 }
 0x167   : > { %3721 = vmatprep.subr.bf16.mxu0 %v8617_v27  ;;  %1496 = vrot.lane.b32.xlu1 %v10076_v55, %s12897_s24  ;;  %v1171_v17 = vrot.slane %v10382_v23, 4 }
 0x168   : > { %1888 = vrot.lane.b32.xlu0 %v1853_v26, %s12901_s28  ;;  %v8601_v26 = vcombine.high %v941_v25, %v943_v30 }
 0x169   : > { %v10402_v31 = vpop.permute.xlu1 %1151  ;;  %v1188_v14 = vsel %vm712_vm10, %v1171_v17, %v1172_v46  ;;  %v9101_v46 = vld [vmem:[%s12856_s1 + $0x50] ss:$20 sps:$4 sm:$0xff]  }
 0x16a   : > { %3722 = vmatpush2.bf16.msra.mxu0 %v8616_v7  ;;  %v10404_v55 = vpop.permute.xlu0 %1149  ;;  %v1174_v27 = vrot.slane %v10402_v31, 4 }
 0x16b   : > { %3723 = vmatprep.subr.bf16.mxu0 %v8613_v34  ;;  %1500 = vrot.lane.b32.xlu1 %v10082_v62, %s12897_s24  ;;  %v945_v62 = vsel %vm940_vm14, %v10208_v59, %v944_v49  ;;  %v1173_v21 = vrot.slane %v10404_v55, 4  ;;  %v1169_v34 = vrot.slane %v10366_v45, 4 }
 0x16c   : > { %1498 = vrot.lane.b32.xlu0 %v1453_v29, %s12897_s24  ;;  %v8605_v20 = vcombine.high %v945_v62, %v947_v22  ;;  %v8604_v54 = vcombine.low %v945_v62, %v947_v22  ;;  %v1165_v22 = vrot.slane %v10336_v38, 4  ;;  %v10472_v62 = vld [vmem:[#allocation3 + $0x140] sm:$0xff] }
 0x16d   : > { %v1156_v11 = vpop.permute.xlu1 %1155  ;;  %v1190_v29 = vsel %vm712_vm10, %v1173_v21, %v1174_v27  ;;  %v1749_v27 = vld [vmem:[#allocation3 + $0x158] sm:$0xf] }
 0x16e   : > { %3724 = vmatpush2.bf16.msra.mxu0 %v8612_v9  ;;  %v1154_v10 = vpop.permute.xlu0 %1153  ;;  %v1176_v6 = vrot.slane %v1156_v11, 4  ;;  %v1191_v43 = vsel %vm1182_vm15, %v10404_v55, %v1190_v29  ;;  %v1186_v11 = vsel %vm712_vm10, %v1169_v34, %v1170_v40  ;;  %v1189_v55 = vsel %vm1182_vm15, %v10382_v23, %v1188_v14  ;;  %v12965_v40 = vld [vmem:[#allocation24_spill] sm:$0xff]  ;;  %v10541_v34 = vld [vmem:[#allocation3 + $0x130] sm:$0xff]  ;;  %v9107_v29 = vld [vmem:[%s12856_s1 + $0x78] ss:$20 sps:$4 sm:$0xff]  }
 0x16f   : > { %3725 = vmatprep.subr.bf16.mxu0 %v8609_v13  ;;  %1794 = vrot.lane.b32.xlu1 %v10418_v47, %s9390_s20  ;;  %v1175_v59 = vrot.slane %v1154_v10, 4  ;;  %v12968_v14 = vld [vmem:[#allocation18_spill] sm:$0xff] }
 0x170   : > { %1502 = vrot.lane.b32.xlu0 %v1455_v24, %s12897_s24  ;;  %v1166_v24 = vrot.slane %v10334_v15, 4  ;;  %v1184_v15 = vsel %vm712_vm10, %v1167_v56, %v1168_v60  ;;  %v12967_v60 = vld [vmem:[#allocation19_spill] sm:$0xff] }
 0x171   : > { %v1160_v39 = vpop.permute.xlu1 %1159  ;;  %v1192_v50 = vsel %vm712_vm10, %v1175_v59, %v1176_v6  ;;  %v9098_v6 = vld [vmem:[%s12856_s1 + $0x28] ss:$20 sps:$4 sm:$0xff]  }
 0x172   : > { %3726 = vmatpush2.bf16.msra.mxu0 %v8608_v52  ;;  %v1158_v36 = vpop.permute.xlu0 %1157  ;;  %v1178_v42 = vrot.slane %v1160_v39, 4  ;;  %v1193_v57 = vsel %vm1182_vm15, %v1154_v10, %v1192_v50  ;;  %v1747_v39 = vld [vmem:[#allocation3 + $0x148] sm:$0xf]  ;;  %v10527_v50 = vld [vmem:[#allocation3 + $0x120] sm:$0xff] }
 0x173   : > { %v1177_v35 = vrot.slane %v1158_v36, 4  ;;  %3727 = vmatprep.subr.bf16.mxu0 %v8605_v20  ;;  %1798 = vrot.lane.b32.xlu1 %v10429_v61, %s9390_s20  ;;  %v8657_v10 = vcombine.high %v1191_v43, %v1193_v57  ;;  %v1187_v20 = vsel %vm1182_vm15, %v10366_v45, %v1186_v11  ;;  %v8656_v23 = vcombine.low %v1191_v43, %v1193_v57  ;;  %v1745_v57 = vld [vmem:[#allocation3 + $0x138] sm:$0xf]  ;;  %v1443_v43 = vld [vmem:[#allocation3 + $0x9c] sm:$0xf]  ;;  %v12971_v11 = vld [vmem:[#allocation14_spill] sm:$0xff] }
 0x174   : > { %1796 = vrot.lane.b32.xlu0 %v1751_v3, %s9390_s20  ;;  %v1181_v3 = vsel %vm712_vm10, %v1165_v22, %v1166_v24  ;;  %v8653_v30 = vcombine.high %v1187_v20, %v1189_v55  ;;  %v1185_v45 = vsel %vm1182_vm15, %v10350_v32, %v1184_v15  ;;  %v8652_v25 = vcombine.low %v1187_v20, %v1189_v55 }
 0x175   : > { %v1164_v0 = vpop.permute.xlu1 %1163  ;;  %v1194_v41 = vsel %vm712_vm10, %v1177_v35, %v1178_v42  ;;  %v1183_v35 = vsel %vm1182_vm15, %v10336_v38, %v1181_v3  ;;  %v1741_v3 = vld [vmem:[#allocation3 + $0x118] sm:$0xf] }
 0x176   : > { %3728 = vmatpush2.bf16.msra.mxu0 %v8604_v54  ;;  %v1162_v48 = vpop.permute.xlu0 %1161  ;;  %v1180_v7 = vrot.slane %v1164_v0, 4  ;;  %v1195_v2 = vsel %vm1182_vm15, %v1158_v36, %v1194_v41  ;;  %v10490_v36 = vld [vmem:[#allocation3 + $0x150] sm:$0xff]  ;;  %v8649_v54 = vcombine.high %v1183_v35, %v1185_v45  ;;  %v8648_v38 = vcombine.low %v1183_v35, %v1185_v45  ;;  %v12964_v41 = vld [vmem:[#allocation28_spill] sm:$0xff] }
 0x177   : > { %v1179_v12 = vrot.slane %v1162_v48, 4  ;;  %3729 = vmatprep.subr.bf16.mxu0 %v8601_v26  ;;  %1488 = vrot.lane.b32.xlu1 %v10111_v16, %s12897_s24  ;;  %v9099_v26 = vld [vmem:[%s12856_s1 + $0x54] ss:$20 sps:$4 sm:$0xff]  }
 0x178   : > { %1800 = vrot.lane.b32.xlu0 %v1753_v33, %s9390_s20  ;;  %v1445_v33 = vld [vmem:[#allocation3 + $0xac] sm:$0xf] }
 0x179   : > { %v1196_v31 = vsel %vm712_vm10, %v1179_v12, %v1180_v7  ;;  %v10456_v51 = vpop.permute.xlu1 %1248 }
 0x17a   : > { %3730 = vmatpush2.bf16.msra.mxu0 %v8600_v18  ;;  %v10458_v16 = vpop.permute.xlu0 %1246  ;;  %v1197_v9 = vsel %vm1182_vm15, %v1162_v48, %v1196_v31  ;;  %v12963_v48 = vld [vmem:[#allocation29_spill] sm:$0xff]  ;;  %v9105_v18 = vld [vmem:[%s12856_s1 + $0x7c] ss:$20 sps:$4 sm:$0xff]  }
 0x17b   : > { %v8661_v49 = vcombine.high %v1195_v2, %v1197_v9  ;;  %v8660_v13 = vcombine.low %v1195_v2, %v1197_v9  ;;  %1492 = vrot.lane.b32.xlu1 %v10120_v44, %s12897_s24  ;;  %v9096_v44 = vld [vmem:[%s12856_s1 + $0x2c] ss:$20 sps:$4 sm:$0xff]  }
 0x17c   : > { %1490 = vrot.lane.b32.xlu0 %v1449_v1, %s12897_s24  ;;  %v1441_v2 = vld [vmem:[#allocation3 + $0x8c] sm:$0xf] }
 0x17d   : > { %3772 = vmatprep.subr.bf16.mxu1 %v8661_v49  ;;  %3732 = vmatmul.mubr.bf16.vlgmr.msra.gmra.mxu0 %v9093_v37  ;;  %v10476_v52 = vpop.permute.xlu1 %1252  ;;  %v12966_v37 = vld [vmem:[#allocation23_spill] sm:$0xff]  ;;  %v12969_v49 = vmov 0  }
 0x17e   : > { %3773 = vmatpush1.bf16.msra.mxu1 %v8660_v13  ;;  %v10478_v19 = vpop.permute.xlu0 %1250  ;;  %3741 = vmatprep.mubr.bf16.mxu0 %v9096_v44  ;;  %v12970_v13 = vld [vmem:[#allocation15_spill] sm:$0xff] }
 0x17f   : > { %3774 = vmatprep.subr.bf16.mxu1 %v8657_v10  ;;  %1786 = vrot.lane.b32.xlu1 %v10472_v62, %s9390_s20  ;;  %v10570_v10 = vld [vmem:[#allocation3 + $0x100] sm:$0xff] }
 0x180   : > { %1494 = vrot.lane.b32.xlu0 %v1451_v28, %s12897_s24  ;;  %v1739_v28 = vld [vmem:[#allocation3 + $0x108] sm:$0xf] }
 0x181   : > { %v10497_v59 = vpop.permute.xlu1 %1256 }
 0x182   : > { %3775 = vmatpush1.bf16.msra.mxu1 %v8656_v23  ;;  %v10499_v42 = vpop.permute.xlu0 %1254  ;;  %v10575_v23 = vld [vmem:[#allocation3 + $0x110] sm:$0xff] }
 0x183   : > { %3776 = vmatprep.subr.bf16.mxu1 %v8653_v30  ;;  %1790 = vrot.lane.b32.xlu1 %v10490_v36, %s9390_s20 }
 0x184   : > { %1788 = vrot.lane.b32.xlu0 %v1747_v39, %s9390_s20 }
 0x185   : > { %3742 = vmatmul.mubr.bf16.gmra.mxu0 %v9098_v6  ;;  %v10506_v21 = vpop.permute.xlu1 %1260 }
 0x186   : > { %3777 = vmatpush1.bf16.msra.mxu1 %v8652_v25  ;;  %v10508_v32 = vpop.permute.xlu0 %1258  ;;  %3751 = vmatprep.mubr.bf16.mxu0 %v9099_v26  ;;  %v2215_v25 = vld [vmem:[#allocation3 + $0xec] sm:$0xf] }
 0x187   : > { %3778 = vmatprep.subr.bf16.mxu1 %v8649_v54  ;;  %1480 = vrot.lane.b32.xlu1 %v10146_v8, %s12897_s24  ;;  %v1447_v8 = vld [vmem:[#allocation3 + $0xbc] sm:$0xf] }
 0x188   : > { %1792 = vrot.lane.b32.xlu0 %v1749_v27, %s9390_s20 }
 0x189   : > { %v10519_v17 = vpop.permute.xlu1 %1264 }
 0x18a   : > { %3779 = vmatpush1.bf16.msra.mxu1 %v8648_v38  ;;  %v10521_v0 = vpop.permute.xlu0 %1262 }
 0x18b   : > { %3780 = vmatprep.subr.bf16.mxu1 %v12963_v48  ;;  %1484 = vrot.lane.b32.xlu1 %v10148_v58, %s12897_s24  ;;  %v1743_v58 = vld [vmem:[#allocation3 + $0x128] sm:$0xf] }
 0x18c   : > { %1482 = vrot.lane.b32.xlu0 %v1445_v33, %s12897_s24 }
 0x18d   : > { %3752 = vmatmul.mubr.bf16.gmra.mxu0 %v9101_v46  ;;  %v10529_v7 = vpop.permute.xlu1 %1268 }
 0x18e   : > { %v10531_v12 = vpop.permute.xlu0 %1266  ;;  %3781 = vmatpush1.bf16.msra.mxu1 %v12964_v41  ;;  %3761 = vmatprep.mubr.bf16.mxu0 %v9105_v18  ;;  %v2217_v18 = vld [vmem:[#allocation3 + $0xfc] sm:$0xf] }
 0x18f   : > { %3782 = vmatprep.subr.bf16.mxu1 %v12965_v40  ;;  %1778 = vrot.lane.b32.xlu1 %v10527_v50, %s9390_s20 }
 0x190   : > { %1486 = vrot.lane.b32.xlu0 %v1447_v8, %s12897_s24  ;;  %v9234_v8 = vld [vmem:[#allocation3 + $0xe4] sm:$0xff] }
 0x191   : > { %v10546_v1 = vpop.permute.xlu1 %1272 }
 0x192   : > { %v10548_v31 = vpop.permute.xlu0 %1270  ;;  %3783 = vmatpush1.bf16.msra.mxu1 %v12966_v37 }
 0x193   : > { %3784 = vmatprep.subr.bf16.mxu1 %v12967_v60  ;;  %1782 = vrot.lane.b32.xlu1 %v10541_v34, %s9390_s20 }
 0x194   : > { %1780 = vrot.lane.b32.xlu0 %v1743_v58, %s9390_s20 }
 0x195   : > { %3762 = vmatmul.mubr.bf16.gmra.mxu0 %v9107_v29  ;;  %v10555_v9 = vpop.permute.xlu1 %1276 }
 0x196   : > { %v10557_v56 = vpop.permute.xlu0 %1274  ;;  %3785 = vmatpush1.bf16.msra.mxu1 %v12968_v14  ;;  %3877 = vmatprep.mubr.bf16.mxu0 %v12969_v49  ;;  %v2087_v14 = vld [vmem:[#allocation3 + $0x168] sm:$0xf] }
 0x197   : > { %3786 = vmatprep.subr.bf16.mxu1 %v12970_v13  ;;  %1474 = vrot.lane.b32.xlu1 %v1441_v2, %s12897_s24 }
 0x198   : > { %1784 = vrot.lane.b32.xlu0 %v1745_v57, %s9390_s20  ;;  %v9235_v57 = vld [vmem:[#allocation3 + $0xf4] sm:$0xff] }
 0x199   : > { %v1384_v24 = vpop.permute.xlu1 %1383 }
 0x19a   : > { %v10564_v22 = vpop.permute.xlu0 %1359  ;;  %3787 = vmatpush1.bf16.msra.mxu1 %v12971_v11  ;;  %v1403_v20 = vrot.slane %v1384_v24, 4 }
 0x19b   : > { %1478 = vrot.lane.b32.xlu1 %v1443_v43, %s12897_s24 }
 0x19c   : > { %1476 = vrot.lane.b32.xlu0 %v10185_v53, %s12897_s24 }
 0x19d   : > { %v1388_v55 = vpop.permute.xlu1 %1387 }
 0x19e   : > { %v1386_v44 = vpop.permute.xlu0 %1385  ;;  %v1405_v53 = vrot.slane %v1388_v55, 4 }
 0x19f   : > { %v1404_v15 = vrot.slane %v1386_v44, 4  ;;  %1772 = vrot.lane.b32.xlu1 %v1739_v28, %s9390_s20 }
 0x1a0   : > { %1770 = vrot.lane.b32.xlu0 %v10570_v10, %s9390_s20 }
 0x1a1   : > { %v1376_v30 = vpop.permute.xlu1 %1375  ;;  %v1420_v6 = vsel %vm712_vm10, %v1403_v20, %v1404_v15  ;;  %v2089_v20 = vld [vmem:[#allocation3 + $0x178] sm:$0xf] }
 0x1a2   : > { %v1390_v39 = vpop.permute.xlu0 %1389  ;;  %v1421_v26 = vsel %vm1408_vm0, %v1384_v24, %v1420_v6  ;;  %v1399_v41 = vrot.slane %v1376_v30, 4 }
 0x1a3   : > { %v1406_v45 = vrot.slane %v1390_v39, 4  ;;  %1776 = vrot.lane.b32.xlu1 %v1741_v3, %s9390_s20  ;;  %v1293_v3 = vrot.slane %v10555_v9, 4  ;;  %v1292_v39 = vrot.slane %v10557_v56, 4  ;;  %v1288_v9 = vrot.slane %v10531_v12, 4 }
 0x1a4   : > { %1774 = vrot.lane.b32.xlu0 %v10575_v23, %s9390_s20 }
 0x1a5   : > { %v1422_v35 = vsel %vm712_vm10, %v1405_v53, %v1406_v45  ;;  %v1380_v54 = vpop.permute.xlu1 %1379 }
 0x1a6   : > { %v1378_v27 = vpop.permute.xlu0 %1377  ;;  %v1423_v38 = vsel %vm1408_vm0, %v1388_v55, %v1422_v35  ;;  %v1401_v29 = vrot.slane %v1380_v54, 4 }
 0x1a7   : > { %v1400_v33 = vrot.slane %v1378_v27, 4  ;;  %v8693_v46 = vcombine.high %v1421_v26, %v1423_v38  ;;  %v8692_v48 = vcombine.low %v1421_v26, %v1423_v38  ;;  %2260 = vrot.lane.b32.xlu1 %v2215_v25, %s9394_s17  ;;  %v1291_v27 = vrot.slane %v10546_v1, 4  ;;  %v9236_v1 = vld [vmem:[#allocation3 + $0xc4] sm:$0xff] }
 0x1a8   : > { %2258 = vrot.lane.b32.xlu0 %v9234_v8, %s9394_s17  ;;  %v1290_v26 = vrot.slane %v10548_v31, 4 }
 0x1a9   : > { %3788 = vmatprep.subr.bf16.mxu1 %v8693_v46  ;;  %v1368_v40 = vpop.permute.xlu1 %1367  ;;  %v1416_v37 = vsel %vm712_vm10, %v1399_v41, %v1400_v33  ;;  %v2211_v33 = vld [vmem:[#allocation3 + $0xcc] sm:$0xf]  ;;  %v1309_v46 = vsel %vm712_vm10, %v1292_v39, %v1293_v3  ;;  %v1283_v3 = vrot.slane %v10497_v59, 4  ;;  %v1282_v39 = vrot.slane %v10499_v42, 4 }
 0x1aa   : > { %3789 = vmatpush2.bf16.msra.mxu1 %v8692_v48  ;;  %v1382_v58 = vpop.permute.xlu0 %1381  ;;  %v1417_v24 = vsel %vm1408_vm0, %v1376_v30, %v1416_v37  ;;  %v1395_v15 = vrot.slane %v1368_v40, 4 }
 0x1ab   : > { %v1402_v60 = vrot.slane %v1382_v58, 4  ;;  %2264 = vrot.lane.b32.xlu1 %v2217_v18, %s9394_s17 }
 0x1ac   : > { %2262 = vrot.lane.b32.xlu0 %v9235_v57, %s9394_s17  ;;  %v1286_v57 = vrot.slane %v10521_v0, 4 }
 0x1ad   : > { %v1418_v2 = vsel %vm712_vm10, %v1401_v29, %v1402_v60  ;;  %v1372_v13 = vpop.permute.xlu1 %1371  ;;  %v1287_v60 = vrot.slane %v10519_v17, 4 }
 0x1ae   : > { %v1370_v43 = vpop.permute.xlu0 %1369  ;;  %v1419_v11 = vsel %vm1408_vm0, %v1380_v54, %v1418_v2  ;;  %v1397_v6 = vrot.slane %v1372_v13, 4  ;;  %v1289_v54 = vrot.slane %v10529_v7, 4  ;;  %v1307_v2 = vsel %vm712_vm10, %v1290_v26, %v1291_v27  ;;  %v2085_v26 = vld [vmem:[#allocation3 + $0x158] sm:$0xf] }
 0x1af   : > { %v1396_v28 = vrot.slane %v1370_v43, 4  ;;  %v8689_v55 = vcombine.high %v1417_v24, %v1419_v11  ;;  %v8688_v44 = vcombine.low %v1417_v24, %v1419_v11  ;;  %2132 = vrot.lane.b32.xlu1 %v2087_v14, %s9393_s16  ;;  %v2213_v14 = vld [vmem:[#allocation3 + $0xdc] sm:$0xf]  ;;  %v1310_v43 = vsel %vm1295_vm1, %v10557_v56, %v1309_v46  ;;  %v9237_v56 = vld [vmem:[#allocation3 + $0xd4] sm:$0xff] }
 0x1b0   : > { %2130 = vrot.lane.b32.xlu0 %v10418_v47, %s9393_s16  ;;  %v1391_v47 = vrot.slane %v10564_v22, 4 }
 0x1b1   : > { %3790 = vmatprep.subr.bf16.mxu1 %v8689_v55  ;;  %v1362_v53 = vpop.permute.xlu1 %1361  ;;  %v1412_v45 = vsel %vm712_vm10, %v1395_v15, %v1396_v28  ;;  %v1284_v55 = vrot.slane %v10508_v32, 4 }
 0x1b2   : > { %3791 = vmatpush2.bf16.msra.mxu1 %v8688_v44  ;;  %v1374_v30 = vpop.permute.xlu0 %1373  ;;  %v1392_v35 = vrot.slane %v1362_v53, 4  ;;  %v1413_v41 = vsel %vm1408_vm0, %v1368_v40, %v1412_v45  ;;  %v1305_v44 = vsel %vm712_vm10, %v1288_v9, %v1289_v54  ;;  %v1278_v9 = vrot.slane %v10458_v16, 4 }
 0x1b3   : > { %v1398_v25 = vrot.slane %v1374_v30, 4  ;;  %2136 = vrot.lane.b32.xlu1 %v2089_v20, %s9393_s16  ;;  %v2083_v30 = vld [vmem:[#allocation3 + $0x148] sm:$0xf] }
 0x1b4   : > { %2134 = vrot.lane.b32.xlu0 %v10429_v61, %s9393_s16  ;;  %v1407_v7 = vsel %vm712_vm10, %v1391_v47, %v1392_v35  ;;  %v1281_v35 = vrot.slane %v10476_v52, 4  ;;  %v1299_v52 = vsel %vm712_vm10, %v1282_v39, %v1283_v3  ;;  %v2079_v3 = vld [vmem:[#allocation3 + $0x128] sm:$0xf] }
 0x1b5   : > { %v1414_v38 = vsel %vm712_vm10, %v1397_v6, %v1398_v25  ;;  %v1366_v48 = vpop.permute.xlu1 %1365  ;;  %v1409_v17 = vsel %vm1408_vm0, %v10564_v22, %v1407_v7  ;;  %v1303_v22 = vsel %vm712_vm10, %v1286_v57, %v1287_v60  ;;  %v1306_v6 = vsel %vm1295_vm1, %v10531_v12, %v1305_v44  ;;  %v9090_v39 = vld [vmem:[%s12856_s1 + $0x8] ss:$20 sps:$4 sm:$0xff]  }
 0x1b6   : > { %v1364_v8 = vpop.permute.xlu0 %1363  ;;  %v1415_v61 = vsel %vm1408_vm0, %v1372_v13, %v1414_v38  ;;  %v1394_v18 = vrot.slane %v1366_v48, 4  ;;  %v1285_v13 = vrot.slane %v10506_v21, 4  ;;  %v1308_v21 = vsel %vm1295_vm1, %v10548_v31, %v1307_v2 }
 0x1b7   : > { %v1393_v58 = vrot.slane %v1364_v8, 4  ;;  %v8685_v29 = vcombine.high %v1413_v41, %v1415_v61  ;;  %v8684_v37 = vcombine.low %v1413_v41, %v1415_v61  ;;  %2252 = vrot.lane.b32.xlu1 %v2211_v33, %s9394_s17  ;;  %v8677_v53 = vcombine.high %v1308_v21, %v1310_v43  ;;  %v2207_v61 = vld [vmem:[#allocation3 + $0xac] sm:$0xf] }
 0x1b8   : > { %2250 = vrot.lane.b32.xlu0 %v9236_v1, %s9394_s17  ;;  %v1280_v25 = vrot.slane %v10478_v19, 4  ;;  %v1301_v54 = vsel %vm712_vm10, %v1284_v55, %v1285_v13  ;;  %v1304_v59 = vsel %vm1295_vm1, %v10521_v0, %v1303_v22  ;;  %v8676_v47 = vcombine.low %v1308_v21, %v1310_v43  ;;  %v9238_v1 = vld [vmem:[#allocation3 + $0xa4] sm:$0xff] }
 0x1b9   : > { %v1410_v40 = vsel %vm712_vm10, %v1393_v58, %v1394_v18  ;;  %3792 = vmatprep.subr.bf16.mxu1 %v8685_v29  ;;  %v10621_v11 = vpop.permute.xlu1 %1906  ;;  %v1279_v12 = vrot.slane %v10456_v51, 4  ;;  %v8673_v27 = vcombine.high %v1304_v59, %v1306_v6  ;;  %v1302_v38 = vsel %vm1295_vm1, %v10508_v32, %v1301_v54  ;;  %v2081_v54 = vld [vmem:[#allocation3 + $0x138] sm:$0xf] }
 0x1ba   : > { %v1411_v24 = vsel %vm1408_vm0, %v1364_v8, %v1410_v40  ;;  %3793 = vmatpush2.bf16.msra.mxu1 %v8684_v37  ;;  %v10623_v28 = vpop.permute.xlu0 %1472  ;;  %v1297_v46 = vsel %vm712_vm10, %v1280_v25, %v1281_v35  ;;  %v1300_v7 = vsel %vm1295_vm1, %v10499_v42, %v1299_v52  ;;  %v8672_v51 = vcombine.low %v1304_v59, %v1306_v6  ;;  %v2209_v40 = vld [vmem:[#allocation3 + $0xbc] sm:$0xf]  ;;  %v9102_v6 = vld [vmem:[%s12856_s1 + $0x34] ss:$20 sps:$4 sm:$0xff]  }
 0x1bb   : > { %v8681_v15 = vcombine.high %v1409_v17, %v1411_v24  ;;  %v8680_v20 = vcombine.low %v1409_v17, %v1411_v24  ;;  %2256 = vrot.lane.b32.xlu1 %v2213_v14, %s9394_s17  ;;  %v1294_v48 = vsel %vm712_vm10, %v1278_v9, %v1279_v12  ;;  %v8669_v41 = vcombine.high %v1300_v7, %v1302_v38 }
 0x1bc   : > { %2254 = vrot.lane.b32.xlu0 %v9237_v56, %s9394_s17  ;;  %v1298_v18 = vsel %vm1295_vm1, %v10478_v19, %v1297_v46  ;;  %v1926_v42 = vrot.slane %v10621_v11, 4  ;;  %v8668_v60 = vcombine.low %v1300_v7, %v1302_v38  ;;  %v9104_v38 = vld [vmem:[%s12856_s1 + $0x30] ss:$20 sps:$4 sm:$0xff]  }
 0x1bd   : > { %3794 = vmatprep.subr.bf16.mxu1 %v8681_v15  ;;  %v1911_v45 = vpop.permute.xlu1 %1910 }
 0x1be   : > { %3795 = vmatpush2.bf16.msra.mxu1 %v8680_v20  ;;  %v1909_v31 = vpop.permute.xlu0 %1908  ;;  %v1928_v8 = vrot.slane %v1911_v45, 4 }
 0x1bf   : > { %3796 = vmatprep.subr.bf16.mxu1 %v8677_v53  ;;  %2124 = vrot.lane.b32.xlu1 %v2083_v30, %s9393_s16  ;;  %v1927_v32 = vrot.slane %v1909_v31, 4 }
 0x1c0   : > { %2122 = vrot.lane.b32.xlu0 %v10472_v62, %s9393_s16 }
 0x1c1   : > { %v1899_v33 = vpop.permute.xlu1 %1898  ;;  %v1942_v57 = vsel %vm712_vm10, %v1926_v42, %v1927_v32 }
 0x1c2   : > { %3797 = vmatpush2.bf16.msra.mxu1 %v8676_v47  ;;  %v1913_v0 = vpop.permute.xlu0 %1912  ;;  %v1922_v24 = vrot.slane %v1899_v33, 4  ;;  %v1943_v15 = vsel %vm827_vm11, %v10621_v11, %v1942_v57 }
 0x1c3   : > { %v1929_v62 = vrot.slane %v1913_v0, 4  ;;  %3798 = vmatprep.subr.bf16.mxu1 %v8673_v27  ;;  %2128 = vrot.lane.b32.xlu1 %v2085_v26, %s9393_s16  ;;  %v2203_v26 = vld [vmem:[#allocation3 + $0x8c] sm:$0xf] }
 0x1c4   : > { %2126 = vrot.lane.b32.xlu0 %v10490_v36, %s9393_s16  ;;  %v1296_v36 = vsel %vm1295_vm1, %v10458_v16, %v1294_v48  ;;  %v9239_v16 = vld [vmem:[#allocation3 + $0xb4] sm:$0xff] }
 0x1c5   : > { %v1903_v58 = vpop.permute.xlu1 %1902  ;;  %v1944_v37 = vsel %vm712_vm10, %v1928_v8, %v1929_v62  ;;  %v8665_v2 = vcombine.high %v1296_v36, %v1298_v18  ;;  %v8664_v44 = vcombine.low %v1296_v36, %v1298_v18  ;;  %v9240_v8 = vld [vmem:[#allocation3 + $0x84] sm:$0xff] }
 0x1c6   : > { %3799 = vmatpush2.bf16.msra.mxu1 %v8672_v51  ;;  %v1901_v29 = vpop.permute.xlu0 %1900  ;;  %v1945_v43 = vsel %vm827_vm11, %v1911_v45, %v1944_v37  ;;  %v1924_v17 = vrot.slane %v1903_v58, 4  ;;  %v9241_v37 = vld [vmem:[#allocation3 + $0x94] sm:$0xff] }
 0x1c7   : > { %3800 = vmatprep.subr.bf16.mxu1 %v8669_v41  ;;  %2244 = vrot.lane.b32.xlu1 %v2207_v61, %s9394_s17  ;;  %v1923_v19 = vrot.slane %v1901_v29, 4  ;;  %v8599_v56 = vcombine.high %v1943_v15, %v1945_v43  ;;  %v8598_v45 = vcombine.low %v1943_v15, %v1945_v43  ;;  %v2205_v41 = vld [vmem:[#allocation3 + $0x9c] sm:$0xf] }
 0x1c8   : > { %2242 = vrot.lane.b32.xlu0 %v9238_v1, %s9394_s17  ;;  %v2075_v1 = vld [vmem:[#allocation3 + $0x108] sm:$0xf] }
 0x1c9   : > { %v1891_v14 = vpop.permute.xlu1 %1890  ;;  %v1938_v20 = vsel %vm712_vm10, %v1922_v24, %v1923_v19 }
 0x1ca   : > { %3801 = vmatpush2.bf16.msra.mxu1 %v8668_v60  ;;  %v1905_v13 = vpop.permute.xlu0 %1904  ;;  %v1939_v31 = vsel %vm827_vm11, %v1899_v33, %v1938_v20  ;;  %v1918_v35 = vrot.slane %v1891_v14, 4  ;;  %v9110_v60 = vld [vmem:[%s12856_s1 + $0x58] ss:$20 sps:$4 sm:$0xff]  }
 0x1cb   : > { %v1925_v55 = vrot.slane %v1905_v13, 4  ;;  %3802 = vmatprep.subr.bf16.mxu1 %v8665_v2  ;;  %2248 = vrot.lane.b32.xlu1 %v2209_v40, %s9394_s17 }
 0x1cc   : > { %2246 = vrot.lane.b32.xlu0 %v9239_v16, %s9394_s17 }
 0x1cd   : > { %v1940_v21 = vsel %vm712_vm10, %v1924_v17, %v1925_v55  ;;  %v1895_v22 = vpop.permute.xlu1 %1894  ;;  %v2077_v55 = vld [vmem:[#allocation3 + $0x118] sm:$0xf] }
 0x1ce   : > { %3803 = vmatpush2.bf16.msra.mxu1 %v8664_v44  ;;  %v1893_v53 = vpop.permute.xlu0 %1892  ;;  %v1941_v30 = vsel %vm827_vm11, %v1903_v58, %v1940_v21  ;;  %v1920_v12 = vrot.slane %v1895_v22, 4 }
 0x1cf   : > { %v1919_v11 = vrot.slane %v1893_v53, 4  ;;  %3918 = vmatprep.subr.bf16.mxu1 %v8599_v56  ;;  %2116 = vrot.lane.b32.xlu1 %v2079_v3, %s9393_s16  ;;  %v8595_v25 = vcombine.high %v1939_v31, %v1941_v30  ;;  %v8594_v27 = vcombine.low %v1939_v31, %v1941_v30  ;;  %v1974_v56 = vld [vmem:[#allocation3 + $0xe0] sm:$0xff]  ;;  %v1975_v3 = vld [vmem:[#allocation3 + $0xe8] sm:$0xf] }
 0x1d0   : > { %2114 = vrot.lane.b32.xlu0 %v10527_v50, %s9393_s16 }
 0x1d1   : > { %3805 = vmatmul.mubr.bf16.vlgmr.msra.gmra.mxu1 %v9090_v39  ;;  %v1883_v47 = vpop.permute.xlu1 %1882  ;;  %v1934_v9 = vsel %vm712_vm10, %v1918_v35, %v1919_v11  ;;  %v9114_v39 = vld [vmem:[%s12856_s1 + $0x80] ss:$20 sps:$4 sm:$0xff]  }
 0x1d2   : > { %3919 = vmatpush1.bf16.msra.mxu1 %v8598_v45  ;;  %v1897_v59 = vpop.permute.xlu0 %1896  ;;  %3814 = vmatprep.mubr.bf16.mxu1 %v9102_v6  ;;  %v1935_v46 = vsel %vm827_vm11, %v1891_v14, %v1934_v9  ;;  %v1914_v32 = vrot.slane %v1883_v47, 4  ;;  %v9112_v14 = vld [vmem:[%s12856_s1 + $0x84] ss:$20 sps:$4 sm:$0xff]   ;;  %v1976_v35 = vld [vmem:[#allocation3 + $0xf0] sm:$0xff] }
 0x1d3   : > { %v1921_v52 = vrot.slane %v1897_v59, 4  ;;  %3920 = vmatprep.subr.bf16.mxu1 %v8595_v25  ;;  %2120 = vrot.lane.b32.xlu1 %v2081_v54, %s9393_s16  ;;  %v1977_v25 = vld [vmem:[#allocation3 + $0xf8] sm:$0xf] }
 0x1d4   : > { %2118 = vrot.lane.b32.xlu0 %v10541_v34, %s9393_s16  ;;  %v9108_v34 = vld [vmem:[%s12856_s1 + $0x5c] ss:$20 sps:$4 sm:$0xff]  }
 0x1d5   : > { %v1936_v50 = vsel %vm712_vm10, %v1920_v12, %v1921_v52  ;;  %v1887_v0 = vpop.permute.xlu1 %1886 }
 0x1d6   : > { %3921 = vmatpush1.bf16.msra.mxu1 %v8594_v27  ;;  %v1885_v33 = vpop.permute.xlu0 %1884  ;;  %v1937_v62 = vsel %vm827_vm11, %v1895_v22, %v1936_v50  ;;  %v1916_v29 = vrot.slane %v1887_v0, 4  ;;  %v1970_v27 = vld [vmem:[#allocation3 + $0xc0] sm:$0xff]  ;;  %v1971_v50 = vld [vmem:[#allocation3 + $0xc8] sm:$0xf] }
 0x1d7   : > { %v1915_v7 = vrot.slane %v1885_v33, 4  ;;  %v8590_v51 = vcombine.low %v1935_v46, %v1937_v62  ;;  %v8591_v48 = vcombine.high %v1935_v46, %v1937_v62  ;;  %2236 = vrot.lane.b32.xlu1 %v2203_v26, %s9394_s17 }
 0x1d8   : > { %2234 = vrot.lane.b32.xlu0 %v9240_v8, %s9394_s17 }
 0x1d9   : > { %3922 = vmatprep.subr.bf16.mxu1 %v8591_v48  ;;  %3815 = vmatmul.mubr.bf16.gmra.mxu1 %v9104_v38  ;;  %v1497_v18 = vpop.permute.xlu1 %1496  ;;  %v1930_v58 = vsel %vm712_vm10, %v1914_v32, %v1915_v7  ;;  %v1972_v7 = vld [vmem:[#allocation3 + $0xd0] sm:$0xff] }
 0x1da   : > { %3923 = vmatpush1.bf16.msra.mxu1 %v8590_v51  ;;  %v1889_v61 = vpop.permute.xlu0 %1888  ;;  %3824 = vmatprep.mubr.bf16.mxu1 %v9108_v34  ;;  %v1931_v2 = vsel %vm827_vm11, %v1883_v47, %v1930_v58  ;;  %v1516_v17 = vrot.slane %v1497_v18, 4  ;;  %v1973_v51 = vld [vmem:[#allocation3 + $0xd8] sm:$0xf]  ;;  %v1966_v58 = vld [vmem:[#allocation3 + $0xa0] sm:$0xff] }
 0x1db   : > { %v1917_v42 = vrot.slane %v1889_v61, 4  ;;  %2240 = vrot.lane.b32.xlu1 %v2205_v41, %s9394_s17 }
 0x1dc   : > { %2238 = vrot.lane.b32.xlu0 %v9241_v37, %s9394_s17 }
 0x1dd   : > { %v1932_v36 = vsel %vm712_vm10, %v1916_v29, %v1917_v42  ;;  %v1501_v19 = vpop.permute.xlu1 %1500  ;;  %v1967_v29 = vld [vmem:[#allocation3 + $0xa8] sm:$0xf] }
 0x1de   : > { %v1499_v57 = vpop.permute.xlu0 %1498  ;;  %v1933_v40 = vsel %vm827_vm11, %v1887_v0, %v1932_v36  ;;  %v1518_v20 = vrot.slane %v1501_v19, 4 }
 0x1df   : > { %v1517_v13 = vrot.slane %v1499_v57, 4  ;;  %v8586_v43 = vcombine.low %v1931_v2, %v1933_v40  ;;  %v8587_v24 = vcombine.high %v1931_v2, %v1933_v40  ;;  %2108 = vrot.lane.b32.xlu1 %v2075_v1, %s9393_s16  ;;  %v1968_v40 = vld [vmem:[#allocation3 + $0xb0] sm:$0xff] }
 0x1e0   : > { %2106 = vrot.lane.b32.xlu0 %v10570_v10, %s9393_s16 }
 0x1e1   : > { %3924 = vmatprep.subr.bf16.mxu1 %v8587_v24  ;;  %3825 = vmatmul.mubr.bf16.gmra.mxu1 %v9110_v60  ;;  %v1795_v44 = vpop.permute.xlu1 %1794  ;;  %v1533_v15 = vsel %vm712_vm10, %v1516_v17, %v1517_v13 }
 0x1e2   : > { %v1503_v16 = vpop.permute.xlu0 %1502  ;;  %3925 = vmatpush1.bf16.msra.mxu1 %v8586_v43  ;;  %3834 = vmatprep.mubr.bf16.mxu1 %v9112_v14  ;;  %v1534_v30 = vsel %vm1521_vm2, %v1497_v18, %v1533_v15  ;;  %v1969_v14 = vld [vmem:[#allocation3 + $0xb8] sm:$0xf]  ;;  %v1963_v15 = vld [vmem:[#allocation3 + $0x88] sm:$0xf] }
 0x1e3   : > { %v1519_v21 = vrot.slane %v1503_v16, 4  ;;  %2112 = vrot.lane.b32.xlu1 %v2077_v55, %s9393_s16 }
 0x1e4   : > { %2110 = vrot.lane.b32.xlu0 %v10575_v23, %s9393_s16  ;;  %v1814_v23 = vrot.slane %v1795_v44, 4 }
 0x1e5   : > { %v1535_v10 = vsel %vm712_vm10, %v1518_v20, %v1519_v21  ;;  %v1799_v53 = vpop.permute.xlu1 %1798 }
 0x1e6   : > { %v1797_v22 = vpop.permute.xlu0 %1796  ;;  %v1536_v6 = vsel %vm1521_vm2, %v1501_v19, %v1535_v10  ;;  %v1816_v12 = vrot.slane %v1799_v53, 4 }
 0x1e7   : > { %v1815_v11 = vrot.slane %v1797_v22, 4  ;;  %v8708_v45 = vcombine.low %v1534_v30, %v1536_v6  ;;  %v8709_v31 = vcombine.high %v1534_v30, %v1536_v6  ;;  %2020 = vrot.lane.b32.xlu1 %v1975_v3, %s12904_s14  ;;  %v1964_v30 = vld [vmem:[#allocation3 + $0x90] sm:$0xff]  ;;  %v1965_v6 = vld [vmem:[#allocation3 + $0x98] sm:$0xf] }
 0x1e8   : > { %2018 = vrot.lane.b32.xlu0 %v1974_v56, %s12904_s14 }
 0x1e9   : > { %3853 = vmatprep.subr.bf16.mxu0 %v8709_v31  ;;  %3835 = vmatmul.mubr.bf16.gmra.mxu1 %v9114_v39  ;;  %v1489_v59 = vpop.permute.xlu1 %1488  ;;  %v1830_v47 = vsel %vm712_vm10, %v1814_v23, %v1815_v11 }
 0x1ea   : > { %v1801_v54 = vpop.permute.xlu0 %1800  ;;  %3854 = vmatpush1.bf16.msra.mxu0 %v8708_v45  ;;  %3950 = vmatprep.mubr.bf16.mxu1 %v10395_v63  ;;  %v1831_v33 = vsel %vm714_vm12, %v1795_v44, %v1830_v47  ;;  %v1512_v34 = vrot.slane %v1489_v59, 4  ;;  %v1962_v44 = vld [vmem:[#allocation3 + $0x80] sm:$0xff] }
 0x1eb   : > { %v1817_v9 = vrot.slane %v1801_v54, 4  ;;  %2024 = vrot.lane.b32.xlu1 %v1977_v25, %s12904_s14  ;;  %v10756_v54 = vld [vmem:[#allocation3 + $0x64] sm:$0xff] }
 0x1ec   : > { %2022 = vrot.lane.b32.xlu0 %v1976_v35, %s12904_s14 }
 0x1ed   : > { %v1832_v52 = vsel %vm712_vm10, %v1816_v12, %v1817_v9  ;;  %v1493_v38 = vpop.permute.xlu1 %1492 }
 0x1ee   : > { %v1491_v26 = vpop.permute.xlu0 %1490  ;;  %v1833_v0 = vsel %vm714_vm12, %v1799_v53, %v1832_v52  ;;  %v1514_v41 = vrot.slane %v1493_v38, 4 }
 0x1ef   : > { %v1513_v46 = vrot.slane %v1491_v26, 4  ;;  %v8582_v63 = vcombine.low %v1831_v33, %v1833_v0  ;;  %v8583_v62 = vcombine.high %v1831_v33, %v1833_v0  ;;  %2012 = vrot.lane.b32.xlu1 %v1971_v50, %s12904_s14  ;;  %v10763_v33 = vld [vmem:[#allocation3 + $0x74] sm:$0xff]  ;;  %v2441_v0 = vld [vmem:[#allocation3 + $0x7c] sm:$0xf] }
 0x1f0   : > { %2010 = vrot.lane.b32.xlu0 %v1970_v27, %s12904_s14 }
 0x1f1   : > { %3926 = vmatprep.subr.bf16.mxu1 %v8583_v62  ;;  %v1787_v8 = vpop.permute.xlu1 %1786  ;;  %v1529_v32 = vsel %vm712_vm10, %v1512_v34, %v1513_v46 }
 0x1f2   : > { %v1495_v48 = vpop.permute.xlu0 %1494  ;;  %3927 = vmatpush1.bf16.msra.mxu1 %v8582_v63  ;;  %v1530_v36 = vsel %vm1521_vm2, %v1489_v59, %v1529_v32  ;;  %v1810_v2 = vrot.slane %v1787_v8, 4  ;;  %v2439_v59 = vld [vmem:[#allocation3 + $0x6c] sm:$0xf]  ;;  %v10771_v32 = vld [vmem:[#allocation3 + $0x44] sm:$0xff] }
 0x1f3   : > { %v1515_v61 = vrot.slane %v1495_v48, 4  ;;  %2016 = vrot.lane.b32.xlu1 %v1973_v51, %s12904_s14  ;;  %v1504_v48 = vrot.slane %v10623_v28, 4 }
 0x1f4   : > { %2014 = vrot.lane.b32.xlu0 %v1972_v7, %s12904_s14 }
 0x1f5   : > { %v1531_v18 = vsel %vm712_vm10, %v1514_v41, %v1515_v61  ;;  %v1791_v37 = vpop.permute.xlu1 %1790  ;;  %v2435_v41 = vld [vmem:[#allocation3 + $0x4c] sm:$0xf] }
 0x1f6   : > { %v1789_v42 = vpop.permute.xlu0 %1788  ;;  %v1532_v1 = vsel %vm1521_vm2, %v1493_v38, %v1531_v18  ;;  %v1812_v17 = vrot.slane %v1791_v37, 4 }
 0x1f7   : > { %v1811_v60 = vrot.slane %v1789_v42, 4  ;;  %v8704_v57 = vcombine.low %v1530_v36, %v1532_v1  ;;  %v8705_v19 = vcombine.high %v1530_v36, %v1532_v1  ;;  %2004 = vrot.lane.b32.xlu1 %v1967_v29, %s12904_s14 }
 0x1f8   : > { %2002 = vrot.lane.b32.xlu0 %v1966_v58, %s12904_s14 }
 0x1f9   : > { %3855 = vmatprep.subr.bf16.mxu0 %v8705_v19  ;;  %v1481_v43 = vpop.permute.xlu1 %1480  ;;  %v1826_v24 = vsel %vm712_vm10, %v1810_v2, %v1811_v60  ;;  %v10780_v19 = vld [vmem:[#allocation3 + $0x54] sm:$0xff]  ;;  %v2437_v2 = vld [vmem:[#allocation3 + $0x5c] sm:$0xf] }
 0x1fa   : > { %v1793_v13 = vpop.permute.xlu0 %1792  ;;  %3856 = vmatpush1.bf16.msra.mxu0 %v8704_v57  ;;  %v1827_v10 = vsel %vm714_vm12, %v1787_v8, %v1826_v24  ;;  %v1508_v53 = vrot.slane %v1481_v43, 4 }
 0x1fb   : > { %v1813_v55 = vrot.slane %v1793_v13, 4  ;;  %2008 = vrot.lane.b32.xlu1 %v1969_v14, %s12904_s14 }
 0x1fc   : > { %2006 = vrot.lane.b32.xlu0 %v1968_v40, %s12904_s14 }
 0x1fd   : > { %v1828_v16 = vsel %vm712_vm10, %v1812_v17, %v1813_v55  ;;  %v1485_v21 = vpop.permute.xlu1 %1484 }
 0x1fe   : > { %v1483_v20 = vpop.permute.xlu0 %1482  ;;  %v1829_v56 = vsel %vm714_vm12, %v1791_v37, %v1828_v16  ;;  %v1510_v23 = vrot.slane %v1485_v21, 4 }
 0x1ff   : > { %v1509_v3 = vrot.slane %v1483_v20, 4  ;;  %v8578_v39 = vcombine.low %v1827_v10, %v1829_v56  ;;  %v8579_v22 = vcombine.high %v1827_v10, %v1829_v56  ;;  %1996 = vrot.lane.b32.xlu1 %v1963_v15, %s12904_s14  ;;  %v2431_v15 = vld [vmem:[#allocation3 + $0x2c] sm:$0xf]  ;;  %v9111_v20 = vld [vmem:[%s12856_s1 + $0x10] ss:$20 sps:$4 sm:$0xff]  }
 0x200   : > { %1994 = vrot.lane.b32.xlu0 %v1962_v44, %s12904_s14  ;;  %v10788_v44 = vld [vmem:[#allocation3 + $0x24] sm:$0xff] }
 0x201   : > { %3928 = vmatprep.subr.bf16.mxu1 %v8579_v22  ;;  %v1779_v45 = vpop.permute.xlu1 %1778  ;;  %v1525_v31 = vsel %vm712_vm10, %v1508_v53, %v1509_v3  ;;  %v10799_v22 = vld [vmem:[#allocation3 + $0x34] sm:$0xff]  ;;  %v2433_v53 = vld [vmem:[#allocation3 + $0x3c] sm:$0xf] }
 0x202   : > { %v1487_v11 = vpop.permute.xlu0 %1486  ;;  %3929 = vmatpush1.bf16.msra.mxu1 %v8578_v39  ;;  %v1526_v9 = vsel %vm1521_vm2, %v1481_v43, %v1525_v31  ;;  %v1806_v38 = vrot.slane %v1779_v45, 4 }
 0x203   : > { %v1511_v35 = vrot.slane %v1487_v11, 4  ;;  %2000 = vrot.lane.b32.xlu1 %v1965_v6, %s12904_s14 }
 0x204   : > { %1998 = vrot.lane.b32.xlu0 %v1964_v30, %s12904_s14 }
 0x205   : > { %v1527_v25 = vsel %vm712_vm10, %v1510_v23, %v1511_v35  ;;  %v1783_v12 = vpop.permute.xlu1 %1782 }
 0x206   : > { %v1781_v47 = vpop.permute.xlu0 %1780  ;;  %v1528_v52 = vsel %vm1521_vm2, %v1485_v21, %v1527_v25  ;;  %v1808_v34 = vrot.slane %v1783_v12, 4 }
 0x207   : > { %v1807_v27 = vrot.slane %v1781_v47, 4  ;;  %v8700_v50 = vcombine.low %v1526_v9, %v1528_v52  ;;  %v8701_v26 = vcombine.high %v1526_v9, %v1528_v52  ;;  %2484 = vrot.lane.b32.xlu1 %v2439_v59, %s12902_s29  ;;  %v10807_v59 = vld [vmem:[#allocation3 + $0x4] sm:$0xff]  ;;  %v2427_v47 = vld [vmem:[#allocation3 + $0xc] sm:$0xf] }
 0x208   : > { %2482 = vrot.lane.b32.xlu0 %v10756_v54, %s12902_s29 }
 0x209   : > { %3857 = vmatprep.subr.bf16.mxu0 %v8701_v26  ;;  %v1475_v63 = vpop.permute.xlu1 %1474  ;;  %v1822_v62 = vsel %vm712_vm10, %v1806_v38, %v1807_v27 }
 0x20a   : > { %v1785_v46 = vpop.permute.xlu0 %1784  ;;  %3858 = vmatpush1.bf16.msra.mxu0 %v8700_v50  ;;  %v1505_v51 = vrot.slane %v1475_v63, 4  ;;  %v1823_v29 = vsel %vm714_vm12, %v1779_v45, %v1822_v62 }
 0x20b   : > { %v1809_v7 = vrot.slane %v1785_v46, 4  ;;  %2488 = vrot.lane.b32.xlu1 %v2441_v0, %s12902_s29  ;;  %v10818_v0 = vld [vmem:[#allocation3 + $0x14] sm:$0xff]  ;;  %v2429_v46 = vld [vmem:[#allocation3 + $0x1c] sm:$0xf] }
 0x20c   : > { %2486 = vrot.lane.b32.xlu0 %v10763_v33, %s12902_s29  ;;  %v1520_v61 = vsel %vm712_vm10, %v1504_v48, %v1505_v51 }
 0x20d   : > { %v1824_v8 = vsel %vm712_vm10, %v1808_v34, %v1809_v7  ;;  %v1479_v58 = vpop.permute.xlu1 %1478  ;;  %v1522_v13 = vsel %vm1521_vm2, %v10623_v28, %v1520_v61  ;;  %v2326_v61 = vld [vmem:[#allocation3 + $0x164] sm:$0xff] }
 0x20e   : > { %v1477_v18 = vpop.permute.xlu0 %1476  ;;  %v1825_v42 = vsel %vm714_vm12, %v1783_v12, %v1824_v8  ;;  %v1507_v36 = vrot.slane %v1479_v58, 4  ;;  %v9115_v12 = vld [vmem:[%s12856_s1 + $0x38] ss:$20 sps:$4 sm:$0xff]   ;;  %v9116_v58 = vld [vmem:[%s12856_s1 + $0x60] ss:$20 sps:$4 sm:$0xff]  }
 0x20f   : > { %v1506_v37 = vrot.slane %v1477_v18, 4  ;;  %v8574_v1 = vcombine.low %v1823_v29, %v1825_v42  ;;  %v8575_v60 = vcombine.high %v1823_v29, %v1825_v42  ;;  %2476 = vrot.lane.b32.xlu1 %v2435_v41, %s12902_s29 }
 0x210   : > { %2474 = vrot.lane.b32.xlu0 %v10771_v32, %s12902_s29 }
 0x211   : > { %v1523_v57 = vsel %vm712_vm10, %v1506_v37, %v1507_v36  ;;  %3930 = vmatprep.subr.bf16.mxu1 %v8575_v60  ;;  %v1773_v14 = vpop.permute.xlu1 %1772 }
 0x212   : > { %v1771_v40 = vpop.permute.xlu0 %1770  ;;  %3931 = vmatpush1.bf16.msra.mxu1 %v8574_v1  ;;  %v1524_v43 = vsel %vm1521_vm2, %v1477_v18, %v1523_v57  ;;  %v1803_v17 = vrot.slane %v1773_v14, 4  ;;  %v2327_v18 = vld [vmem:[#allocation3 + $0x16c] sm:$0xf]  ;;  %v2328_v57 = vld [vmem:[#allocation3 + $0x174] sm:$0xff] }
 0x213   : > { %v1802_v24 = vrot.slane %v1771_v40, 4  ;;  %v8696_v55 = vcombine.low %v1522_v13, %v1524_v43  ;;  %v8697_v16 = vcombine.high %v1522_v13, %v1524_v43  ;;  %2480 = vrot.lane.b32.xlu1 %v2437_v2, %s12902_s29  ;;  %v2329_v2 = vld [vmem:[#allocation3 + $0x17c] sm:$0xf] }
 0x214   : > { %2478 = vrot.lane.b32.xlu0 %v10780_v19, %s12902_s29 }
 0x215   : > { %3859 = vmatprep.subr.bf16.mxu0 %v8697_v16  ;;  %v1777_v21 = vpop.permute.xlu1 %1776  ;;  %v1818_v10 = vsel %vm712_vm10, %v1802_v24, %v1803_v17 }
 0x216   : > { %v1775_v28 = vpop.permute.xlu0 %1774  ;;  %3860 = vmatpush1.bf16.msra.mxu0 %v8696_v55  ;;  %v1805_v3 = vrot.slane %v1777_v21, 4  ;;  %v1819_v11 = vsel %vm714_vm12, %v1771_v40, %v1818_v10 }
 0x217   : > { %v1804_v56 = vrot.slane %v1775_v28, 4  ;;  %2468 = vrot.lane.b32.xlu1 %v2431_v15, %s12902_s29  ;;  %v2550_v15 = vld [vmem:[#allocation3 + $0xe4] sm:$0xff] }
 0x218   : > { %2466 = vrot.lane.b32.xlu0 %v10788_v44, %s12902_s29 }
 0x219   : > { %v1820_v39 = vsel %vm712_vm10, %v1804_v56, %v1805_v3  ;;  %8712 = vmatmul.mubr.msk.bf16.vlgmr.msra.gmra.mxu0 %vm3686_vm3, %v9111_v20  ;;  %v2261_v6 = vpop.permute.xlu1 %2260  ;;  %v2551_v20 = vld [vmem:[#allocation3 + $0xec] sm:$0xf] }
 0x21a   : > { %v2259_v30 = vpop.permute.xlu0 %2258  ;;  %v1821_v45 = vsel %vm714_vm12, %v1775_v28, %v1820_v39  ;;  %3887 = vmatprep.mubr.bf16.mxu0 %v12969_v49  ;;  %v2279_v23 = vrot.slane %v2261_v6, 4  ;;  %v9117_v28 = vld [vmem:[%s12856_s1 + $0x88] ss:$20 sps:$4 sm:$0xff]  }
 0x21b   : > { %v2278_v31 = vrot.slane %v2259_v30, 4  ;;  %v8570_v35 = vcombine.low %v1819_v11, %v1821_v45  ;;  %v8571_v25 = vcombine.high %v1819_v11, %v1821_v45  ;;  %2472 = vrot.lane.b32.xlu1 %v2433_v53, %s12902_s29  ;;  %v2553_v6 = vld [vmem:[#allocation3 + $0xfc] sm:$0xf] }
 0x21c   : > { %2470 = vrot.lane.b32.xlu0 %v10799_v22, %s12902_s29 }
 0x21d   : > { %3932 = vmatprep.subr.bf16.mxu1 %v8571_v25  ;;  %v2265_v52 = vpop.permute.xlu1 %2264  ;;  %v2294_v27 = vsel %vm712_vm10, %v2278_v31, %v2279_v23 }
 0x21e   : > { %v2263_v9 = vpop.permute.xlu0 %2262  ;;  %3933 = vmatpush1.bf16.msra.mxu1 %v8570_v35  ;;  %v2281_v26 = vrot.slane %v2265_v52, 4  ;;  %v2295_v34 = vsel %vm1182_vm15, %v2259_v30, %v2294_v27  ;;  %v2552_v30 = vld [vmem:[#allocation3 + $0xf4] sm:$0xff]  ;;  %v9242_v35 = vld [vmem:[%s12856_s1 + $0xc] ss:$20 sps:$4 sm:$0xff]   ;;  %v2322_v52 = vld [vmem:[#allocation3 + $0x144] sm:$0xff] }
 0x21f   : > { %v2280_v50 = vrot.slane %v2263_v9, 4  ;;  %2460 = vrot.lane.b32.xlu1 %v2427_v47, %s12902_s29  ;;  %v2323_v27 = vld [vmem:[#allocation3 + $0x14c] sm:$0xf] }
 0x220   : > { %2458 = vrot.lane.b32.xlu0 %v10807_v59, %s12902_s29 }
 0x221   : > { %v2296_v38 = vsel %vm712_vm10, %v2280_v50, %v2281_v26  ;;  %8713 = vmatmul.mubr.msk.bf16.gmra.mxu0 %vm3686_vm3, %v9115_v12  ;;  %v2133_v62 = vpop.permute.xlu1 %2132 }
 0x222   : > { %v2131_v63 = vpop.permute.xlu0 %2130  ;;  %v2297_v7 = vsel %vm1182_vm15, %v2263_v9, %v2296_v38  ;;  %3897 = vmatprep.mubr.bf16.mxu0 %v12969_v49  ;;  %v2151_v48 = vrot.slane %v2133_v62, 4 }
 0x223   : > { %v2150_v51 = vrot.slane %v2131_v63, 4  ;;  %v8662_v8 = vcombine.low %v2295_v34, %v2297_v7  ;;  %v8663_v41 = vcombine.high %v2295_v34, %v2297_v7  ;;  %2464 = vrot.lane.b32.xlu1 %v2429_v46, %s12902_s29  ;;  %v2324_v34 = vld [vmem:[#allocation3 + $0x154] sm:$0xff]  ;;  %v2325_v7 = vld [vmem:[#allocation3 + $0x15c] sm:$0xf] }
 0x224   : > { %2462 = vrot.lane.b32.xlu0 %v10818_v0, %s12902_s29 }
 0x225   : > { %3991 = vmatprep.subr.bf16.mxu0 %v8663_v41  ;;  %v2137_v42 = vpop.permute.xlu1 %2136  ;;  %v2166_v37 = vsel %vm712_vm10, %v2150_v51, %v2151_v48 }
 0x226   : > { %v2135_v29 = vpop.permute.xlu0 %2134  ;;  %3992 = vmatpush1.bf16.msra.mxu0 %v8662_v8  ;;  %v2153_v1 = vrot.slane %v2137_v42, 4  ;;  %v2167_v13 = vsel %vm1053_vm13, %v2131_v63, %v2166_v37  ;;  %v2546_v42 = vld [vmem:[#allocation3 + $0xc4] sm:$0xff]  ;;  %v2547_v37 = vld [vmem:[#allocation3 + $0xcc] sm:$0xf] }
 0x227   : > { %v2152_v36 = vrot.slane %v2135_v29, 4  ;;  %2372 = vrot.lane.b32.xlu1 %v2327_v18, %s12899_s23 }
 0x228   : > { %2370 = vrot.lane.b32.xlu0 %v2326_v61, %s12899_s23 }
 0x229   : > { %v2168_v60 = vsel %vm712_vm10, %v2152_v36, %v2153_v1  ;;  %8714 = vmatmul.mubr.msk.bf16.gmra.mxu0 %vm3686_vm3, %v9116_v58  ;;  %v2253_v14 = vpop.permute.xlu1 %2252 }
 0x22a   : > { %v2251_v40 = vpop.permute.xlu0 %2250  ;;  %v2169_v43 = vsel %vm1053_vm13, %v2135_v29, %v2168_v60  ;;  %3907 = vmatprep.mubr.bf16.mxu0 %v12969_v49  ;;  %v2275_v17 = vrot.slane %v2253_v14, 4  ;;  %v2548_v14 = vld [vmem:[#allocation3 + $0xd4] sm:$0xff] }
 0x22b   : > { %v2274_v24 = vrot.slane %v2251_v40, 4  ;;  %v8630_v55 = vcombine.low %v2167_v13, %v2169_v43  ;;  %v8631_v16 = vcombine.high %v2167_v13, %v2169_v43  ;;  %2376 = vrot.lane.b32.xlu1 %v2329_v2, %s12899_s23  ;;  %v2549_v13 = vld [vmem:[#allocation3 + $0xdc] sm:$0xf] }
 0x22c   : > { %2374 = vrot.lane.b32.xlu0 %v2328_v57, %s12899_s23 }
 0x22d   : > { %3934 = vmatprep.subr.bf16.mxu1 %v8631_v16  ;;  %v2257_v10 = vpop.permute.xlu1 %2256  ;;  %v2290_v56 = vsel %vm712_vm10, %v2274_v24, %v2275_v17 }
 0x22e   : > { %v2255_v21 = vpop.permute.xlu0 %2254  ;;  %3935 = vmatpush2.bf16.msra.mxu1 %v8630_v55  ;;  %v2277_v39 = vrot.slane %v2257_v10, 4  ;;  %v2291_v31 = vsel %vm1182_vm15, %v2251_v40, %v2290_v56  ;;  %v2319_v10 = vld [vmem:[#allocation3 + $0x12c] sm:$0xf] }
 0x22f   : > { %v2276_v3 = vrot.slane %v2255_v21, 4  ;;  %2596 = vrot.lane.b32.xlu1 %v2551_v20, %s12897_s24 }
 0x230   : > { %2594 = vrot.lane.b32.xlu0 %v2550_v15, %s12897_s24 }
 0x231   : > { %v2292_v53 = vsel %vm712_vm10, %v2276_v3, %v2277_v39  ;;  %8715 = vmatmul.mubr.msk.bf16.gmra.mxu0 %vm3686_vm3, %v9117_v28  ;;  %v2125_v45 = vpop.permute.xlu1 %2124 }
 0x232   : > { %v2123_v11 = vpop.permute.xlu0 %2122  ;;  %v2293_v23 = vsel %vm1182_vm15, %v2255_v21, %v2292_v53  ;;  %4023 = vmatprep.mubr.bf16.mxu0 %v9242_v35  ;;  %v2147_v47 = vrot.slane %v2125_v45, 4  ;;  %v2318_v21 = vld [vmem:[#allocation3 + $0x124] sm:$0xff]  ;;  %v2321_v45 = vld [vmem:[#allocation3 + $0x13c] sm:$0xf] }
 0x233   : > { %v2146_v25 = vrot.slane %v2123_v11, 4  ;;  %v8658_v12 = vcombine.low %v2291_v31, %v2293_v23  ;;  %v8659_v9 = vcombine.high %v2291_v31, %v2293_v23  ;;  %2600 = vrot.lane.b32.xlu1 %v2553_v6, %s12897_s24 }
 0x234   : > { %2598 = vrot.lane.b32.xlu0 %v2552_v30, %s12897_s24 }
 0x235   : > { %3993 = vmatprep.subr.bf16.mxu0 %v8659_v9  ;;  %v2129_v26 = vpop.permute.xlu1 %2128  ;;  %v2162_v38 = vsel %vm712_vm10, %v2146_v25, %v2147_v47 }
 0x236   : > { %v2127_v50 = vpop.permute.xlu0 %2126  ;;  %3994 = vmatpush1.bf16.msra.mxu0 %v8658_v12  ;;  %v2149_v63 = vrot.slane %v2129_v26, 4  ;;  %v2163_v8 = vsel %vm1053_vm13, %v2123_v11, %v2162_v38  ;;  %v2320_v11 = vld [vmem:[#allocation3 + $0x134] sm:$0xff] }
 0x237   : > { %v2148_v46 = vrot.slane %v2127_v50, 4  ;;  %2364 = vrot.lane.b32.xlu1 %v2323_v27, %s12899_s23  ;;  %v2542_v27 = vld [vmem:[#allocation3 + $0xa4] sm:$0xff] }
 0x238   : > { %2362 = vrot.lane.b32.xlu0 %v2322_v52, %s12899_s23 }
 0x239   : > { %v2164_v62 = vsel %vm712_vm10, %v2148_v46, %v2149_v63  ;;  %v2245_v48 = vpop.permute.xlu1 %2244 }
 0x23a   : > { %v2243_v51 = vpop.permute.xlu0 %2242  ;;  %v2165_v41 = vsel %vm1053_vm13, %v2127_v50, %v2164_v62  ;;  %v2271_v18 = vrot.slane %v2245_v48, 4  ;;  %v2543_v50 = vld [vmem:[#allocation3 + $0xac] sm:$0xf] }
 0x23b   : > { %v2270_v61 = vrot.slane %v2243_v51, 4  ;;  %v8626_v58 = vcombine.low %v2163_v8, %v2165_v41  ;;  %v8627_v29 = vcombine.high %v2163_v8, %v2165_v41  ;;  %2368 = vrot.lane.b32.xlu1 %v2325_v7, %s12899_s23  ;;  %v2544_v7 = vld [vmem:[#allocation3 + $0xb4] sm:$0xff] }
 0x23c   : > { %2366 = vrot.lane.b32.xlu0 %v2324_v34, %s12899_s23 }
 0x23d   : > { %3936 = vmatprep.subr.bf16.mxu1 %v8627_v29  ;;  %v2249_v1 = vpop.permute.xlu1 %2248  ;;  %v2286_v60 = vsel %vm712_vm10, %v2270_v61, %v2271_v18  ;;  %v8647_v18 = vcombine.high %v10756_v54, %v10763_v33 }
 0x23e   : > { %v2247_v36 = vpop.permute.xlu0 %2246  ;;  %3937 = vmatpush2.bf16.msra.mxu1 %v8626_v58  ;;  %v2273_v2 = vrot.slane %v2249_v1, 4  ;;  %v2287_v17 = vsel %vm1182_vm15, %v2243_v51, %v2286_v60  ;;  %v2545_v51 = vld [vmem:[#allocation3 + $0xbc] sm:$0xf]  ;;  %v2315_v1 = vld [vmem:[#allocation3 + $0x10c] sm:$0xf] }
 0x23f   : > { %v2272_v57 = vrot.slane %v2247_v36, 4  ;;  %2588 = vrot.lane.b32.xlu1 %v2547_v37, %s12897_s24 }
 0x240   : > { %2586 = vrot.lane.b32.xlu0 %v2546_v42, %s12897_s24 }
 0x241   : > { %v2288_v40 = vsel %vm712_vm10, %v2272_v57, %v2273_v2  ;;  %v2117_v24 = vpop.permute.xlu1 %2116  ;;  %v8646_v2 = vcombine.low %v10756_v54, %v10763_v33 }
 0x242   : > { %v2115_v43 = vpop.permute.xlu0 %2114  ;;  %v2289_v55 = vsel %vm1182_vm15, %v2247_v36, %v2288_v40  ;;  %v2143_v15 = vrot.slane %v2117_v24, 4  ;;  %v2314_v36 = vld [vmem:[#allocation3 + $0x104] sm:$0xff] }
 0x243   : > { %v2142_v16 = vrot.slane %v2115_v43, 4  ;;  %v8654_v20 = vcombine.low %v2287_v17, %v2289_v55  ;;  %v8655_v28 = vcombine.high %v2287_v17, %v2289_v55  ;;  %2592 = vrot.lane.b32.xlu1 %v2549_v13, %s12897_s24  ;;  %v2316_v17 = vld [vmem:[#allocation3 + $0x114] sm:$0xff]  ;;  %v2317_v55 = vld [vmem:[#allocation3 + $0x11c] sm:$0xf] }
 0x244   : > { %2590 = vrot.lane.b32.xlu0 %v2548_v14, %s12897_s24 }
 0x245   : > { %3995 = vmatprep.subr.bf16.mxu0 %v8655_v28  ;;  %v2121_v3 = vpop.permute.xlu1 %2120  ;;  %v2158_v39 = vsel %vm712_vm10, %v2142_v16, %v2143_v15  ;;  %v8639_v28 = vcombine.high %v10788_v44, %v10799_v22 }
 0x246   : > { %v2119_v56 = vpop.permute.xlu0 %2118  ;;  %3996 = vmatpush1.bf16.msra.mxu0 %v8654_v20  ;;  %v2145_v30 = vrot.slane %v2121_v3, 4  ;;  %v2159_v35 = vsel %vm1053_vm13, %v2115_v43, %v2158_v39  ;;  %v8643_v43 = vcombine.high %v10771_v32, %v10780_v19  ;;  %v8642_v20 = vcombine.low %v10771_v32, %v10780_v19  ;;  %v2538_v39 = vld [vmem:[#allocation3 + $0x84] sm:$0xff] }
 0x247   : > { %v2144_v53 = vrot.slane %v2119_v56, 4  ;;  %2356 = vrot.lane.b32.xlu1 %v2319_v10, %s12899_s23  ;;  %v8638_v32 = vcombine.low %v10788_v44, %v10799_v22 }
 0x248   : > { %2354 = vrot.lane.b32.xlu0 %v2318_v21, %s12899_s23 }
 0x249   : > { %v2160_v6 = vsel %vm712_vm10, %v2144_v53, %v2145_v30  ;;  %v2237_v23 = vpop.permute.xlu1 %2236  ;;  %v2539_v53 = vld [vmem:[#allocation3 + $0x8c] sm:$0xf] }
 0x24a   : > { %v2235_v31 = vpop.permute.xlu0 %2234  ;;  %v2161_v25 = vsel %vm1053_vm13, %v2119_v56, %v2160_v6  ;;  %v2267_v12 = vrot.slane %v2237_v23, 4 }
 0x24b   : > { %v2266_v47 = vrot.slane %v2235_v31, 4  ;;  %v8622_v9 = vcombine.low %v2159_v35, %v2161_v25  ;;  %v8623_v52 = vcombine.high %v2159_v35, %v2161_v25  ;;  %2360 = vrot.lane.b32.xlu1 %v2321_v45, %s12899_s23  ;;  %v2540_v35 = vld [vmem:[#allocation3 + $0x94] sm:$0xff]  ;;  %v2541_v25 = vld [vmem:[#allocation3 + $0x9c] sm:$0xf] }
 0x24c   : > { %2358 = vrot.lane.b32.xlu0 %v2320_v11, %s12899_s23 }
 0x24d   : > { %3938 = vmatprep.subr.bf16.mxu1 %v8623_v52  ;;  %v2241_v38 = vpop.permute.xlu1 %2240  ;;  %v2282_v46 = vsel %vm712_vm10, %v2266_v47, %v2267_v12 }
 0x24e   : > { %v2239_v26 = vpop.permute.xlu0 %2238  ;;  %3939 = vmatpush2.bf16.msra.mxu1 %v8622_v9  ;;  %v2269_v62 = vrot.slane %v2241_v38, 4  ;;  %v2283_v41 = vsel %vm1182_vm15, %v2235_v31, %v2282_v46  ;;  %v8635_v31 = vcombine.high %v10807_v59, %v10818_v0  ;;  %v8634_v9 = vcombine.low %v10807_v59, %v10818_v0  ;;  %v2824_v38 = vld [vmem:[%s12857_s2 + $0x30] sm:$0xff]  ;;  %v2825_v46 = vld [vmem:[%s12857_s2 + $0x38] sm:$0xff] }
 0x24f   : > { %v2268_v63 = vrot.slane %v2239_v26, 4  ;;  %2580 = vrot.lane.b32.xlu1 %v2543_v50, %s12897_s24 }
 0x250   : > { %2578 = vrot.lane.b32.xlu0 %v2542_v27, %s12897_s24 }
 0x251   : > { %v2284_v34 = vsel %vm712_vm10, %v2268_v63, %v2269_v62  ;;  %v2109_v8 = vpop.permute.xlu1 %2108 }
 0x252   : > { %v2107_v48 = vpop.permute.xlu0 %2106  ;;  %v2285_v61 = vsel %vm1182_vm15, %v2239_v26, %v2284_v34  ;;  %v2139_v29 = vrot.slane %v2109_v8, 4 }
 0x253   : > { %v2138_v58 = vrot.slane %v2107_v48, 4  ;;  %v8650_v42 = vcombine.low %v2283_v41, %v2285_v61  ;;  %v8651_v37 = vcombine.high %v2283_v41, %v2285_v61  ;;  %2584 = vrot.lane.b32.xlu1 %v2545_v51, %s12897_s24  ;;  %v2823_v51 = vld [vmem:[%s12857_s2 + $0x28] sm:$0xff] }
 0x254   : > { %2582 = vrot.lane.b32.xlu0 %v2544_v7, %s12897_s24 }
 0x255   : > { %3997 = vmatprep.subr.bf16.mxu0 %v8651_v37  ;;  %v2113_v57 = vpop.permute.xlu1 %2112  ;;  %v2154_v40 = vsel %vm712_vm10, %v2138_v58, %v2139_v29 }
 0x256   : > { %v2111_v60 = vpop.permute.xlu0 %2110  ;;  %3998 = vmatpush1.bf16.msra.mxu0 %v8650_v42  ;;  %v2141_v13 = vrot.slane %v2113_v57, 4  ;;  %v2155_v54 = vsel %vm1053_vm13, %v2107_v48, %v2154_v40  ;;  %v2822_v48 = vld [vmem:[%s12857_s2 + $0x20] sm:$0xff] }
 0x257   : > { %v2140_v14 = vrot.slane %v2111_v60, 4  ;;  %3999 = vmatprep.subr.bf16.mxu0 %v8647_v18  ;;  %2348 = vrot.lane.b32.xlu1 %v2315_v1, %s12899_s23  ;;  %v2820_v1 = vld [vmem:[%s12857_s2 + $0x10] sm:$0xff] }
 0x258   : > { %2346 = vrot.lane.b32.xlu0 %v2314_v36, %s12899_s23  ;;  %v2821_v36 = vld [vmem:[%s12857_s2 + $0x18] sm:$0xff] }
 0x259   : > { %v2156_v24 = vsel %vm712_vm10, %v2140_v14, %v2141_v13  ;;  %v2021_v15 = vpop.permute.xlu1 %2020 }
 0x25a   : > { %v2019_v16 = vpop.permute.xlu0 %2018  ;;  %v2157_v33 = vsel %vm1053_vm13, %v2111_v60, %v2156_v24  ;;  %4000 = vmatpush1.bf16.msra.mxu0 %v8646_v2  ;;  %v2039_v10 = vrot.slane %v2021_v15, 4  ;;  %v2818_v24 = vld [vmem:[%s12857_s2] sm:$0xff] }
 0x25b   : > { %v2038_v21 = vrot.slane %v2019_v16, 4  ;;  %v8618_v56 = vcombine.low %v2155_v54, %v2157_v33  ;;  %v8619_v3 = vcombine.high %v2155_v54, %v2157_v33  ;;  %4001 = vmatprep.subr.bf16.mxu0 %v8643_v43  ;;  %2352 = vrot.lane.b32.xlu1 %v2317_v55, %s12899_s23  ;;  %v2819_v43 = vld [vmem:[%s12857_s2 + $0x8] sm:$0xff] }
 0x25c   : > { %2350 = vrot.lane.b32.xlu0 %v2316_v17, %s12899_s23  ;;  %s12975_s23 = smov 111  }
 0x25d   : > { %3940 = vmatprep.subr.bf16.mxu1 %v8619_v3  ;;  %v2025_v6 = vpop.permute.xlu1 %2024  ;;  %v2054_v19 = vsel %vm712_vm10, %v2038_v21, %v2039_v10 }
 0x25e   : > { %v2023_v30 = vpop.permute.xlu0 %2022  ;;  %3941 = vmatpush2.bf16.msra.mxu1 %v8618_v56  ;;  %4002 = vmatpush1.bf16.msra.mxu0 %v8642_v20  ;;  %v2041_v45 = vrot.slane %v2025_v6, 4  ;;  %v2055_v44 = vsel %vm940_vm14, %v2019_v16, %v2054_v19 }
 0x25f   : > { %v2040_v11 = vrot.slane %v2023_v30, 4  ;;  %4003 = vmatprep.subr.bf16.mxu0 %v8639_v28  ;;  %2572 = vrot.lane.b32.xlu1 %v2539_v53, %s12897_s24 }
 0x260   : > { %2570 = vrot.lane.b32.xlu0 %v2538_v39, %s12897_s24 }
 0x261   : > { %v2056_v23 = vsel %vm712_vm10, %v2040_v11, %v2041_v45  ;;  %v2013_v12 = vpop.permute.xlu1 %2012 }
 0x262   : > { %v2011_v47 = vpop.permute.xlu0 %2010  ;;  %v2057_v22 = vsel %vm940_vm14, %v2023_v30, %v2056_v23  ;;  %4004 = vmatpush1.bf16.msra.mxu0 %v8638_v32  ;;  %v2035_v27 = vrot.slane %v2013_v12, 4 }
 0x263   : > { %v2034_v52 = vrot.slane %v2011_v47, 4  ;;  %v8614_v50 = vcombine.low %v2055_v44, %v2057_v22  ;;  %v8615_v26 = vcombine.high %v2055_v44, %v2057_v22  ;;  %4005 = vmatprep.subr.bf16.mxu0 %v8635_v31  ;;  %2576 = vrot.lane.b32.xlu1 %v2541_v25, %s12897_s24 }
 0x264   : > { %2574 = vrot.lane.b32.xlu0 %v2540_v35, %s12897_s24  ;;  %s12974_s24 = smov 113  }
 0x265   : > { %3942 = vmatprep.subr.bf16.mxu1 %v8615_v26  ;;  %v2017_v59 = vpop.permute.xlu1 %2016  ;;  %v2050_v0 = vsel %vm712_vm10, %v2034_v52, %v2035_v27 }
 0x266   : > { %v2015_v63 = vpop.permute.xlu0 %2014  ;;  %3943 = vmatpush2.bf16.msra.mxu1 %v8614_v50  ;;  %4006 = vmatpush1.bf16.msra.mxu0 %v8634_v9  ;;  %v2037_v34 = vrot.slane %v2017_v59, 4  ;;  %v2051_v61 = vsel %vm940_vm14, %v2011_v47, %v2050_v0  ;;  %v9243_v9 = vld [vmem:[%s12856_s1] ss:$20 sps:$4 sm:$0xff]  }
 0x267   : > { %v2036_v62 = vrot.slane %v2015_v63, 4  ;;  %2863 = vperm.xlu1 %9089, %v2825_v46  }
 0x268   : > { %2858 = vperm.xlu0 %9088, %v2824_v38   ;;  %v9244_v38 = vld [vmem:[%s12856_s1 + $0x2c] ss:$20 sps:$4 sm:$0xff]  }
 0x269   : > { %v2052_v7 = vsel %vm712_vm10, %v2036_v62, %v2037_v34  ;;  %v2005_v41 = vpop.permute.xlu1 %2004 }
 0x26a   : > { %v2003_v8 = vpop.permute.xlu0 %2002  ;;  %v2053_v18 = vsel %vm940_vm14, %v2015_v63, %v2052_v7  ;;  %v2031_v29 = vrot.slane %v2005_v41, 4  ;;  %v9245_v41 = vld [vmem:[%s12856_s1 + $0x28] ss:$20 sps:$4 sm:$0xff]  }
 0x26b   : > { %v2030_v58 = vrot.slane %v2003_v8, 4  ;;  %v8610_v42 = vcombine.low %v2051_v61, %v2053_v18  ;;  %v8611_v37 = vcombine.high %v2051_v61, %v2053_v18  ;;  %2848 = vperm.xlu1 %9089, %v2822_v48  }
 0x26c   : > { %2853 = vperm.xlu0 %9088, %v2823_v51  }
 0x26d   : > { %3944 = vmatprep.subr.bf16.mxu1 %v8611_v37  ;;  %v2009_v57 = vpop.permute.xlu1 %2008  ;;  %v2046_v2 = vsel %vm712_vm10, %v2030_v58, %v2031_v29 }
 0x26e   : > { %v2007_v60 = vpop.permute.xlu0 %2006  ;;  %3945 = vmatpush2.bf16.msra.mxu1 %v8610_v42  ;;  %v2033_v14 = vrot.slane %v2009_v57, 4  ;;  %v2047_v16 = vsel %vm940_vm14, %v2003_v8, %v2046_v2  ;;  %v9246_v42 = vld [vmem:[%s12856_s1 + $0x54] ss:$20 sps:$4 sm:$0xff]  }
 0x26f   : > { %v2032_v40 = vrot.slane %v2007_v60, 4  ;;  %2838 = vperm.xlu1 %9089, %v2820_v1  }
 0x270   : > { %2843 = vperm.xlu0 %9088, %v2821_v36  }
 0x271   : > { %v2048_v13 = vsel %vm712_vm10, %v2032_v40, %v2033_v14  ;;  %v1997_v55 = vpop.permute.xlu1 %1996 }
 0x272   : > { %v1995_v17 = vpop.permute.xlu0 %1994  ;;  %v2049_v15 = vsel %vm940_vm14, %v2007_v60, %v2048_v13  ;;  %v2027_v33 = vrot.slane %v1997_v55, 4 }
 0x273   : > { %v2026_v54 = vrot.slane %v1995_v17, 4  ;;  %v8606_v20 = vcombine.low %v2047_v16, %v2049_v15  ;;  %v8607_v28 = vcombine.high %v2047_v16, %v2049_v15  ;;  %2828 = vperm.xlu1 %9089, %v2818_v24   ;;  %v9247_v24 = vld [vmem:[%s12856_s1 + $0x50] ss:$20 sps:$4 sm:$0xff]  }
 0x274   : > { %2833 = vperm.xlu0 %9088, %v2819_v43  }
 0x275   : > { %3946 = vmatprep.subr.bf16.mxu1 %v8607_v28  ;;  %v2001_v10 = vpop.permute.xlu1 %2000  ;;  %v2042_v56 = vsel %vm712_vm10, %v2026_v54, %v2027_v33  ;;  %v9248_v54 = vld [vmem:[%s12856_s1 + $0x7c] ss:$20 sps:$4 sm:$0xff]  }
 0x276   : > { %v1999_v21 = vpop.permute.xlu0 %1998  ;;  %3947 = vmatpush2.bf16.msra.mxu1 %v8606_v20  ;;  %v2029_v39 = vrot.slane %v2001_v10, 4  ;;  %v2043_v32 = vsel %vm940_vm14, %v1995_v17, %v2042_v56 }
 0x277   : > { %v2028_v3 = vrot.slane %v1999_v21, 4 }
 0x279   : > { %v2044_v53 = vsel %vm712_vm10, %v2028_v3, %v2029_v39  ;;  %v2485_v6 = vpop.permute.xlu1 %2484 }
 0x27a   : > { %v2483_v30 = vpop.permute.xlu0 %2482  ;;  %v2045_v19 = vsel %vm940_vm14, %v1999_v21, %v2044_v53  ;;  %v2503_v45 = vrot.slane %v2485_v6, 4  ;;  %v9249_v6 = vld [vmem:[%s12856_s1 + $0x78] ss:$20 sps:$4 sm:$0xff]  }
 0x27b   : > { %v2502_v11 = vrot.slane %v2483_v30, 4  ;;  %v8602_v31 = vcombine.low %v2043_v32, %v2045_v19  ;;  %v8603_v23 = vcombine.high %v2043_v32, %v2045_v19  ;;  %v10989_v32 = vpop.f32.mrf.mxu0 }
 0x27d   : > { %3948 = vmatprep.subr.bf16.mxu1 %v8603_v23  ;;  %v2489_v25 = vpop.permute.xlu1 %2488  ;;  %v2518_v47 = vsel %vm712_vm10, %v2502_v11, %v2503_v45 }
 0x27e   : > { %v2487_v35 = vpop.permute.xlu0 %2486  ;;  %3949 = vmatpush2.bf16.msra.mxu1 %v8602_v31  ;;  %v2505_v44 = vrot.slane %v2489_v25, 4  ;;  %v2519_v50 = vsel %vm1408_vm0, %v2483_v30, %v2518_v47 }
 0x27f   : > { %v2504_v12 = vrot.slane %v2487_v35, 4 }
 0x281   : > { %v2520_v22 = vsel %vm712_vm10, %v2504_v12, %v2505_v44  ;;  %3951 = vmatmul.mubr.bf16.vlgmr.msra.gmra.mxu1 %v9243_v9  ;;  %v2477_v27 = vpop.permute.xlu1 %2476  ;;  %v10994_v12 = vpop.f32.mrf.mxu0 }
 0x282   : > { %v2475_v52 = vpop.permute.xlu0 %2474  ;;  %v2521_v26 = vsel %vm1408_vm0, %v2487_v35, %v2520_v22  ;;  %3960 = vmatprep.mubr.bf16.mxu1 %v9244_v38  ;;  %v2499_v63 = vrot.slane %v2477_v27, 4 }
 0x283   : > { %v2498_v46 = vrot.slane %v2475_v52, 4  ;;  %v8694_v59 = vcombine.low %v2519_v50, %v2521_v26  ;;  %v8695_v0 = vcombine.high %v2519_v50, %v2521_v26  ;;  %v10998_v26 = vpop.f32.mrf.mxu0 }
 0x285   : > { %4007 = vmatprep.subr.bf16.mxu0 %v8695_v0  ;;  %v2481_v34 = vpop.permute.xlu1 %2480  ;;  %v2514_v7 = vsel %vm712_vm10, %v2498_v46, %v2499_v63 }
 0x286   : > { %v2479_v62 = vpop.permute.xlu0 %2478  ;;  %4008 = vmatpush2.bf16.msra.mxu0 %v8694_v59  ;;  %v2501_v48 = vrot.slane %v2481_v34, 4  ;;  %v2515_v58 = vsel %vm1408_vm0, %v2475_v52, %v2514_v7 }
 0x287   : > { %v2500_v51 = vrot.slane %v2479_v62, 4 }
 0x289   : > { %v2516_v8 = vsel %vm712_vm10, %v2500_v51, %v2501_v48  ;;  %3961 = vmatmul.mubr.bf16.gmra.mxu1 %v9245_v41  ;;  %v2469_v18 = vpop.permute.xlu1 %2468  ;;  %v11002_v51 = vpop.f32.mrf.mxu0 }
 0x28a   : > { %v2467_v61 = vpop.permute.xlu0 %2466  ;;  %v2517_v29 = vsel %vm1408_vm0, %v2479_v62, %v2516_v8  ;;  %3970 = vmatprep.mubr.bf16.mxu1 %v9246_v42  ;;  %v2495_v36 = vrot.slane %v2469_v18, 4 }
 0x28b   : > { %v2494_v37 = vrot.slane %v2467_v61, 4  ;;  %v8690_v1 = vcombine.low %v2515_v58, %v2517_v29  ;;  %v8691_v60 = vcombine.high %v2515_v58, %v2517_v29  ;;  %v11006_v29 = vpop.f32.mrf.mxu0 }
 0x28d   : > { %4009 = vmatprep.subr.bf16.mxu0 %v8691_v60  ;;  %v2473_v2 = vpop.permute.xlu1 %2472  ;;  %v2510_v40 = vsel %vm712_vm10, %v2494_v37, %v2495_v36 }
 0x28e   : > { %v2471_v57 = vpop.permute.xlu0 %2470  ;;  %4010 = vmatpush2.bf16.msra.mxu0 %v8690_v1  ;;  %v2497_v13 = vrot.slane %v2473_v2, 4  ;;  %v2511_v16 = vsel %vm1408_vm0, %v2467_v61, %v2510_v40 }
 0x28f   : > { %v2496_v14 = vrot.slane %v2471_v57, 4 }
 0x291   : > { %v2512_v43 = vsel %vm712_vm10, %v2496_v14, %v2497_v13  ;;  %3971 = vmatmul.mubr.bf16.gmra.mxu1 %v9247_v24  ;;  %v2461_v55 = vpop.permute.xlu1 %2460  ;;  %v11010_v14 = vpop.f32.mrf.mxu1 }
 0x292   : > { %v2459_v17 = vpop.permute.xlu0 %2458  ;;  %v2513_v15 = vsel %vm1408_vm0, %v2471_v57, %v2512_v43  ;;  %3980 = vmatprep.mubr.bf16.mxu1 %v9248_v54  ;;  %v2491_v20 = vrot.slane %v2461_v55, 4  ;;  %v11012_v13 = vpop.f32.mrf.mxu0 }
 0x293   : > { %v2490_v33 = vrot.slane %v2459_v17, 4  ;;  %v8686_v28 = vcombine.low %v2511_v16, %v2513_v15  ;;  %v8687_v21 = vcombine.high %v2511_v16, %v2513_v15  ;;  %v11015_v15 = vpop.f32.mrf.mxu1 }
 0x295   : > { %4011 = vmatprep.subr.bf16.mxu0 %v8687_v21  ;;  %v2465_v56 = vpop.permute.xlu1 %2464  ;;  %v2506_v3 = vsel %vm712_vm10, %v2490_v33, %v2491_v20  ;;  %v11018_v33 = vpop.f32.mrf.mxu0 }
 0x296   : > { %v2463_v10 = vpop.permute.xlu0 %2462  ;;  %4012 = vmatpush2.bf16.msra.mxu0 %v8686_v28  ;;  %v2493_v53 = vrot.slane %v2465_v56, 4  ;;  %v2507_v45 = vsel %vm1408_vm0, %v2459_v17, %v2506_v3 }
 0x297   : > { %v2492_v39 = vrot.slane %v2463_v10, 4 }
 0x299   : > { %v2508_v30 = vsel %vm712_vm10, %v2492_v39, %v2493_v53  ;;  %3981 = vmatmul.mubr.bf16.gmra.mxu1 %v9249_v6  ;;  %v2373_v11 = vpop.permute.xlu1 %2372  ;;  %v11024_v6 = vpop.f32.mrf.mxu0 }
 0x29a   : > { %v2371_v19 = vpop.permute.xlu0 %2370  ;;  %v2509_v31 = vsel %vm1408_vm0, %v2463_v10, %v2508_v30  ;;  %4096 = vmatprep.mubr.bf16.mxu1 %v12969_v49  ;;  %v2391_v35 = vrot.slane %v2373_v11, 4  ;;  %v11022_v30 = vpop.f32.mrf.mxu1 }
 0x29b   : > { %v2390_v23 = vrot.slane %v2371_v19, 4  ;;  %v8682_v25 = vcombine.low %v2507_v45, %v2509_v31  ;;  %v8683_v47 = vcombine.high %v2507_v45, %v2509_v31 }
 0x29d   : > { %4013 = vmatprep.subr.bf16.mxu0 %v8683_v47  ;;  %v2377_v22 = vpop.permute.xlu1 %2376  ;;  %v2406_v9 = vsel %vm712_vm10, %v2390_v23, %v2391_v35  ;;  %v11027_v35 = vpop.f32.mrf.mxu1 }
 0x29e   : > { %v2375_v44 = vpop.permute.xlu0 %2374  ;;  %4014 = vmatpush2.bf16.msra.mxu0 %v8682_v25  ;;  %v2393_v27 = vrot.slane %v2377_v22, 4  ;;  %v2407_v63 = vsel %vm1295_vm1, %v2371_v19, %v2406_v9  ;;  %v11030_v47 = vpop.f32.mrf.mxu0 }
 0x29f   : > { %v2392_v52 = vrot.slane %v2375_v44, 4 }
 0x2a1   : > { %v2408_v50 = vsel %vm712_vm10, %v2392_v52, %v2393_v27  ;;  %v2597_v46 = vpop.permute.xlu1 %2596 }
 0x2a2   : > { %v2595_v38 = vpop.permute.xlu0 %2594  ;;  %v2409_v59 = vsel %vm1295_vm1, %v2375_v44, %v2408_v50  ;;  %v2615_v62 = vrot.slane %v2597_v46, 4 }
 0x2a3   : > { %v2614_v0 = vrot.slane %v2595_v38, 4  ;;  %v8678_v34 = vcombine.low %v2407_v63, %v2409_v59  ;;  %v8679_v7 = vcombine.high %v2407_v63, %v2409_v59  ;;  %v11034_v63 = vpop.f32.mrf.mxu1  ;;  %v11036_v59 = vpop.f32.mrf.mxu0 }
 0x2a5   : > { %4015 = vmatprep.subr.bf16.mxu0 %v8679_v7  ;;  %v2601_v8 = vpop.permute.xlu1 %2600  ;;  %v2630_v41 = vsel %vm712_vm10, %v2614_v0, %v2615_v62 }
 0x2a6   : > { %v2599_v48 = vpop.permute.xlu0 %2598  ;;  %4016 = vmatpush2.bf16.msra.mxu0 %v8678_v34  ;;  %v2617_v18 = vrot.slane %v2601_v8, 4  ;;  %v2631_v36 = vsel %vm1521_vm2, %v2595_v38, %v2630_v41  ;;  %v11039_v8 = vpop.f32.mrf.mxu1 }
 0x2a7   : > { %v2616_v61 = vrot.slane %v2599_v48, 4 }
 0x2a9   : > { %v2632_v58 = vsel %vm712_vm10, %v2616_v61, %v2617_v18  ;;  %v2365_v37 = vpop.permute.xlu1 %2364  ;;  %v11042_v61 = vpop.f32.mrf.mxu0 }
 0x2aa   : > { %v2363_v42 = vpop.permute.xlu0 %2362  ;;  %v2633_v1 = vsel %vm1521_vm2, %v2599_v48, %v2632_v58  ;;  %v2387_v57 = vrot.slane %v2365_v37, 4 }
 0x2ab   : > { %v2386_v60 = vrot.slane %v2363_v42, 4  ;;  %v8710_v2 = vcombine.low %v2631_v36, %v2633_v1  ;;  %v8711_v40 = vcombine.high %v2631_v36, %v2633_v1 }
 0x2ad   : > { %4072 = vmatprep.subr.bf16.mxu1 %v8711_v40  ;;  %v2369_v24 = vpop.permute.xlu1 %2368  ;;  %v2402_v17 = vsel %vm712_vm10, %v2386_v60, %v2387_v57  ;;  %v11048_v40 = vpop.f32.mrf.mxu0 }
 0x2ae   : > { %v2367_v43 = vpop.permute.xlu0 %2366  ;;  %4073 = vmatpush1.bf16.msra.mxu1 %v8710_v2  ;;  %v2389_v16 = vrot.slane %v2369_v24, 4  ;;  %v2403_v21 = vsel %vm1295_vm1, %v2363_v42, %v2402_v17  ;;  %v11046_v2 = vpop.f32.mrf.mxu1 }
 0x2af   : > { %v2388_v55 = vrot.slane %v2367_v43, 4 }
 0x2b1   : > { %v2404_v54 = vsel %vm712_vm10, %v2388_v55, %v2389_v16  ;;  %v2589_v28 = vpop.permute.xlu1 %2588 }
 0x2b2   : > { %v2587_v20 = vpop.permute.xlu0 %2586  ;;  %v2405_v10 = vsel %vm1295_vm1, %v2367_v43, %v2404_v54  ;;  %v2611_v3 = vrot.slane %v2589_v28, 4  ;;  %v11051_v54 = vpop.f32.mrf.mxu1 }
 0x2b3   : > { %v2610_v56 = vrot.slane %v2587_v20, 4  ;;  %v8674_v39 = vcombine.low %v2403_v21, %v2405_v10  ;;  %v8675_v53 = vcombine.high %v2403_v21, %v2405_v10  ;;  %v11054_v28 = vpop.f32.mrf.mxu0 }
 0x2b5   : > { %4017 = vmatprep.subr.bf16.mxu0 %v8675_v53  ;;  %v2593_v11 = vpop.permute.xlu1 %2592  ;;  %v2626_v45 = vsel %vm712_vm10, %v2610_v56, %v2611_v3 }
 0x2b6   : > { %v2591_v19 = vpop.permute.xlu0 %2590  ;;  %4018 = vmatpush2.bf16.msra.mxu0 %v8674_v39  ;;  %v2613_v23 = vrot.slane %v2593_v11, 4  ;;  %v2627_v9 = vsel %vm1521_vm2, %v2587_v20, %v2626_v45  ;;  %v11058_v45 = vpop.f32.mrf.mxu1 }
 0x2b7   : > { %v2612_v31 = vrot.slane %v2591_v19, 4 }
 0x2b9   : > { %v2628_v25 = vsel %vm712_vm10, %v2612_v31, %v2613_v23  ;;  %v2357_v22 = vpop.permute.xlu1 %2356  ;;  %v3765_v31 = vpop.f32.mrf.mxu0 }
 0x2ba   : > { %v2355_v44 = vpop.permute.xlu0 %2354  ;;  %v2629_v52 = vsel %vm1521_vm2, %v2591_v19, %v2628_v25  ;;  %v2383_v50 = vrot.slane %v2357_v22, 4 }
 0x2bb   : > { %v2382_v27 = vrot.slane %v2355_v44, 4  ;;  %v8706_v38 = vcombine.low %v2627_v9, %v2629_v52  ;;  %v8707_v46 = vcombine.high %v2627_v9, %v2629_v52  ;;  %v11061_v52 = vpop.f32.mrf.mxu1 }
 0x2bd   : > { %4074 = vmatprep.subr.bf16.mxu1 %v8707_v46  ;;  %v2361_v62 = vpop.permute.xlu1 %2360  ;;  %v2398_v34 = vsel %vm712_vm10, %v2382_v27, %v2383_v50  ;;  %v3767_v50 = vpop.f32.mrf.mxu0 }
 0x2be   : > { %v2359_v0 = vpop.permute.xlu0 %2358  ;;  %4075 = vmatpush1.bf16.msra.mxu1 %v8706_v38  ;;  %v2385_v48 = vrot.slane %v2361_v62, 4  ;;  %v2399_v42 = vsel %vm1295_vm1, %v2355_v44, %v2398_v34 }
 0x2bf   : > { %v2384_v7 = vrot.slane %v2359_v0, 4 }
 0x2c1   : > { %v2400_v41 = vsel %vm712_vm10, %v2384_v7, %v2385_v48  ;;  %v2581_v58 = vpop.permute.xlu1 %2580 }
 0x2c2   : > { %v2579_v18 = vpop.permute.xlu0 %2578  ;;  %v2401_v37 = vsel %vm1295_vm1, %v2359_v0, %v2400_v41  ;;  %v2607_v1 = vrot.slane %v2581_v58, 4  ;;  %v3769_v58 = vpop.f32.mrf.mxu0 }
 0x2c3   : > { %v2606_v36 = vrot.slane %v2579_v18, 4  ;;  %v8670_v60 = vcombine.low %v2399_v42, %v2401_v37  ;;  %v8671_v57 = vcombine.high %v2399_v42, %v2401_v37 }
 0x2c5   : > { %4019 = vmatprep.subr.bf16.mxu0 %v8671_v57  ;;  %v2585_v24 = vpop.permute.xlu1 %2584  ;;  %v2622_v17 = vsel %vm712_vm10, %v2606_v36, %v2607_v1 }
 0x2c6   : > { %v2583_v43 = vpop.permute.xlu0 %2582  ;;  %4020 = vmatpush2.bf16.msra.mxu0 %v8670_v60  ;;  %v2609_v16 = vrot.slane %v2585_v24, 4  ;;  %v2623_v56 = vsel %vm1521_vm2, %v2579_v18, %v2622_v17  ;;  %v11066_v18 = vpop.f32.mrf.mxu1  ;;  %v9250_v17 = vld [vmem:[%s12856_s1 + $0x8] ss:$20 sps:$4 sm:$0xff]  }
 0x2c7   : > { %v2608_v55 = vrot.slane %v2583_v43, 4 }
 0x2c8   : > { %v11069_v57 = vpop.f32.mrf.mxu1 }
 0x2c9   : > { %v2624_v20 = vsel %vm712_vm10, %v2608_v55, %v2609_v16  ;;  %v2349_v10 = vpop.permute.xlu1 %2348 }
 0x2ca   : > { %v2347_v21 = vpop.permute.xlu0 %2346  ;;  %v2625_v3 = vsel %vm1521_vm2, %v2583_v43, %v2624_v20  ;;  %v2379_v53 = vrot.slane %v2349_v10, 4  ;;  %v9251_v20 = vld [vmem:[%s12856_s1 + $0x34] ss:$20 sps:$4 sm:$0xff]  }
 0x2cb   : > { %v2378_v39 = vrot.slane %v2347_v21, 4  ;;  %v8702_v19 = vcombine.low %v2623_v56, %v2625_v3  ;;  %v8703_v11 = vcombine.high %v2623_v56, %v2625_v3  ;;  %v3836_v3 = vpop.f32.mrf.mxu1 }
 0x2cd   : > { %4076 = vmatprep.subr.bf16.mxu1 %v8703_v11  ;;  %v2353_v25 = vpop.permute.xlu1 %2352  ;;  %v2394_v44 = vsel %vm712_vm10, %v2378_v39, %v2379_v53 }
 0x2ce   : > { %v2351_v23 = vpop.permute.xlu0 %2350  ;;  %4077 = vmatpush1.bf16.msra.mxu1 %v8702_v19  ;;  %v2381_v9 = vrot.slane %v2353_v25, 4  ;;  %v2395_v0 = vsel %vm1295_vm1, %v2347_v21, %v2394_v44  ;;  %v3838_v19 = vpop.f32.mrf.mxu1  ;;  %v9253_v25 = vld [vmem:[%s12856_s1 + $0x10] ss:$20 sps:$4 sm:$0xff]  }
 0x2cf   : > { %v2380_v22 = vrot.slane %v2351_v23, 4  ;;  %v9254_v44 = vld [vmem:[%s12856_s1 + $0x5c] ss:$20 sps:$4 sm:$0xff]  }
 0x2d1   : > { %v2396_v27 = vsel %vm712_vm10, %v2380_v22, %v2381_v9  ;;  %v2573_v46 = vpop.permute.xlu1 %2572 }
 0x2d2   : > { %v2571_v38 = vpop.permute.xlu0 %2570  ;;  %v2397_v62 = vsel %vm1295_vm1, %v2351_v23, %v2396_v27  ;;  %v2603_v7 = vrot.slane %v2573_v46, 4  ;;  %v9252_v23 = vld [vmem:[%s12856_s1 + $0x30] ss:$20 sps:$4 sm:$0xff]   ;;  %v3840_v27 = vpop.f32.mrf.mxu1 }
 0x2d3   : > { %v2602_v34 = vrot.slane %v2571_v38, 4  ;;  %v8666_v48 = vcombine.low %v2395_v0, %v2397_v62  ;;  %v8667_v41 = vcombine.high %v2395_v0, %v2397_v62 }
 0x2d5   : > { %4021 = vmatprep.subr.bf16.mxu0 %v8667_v41  ;;  %v2577_v37 = vpop.permute.xlu1 %2576  ;;  %v2618_v36 = vsel %vm712_vm10, %v2602_v34, %v2603_v7  ;;  %v3842_v41 = vpop.f32.mrf.mxu1 }
 0x2d6   : > { %v2575_v42 = vpop.permute.xlu0 %2574  ;;  %4022 = vmatpush2.bf16.msra.mxu0 %v8666_v48  ;;  %v2605_v60 = vrot.slane %v2577_v37, 4  ;;  %v2619_v55 = vsel %vm1521_vm2, %v2571_v38, %v2618_v36 }
 0x2d7   : > { %v2604_v1 = vrot.slane %v2575_v42, 4 }
 0x2d9   : > { %v2620_v43 = vsel %vm712_vm10, %v2604_v1, %v2605_v60  ;;  %v11072_v24 = vpop.f32.mrf.mxu0  ;;  %4024 = vmatmul.mubr.bf16.vlgmr.msra.gmra.mxu0 %v9250_v17 }
 0x2da   : > { %v2621_v16 = vsel %vm1521_vm2, %v2575_v42, %v2620_v43  ;;  %4033 = vmatprep.mubr.bf16.mxu0 %v9251_v20 }
 0x2db   : > { %v11082_v21 = vpop.f32.mrf.mxu0  ;;  %v8698_v10 = vcombine.low %v2619_v55, %v2621_v16  ;;  %v8699_v56 = vcombine.high %v2619_v55, %v2621_v16 }
 0x2dd   : > { %v11084_v39 = vpop.f32.mrf.mxu0  ;;  %4078 = vmatprep.subr.bf16.mxu1 %v8699_v56 }
 0x2de   : > { %4079 = vmatpush1.bf16.msra.mxu1 %v8698_v10 }
 0x2df   : > { %v11086_v53 = vpop.f32.mrf.mxu0 }
 0x2e1   : > { %v11088_v11 = vpop.f32.mrf.mxu0  ;;  %4034 = vmatmul.mubr.bf16.gmra.mxu0 %v9252_v23  ;;  %8716 = vmatmul.mubr.msk.bf16.vlgmr.msra.gmra.mxu1 %vm3686_vm3, %v9253_v25 }
 0x2e2   : > { %4043 = vmatprep.mubr.bf16.mxu0 %v9254_v44  ;;  %4106 = vmatprep.mubr.bf16.mxu1 %v12969_v49  ;;  %v11103_v38 = vpop.permute.xlu1 %2863 }
 0x2e3   : > { %v11101_v22 = vpop.permute.xlu0 %2858  ;;  %v3891_v9 = vpop.f32.mrf.mxu0  ;;  %v3770_v62 = vadd.f32 %v3769_v58, %v11103_v38  ;;  %v3768_v36 = vadd.f32 %v3767_v50, %v11103_v38 }
 0x2e4   : > { %v3764_v0 = vadd.f32 %v11054_v28, %v11101_v22  ;;  %v3766_v48 = vadd.f32 %v3765_v31, %v11101_v22  ;;  %v9255_v28 = vld [vmem:[%s12856_s1 + $0x58] ss:$20 sps:$4 sm:$0xff]  }
 0x2e5   : > { %v3893_v46 = vpop.f32.mrf.mxu0  ;;  %v9256_v31 = vld [vmem:[%s12856_s1 + $0x38] ss:$20 sps:$4 sm:$0xff]   ;;  %v11135_v43 = vadd.f32 %v3842_v41, %v3770_v62  ;;  %v11150_v23 = vadd.f32 %v3840_v27, %v3768_v36 }
 0x2e6   : > { %v11111_v42 = vpop.permute.xlu1 %2848  ;;  %v11133_v58 = vadd.f32 %v3836_v3, %v3764_v0  ;;  %v11141_v20 = vadd.f32 %v3838_v19, %v3766_v48 }
 0x2e7   : > { %v11108_v34 = vpop.permute.xlu0 %2853  ;;  %v3895_v7 = vpop.f32.mrf.mxu0  ;;  %v3754_v1 = vadd.f32 %v11030_v47, %v11111_v42  ;;  %v9257_v47 = vld [vmem:[%s12856_s1 + $0x84] ss:$20 sps:$4 sm:$0xff]  }
 0x2e8   : > { %v3758_v37 = vadd.f32 %v11042_v61, %v11108_v34  ;;  %v3756_v61 = vadd.f32 %v11036_v59, %v11111_v42  ;;  %v3760_v50 = vadd.f32 %v11048_v40, %v11108_v34 }
 0x2e9   : > { %v3899_v60 = vpop.f32.mrf.mxu0  ;;  %4044 = vmatmul.mubr.bf16.gmra.mxu0 %v9255_v28  ;;  %8717 = vmatmul.mubr.msk.bf16.gmra.mxu1 %vm3686_vm3, %v9256_v31  ;;  %v3827_v17 = vadd.f32 %v11058_v45, %v3754_v1 }
 0x2ea   : > { %4053 = vmatprep.mubr.bf16.mxu0 %v9257_v47  ;;  %4116 = vmatprep.mubr.bf16.mxu1 %v12969_v49  ;;  %v3829_v59 = vadd.f32 %v11061_v52, %v3756_v61  ;;  %v11147_v56 = vpop.permute.xlu1 %2838  ;;  %v3831_v3 = vadd.f32 %v11066_v18, %v3758_v37  ;;  %v3833_v62 = vadd.f32 %v11069_v57, %v3760_v50 }
 0x2eb   : > { %v11138_v55 = vpop.permute.xlu0 %2843  ;;  %v3901_v16 = vpop.f32.mrf.mxu0  ;;  %v3900_v45 = vadd.f32 %v3899_v60, %v3827_v17  ;;  %v3744_v52 = vadd.f32 %v11006_v29, %v11147_v56  ;;  %v3746_v19 = vadd.f32 %v11012_v13, %v11147_v56 }
 0x2ec   : > { %v3748_v40 = vadd.f32 %v11018_v33, %v11138_v55  ;;  %v3750_v10 = vadd.f32 %v11024_v6, %v11138_v55  ;;  %v11152_v25 = vadd.f32 %v3901_v16, %v3829_v59 }
 0x2ed   : > { %v3903_v44 = vpop.f32.mrf.mxu0  ;;  %v4153_v18 = vmax.f32 %v3900_v45, 0.0  ;;  %v3817_v48 = vadd.f32 %v11034_v63, %v3744_v52  ;;  %v3819_v41 = vadd.f32 %v11039_v8, %v3746_v19  ;;  %v9258_v8 = vld [vmem:[%s12856_s1 + $0x80] ss:$20 sps:$4 sm:$0xff]  }
 0x2ee   : > { %v3821_v33 = vadd.f32 %v11046_v2, %v3748_v40  ;;  %v3823_v6 = vadd.f32 %v11051_v54, %v3750_v10  ;;  %v3904_v0 = vadd.f32 %v3903_v44, %v3831_v3  ;;  %v4154_v27 = vmax.f32 %v11152_v25, 0.0  ;;  %v11183_v47 = vpop.permute.xlu1 %2828 }
 0x2ef   : > { %v11164_v37 = vpop.permute.xlu0 %2833  ;;  %v3905_v29 = vpop.f32.mrf.mxu0  ;;  %v3890_v57 = vadd.f32 %v11088_v11, %v3817_v48  ;;  %v3892_v60 = vadd.f32 %v3891_v9, %v3819_v41  ;;  %v3734_v44 = vadd.f32 %v10989_v32, %v11183_v47 }
 0x2f0   : > { %v3894_v36 = vadd.f32 %v3893_v46, %v3821_v33  ;;  %v3896_v13 = vadd.f32 %v3895_v7, %v3823_v6  ;;  %v4157_v1 = vmax.f32 %v3904_v0, 0.0  ;;  %v3738_v2 = vadd.f32 %v10998_v26, %v11164_v37  ;;  %v9259_v26 = vld [vmem:[%s12856_s1 + $0x60] ss:$20 sps:$4 sm:$0xff]  }
 0x2f1   : > { %v11168_v54 = vpack.c.bf16 %v4154_v27, %v4153_v18  ;;  %v3740_v28 = vadd.f32 %v11002_v51, %v11164_v37  ;;  %v3909_v63 = vpop.f32.mrf.mxu0  ;;  %4054 = vmatmul.mubr.bf16.gmra.mxu0 %v9258_v8  ;;  %8718 = vmatmul.mubr.msk.bf16.gmra.mxu1 %vm3686_vm3, %v9259_v26  ;;  %v4145_v51 = vmax.f32 %v3890_v57, 0.0  ;;  %v4146_v11 = vmax.f32 %v3892_v60, 0.0 }
 0x2f2   : > { %v4149_v46 = vmax.f32 %v3894_v36, 0.0  ;;  %v4150_v7 = vmax.f32 %v3896_v13, 0.0  ;;  %v4177_v31 = vpack.c.bf16 %v4157_v1, %v4153_v18  ;;  %v3811_v61 = vadd.f32 %v11022_v30, %v3738_v2  ;;  %4126 = vmatprep.mubr.bf16.mxu1 %v12969_v49 }
 0x2f3   : > { %4229 = vst [vmem:[#allocation3 + $0x44] sm:$0xff] %v11168_v54  ;;  %v3813_v9 = vadd.f32 %v11027_v35, %v3740_v28  ;;  %v3906_v50 = vadd.f32 %v3905_v29, %v3833_v62  ;;  %v3911_v17 = vpop.f32.mrf.mxu0  ;;  %v11193_v25 = vpack.c.bf16 %v4146_v11, %v4145_v51  ;;  %v3736_v33 = vadd.f32 %v10994_v12, %v11183_v47 }
 0x2f4   : > { %v11186_v59 = vpack.c.bf16 %v4150_v7, %v4149_v46  ;;  %v4237_v30 = vsel %vm9759_vm8, %v4177_v31, 0  ;;  %v4293_v40 = vsel %vm9681_vm5, %v4177_v31, 0  ;;  %v3884_v10 = vadd.f32 %v11084_v39, %v3811_v61 }
 0x2f5   : > { %v4173_v3 = vpack.c.bf16 %v4149_v46, %v4145_v51  ;;  %v4174_v45 = vpack.c.bf16 %v4150_v7, %v4146_v11  ;;  %v3886_v35 = vadd.f32 %v11086_v53, %v3813_v9  ;;  %v4158_v19 = vmax.f32 %v3906_v50, 0.0  ;;  %4227 = vst [vmem:[#allocation3 + $0x24] sm:$0xff] %v11193_v25  ;;  %v3913_v18 = vpop.f32.mrf.mxu0 }
 0x2f6   : > { %4228 = vst [vmem:[#allocation3 + $0x34] sm:$0xff] %v11186_v59  ;;  %v4141_v52 = vmax.f32 %v3884_v10, 0.0  ;;  %v3807_v2 = vadd.f32 %v11010_v14, %v3734_v44  ;;  %v3809_v57 = vadd.f32 %v11015_v15, %v3736_v33  ;;  %v3910_v60 = vadd.f32 %v3909_v63, %v11133_v58 }
 0x2f7   : > { %v4235_v6 = vsel %vm9759_vm8, %v4173_v3, 0  ;;  %v4236_v39 = vsel %vm501_vm9, %v4174_v45, 0  ;;  %v4291_v0 = vsel %vm9681_vm5, %v4173_v3, 0  ;;  %v4292_v62 = vsel %vm574_vm6, %v4174_v45, 0 }
 0x2f8   : > { %v11210_v48 = vcombine.low %v4235_v6, %v4236_v39  ;;  %v11212_v32 = vcombine.high %v4235_v6, %v4236_v39  ;;  %v8738_v12 = vcombine.low %v4291_v0, %v4292_v62  ;;  %v8739_v41 = vcombine.high %v4291_v0, %v4292_v62 }
 0x2f9   : > { %v4142_v29 = vmax.f32 %v3886_v35, 0.0  ;;  %v4178_v36 = vpack.c.bf16 %v4158_v19, %v4154_v27  ;;  %v11214_v13 = vpack.c.bf16 %v4158_v19, %v4157_v1  ;;  %v3912_v28 = vadd.f32 %v3911_v17, %v11141_v20  ;;  %v9260_v27 = vld [vmem:[%s12856_s1 + $0x88] ss:$20 sps:$4 sm:$0xff]   ;;  %v3915_v20 = vpop.f32.mrf.mxu0 }
 0x2fa   : > { %4283 = vst [vmem:[#allocation3 + $0xa4] sm:$0xff] %v11210_v48  ;;  %4284 = vst [vmem:[#allocation3 + $0xb4] sm:$0xff] %v11212_v32  ;;  %v3914_v8 = vadd.f32 %v3913_v18, %v11150_v23  ;;  %8719 = vmatmul.mubr.msk.bf16.gmra.mxu1 %vm3686_vm3, %v9260_v27  ;;  %v3880_v58 = vadd.f32 %v11072_v24, %v3807_v2  ;;  %v3882_v31 = vadd.f32 %v11082_v21, %v3809_v57 }
 0x2fb   : > { %4339 = vst [vmem:[#allocation3 + $0x124] sm:$0xff] %v8738_v12  ;;  %4340 = vst [vmem:[#allocation3 + $0x134] sm:$0xff] %v8739_v41  ;;  %v11227_v14 = vpack.c.bf16 %v4142_v29, %v4141_v52  ;;  %v4238_v1 = vsel %vm501_vm9, %v4178_v36, 0  ;;  %v4294_v15 = vsel %vm574_vm6, %v4178_v36, 0  ;;  %v4161_v26 = vmax.f32 %v3910_v60, 0.0 }
 0x2fc   : > { %4230 = vst [vmem:[#allocation3 + $0x54] sm:$0xff] %v11214_v13  ;;  %v11235_v23 = vcombine.low %v4237_v30, %v4238_v1  ;;  %v11237_v63 = vcombine.high %v4237_v30, %v4238_v1  ;;  %v8740_v46 = vcombine.low %v4293_v40, %v4294_v15  ;;  %v8741_v7 = vcombine.high %v4293_v40, %v4294_v15 }
 0x2fd   : > { %4226 = vst [vmem:[#allocation3 + $0x14] sm:$0xff] %v11227_v14  ;;  %v4137_v61 = vmax.f32 %v3880_v58, 0.0  ;;  %v4162_v51 = vmax.f32 %v3912_v28, 0.0  ;;  %v4165_v24 = vmax.f32 %v3914_v8, 0.0  ;;  %v3916_v11 = vadd.f32 %v3915_v20, %v11135_v43 }
 0x2fe   : > { %4285 = vst [vmem:[#allocation3 + $0xc4] sm:$0xff] %v11235_v23  ;;  %4286 = vst [vmem:[#allocation3 + $0xd4] sm:$0xff] %v11237_v63  ;;  %v4138_v9 = vmax.f32 %v3882_v31, 0.0  ;;  %v4822_v31 = vld [vmem:[#allocation3 + $0xec] sm:$0xf] }
 0x2ff   : > { %4341 = vst [vmem:[#allocation3 + $0x144] sm:$0xff] %v8740_v46  ;;  %4342 = vst [vmem:[#allocation3 + $0x154] sm:$0xff] %v8741_v7  ;;  %v4169_v50 = vpack.c.bf16 %v4141_v52, %v4137_v61  ;;  %v11244_v17 = vpack.c.bf16 %v4162_v51, %v4161_v26  ;;  %v4181_v30 = vpack.c.bf16 %v4165_v24, %v4161_v26  ;;  %v4166_v40 = vmax.f32 %v3916_v11, 0.0  ;;  %v4465_v26 = vld [vmem:[#allocation3 + $0x40] sm:$0xff] }
 0x300   : > { %v4170_v10 = vpack.c.bf16 %v4142_v29, %v4138_v9  ;;  %v11246_v21 = vpack.c.bf16 %v4138_v9, %v4137_v61  ;;  %v4824_v61 = vld [vmem:[#allocation3 + $0xfc] sm:$0xf]  ;;  %v4818_v9 = vld [vmem:[#allocation3 + $0xcc] sm:$0xf] }
 0x301   : > { %v4233_v3 = vsel %vm9759_vm8, %v4169_v50, 0  ;;  %v4289_v45 = vsel %vm9681_vm5, %v4169_v50, 0  ;;  %4231 = vst [vmem:[#allocation3 + $0x64] sm:$0xff] %v11244_v17  ;;  %v4182_v35 = vpack.c.bf16 %v4166_v40, %v4162_v51  ;;  %v11253_v19 = vpack.c.bf16 %v4166_v40, %v4165_v24  ;;  %v4466_v24 = vld [vmem:[#allocation3 + $0x48] sm:$0xf]  ;;  %v4463_v40 = vld [vmem:[#allocation3 + $0x30] sm:$0xff] }
 0x302   : > { %v4234_v43 = vsel %vm501_vm9, %v4170_v10, 0  ;;  %v4290_v52 = vsel %vm574_vm6, %v4170_v10, 0  ;;  %4225 = vst [vmem:[#allocation3 + $0x4] sm:$0xff] %v11246_v21  ;;  %v4239_v0 = vsel %vm9759_vm8, %v4181_v30, 0  ;;  %v4295_v62 = vsel %vm9681_vm5, %v4181_v30, 0  ;;  %v11291_v1 = vld [vmem:[#allocation3 + $0x120] sm:$0xff] }
 0x303   : > { %v11260_v44 = vcombine.low %v4233_v3, %v4234_v43  ;;  %v11262_v33 = vcombine.high %v4233_v3, %v4234_v43  ;;  %v8736_v6 = vcombine.low %v4289_v45, %v4290_v52  ;;  %v8737_v39 = vcombine.high %v4289_v45, %v4290_v52  ;;  %4232 = vst [vmem:[#allocation3 + $0x74] sm:$0xff] %v11253_v19  ;;  %v4350_v27 = vld [vmem:[#allocation3 + $0x128] sm:$0xf]  ;;  %v11296_v58 = vld [vmem:[#allocation3 + $0x130] sm:$0xff]  ;;  %v4468_v11 = vld [vmem:[#allocation3 + $0x58] sm:$0xf] }
 0x304   : > { %v4240_v18 = vsel %vm501_vm9, %v4182_v35, 0  ;;  %v4296_v12 = vsel %vm574_vm6, %v4182_v35, 0  ;;  %v4467_v51 = vld [vmem:[#allocation3 + $0x50] sm:$0xff]  ;;  %v4820_v50 = vld [vmem:[#allocation3 + $0xdc] sm:$0xf]  ;;  %v4461_v30 = vld [vmem:[#allocation3 + $0x20] sm:$0xff] }
 0x305   : > { %4281 = vst [vmem:[#allocation3 + $0x84] sm:$0xff] %v11260_v44  ;;  %4282 = vst [vmem:[#allocation3 + $0x94] sm:$0xff] %v11262_v33  ;;  %v8734_v41 = vcombine.low %v4239_v0, %v4240_v18  ;;  %v8735_v29 = vcombine.high %v4239_v0, %v4240_v18  ;;  %v11275_v36 = vcombine.low %v4295_v62, %v4296_v12  ;;  %v4462_v10 = vld [vmem:[#allocation3 + $0x28] sm:$0xf]  ;;  %v4816_v3 = vld [vmem:[#allocation3 + $0xbc] sm:$0xf] }
 0x306   : > { %4337 = vst [vmem:[#allocation3 + $0x104] sm:$0xff] %v8736_v6  ;;  %4338 = vst [vmem:[#allocation3 + $0x114] sm:$0xff] %v8737_v39  ;;  %v11277_v2 = vcombine.high %v4295_v62, %v4296_v12  ;;  %v4459_v35 = vld [vmem:[#allocation3 + $0x10] sm:$0xff]  ;;  %v4812_v52 = vld [vmem:[#allocation3 + $0x9c] sm:$0xf] }
 0x307   : > { %4287 = vst [vmem:[#allocation3 + $0xe4] sm:$0xff] %v8734_v41  ;;  %4288 = vst [vmem:[#allocation3 + $0xf4] sm:$0xff] %v8735_v29  ;;  %v4355_v12 = vld [vmem:[#allocation3 + $0x150] sm:$0xff] }
 0x308   : > { %4343 = vst [vmem:[#allocation3 + $0x164] sm:$0xff] %v11275_v36  ;;  %4344 = vst [vmem:[#allocation3 + $0x174] sm:$0xff] %v11277_v2  ;;  %v4469_v15 = vld [vmem:[#allocation3 + $0x60] sm:$0xff]  ;;  %v4470_v46 = vld [vmem:[#allocation3 + $0x68] sm:$0xf] }
 0x309   : > { %v4457_v45 = vld [vmem:[#allocation3] sm:$0xff]  ;;  %v4458_v43 = vld [vmem:[#allocation3 + $0x8] sm:$0xf] }
 0x30a   : > { %v4471_v20 = vld [vmem:[#allocation3 + $0x70] sm:$0xff]  ;;  %v4472_v7 = vld [vmem:[#allocation3 + $0x78] sm:$0xf] }
 0x30d   : > { %v4346_v57 = vld [vmem:[#allocation3 + $0x108] sm:$0xf]  ;;  %v11281_v60 = vld [vmem:[#allocation3 + $0x100] sm:$0xff]  ;;  %v4348_v28 = vld [vmem:[#allocation3 + $0x118] sm:$0xf] }
 0x30e   : > { %4379 = vrot.lane.b32.xlu0 %v4346_v57, %s9390_s20  ;;  %4377 = vrot.lane.b32.xlu1 %v11281_v60, %s9390_s20  ;;  %v11286_v8 = vld [vmem:[#allocation3 + $0x110] sm:$0xff]  ;;  %v4352_v57 = vld [vmem:[#allocation3 + $0x138] sm:$0xf] }
 0x30f   : > { %v4357_v6 = vld [vmem:[#allocation3 + $0x160] sm:$0xff]  ;;  %v4358_v39 = vld [vmem:[#allocation3 + $0x168] sm:$0xf]  ;;  %v4359_v0 = vld [vmem:[#allocation3 + $0x170] sm:$0xff] }
 0x310   : > { %v4360_v62 = vld [vmem:[#allocation3 + $0x178] sm:$0xf] }
 0x311   : > { %v11667_v4 = vld [vmem:[#allocation3 + $0xf4] sm:$0xff] }
 0x312   : > { %4383 = vrot.lane.b32.xlu0 %v4348_v28, %s9390_s20  ;;  %4381 = vrot.lane.b32.xlu1 %v11286_v8, %s9390_s20 }
 0x316   : > { %4387 = vrot.lane.b32.xlu0 %v4350_v27, %s9390_s20  ;;  %4385 = vrot.lane.b32.xlu1 %v11291_v1, %s9390_s20  ;;  %v4694_v27 = vld [vmem:[#allocation3 + $0x168] sm:$0xf] }
 0x31a   : > { %4513 = vrot.lane.b32.xlu0 %v4469_v15, %s12901_s28  ;;  %4389 = vrot.lane.b32.xlu1 %v11296_v58, %s9390_s20 }
 0x31e   : > { %4517 = vrot.lane.b32.xlu0 %v4471_v20, %s12901_s28  ;;  %4515 = vrot.lane.b32.xlu1 %v4470_v46, %s12901_s28  ;;  %v4696_v20 = vld [vmem:[#allocation3 + $0x178] sm:$0xf] }
 0x322   : > { %4865 = vrot.lane.b32.xlu0 %v8734_v41, %s9394_s17  ;;  %4519 = vrot.lane.b32.xlu1 %v4472_v7, %s12901_s28  ;;  %v5046_v7 = vld [vmem:[#allocation3 + $0x6c] sm:$0xf] }
 0x326   : > { %4869 = vrot.lane.b32.xlu0 %v8735_v29, %s9394_s17  ;;  %4867 = vrot.lane.b32.xlu1 %v4822_v31, %s9394_s17  ;;  %v4356_v29 = vld [vmem:[#allocation3 + $0x158] sm:$0xf] }
 0x32a   : > { %4505 = vrot.lane.b32.xlu0 %v4465_v26, %s12901_s28  ;;  %4871 = vrot.lane.b32.xlu1 %v4824_v61, %s9394_s17  ;;  %v5048_v61 = vld [vmem:[#allocation3 + $0x7c] sm:$0xf] }
 0x32e   : > { %4509 = vrot.lane.b32.xlu0 %v4467_v51, %s12901_s28  ;;  %4507 = vrot.lane.b32.xlu1 %v4466_v24, %s12901_s28  ;;  %v4690_v51 = vld [vmem:[#allocation3 + $0x148] sm:$0xf] }
 0x332   : > { %4857 = vrot.lane.b32.xlu0 %v11235_v23, %s9394_s17  ;;  %4511 = vrot.lane.b32.xlu1 %v4468_v11, %s12901_s28  ;;  %v4464_v23 = vld [vmem:[#allocation3 + $0x38] sm:$0xf] }
 0x336   : > { %4861 = vrot.lane.b32.xlu0 %v11237_v63, %s9394_s17  ;;  %4859 = vrot.lane.b32.xlu1 %v4818_v9, %s9394_s17  ;;  %v4814_v63 = vld [vmem:[#allocation3 + $0xac] sm:$0xf]  ;;  %v4692_v9 = vld [vmem:[#allocation3 + $0x158] sm:$0xf] }
 0x33a   : > { %4497 = vrot.lane.b32.xlu0 %v4461_v30, %s12901_s28  ;;  %4863 = vrot.lane.b32.xlu1 %v4820_v50, %s9394_s17  ;;  %v5042_v50 = vld [vmem:[#allocation3 + $0x4c] sm:$0xf] }
 0x33e   : > { %4501 = vrot.lane.b32.xlu0 %v4463_v40, %s12901_s28  ;;  %4499 = vrot.lane.b32.xlu1 %v4462_v10, %s12901_s28 }
 0x341   : > { %v11343_v18 = vpop.f32.mrf.mxu1 }
 0x342   : > { %4849 = vrot.lane.b32.xlu0 %v11210_v48, %s9394_s17  ;;  %4503 = vrot.lane.b32.xlu1 %v4464_v23, %s12901_s28  ;;  %v4460_v48 = vld [vmem:[#allocation3 + $0x18] sm:$0xf]  ;;  %v5044_v23 = vld [vmem:[#allocation3 + $0x5c] sm:$0xf] }
 0x343   : > { %v11347_v41 = vpop.f32.mrf.mxu1 }
 0x345   : > { %v11351_v28 = vpop.f32.mrf.mxu1 }
 0x346   : > { %4853 = vrot.lane.b32.xlu0 %v11212_v32, %s9394_s17  ;;  %4851 = vrot.lane.b32.xlu1 %v4814_v63, %s9394_s17  ;;  %v4810_v32 = vld [vmem:[#allocation3 + $0x8c] sm:$0xf] }
 0x347   : > { %v11355_v15 = vpop.f32.mrf.mxu1 }
 0x349   : > { %v11359_v46 = vpop.f32.mrf.mxu1 }
 0x34a   : > { %4489 = vrot.lane.b32.xlu0 %v4457_v45, %s12901_s28  ;;  %4855 = vrot.lane.b32.xlu1 %v4816_v3, %s9394_s17 }
 0x34b   : > { %v11364_v31 = vpop.f32.mrf.mxu1 }
 0x34d   : > { %v11369_v26 = vpop.f32.mrf.mxu1 }
 0x34e   : > { %4493 = vrot.lane.b32.xlu0 %v4459_v35, %s12901_s28  ;;  %4491 = vrot.lane.b32.xlu1 %v4458_v43, %s12901_s28 }
 0x34f   : > { %v11373_v24 = vpop.f32.mrf.mxu1 }
 0x352   : > { %4495 = vrot.lane.b32.xlu1 %v4460_v48, %s12901_s28  ;;  %4841 = vrot.lane.b32.xlu0 %v11260_v44, %s9394_s17  ;;  %v4353_v44 = vld [vmem:[#allocation3 + $0x140] sm:$0xff] }
 0x356   : > { %4843 = vrot.lane.b32.xlu1 %v4810_v32, %s9394_s17  ;;  %4845 = vrot.lane.b32.xlu0 %v11262_v33, %s9394_s17  ;;  %v4354_v33 = vld [vmem:[#allocation3 + $0x148] sm:$0xf] }
 0x35a   : > { %4847 = vrot.lane.b32.xlu1 %v4812_v52, %s9394_s17  ;;  %4401 = vrot.lane.b32.xlu0 %v4357_v6, %s9390_s20 }
 0x35e   : > { %4403 = vrot.lane.b32.xlu1 %v4358_v39, %s9390_s20  ;;  %4405 = vrot.lane.b32.xlu0 %v4359_v0, %s9390_s20  ;;  %v4688_v39 = vld [vmem:[#allocation3 + $0x138] sm:$0xf] }
 0x362   : > { %4407 = vrot.lane.b32.xlu1 %v4360_v62, %s9390_s20  ;;  %4393 = vrot.lane.b32.xlu0 %v4353_v44, %s9390_s20  ;;  %v5038_v62 = vld [vmem:[#allocation3 + $0x2c] sm:$0xf] }
 0x366   : > { %4395 = vrot.lane.b32.xlu1 %v4354_v33, %s9390_s20  ;;  %4397 = vrot.lane.b32.xlu0 %v4355_v12, %s9390_s20 }
 0x36a   : > { %4399 = vrot.lane.b32.xlu1 %v4356_v29, %s9390_s20  ;;  %4391 = vrot.lane.b32.xlu0 %v4352_v57, %s9390_s20 }
 0x36e   : > { %4737 = vrot.lane.b32.xlu1 %v4357_v6, %s9393_s16  ;;  %4739 = vrot.lane.b32.xlu0 %v4694_v27, %s9393_s16  ;;  %v5040_v27 = vld [vmem:[#allocation3 + $0x3c] sm:$0xf] }
 0x372   : > { %4741 = vrot.lane.b32.xlu1 %v4359_v0, %s9393_s16  ;;  %4743 = vrot.lane.b32.xlu0 %v4696_v20, %s9393_s16 }
 0x376   : > { %5089 = vrot.lane.b32.xlu1 %v11244_v17, %s12902_s29  ;;  %5091 = vrot.lane.b32.xlu0 %v5046_v7, %s12902_s29 }
 0x37a   : > { %5093 = vrot.lane.b32.xlu1 %v11253_v19, %s12902_s29  ;;  %5095 = vrot.lane.b32.xlu0 %v5048_v61, %s12902_s29  ;;  %v11381_v19 = vpop.f32.mrf.mxu1 }
 0x37c   : > { %v11390_v10 = vpop.f32.mrf.mxu1 }
 0x37e   : > { %4729 = vrot.lane.b32.xlu1 %v4353_v44, %s9393_s16  ;;  %4731 = vrot.lane.b32.xlu0 %v4690_v51, %s9393_s16  ;;  %v11399_v45 = vpop.f32.mrf.mxu1 }
 0x380   : > { %v11375_v17 = vpop.permute.xlu0 %4379  ;;  %v11377_v11 = vpop.permute.xlu1 %4377 }
 0x381   : > { %v11406_v48 = vpop.f32.mrf.mxu1 }
 0x382   : > { %4733 = vrot.lane.b32.xlu1 %v4355_v12, %s9393_s16  ;;  %4735 = vrot.lane.b32.xlu0 %v4692_v9, %s9393_s16 }
 0x384   : > { %v11383_v30 = vpop.permute.xlu0 %4383  ;;  %v11385_v40 = vpop.permute.xlu1 %4381 }
 0x386   : > { %5081 = vrot.lane.b32.xlu1 %v11168_v54, %s12902_s29  ;;  %5083 = vrot.lane.b32.xlu0 %v5042_v50, %s12902_s29  ;;  %v4686_v54 = vld [vmem:[#allocation3 + $0x128] sm:$0xf] }
 0x388   : > { %v11392_v63 = vpop.permute.xlu0 %4387  ;;  %v11394_v3 = vpop.permute.xlu1 %4385 }
 0x38a   : > { %5085 = vrot.lane.b32.xlu1 %v11214_v13, %s12902_s29  ;;  %5087 = vrot.lane.b32.xlu0 %v5044_v23, %s12902_s29  ;;  %v11411_v13 = vpop.f32.mrf.mxu1 }
 0x38c   : > { %v4514_v35 = vpop.permute.xlu0 %4513  ;;  %v11401_v43 = vpop.permute.xlu1 %4389 }
 0x38d   : > { %v4533_v0 = vrot.slane %v4514_v35, 4  ;;  %v11417_v57 = vpop.f32.mrf.mxu1 }
 0x38e   : > { %4721 = vrot.lane.b32.xlu1 %v11291_v1, %s9393_s16  ;;  %4723 = vrot.lane.b32.xlu0 %v4686_v54, %s9393_s16 }
 0x390   : > { %v4518_v32 = vpop.permute.xlu0 %4517  ;;  %v4516_v52 = vpop.permute.xlu1 %4515 }
 0x391   : > { %v4534_v6 = vrot.slane %v4516_v52, 4  ;;  %v4535_v1 = vrot.slane %v4518_v32, 4 }
 0x392   : > { %4725 = vrot.lane.b32.xlu1 %v11296_v58, %s9393_s16  ;;  %4727 = vrot.lane.b32.xlu0 %v4688_v39, %s9393_s16 }
 0x393   : > { %v4549_v12 = vsel %vm712_vm10, %v4533_v0, %v4534_v6 }
 0x394   : > { %v4866_v44 = vpop.permute.xlu0 %4865  ;;  %v4520_v33 = vpop.permute.xlu1 %4519  ;;  %v4550_v61 = vsel %vm827_vm11, %v4514_v35, %v4549_v12 }
 0x395   : > { %v4536_v29 = vrot.slane %v4520_v33, 4  ;;  %v4885_v52 = vrot.slane %v4866_v44, 4  ;;  %v4682_v33 = vld [vmem:[#allocation3 + $0x108] sm:$0xf] }
 0x396   : > { %5073 = vrot.lane.b32.xlu1 %v11193_v25, %s12902_s29  ;;  %5075 = vrot.lane.b32.xlu0 %v5038_v62, %s12902_s29  ;;  %v11425_v25 = vpop.f32.mrf.mxu1 }
 0x397   : > { %v4551_v58 = vsel %vm712_vm10, %v4535_v1, %v4536_v29 }
 0x398   : > { %v4870_v20 = vpop.permute.xlu0 %4869  ;;  %v4868_v7 = vpop.permute.xlu1 %4867  ;;  %v4552_v51 = vsel %vm827_vm11, %v4518_v32, %v4551_v58 }
 0x399   : > { %v4886_v9 = vrot.slane %v4868_v7, 4  ;;  %v8816_v50 = vcombine.low %v4550_v61, %v4552_v51  ;;  %v8817_v23 = vcombine.high %v4550_v61, %v4552_v51  ;;  %v4025_v54 = vpop.f32.mrf.mxu0  ;;  %v4887_v0 = vrot.slane %v4870_v20, 4  ;;  %v11435_v12 = vpop.f32.mrf.mxu1 }
 0x39a   : > { %5077 = vrot.lane.b32.xlu1 %v11186_v59, %s12902_s29  ;;  %5079 = vrot.lane.b32.xlu0 %v5040_v27, %s12902_s29  ;;  %v3953_v59 = vadd.f32 %v11343_v18, %v11183_v47  ;;  %v3955_v27 = vadd.f32 %v11347_v41, %v11183_v47 }
 0x39b   : > { %7377 = vmatprep.subr.bf16.mxu0 %v8817_v23  ;;  %v4027_v6 = vpop.f32.mrf.mxu0  ;;  %v4901_v32 = vsel %vm712_vm10, %v4885_v52, %v4886_v9  ;;  %v4684_v23 = vld [vmem:[#allocation3 + $0x118] sm:$0xf] }
 0x39c   : > { %v11427_v39 = vpop.permute.xlu0 %4505  ;;  %7378 = vmatpush1.bf16.msra.mxu0 %v8816_v50  ;;  %v4872_v35 = vpop.permute.xlu1 %4871  ;;  %v4026_v51 = vadd.f32 %v4025_v54, %v3953_v59  ;;  %v4902_v9 = vsel %vm1182_vm15, %v4866_v44, %v4901_v32  ;;  %v4028_v47 = vadd.f32 %v4027_v6, %v3955_v27  ;;  %v3959_v44 = vadd.f32 %v11355_v15, %v11164_v37 }
 0x39d   : > { %v4888_v62 = vrot.slane %v4872_v35, 4  ;;  %v4029_v1 = vpop.f32.mrf.mxu0  ;;  %v3965_v54 = vadd.f32 %v11364_v31, %v11147_v56  ;;  %v4529_v32 = vrot.slane %v11427_v39, 4  ;;  %v3969_v6 = vadd.f32 %v11373_v24, %v11138_v55 }
 0x39e   : > { %4713 = vrot.lane.b32.xlu1 %v11281_v60, %s9393_s16  ;;  %4715 = vrot.lane.b32.xlu0 %v4682_v33, %s9393_s16 }
 0x39f   : > { %v4903_v29 = vsel %vm712_vm10, %v4887_v0, %v4888_v62  ;;  %v4031_v58 = vpop.f32.mrf.mxu0  ;;  %v3957_v0 = vadd.f32 %v11351_v28, %v11164_v37  ;;  %v5034_v28 = vld [vmem:[#allocation3 + $0xc] sm:$0xf] }
 0x3a0   : > { %v4510_v7 = vpop.permute.xlu0 %4509  ;;  %v4508_v61 = vpop.permute.xlu1 %4507  ;;  %v4904_v18 = vsel %vm1182_vm15, %v4870_v20, %v4903_v29  ;;  %v3963_v20 = vadd.f32 %v11359_v46, %v11147_v56  ;;  %v3973_v56 = vadd.f32 %v11381_v19, %v11111_v42  ;;  %v11475_v19 = vadd.f32 %v11399_v45, %v11108_v34 }
 0x3a1   : > { %v4530_v50 = vrot.slane %v4508_v61, 4  ;;  %v8880_v60 = vcombine.low %v4902_v9, %v4904_v18  ;;  %v8881_v52 = vcombine.high %v4902_v9, %v4904_v18  ;;  %v4035_v35 = vpop.f32.mrf.mxu0  ;;  %v4098_v33 = vpop.f32.mrf.mxu1  ;;  %v4030_v15 = vadd.f32 %v4029_v1, %v3957_v0 }
 0x3a2   : > { %4717 = vrot.lane.b32.xlu1 %v11286_v8, %s9393_s16  ;;  %4719 = vrot.lane.b32.xlu0 %v4684_v23, %s9393_s16  ;;  %v4099_v41 = vadd.f32 %v4098_v33, %v4026_v51  ;;  %v3967_v8 = vadd.f32 %v11369_v26, %v11138_v55  ;;  %v4531_v31 = vrot.slane %v4510_v7, 4  ;;  %v11467_v26 = vadd.f32 %v11390_v10, %v11111_v42 }
 0x3a3   : > { %7450 = vmatprep.subr.bf16.mxu1 %v8881_v52  ;;  %v4037_v62 = vpop.f32.mrf.mxu0  ;;  %v4100_v59 = vpop.f32.mrf.mxu1  ;;  %v4545_v27 = vsel %vm712_vm10, %v4529_v32, %v4530_v50  ;;  %v11479_v18 = vadd.f32 %v11406_v48, %v11108_v34  ;;  %v4032_v10 = vadd.f32 %v4031_v58, %v3959_v44  ;;  %v5036_v50 = vld [vmem:[#allocation3 + $0x1c] sm:$0xf]  ;;  %v4036_v32 = vadd.f32 %v4035_v35, %v3963_v20 }
 0x3a4   : > { %v11458_v29 = vpop.permute.xlu0 %4857  ;;  %7451 = vmatpush1.bf16.msra.mxu1 %v8880_v60  ;;  %v4512_v37 = vpop.permute.xlu1 %4511  ;;  %v11460_v46 = vadd.f32 %v4100_v59, %v4028_v47  ;;  %v4139_v55 = vmax.f32 %v4099_v41, 0.0  ;;  %v4546_v33 = vsel %vm827_vm11, %v11427_v39, %v4545_v27  ;;  %v11489_v58 = vadd.f32 %v11411_v13, %v11101_v22 }
 0x3a5   : > { %v4532_v61 = vrot.slane %v4512_v37, 4  ;;  %v4039_v51 = vpop.f32.mrf.mxu0  ;;  %v4102_v9 = vpop.f32.mrf.mxu1  ;;  %v11485_v37 = vld [vmem:[#allocation3 + $0x8] ss:$16 sps:$4 sm:$0xff]   ;;  %v4881_v44 = vrot.slane %v11458_v29, 4  ;;  %v11497_v35 = vadd.f32 %v11417_v57, %v11101_v22  ;;  %v11501_v20 = vadd.f32 %v11425_v25, %v11103_v38 }
 0x3a6   : > { %5065 = vrot.lane.b32.xlu1 %v11246_v21, %s12902_s29  ;;  %5067 = vrot.lane.b32.xlu0 %v5034_v28, %s12902_s29  ;;  %v4140_v24 = vmax.f32 %v11460_v46, 0.0  ;;  %v4103_v1 = vadd.f32 %v4102_v9, %v4030_v15  ;;  %v4038_v13 = vadd.f32 %v4037_v62, %v3965_v54  ;;  %v4040_v9 = vadd.f32 %v4039_v51, %v3967_v8  ;;  %v4582_v54 = vld [vmem:[#allocation3 + $0xe8] sm:$0xf] }
 0x3a7   : > { %v4547_v42 = vsel %vm712_vm10, %v4531_v31, %v4532_v61  ;;  %v4041_v23 = vpop.f32.mrf.mxu0  ;;  %v4104_v21 = vpop.f32.mrf.mxu1 }
 0x3a8   : > { %v4862_v60 = vpop.permute.xlu0 %4861  ;;  %v4860_v52 = vpop.permute.xlu1 %4859  ;;  %v4548_v0 = vsel %vm827_vm11, %v4510_v7, %v4547_v42  ;;  %v9020_v47 = vpack.c.bf16 %v4140_v24, %v4139_v55  ;;  %v4143_v45 = vmax.f32 %v4103_v1, 0.0  ;;  %v4105_v7 = vadd.f32 %v4104_v21, %v4032_v10  ;;  %v4581_v42 = vld [vmem:[#allocation3 + $0xe0] sm:$0xff] }
 0x3a9   : > { %v4882_v41 = vrot.slane %v4860_v52, 4  ;;  %v8812_v28 = vcombine.low %v4546_v33, %v4548_v0  ;;  %v8813_v34 = vcombine.high %v4546_v33, %v4548_v0  ;;  %v4045_v48 = vpop.f32.mrf.mxu0  ;;  %v4108_v59 = vpop.f32.mrf.mxu1  ;;  %v4883_v57 = vrot.slane %v4862_v60, 4  ;;  %v4583_v33 = vld [vmem:[#allocation3 + $0xf0] sm:$0xff]  ;;  %v4584_v0 = vld [vmem:[#allocation3 + $0xf8] sm:$0xf] }
 0x3aa   : > { %5069 = vrot.lane.b32.xlu1 %v11227_v14, %s12902_s29  ;;  %5071 = vrot.lane.b32.xlu0 %v5036_v50, %s12902_s29  ;;  %v4171_v39 = vpack.c.bf16 %v4143_v45, %v4139_v55  ;;  %5297 = vst [vmem:[#allocation3 + $0x4] sm:$0xff] %v9020_v47  ;;  %v11503_v15 = vadd.f32 %v4108_v59, %v4036_v32  ;;  %v4144_v22 = vmax.f32 %v4105_v7, 0.0 }
 0x3ab   : > { %7379 = vmatprep.subr.bf16.mxu0 %v8813_v34  ;;  %v4047_v46 = vpop.f32.mrf.mxu0  ;;  %v4110_v31 = vpop.f32.mrf.mxu1  ;;  %v4897_v14 = vsel %vm712_vm10, %v4881_v44, %v4882_v41  ;;  %v4042_v55 = vadd.f32 %v4041_v23, %v3969_v6  ;;  %v4046_v62 = vadd.f32 %v4045_v48, %v3973_v56  ;;  %v11530_v44 = vld [vmem:[#allocation3 + $0x88] sm:$0xf] }
 0x3ac   : > { %v11506_v27 = vpop.permute.xlu0 %4497  ;;  %7380 = vmatpush1.bf16.msra.mxu0 %v8812_v28  ;;  %v4864_v61 = vpop.permute.xlu1 %4863  ;;  %v5305_v25 = vsel %vm9759_vm8, %v4171_v39, 0  ;;  %v5361_v21 = vsel %vm9681_vm5, %v4171_v39, 0  ;;  %v4172_v8 = vpack.c.bf16 %v4144_v22, %v4140_v24  ;;  %v9021_v6 = vpack.c.bf16 %v4144_v22, %v4143_v45 }
 0x3ad   : > { %v4884_v1 = vrot.slane %v4864_v61, 4  ;;  %v4049_v10 = vpop.f32.mrf.mxu0  ;;  %v4112_v50 = vpop.f32.mrf.mxu1  ;;  %v11514_v51 = vadd.f32 %v4110_v31, %v4038_v13  ;;  %v4147_v52 = vmax.f32 %v11503_v15, 0.0  ;;  %v4898_v56 = vsel %vm1182_vm15, %v11458_v29, %v4897_v14  ;;  %v11532_v29 = vld [vmem:[#allocation3 + $0x80] sm:$0xff]  ;;  %v11534_v14 = vld [vmem:[#allocation3 + $0x98] sm:$0xf]  ;;  %v11536_v61 = vld [vmem:[#allocation3 + $0x90] sm:$0xff] }
 0x3ae   : > { %4625 = vrot.lane.b32.xlu1 %v4581_v42, %s12904_s14  ;;  %4627 = vrot.lane.b32.xlu0 %v4582_v54, %s12904_s14  ;;  %v11520_v47 = vadd.f32 %v4112_v50, %v4040_v9  ;;  %v5306_v28 = vsel %vm501_vm9, %v4172_v8, 0  ;;  %v5362_v24 = vsel %vm574_vm6, %v4172_v8, 0  ;;  %5298 = vst [vmem:[#allocation3 + $0x14] sm:$0xff] %v9021_v6  ;;  %v11538_v9 = vld [vmem:[#allocation3 + $0x104] sm:$0xff]  ;;  %v11547_v50 = vld [vmem:[#allocation3 + $0x94] sm:$0xff] }
 0x3af   : > { %v4899_v23 = vsel %vm712_vm10, %v4883_v57, %v4884_v1  ;;  %v4051_v41 = vpop.f32.mrf.mxu0  ;;  %v4114_v32 = vpop.f32.mrf.mxu1  ;;  %v4148_v59 = vmax.f32 %v11514_v51, 0.0  ;;  %v8752_v39 = vcombine.low %v5305_v25, %v5306_v28  ;;  %v8753_v7 = vcombine.high %v5305_v25, %v5306_v28  ;;  %v11543_v25 = vld [vmem:[#allocation3 + $0x114] sm:$0xff]  ;;  %v11545_v54 = vld [vmem:[#allocation3 + $0x84] sm:$0xff]  ;;  %v4934_v51 = vld [vmem:[#allocation3 + $0x16c] sm:$0xf] }
 0x3b0   : > { %v11526_v45 = vpop.permute.xlu0 %4501  ;;  %v4500_v34 = vpop.permute.xlu1 %4499  ;;  %v4900_v48 = vsel %vm1182_vm15, %v4862_v60, %v4899_v23  ;;  %v8760_v13 = vcombine.low %v5361_v21, %v5362_v24  ;;  %v8761_v15 = vcombine.high %v5361_v21, %v5362_v24  ;;  %v4525_v60 = vrot.slane %v11506_v27, 4 }
 0x3b1   : > { %v4055_v31 = vpop.f32.mrf.mxu0  ;;  %v4526_v22 = vrot.slane %v4500_v34, 4  ;;  %v8876_v57 = vcombine.low %v4898_v56, %v4900_v48  ;;  %v8877_v1 = vcombine.high %v4898_v56, %v4900_v48  ;;  %v4118_v42 = vpop.f32.mrf.mxu1  ;;  %v4048_v21 = vadd.f32 %v4047_v46, %v11467_v26  ;;  %5353 = vst [vmem:[#allocation3 + $0x84] sm:$0xff] %v8752_v39  ;;  %5354 = vst [vmem:[#allocation3 + $0x94] sm:$0xff] %v8753_v7 }
 0x3b2   : > { %4629 = vrot.lane.b32.xlu1 %v4583_v33, %s12904_s14  ;;  %4631 = vrot.lane.b32.xlu0 %v4584_v0, %s12904_s14  ;;  %v9022_v8 = vpack.c.bf16 %v4148_v59, %v4147_v52  ;;  %v4151_v6 = vmax.f32 %v11520_v47, 0.0  ;;  %v4115_v23 = vadd.f32 %v4114_v32, %v4042_v55  ;;  %5409 = vst [vmem:[#allocation3 + $0x104] sm:$0xff] %v8760_v13  ;;  %5410 = vst [vmem:[#allocation3 + $0x114] sm:$0xff] %v8761_v15  ;;  %v11558_v47 = vld [vmem:[#allocation3 + $0x28] ss:$16 sps:$4 sm:$0xff]  }
 0x3b3   : > { %v4057_v28 = vpop.f32.mrf.mxu0  ;;  %v4527_v33 = vrot.slane %v11526_v45, 4  ;;  %v4541_v0 = vsel %vm712_vm10, %v4525_v60, %v4526_v22  ;;  %7452 = vmatprep.subr.bf16.mxu1 %v8877_v1  ;;  %v4050_v26 = vadd.f32 %v4049_v10, %v11475_v19  ;;  %v11556_v46 = vadd.f32 %v4118_v42, %v4046_v62  ;;  %v4120_v39 = vpop.f32.mrf.mxu1 }
 0x3b4   : > { %v11553_v56 = vpop.permute.xlu0 %4849  ;;  %v4504_v24 = vpop.permute.xlu1 %4503  ;;  %7453 = vmatpush1.bf16.msra.mxu1 %v8876_v57  ;;  %v4175_v32 = vpack.c.bf16 %v4151_v6, %v4147_v52  ;;  %v4052_v34 = vadd.f32 %v4051_v41, %v11479_v18  ;;  %v4152_v48 = vmax.f32 %v4115_v23, 0.0  ;;  %5299 = vst [vmem:[#allocation3 + $0x24] sm:$0xff] %v9022_v8  ;;  %v4056_v19 = vadd.f32 %v4055_v31, %v11489_v58  ;;  %v4936_v58 = vld [vmem:[#allocation3 + $0x17c] sm:$0xf]  ;;  %v11587_v23 = vld [vmem:[#allocation3 + $0xa8] sm:$0xf] }
 0x3b5   : > { %v4528_v55 = vrot.slane %v4504_v24, 4  ;;  %v4877_v7 = vrot.slane %v11553_v56, 4  ;;  %v4155_v62 = vmax.f32 %v11556_v46, 0.0  ;;  %v11567_v10 = vadd.f32 %v4120_v39, %v4048_v21  ;;  %v4059_v15 = vpop.f32.mrf.mxu0  ;;  %v4122_v60 = vpop.f32.mrf.mxu1  ;;  %v11593_v46 = vld [vmem:[#allocation3 + $0xb8] sm:$0xf] }
 0x3b6   : > { %4977 = vrot.lane.b32.xlu1 %v11275_v36, %s12974_s24  ;;  %4979 = vrot.lane.b32.xlu0 %v4934_v51, %s12974_s24  ;;  %v5307_v18 = vsel %vm9759_vm8, %v4175_v32, 0  ;;  %v4176_v41 = vpack.c.bf16 %v4152_v48, %v4148_v59  ;;  %v4542_v13 = vsel %vm827_vm11, %v11506_v27, %v4541_v0  ;;  %v9023_v36 = vpack.c.bf16 %v4152_v48, %v4151_v6  ;;  %v11585_v51 = vld [vmem:[#allocation3 + $0xa0] sm:$0xff] }
 0x3b7   : > { %v4543_v52 = vsel %vm712_vm10, %v4527_v33, %v4528_v55  ;;  %v4156_v1 = vmax.f32 %v11567_v10, 0.0  ;;  %v4123_v42 = vadd.f32 %v4122_v60, %v4050_v26  ;;  %v5363_v21 = vsel %vm9681_vm5, %v4175_v32, 0  ;;  %v4124_v6 = vpop.f32.mrf.mxu1  ;;  %v11591_v26 = vld [vmem:[#allocation3 + $0xb0] sm:$0xff]  ;;  %v11595_v55 = vld [vmem:[#allocation3 + $0x124] sm:$0xff] }
 0x3b8   : > { %v11574_v22 = vpop.permute.xlu0 %4853  ;;  %v4852_v57 = vpop.permute.xlu1 %4851  ;;  %v4544_v31 = vsel %vm827_vm11, %v11526_v45, %v4543_v52  ;;  %v5308_v59 = vsel %vm501_vm9, %v4176_v41, 0  ;;  %v5364_v27 = vsel %vm574_vm6, %v4176_v41, 0  ;;  %5300 = vst [vmem:[#allocation3 + $0x34] sm:$0xff] %v9023_v36  ;;  %v4058_v39 = vadd.f32 %v4057_v28, %v11497_v35  ;;  %v11599_v41 = vld [vmem:[#allocation3 + $0x134] sm:$0xff]  ;;  %v11601_v60 = vld [vmem:[#allocation3 + $0xa4] sm:$0xff] }
 0x3b9   : > { %v4878_v8 = vrot.slane %v4852_v57, 4  ;;  %v8754_v33 = vcombine.low %v5307_v18, %v5308_v59  ;;  %v8755_v45 = vcombine.high %v5307_v18, %v5308_v59  ;;  %v8762_v0 = vcombine.low %v5363_v21, %v5364_v27  ;;  %v4061_v52 = vpop.f32.mrf.mxu0  ;;  %v11610_v35 = vld [vmem:[#allocation3 + $0x48] ss:$16 sps:$4 sm:$0xff]  }
 0x3ba   : > { %v8763_v24 = vcombine.high %v5363_v21, %v5364_v27  ;;  %4981 = vrot.lane.b32.xlu1 %v11277_v2, %s12974_s24  ;;  %4983 = vrot.lane.b32.xlu0 %v4936_v58, %s12974_s24  ;;  %v8808_v32 = vcombine.low %v4542_v13, %v4544_v31  ;;  %v8809_v48 = vcombine.high %v4542_v13, %v4544_v31  ;;  %v4128_v18 = vpop.f32.mrf.mxu1  ;;  %v11603_v2 = vld [vmem:[#allocation3 + $0xb4] sm:$0xff]  ;;  %v4159_v59 = vmax.f32 %v4123_v42, 0.0  ;;  %v4577_v31 = vld [vmem:[#allocation3 + $0xc0] sm:$0xff]  ;;  %v4578_v42 = vld [vmem:[#allocation3 + $0xc8] sm:$0xf] }
 0x3bb   : > { %v9024_v10 = vpack.c.bf16 %v4156_v1, %v4155_v62  ;;  %v4893_v57 = vsel %vm712_vm10, %v4877_v7, %v4878_v8  ;;  %v4125_v58 = vadd.f32 %v4124_v6, %v4052_v34  ;;  %v11608_v27 = vadd.f32 %v4128_v18, %v4056_v19  ;;  %5411 = vst [vmem:[#allocation3 + $0x124] sm:$0xff] %v8762_v0 }
 0x3bc   : > { %v11606_v21 = vpop.permute.xlu0 %4489  ;;  %v4856_v36 = vpop.permute.xlu1 %4855  ;;  %5412 = vst [vmem:[#allocation3 + $0x134] sm:$0xff] %v8763_v24  ;;  %5355 = vst [vmem:[#allocation3 + $0xa4] sm:$0xff] %v8754_v33  ;;  %v3989_v28 = vadd.f32 %v11435_v12, %v11103_v38  ;;  %v4879_v13 = vrot.slane %v11574_v22, 4  ;;  %7381 = vmatprep.subr.bf16.mxu0 %v8809_v48  ;;  %v4060_v34 = vadd.f32 %v4059_v15, %v11501_v20 }
 0x3bd   : > { %5356 = vst [vmem:[#allocation3 + $0xb4] sm:$0xff] %v8755_v45  ;;  %v4880_v7 = vrot.slane %v4856_v36, 4  ;;  %v4130_v8 = vpop.f32.mrf.mxu1  ;;  %5301 = vst [vmem:[#allocation3 + $0x44] sm:$0xff] %v9024_v10  ;;  %7382 = vmatpush1.bf16.msra.mxu0 %v8808_v32  ;;  %v4179_v19 = vpack.c.bf16 %v4159_v59, %v4155_v62  ;;  %v4160_v6 = vmax.f32 %v4125_v58, 0.0  ;;  %v4521_v45 = vrot.slane %v11606_v21, 4  ;;  %v4579_v36 = vld [vmem:[#allocation3 + $0xd0] sm:$0xff] }
 0x3be   : > { %4617 = vrot.lane.b32.xlu1 %v4577_v31, %s12904_s14  ;;  %v4131_v33 = vadd.f32 %v4130_v8, %v4058_v39  ;;  %4619 = vrot.lane.b32.xlu0 %v4578_v42, %s12904_s14  ;;  %v4062_v12 = vadd.f32 %v4061_v52, %v3989_v28  ;;  %v4894_v0 = vsel %vm1182_vm15, %v11553_v56, %v4893_v57  ;;  %v4163_v39 = vmax.f32 %v11608_v27, 0.0 }
 0x3bf   : > { %v4895_v38 = vsel %vm712_vm10, %v4879_v13, %v4880_v7  ;;  %v4132_v24 = vpop.f32.mrf.mxu1  ;;  %v5309_v20 = vsel %vm9759_vm8, %v4179_v19, 0  ;;  %v4180_v62 = vpack.c.bf16 %v4160_v6, %v4156_v1  ;;  %v9025_v15 = vpack.c.bf16 %v4160_v6, %v4159_v59  ;;  %v4580_v59 = vld [vmem:[#allocation3 + $0xd8] sm:$0xf] }
 0x3c0   : > { %v4494_v32 = vpop.permute.xlu0 %4493  ;;  %v4492_v48 = vpop.permute.xlu1 %4491  ;;  %v5365_v10 = vsel %vm9681_vm5, %v4179_v19, 0  ;;  %v4896_v52 = vsel %vm1182_vm15, %v11574_v22, %v4895_v38  ;;  %v4164_v58 = vmax.f32 %v4131_v33, 0.0  ;;  %v4929_v22 = vld [vmem:[#allocation3 + $0x144] sm:$0xff]  ;;  %v4931_v19 = vld [vmem:[#allocation3 + $0x154] sm:$0xff] }
 0x3c1   : > { %v4522_v18 = vrot.slane %v4492_v48, 4  ;;  %v4134_v56 = vpop.f32.mrf.mxu1  ;;  %v5310_v57 = vsel %vm501_vm9, %v4180_v62, 0  ;;  %v5366_v1 = vsel %vm574_vm6, %v4180_v62, 0  ;;  %v8872_v27 = vcombine.low %v4894_v0, %v4896_v52  ;;  %5302 = vst [vmem:[#allocation3 + $0x54] sm:$0xff] %v9025_v15  ;;  %v4930_v48 = vld [vmem:[#allocation3 + $0x14c] sm:$0xf] }
 0x3c2   : > { %4621 = vrot.lane.b32.xlu1 %v4579_v36, %s12904_s14  ;;  %v8873_v28 = vcombine.high %v4894_v0, %v4896_v52  ;;  %v11634_v13 = vcombine.low %v5309_v20, %v5310_v57  ;;  %v8757_v7 = vcombine.high %v5309_v20, %v5310_v57  ;;  %v8764_v31 = vcombine.low %v5365_v10, %v5366_v1  ;;  %v11638_v0 = vld [vmem:[#allocation3 + $0xc4] sm:$0xff]  ;;  %v11640_v15 = vld [vmem:[#allocation3 + $0xd4] sm:$0xff] }
 0x3c3   : > { %v8765_v8 = vcombine.high %v5365_v10, %v5366_v1  ;;  %4623 = vrot.lane.b32.xlu0 %v4580_v59, %s12904_s14  ;;  %v4537_v42 = vsel %vm712_vm10, %v4521_v45, %v4522_v18  ;;  %v9026_v6 = vpack.c.bf16 %v4164_v58, %v4163_v39  ;;  %v4133_v62 = vadd.f32 %v4132_v24, %v4060_v34  ;;  %v11642_v52 = vld [vmem:[#allocation3 + $0x68] ss:$16 sps:$4 sm:$0xff]  }
 0x3c4   : > { %7454 = vmatprep.subr.bf16.mxu1 %v8873_v28  ;;  %v4496_v33 = vpop.permute.xlu1 %4495  ;;  %v4842_v38 = vpop.permute.xlu0 %4841  ;;  %v4135_v36 = vadd.f32 %v4134_v56, %v4062_v12  ;;  %v4523_v20 = vrot.slane %v4494_v32, 4  ;;  %5413 = vst [vmem:[#allocation3 + $0x144] sm:$0xff] %v8764_v31  ;;  %5357 = vst [vmem:[#allocation3 + $0xc4] sm:$0xff] %v11634_v13  ;;  %v4538_v24 = vsel %vm827_vm11, %v11606_v21, %v4537_v42 }
 0x3c5   : > { %7455 = vmatpush1.bf16.msra.mxu1 %v8872_v27  ;;  %v4524_v10 = vrot.slane %v4496_v33, 4  ;;  %5414 = vst [vmem:[#allocation3 + $0x154] sm:$0xff] %v8765_v8  ;;  %5358 = vst [vmem:[#allocation3 + $0xd4] sm:$0xff] %v8757_v7  ;;  %v4167_v45 = vmax.f32 %v4133_v62, 0.0  ;;  %v4932_v27 = vld [vmem:[#allocation3 + $0x15c] sm:$0xf] }
 0x3c6   : > { %4969 = vrot.lane.b32.xlu1 %v4929_v22, %s12974_s24  ;;  %v4168_v34 = vmax.f32 %v4135_v36, 0.0  ;;  %5303 = vst [vmem:[#allocation3 + $0x64] sm:$0xff] %v9026_v6  ;;  %v4873_v7 = vrot.slane %v4842_v38, 4 }
 0x3c7   : > { %v4539_v12 = vsel %vm712_vm10, %v4523_v20, %v4524_v10  ;;  %4971 = vrot.lane.b32.xlu0 %v4930_v48, %s12974_s24  ;;  %v4183_v18 = vpack.c.bf16 %v4167_v45, %v4163_v39  ;;  %v11665_v48 = vld [vmem:[#allocation3 + $0xe4] sm:$0xff] }
 0x3c8   : > { %v4184_v56 = vpack.c.bf16 %v4168_v34, %v4164_v58  ;;  %v9027_v57 = vpack.c.bf16 %v4168_v34, %v4167_v45  ;;  %v4844_v1 = vpop.permute.xlu1 %4843  ;;  %v4846_v59 = vpop.permute.xlu0 %4845  ;;  %v4540_v28 = vsel %vm827_vm11, %v4494_v32, %v4539_v12 }
 0x3c9   : > { %v4874_v31 = vrot.slane %v4844_v1, 4  ;;  %v8804_v8 = vcombine.low %v4538_v24, %v4540_v28  ;;  %v8805_v22 = vcombine.high %v4538_v24, %v4540_v28  ;;  %v5311_v6 = vsel %vm9759_vm8, %v4183_v18, 0 }
 0x3ca   : > { %v5367_v33 = vsel %vm9681_vm5, %v4183_v18, 0  ;;  %v5312_v21 = vsel %vm501_vm9, %v4184_v56, 0  ;;  %v5368_v39 = vsel %vm574_vm6, %v4184_v56, 0  ;;  %4973 = vrot.lane.b32.xlu1 %v4931_v19, %s12974_s24  ;;  %5304 = vst [vmem:[#allocation3 + $0x74] sm:$0xff] %v9027_v57  ;;  %v4875_v19 = vrot.slane %v4846_v59, 4 }
 0x3cb   : > { %v11660_v32 = vcombine.low %v5311_v6, %v5312_v21  ;;  %v11662_v58 = vcombine.high %v5311_v6, %v5312_v21  ;;  %v8766_v42 = vcombine.low %v5367_v33, %v5368_v39  ;;  %v8767_v62 = vcombine.high %v5367_v33, %v5368_v39  ;;  %4975 = vrot.lane.b32.xlu0 %v4932_v27, %s12974_s24  ;;  %v4926_v27 = vld [vmem:[#allocation3 + $0x12c] sm:$0xf]  ;;  %v4928_v6 = vld [vmem:[#allocation3 + $0x13c] sm:$0xf] }
 0x3cc   : > { %7383 = vmatprep.subr.bf16.mxu0 %v8805_v22  ;;  %v4848_v5 = vpop.permute.xlu1 %4847  ;;  %v4402_v16 = vpop.permute.xlu0 %4401  ;;  %v4889_v53 = vsel %vm712_vm10, %v4873_v7, %v4874_v31 }
 0x3cd   : > { %5415 = vst [vmem:[#allocation3 + $0x164] sm:$0xff] %v8766_v42  ;;  %5416 = vst [vmem:[#allocation3 + $0x174] sm:$0xff] %v8767_v62  ;;  %7384 = vmatpush1.bf16.msra.mxu0 %v8804_v8  ;;  %v4876_v36 = vrot.slane %v4848_v5, 4  ;;  %v4890_v34 = vsel %vm1182_vm15, %v4842_v38, %v4889_v53  ;;  %v4421_v57 = vrot.slane %v4402_v16, 4  ;;  %v4799_v7 = vld [vmem:[#allocation3 + $0x64] sm:$0xff]  ;;  %v4414_v5 = vrot.slane %v11392_v63, 4 }
 0x3ce   : > { %5359 = vst [vmem:[#allocation3 + $0xe4] sm:$0xff] %v11660_v32  ;;  %5360 = vst [vmem:[#allocation3 + $0xf4] sm:$0xff] %v11662_v58  ;;  %4609 = vrot.lane.b32.xlu1 %v11585_v51, %s12904_s14  ;;  %v4797_v42 = vld [vmem:[#allocation3 + $0x44] sm:$0xff]  ;;  %v4413_v53 = vrot.slane %v11394_v3, 4 }
 0x3cf   : > { %v4891_v20 = vsel %vm712_vm10, %v4875_v19, %v4876_v36  ;;  %4611 = vrot.lane.b32.xlu0 %v11587_v23, %s12904_s14  ;;  %v4796_v36 = vld [vmem:[#allocation3 + $0x34] sm:$0xff] }
 0x3d0   : > { %v4404_v10 = vpop.permute.xlu1 %4403  ;;  %v4406_v45 = vpop.permute.xlu0 %4405  ;;  %v4892_v12 = vsel %vm1182_vm15, %v4846_v59, %v4891_v20  ;;  %v4412_v20 = vrot.slane %v11383_v30, 4 }
 0x3d1   : > { %v4422_v24 = vrot.slane %v4404_v10, 4  ;;  %v8868_v18 = vcombine.low %v4890_v34, %v4892_v12  ;;  %v8869_v56 = vcombine.high %v4890_v34, %v4892_v12  ;;  %v4800_v51 = vld [vmem:[#allocation3 + $0x74] sm:$0xff]  ;;  %v4423_v28 = vrot.slane %v4406_v45, 4 }
 0x3d2   : > { %4613 = vrot.lane.b32.xlu1 %v11591_v26, %s12904_s14  ;;  %v8864_v26 = vcombine.low %v4799_v7, %v4800_v51  ;;  %v4415_v10 = vrot.slane %v11401_v43, 4 }
 0x3d3   : > { %4615 = vrot.lane.b32.xlu0 %v11593_v46, %s12904_s14  ;;  %7456 = vmatprep.subr.bf16.mxu1 %v8869_v56  ;;  %v4437_v38 = vsel %vm712_vm10, %v4421_v57, %v4422_v24  ;;  %v4798_v46 = vld [vmem:[#allocation3 + $0x54] sm:$0xff]  ;;  %v4409_v56 = vrot.slane %v11377_v11, 4  ;;  %v4429_v57 = vsel %vm712_vm10, %v4413_v53, %v4414_v5  ;;  %v4924_v5 = vld [vmem:[#allocation3 + $0x11c] sm:$0xf] }
 0x3d4   : > { %v4408_v1 = vpop.permute.xlu1 %4407  ;;  %7457 = vmatpush1.bf16.msra.mxu1 %v8868_v18  ;;  %v4394_v23 = vpop.permute.xlu0 %4393  ;;  %v4438_v33 = vsel %vm714_vm12, %v4402_v16, %v4437_v38  ;;  %v8860_v62 = vcombine.low %v4797_v42, %v4798_v46  ;;  %v4795_v16 = vld [vmem:[#allocation3 + $0x24] sm:$0xff]  ;;  %v4410_v18 = vrot.slane %v11375_v17, 4  ;;  %v4794_v38 = vld [vmem:[#allocation3 + $0x14] sm:$0xff] }
 0x3d5   : > { %v4424_v59 = vrot.slane %v4408_v1, 4  ;;  %7458 = vmatprep.subr.bf16.mxu1 %v11642_v52  ;;  %v4417_v19 = vrot.slane %v4394_v23, 4  ;;  %v8856_v30 = vcombine.low %v4795_v16, %v4796_v36 }
 0x3d6   : > { %4961 = vrot.lane.b32.xlu1 %v11595_v55, %s12974_s24 }
 0x3d7   : > { %v4439_v31 = vsel %vm712_vm10, %v4423_v28, %v4424_v59  ;;  %4963 = vrot.lane.b32.xlu0 %v4926_v27, %s12974_s24  ;;  %v4793_v27 = vld [vmem:[#allocation3 + $0x4] sm:$0xff] }
 0x3d8   : > { %v4396_v8 = vpop.permute.xlu1 %4395  ;;  %7459 = vmatpush1.bf16.msra.mxu1 %v8864_v26  ;;  %v4398_v22 = vpop.permute.xlu0 %4397  ;;  %v4440_v21 = vsel %vm714_vm12, %v4406_v45, %v4439_v31  ;;  %v8852_v46 = vcombine.low %v4793_v27, %v4794_v38  ;;  %v5543_v27 = vld [vmem:[#allocation3 + $0x70] sm:$0xff] }
 0x3d9   : > { %v4418_v39 = vrot.slane %v4396_v8, 4  ;;  %7460 = vmatprep.subr.bf16.mxu1 %v11610_v35  ;;  %v8800_v52 = vcombine.low %v4438_v33, %v4440_v21  ;;  %v8801_v55 = vcombine.high %v4438_v33, %v4440_v21  ;;  %v4411_v35 = vrot.slane %v11385_v40, 4  ;;  %v4922_v33 = vld [vmem:[#allocation3 + $0x10c] sm:$0xf] }
 0x3da   : > { %4965 = vrot.lane.b32.xlu1 %v11599_v41, %s12974_s24  ;;  %v4419_v34 = vrot.slane %v4398_v22, 4 }
 0x3db   : > { %4967 = vrot.lane.b32.xlu0 %v4928_v6, %s12974_s24  ;;  %7385 = vmatprep.subr.bf16.mxu0 %v8801_v55  ;;  %v4433_v63 = vsel %vm712_vm10, %v4417_v19, %v4418_v39  ;;  %v4427_v7 = vsel %vm712_vm10, %v4411_v35, %v4412_v20 }
 0x3dc   : > { %v4400_v45 = vpop.permute.xlu1 %4399  ;;  %7386 = vmatpush1.bf16.msra.mxu0 %v8800_v52  ;;  %7461 = vmatpush1.bf16.msra.mxu1 %v8860_v62  ;;  %v4392_v41 = vpop.permute.xlu0 %4391  ;;  %v4434_v28 = vsel %vm714_vm12, %v4394_v23, %v4433_v63  ;;  %v4425_v23 = vsel %vm712_vm10, %v4409_v56, %v4410_v18  ;;  %v5541_v63 = vld [vmem:[#allocation3 + $0x60] sm:$0xff] }
 0x3dd   : > { %v4420_v12 = vrot.slane %v4400_v45, 4  ;;  %v4416_v24 = vrot.slane %v4392_v41, 4  ;;  %7462 = vmatprep.subr.bf16.mxu1 %v11558_v47  ;;  %v4426_v39 = vsel %vm714_vm12, %v11377_v11, %v4425_v23 }
 0x3de   : > { %4601 = vrot.lane.b32.xlu1 %v11532_v29, %s12904_s14 }
 0x3df   : > { %v4435_v51 = vsel %vm712_vm10, %v4419_v34, %v4420_v12  ;;  %v4431_v1 = vsel %vm712_vm10, %v4415_v10, %v4416_v24  ;;  %4603 = vrot.lane.b32.xlu0 %v11530_v44, %s12904_s14  ;;  %v4430_v44 = vsel %vm714_vm12, %v11394_v3, %v4429_v57  ;;  %v9136_v34 = vld [vmem:[%s12858_s3 + $0xc] ss:$20 sps:$4 sm:$0xff]  }
 0x3e0   : > { %v4738_v47 = vpop.permute.xlu1 %4737  ;;  %7463 = vmatpush1.bf16.msra.mxu1 %v8856_v30  ;;  %v4740_v17 = vpop.permute.xlu0 %4739  ;;  %v4436_v29 = vsel %vm714_vm12, %v4398_v22, %v4435_v51  ;;  %v4432_v59 = vsel %vm714_vm12, %v11401_v43, %v4431_v1  ;;  %7482 = vmatprep.mubr.bf16.mxu1 %v9136_v34 }
 0x3e1   : > { %7464 = vmatprep.subr.bf16.mxu1 %v11485_v37  ;;  %v8796_v26 = vcombine.low %v4434_v28, %v4436_v29  ;;  %v8797_v31 = vcombine.high %v4434_v28, %v4436_v29  ;;  %v4757_v8 = vrot.slane %v4738_v47, 4  ;;  %v4758_v22 = vrot.slane %v4740_v17, 4  ;;  %v5544_v17 = vld [vmem:[#allocation3 + $0x78] sm:$0xf] }
 0x3e2   : > { %4605 = vrot.lane.b32.xlu1 %v11536_v61, %s12904_s14  ;;  %v8793_v43 = vcombine.high %v4430_v44, %v4432_v59  ;;  %v4428_v37 = vsel %vm714_vm12, %v11385_v40, %v4427_v7  ;;  %v8792_v42 = vcombine.low %v4430_v44, %v4432_v59  ;;  %v5538_v44 = vld [vmem:[#allocation3 + $0x48] sm:$0xf] }
 0x3e3   : > { %4607 = vrot.lane.b32.xlu0 %v11534_v14, %s12904_s14  ;;  %7387 = vmatprep.subr.bf16.mxu0 %v8797_v31  ;;  %v4773_v14 = vsel %vm712_vm10, %v4757_v8, %v4758_v22  ;;  %v8789_v40 = vcombine.high %v4426_v39, %v4428_v37  ;;  %v8788_v11 = vcombine.low %v4426_v39, %v4428_v37  ;;  %v5537_v31 = vld [vmem:[#allocation3 + $0x40] sm:$0xff] }
 0x3e4   : > { %v4742_v6 = vpop.permute.xlu1 %4741  ;;  %7388 = vmatpush1.bf16.msra.mxu0 %v8796_v26  ;;  %7465 = vmatpush1.bf16.msra.mxu1 %v8852_v46  ;;  %v4744_v3 = vpop.permute.xlu0 %4743 }
 0x3e5   : > { %v4759_v21 = vrot.slane %v4742_v6, 4  ;;  %v4760_v61 = vrot.slane %v4744_v3, 4  ;;  %7389 = vmatprep.subr.bf16.mxu0 %v8793_v43  ;;  %v5539_v3 = vld [vmem:[#allocation3 + $0x50] sm:$0xff] }
 0x3e6   : > { %4953 = vrot.lane.b32.xlu1 %v11538_v9, %s12974_s24  ;;  %v4774_v9 = vsel %vm1053_vm13, %v4738_v47, %v4773_v14 }
 0x3e7   : > { %v4775_v52 = vsel %vm712_vm10, %v4759_v21, %v4760_v61  ;;  %4955 = vrot.lane.b32.xlu0 %v4922_v33, %s12974_s24  ;;  %v5540_v61 = vld [vmem:[#allocation3 + $0x58] sm:$0xf] }
 0x3e8   : > { %v5090_v55 = vpop.permute.xlu1 %5089  ;;  %7390 = vmatpush1.bf16.msra.mxu0 %v8792_v42  ;;  %v5092_v62 = vpop.permute.xlu0 %5091  ;;  %v4776_v53 = vsel %vm1053_vm13, %v4742_v6, %v4775_v52 }
 0x3e9   : > { %v5109_v19 = vrot.slane %v5090_v55, 4  ;;  %v5110_v16 = vrot.slane %v5092_v62, 4  ;;  %7391 = vmatprep.subr.bf16.mxu0 %v8789_v40  ;;  %v8849_v36 = vcombine.high %v4774_v9, %v4776_v53  ;;  %v8848_v12 = vcombine.low %v4774_v9, %v4776_v53  ;;  %v5534_v62 = vld [vmem:[#allocation3 + $0x28] sm:$0xf] }
 0x3ea   : > { %4957 = vrot.lane.b32.xlu1 %v11543_v25, %s12974_s24  ;;  %v5542_v25 = vld [vmem:[#allocation3 + $0x68] sm:$0xf] }
 0x3eb   : > { %4959 = vrot.lane.b32.xlu0 %v4924_v5, %s12974_s24  ;;  %v5125_v10 = vsel %vm712_vm10, %v5109_v19, %v5110_v16 }
 0x3ec   : > { %v5094_v20 = vpop.permute.xlu1 %5093  ;;  %7392 = vmatpush1.bf16.msra.mxu0 %v8788_v11  ;;  %v5096_v35 = vpop.permute.xlu0 %5095  ;;  %v5126_v56 = vsel %vm1408_vm0, %v5090_v55, %v5125_v10  ;;  %v5533_v55 = vld [vmem:[#allocation3 + $0x20] sm:$0xff] }
 0x3ed   : > { %v5111_v45 = vrot.slane %v5094_v20, 4  ;;  %v5112_v41 = vrot.slane %v5096_v35, 4  ;;  %7393 = vmatprep.subr.bf16.mxu0 %v8849_v36 }
 0x3ee   : > { %5585 = vrot.lane.b32.xlu1 %v5541_v63, %s12901_s28 }
 0x3ef   : > { %v5127_v24 = vsel %vm712_vm10, %v5111_v45, %v5112_v41  ;;  %5587 = vrot.lane.b32.xlu0 %v5542_v25, %s12901_s28  ;;  %v5536_v45 = vld [vmem:[#allocation3 + $0x38] sm:$0xf] }
 0x3f0   : > { %v4730_v18 = vpop.permute.xlu1 %4729  ;;  %7394 = vmatpush2.bf16.msra.mxu0 %v8848_v12  ;;  %v4732_v30 = vpop.permute.xlu0 %4731  ;;  %v5128_v57 = vsel %vm1408_vm0, %v5094_v20, %v5127_v24  ;;  %v5535_v20 = vld [vmem:[#allocation3 + $0x30] sm:$0xff]  ;;  %v5529_v24 = vld [vmem:[#allocation3] sm:$0xff] }
 0x3f1   : > { %v4753_v51 = vrot.slane %v4730_v18, 4  ;;  %v4754_v1 = vrot.slane %v4732_v30, 4  ;;  %v8912_v38 = vcombine.low %v5126_v56, %v5128_v57  ;;  %v8913_v47 = vcombine.high %v5126_v56, %v5128_v57 }
 0x3f2   : > { %5589 = vrot.lane.b32.xlu1 %v5543_v27, %s12901_s28 }
 0x3f3   : > { %5591 = vrot.lane.b32.xlu0 %v5544_v17, %s12901_s28  ;;  %7466 = vmatprep.subr.bf16.mxu1 %v8913_v47  ;;  %v4769_v59 = vsel %vm712_vm10, %v4753_v51, %v4754_v1  ;;  %v5531_v47 = vld [vmem:[#allocation3 + $0x10] sm:$0xff] }
 0x3f4   : > { %v4734_v28 = vpop.permute.xlu1 %4733  ;;  %7467 = vmatpush2.bf16.msra.mxu1 %v8912_v38  ;;  %v4736_v29 = vpop.permute.xlu0 %4735  ;;  %v4770_v22 = vsel %vm1053_vm13, %v4730_v18, %v4769_v59  ;;  %v5530_v18 = vld [vmem:[#allocation3 + $0x8] sm:$0xf] }
 0x3f5   : > { %v4755_v7 = vrot.slane %v4734_v28, 4  ;;  %v4756_v26 = vrot.slane %v4736_v29, 4  ;;  %v5532_v29 = vld [vmem:[#allocation3 + $0x18] sm:$0xf] }
 0x3f6   : > { %5577 = vrot.lane.b32.xlu1 %v5537_v31, %s12901_s28 }
 0x3f7   : > { %v4771_v46 = vsel %vm712_vm10, %v4755_v7, %v4756_v26  ;;  %5579 = vrot.lane.b32.xlu0 %v5538_v44, %s12901_s28  ;;  %v5158_v26 = vld [vmem:[#allocation3 + $0xec] sm:$0xf] }
 0x3f8   : > { %v5082_v23 = vpop.permute.xlu1 %5081  ;;  %v5084_v8 = vpop.permute.xlu0 %5083  ;;  %v4772_v43 = vsel %vm1053_vm13, %v4734_v28, %v4771_v46 }
 0x3f9   : > { %v5105_v37 = vrot.slane %v5082_v23, 4  ;;  %v5106_v6 = vrot.slane %v5084_v8, 4  ;;  %v8844_v33 = vcombine.low %v4770_v22, %v4772_v43  ;;  %v8845_v21 = vcombine.high %v4770_v22, %v4772_v43 }
 0x3fa   : > { %5581 = vrot.lane.b32.xlu1 %v5539_v3, %s12901_s28 }
 0x3fb   : > { %5583 = vrot.lane.b32.xlu0 %v5540_v61, %s12901_s28  ;;  %7395 = vmatprep.subr.bf16.mxu0 %v8845_v21  ;;  %v5121_v14 = vsel %vm712_vm10, %v5105_v37, %v5106_v6  ;;  %v5160_v37 = vld [vmem:[#allocation3 + $0xfc] sm:$0xf] }
 0x3fc   : > { %v5086_v39 = vpop.permute.xlu1 %5085  ;;  %7396 = vmatpush2.bf16.msra.mxu0 %v8844_v33  ;;  %v5088_v42 = vpop.permute.xlu0 %5087  ;;  %v5122_v16 = vsel %vm1408_vm0, %v5082_v23, %v5121_v14  ;;  %v11777_v23 = vld [vmem:[%s12858_s3 + $0x4] ss:$20 sps:$4 sm:$0xff]  }
 0x3fd   : > { %v5107_v52 = vrot.slane %v5086_v39, 4  ;;  %v5108_v40 = vrot.slane %v5088_v42, 4  ;;  %7409 = vmatprep.mubr.bf16.mxu0 %v11777_v23 }
 0x3fe   : > { %5569 = vrot.lane.b32.xlu1 %v5533_v55, %s12901_s28  ;;  %v11790_v55 = vld [vmem:[#allocation3 + $0x160] sm:$0xff] }
 0x3ff   : > { %v5123_v5 = vsel %vm712_vm10, %v5107_v52, %v5108_v40  ;;  %5571 = vrot.lane.b32.xlu0 %v5534_v62, %s12901_s28  ;;  %v5430_v62 = vld [vmem:[#allocation3 + $0x168] sm:$0xf] }
 0x400   : > { %v4722_v53 = vpop.permute.xlu1 %4721  ;;  %v4724_v19 = vpop.permute.xlu0 %4723  ;;  %v5124_v11 = vsel %vm1408_vm0, %v5086_v39, %v5123_v5 }
 0x401   : > { %v4749_v9 = vrot.slane %v4722_v53, 4  ;;  %v4750_v36 = vrot.slane %v4724_v19, 4  ;;  %v8908_v35 = vcombine.low %v5122_v16, %v5124_v11  ;;  %v8909_v10 = vcombine.high %v5122_v16, %v5124_v11 }
 0x402   : > { %5573 = vrot.lane.b32.xlu1 %v5535_v20, %s12901_s28 }
 0x403   : > { %5575 = vrot.lane.b32.xlu0 %v5536_v45, %s12901_s28  ;;  %7468 = vmatprep.subr.bf16.mxu1 %v8909_v10  ;;  %v4765_v34 = vsel %vm712_vm10, %v4749_v9, %v4750_v36  ;;  %v11798_v36 = vld [vmem:[#allocation3 + $0x170] sm:$0xff]  ;;  %v5432_v10 = vld [vmem:[#allocation3 + $0x178] sm:$0xf] }
 0x404   : > { %v4726_v41 = vpop.permute.xlu1 %4725  ;;  %7469 = vmatpush2.bf16.msra.mxu1 %v8908_v35  ;;  %v4728_v63 = vpop.permute.xlu0 %4727  ;;  %v4766_v51 = vsel %vm1053_vm13, %v4722_v53, %v4765_v34 }
 0x405   : > { %v4751_v12 = vrot.slane %v4726_v41, 4  ;;  %v4752_v25 = vrot.slane %v4728_v63, 4  ;;  %v5154_v63 = vld [vmem:[#allocation3 + $0xcc] sm:$0xf] }
 0x406   : > { %5561 = vrot.lane.b32.xlu1 %v5529_v24, %s12901_s28 }
 0x407   : > { %v4767_v30 = vsel %vm712_vm10, %v4751_v12, %v4752_v25  ;;  %5563 = vrot.lane.b32.xlu0 %v5530_v18, %s12901_s28 }
 0x408   : > { %v5074_v56 = vpop.permute.xlu1 %5073  ;;  %v5076_v57 = vpop.permute.xlu0 %5075  ;;  %v4768_v1 = vsel %vm1053_vm13, %v4726_v41, %v4767_v30 }
 0x409   : > { %v5101_v27 = vrot.slane %v5074_v56, 4  ;;  %v5102_v38 = vrot.slane %v5076_v57, 4  ;;  %v8840_v17 = vcombine.low %v4766_v51, %v4768_v1  ;;  %v8841_v28 = vcombine.high %v4766_v51, %v4768_v1 }
 0x40a   : > { %5565 = vrot.lane.b32.xlu1 %v5531_v47, %s12901_s28 }
 0x40b   : > { %5567 = vrot.lane.b32.xlu0 %v5532_v29, %s12901_s28  ;;  %7397 = vmatprep.subr.bf16.mxu0 %v8841_v28  ;;  %v5117_v31 = vsel %vm712_vm10, %v5101_v27, %v5102_v38  ;;  %s9398_s28 = smov [#allocation7]  }
 0x40c   : > { %v5078_v59 = vpop.permute.xlu1 %5077  ;;  %7398 = vmatpush2.bf16.msra.mxu0 %v8840_v17  ;;  %v5080_v7 = vpop.permute.xlu0 %5079  ;;  %v5118_v6 = vsel %vm1408_vm0, %v5074_v56, %v5117_v31  ;;  %v5156_v56 = vld [vmem:[#allocation3 + $0xdc] sm:$0xf]  ;;  %s9324_s14 = sshll.u32 %s9398_s28, 4  ;;  %s9325_s14 = int_to_ptr.vmem [resolvable:$false] %s9324_s14 }
 0x40d   : > { %v5103_v44 = vrot.slane %v5078_v59, 4  ;;  %v5104_v46 = vrot.slane %v5080_v7, 4  ;;  %v11814_v7 = vld [vmem:[#allocation3 + $0x140] sm:$0xff]  ;;  %s9326_s29 = scalar_lea.vmem %s9325_s14, 8192 }
 0x40e   : > { %5201 = vrot.lane.b32.xlu1 %v11665_v48, %s12975_s23 }
 0x40f   : > { %v5119_v8 = vsel %vm712_vm10, %v5103_v44, %v5104_v46  ;;  %5203 = vrot.lane.b32.xlu0 %v5158_v26, %s12975_s23  ;;  %v5426_v26 = vld [vmem:[#allocation3 + $0x148] sm:$0xf] }
 0x410   : > { %v4714_v22 = vpop.permute.xlu1 %4713  ;;  %v4716_v43 = vpop.permute.xlu0 %4715  ;;  %v5120_v3 = vsel %vm1408_vm0, %v5078_v59, %v5119_v8 }
 0x411   : > { %v4745_v33 = vrot.slane %v4714_v22, 4  ;;  %v4746_v21 = vrot.slane %v4716_v43, 4  ;;  %v8904_v61 = vcombine.low %v5118_v6, %v5120_v3  ;;  %v8905_v39 = vcombine.high %v5118_v6, %v5120_v3 }
 0x412   : > { %5205 = vrot.lane.b32.xlu1 %v11667_v4, %s12975_s23 }
 0x413   : > { %5207 = vrot.lane.b32.xlu0 %v5160_v37, %s12975_s23  ;;  %7470 = vmatprep.subr.bf16.mxu1 %v8905_v39  ;;  %v4761_v14 = vsel %vm712_vm10, %v4745_v33, %v4746_v21  ;;  %v5428_v33 = vld [vmem:[#allocation3 + $0x158] sm:$0xf] }
 0x414   : > { %v4718_v48 = vpop.permute.xlu1 %4717  ;;  %7471 = vmatpush2.bf16.msra.mxu1 %v8904_v61  ;;  %v4720_v42 = vpop.permute.xlu0 %4719  ;;  %v4762_v19 = vsel %vm1053_vm13, %v4714_v22, %v4761_v14  ;;  %v11822_v22 = vld [vmem:[#allocation3 + $0x150] sm:$0xff]  ;;  %v5150_v61 = vld [vmem:[#allocation3 + $0xac] sm:$0xf] }
 0x415   : > { %v4747_v52 = vrot.slane %v4718_v48, 4  ;;  %v4748_v40 = vrot.slane %v4720_v42, 4 }
 0x416   : > { %5473 = vrot.lane.b32.xlu1 %v11790_v55, %s9390_s20 }
 0x417   : > { %v4763_v5 = vsel %vm712_vm10, %v4747_v52, %v4748_v40  ;;  %5475 = vrot.lane.b32.xlu0 %v5430_v62, %s9390_s20  ;;  %v5152_v62 = vld [vmem:[#allocation3 + $0xbc] sm:$0xf] }
 0x418   : > { %v5066_v4 = vpop.permute.xlu1 %5065  ;;  %v5068_v53 = vpop.permute.xlu0 %5067  ;;  %v4764_v16 = vsel %vm1053_vm13, %v4718_v48, %v4763_v5 }
 0x419   : > { %v5097_v11 = vrot.slane %v5066_v4, 4  ;;  %v5098_v9 = vrot.slane %v5068_v53, 4  ;;  %v8836_v20 = vcombine.low %v4762_v19, %v4764_v16  ;;  %v8837_v35 = vcombine.high %v4762_v19, %v4764_v16 }
 0x41a   : > { %5477 = vrot.lane.b32.xlu1 %v11798_v36, %s9390_s20 }
 0x41b   : > { %5479 = vrot.lane.b32.xlu0 %v5432_v10, %s9390_s20  ;;  %7399 = vmatprep.subr.bf16.mxu0 %v8837_v35  ;;  %v5113_v34 = vsel %vm712_vm10, %v5097_v11, %v5098_v9  ;;  %v11837_v10 = vld [vmem:[#allocation3 + $0x120] sm:$0xff] }
 0x41c   : > { %v5070_v45 = vpop.permute.xlu1 %5069  ;;  %7400 = vmatpush2.bf16.msra.mxu0 %v8836_v20  ;;  %v5072_v41 = vpop.permute.xlu0 %5071  ;;  %v5114_v57 = vsel %vm1408_vm0, %v5066_v4, %v5113_v34 }
 0x41d   : > { %v5099_v12 = vrot.slane %v5070_v45, 4  ;;  %v5100_v25 = vrot.slane %v5072_v41, 4 }
 0x41e   : > { %5193 = vrot.lane.b32.xlu1 %v11638_v0, %s12975_s23 }
 0x41f   : > { %v5115_v24 = vsel %vm712_vm10, %v5099_v12, %v5100_v25  ;;  %5195 = vrot.lane.b32.xlu0 %v5154_v63, %s12975_s23  ;;  %v5422_v63 = vld [vmem:[#allocation3 + $0x128] sm:$0xf]  ;;  %v11844_v25 = vld [vmem:[#allocation3 + $0x130] sm:$0xff] }
 0x420   : > { %v4626_v18 = vpop.permute.xlu1 %4625  ;;  %v4628_v30 = vpop.permute.xlu0 %4627  ;;  %v5116_v51 = vsel %vm1408_vm0, %v5070_v45, %v5115_v24 }
 0x421   : > { %v4645_v1 = vrot.slane %v4626_v18, 4  ;;  %v4646_v27 = vrot.slane %v4628_v30, 4  ;;  %v8900_v38 = vcombine.low %v5114_v57, %v5116_v51  ;;  %v8901_v47 = vcombine.high %v5114_v57, %v5116_v51  ;;  %v5424_v57 = vld [vmem:[#allocation3 + $0x138] sm:$0xf] }
 0x422   : > { %5197 = vrot.lane.b32.xlu1 %v11640_v15, %s12975_s23 }
 0x423   : > { %5199 = vrot.lane.b32.xlu0 %v5156_v56, %s12975_s23  ;;  %7472 = vmatprep.subr.bf16.mxu1 %v8901_v47  ;;  %v4661_v28 = vsel %vm712_vm10, %v4645_v1, %v4646_v27 }
 0x424   : > { %v4630_v0 = vpop.permute.xlu1 %4629  ;;  %7473 = vmatpush2.bf16.msra.mxu1 %v8900_v38  ;;  %v4632_v17 = vpop.permute.xlu0 %4631  ;;  %v4662_v46 = vsel %vm940_vm14, %v4626_v18, %v4661_v28  ;;  %v5146_v38 = vld [vmem:[#allocation3 + $0x8c] sm:$0xf] }
 0x425   : > { %v4647_v29 = vrot.slane %v4630_v0, 4  ;;  %v4648_v59 = vrot.slane %v4632_v17, 4 }
 0x426   : > { %5465 = vrot.lane.b32.xlu1 %v11814_v7, %s9390_s20 }
 0x427   : > { %v4663_v31 = vsel %vm712_vm10, %v4647_v29, %v4648_v59  ;;  %5467 = vrot.lane.b32.xlu0 %v5426_v26, %s9390_s20  ;;  %v5148_v26 = vld [vmem:[#allocation3 + $0x9c] sm:$0xf] }
 0x428   : > { %v4978_v15 = vpop.permute.xlu1 %4977  ;;  %v4980_v44 = vpop.permute.xlu0 %4979  ;;  %v4664_v8 = vsel %vm940_vm14, %v4630_v0, %v4663_v31 }
 0x429   : > { %v8832_v43 = vcombine.low %v4662_v46, %v4664_v8  ;;  %v8833_v37 = vcombine.high %v4662_v46, %v4664_v8  ;;  %v4997_v6 = vrot.slane %v4978_v15, 4  ;;  %v4998_v3 = vrot.slane %v4980_v44, 4 }
 0x42a   : > { %5469 = vrot.lane.b32.xlu1 %v11822_v22, %s9390_s20 }
 0x42b   : > { %5471 = vrot.lane.b32.xlu0 %v5428_v33, %s9390_s20  ;;  %7401 = vmatprep.subr.bf16.mxu0 %v8833_v37  ;;  %v5013_v42 = vsel %vm712_vm10, %v4997_v6, %v4998_v3  ;;  %v11861_v33 = vld [vmem:[#allocation3 + $0x100] sm:$0xff] }
 0x42c   : > { %v4982_v21 = vpop.permute.xlu1 %4981  ;;  %7402 = vmatpush2.bf16.msra.mxu0 %v8832_v43  ;;  %v4984_v48 = vpop.permute.xlu0 %4983  ;;  %v5014_v4 = vsel %vm1295_vm1, %v4978_v15, %v5013_v42 }
 0x42d   : > { %v4999_v39 = vrot.slane %v4982_v21, 4  ;;  %v5000_v14 = vrot.slane %v4984_v48, 4 }
 0x42e   : > { %5185 = vrot.lane.b32.xlu1 %v11601_v60, %s12975_s23 }
 0x42f   : > { %5187 = vrot.lane.b32.xlu0 %v5150_v61, %s12975_s23  ;;  %v5015_v52 = vsel %vm712_vm10, %v4999_v39, %v5000_v14  ;;  %v5418_v39 = vld [vmem:[#allocation3 + $0x108] sm:$0xf]  ;;  %v11868_v14 = vld [vmem:[#allocation3 + $0x110] sm:$0xff] }
 0x430   : > { %v4618_v40 = vpop.permute.xlu1 %4617  ;;  %v4620_v5 = vpop.permute.xlu0 %4619  ;;  %v5016_v53 = vsel %vm1295_vm1, %v4982_v21, %v5015_v52 }
 0x431   : > { %v4641_v19 = vrot.slane %v4618_v40, 4  ;;  %v4642_v16 = vrot.slane %v4620_v5, 4  ;;  %v8896_v11 = vcombine.low %v5014_v4, %v5016_v53  ;;  %v8897_v9 = vcombine.high %v5014_v4, %v5016_v53  ;;  %v5420_v4 = vld [vmem:[#allocation3 + $0x118] sm:$0xf] }
 0x432   : > { %5189 = vrot.lane.b32.xlu1 %v11603_v2, %s12975_s23 }
 0x433   : > { %5191 = vrot.lane.b32.xlu0 %v5152_v62, %s12975_s23  ;;  %7474 = vmatprep.subr.bf16.mxu1 %v8897_v9  ;;  %v4657_v45 = vsel %vm712_vm10, %v4641_v19, %v4642_v16 }
 0x434   : > { %v4622_v60 = vpop.permute.xlu1 %4621  ;;  %7475 = vmatpush2.bf16.msra.mxu1 %v8896_v11  ;;  %v4658_v24 = vsel %vm940_vm14, %v4618_v40, %v4657_v45  ;;  %v5894_v11 = vld [vmem:[#allocation3 + $0xec] sm:$0xf] }
 0x435   : > { %v4643_v20 = vrot.slane %v4622_v60, 4  ;;  %v4624_v35 = vpop.permute.xlu0 %4623 }
 0x436   : > { %v4644_v41 = vrot.slane %v4624_v35, 4  ;;  %5457 = vrot.lane.b32.xlu1 %v11837_v10, %s9390_s20 }
 0x437   : > { %5459 = vrot.lane.b32.xlu0 %v5422_v63, %s9390_s20  ;;  %v5896_v63 = vld [vmem:[#allocation3 + $0xfc] sm:$0xf] }
 0x438   : > { %v4659_v2 = vsel %vm712_vm10, %v4643_v20, %v4644_v41  ;;  %v4970_v34 = vpop.permute.xlu1 %4969 }
 0x439   : > { %v4972_v12 = vpop.permute.xlu0 %4971  ;;  %v4660_v18 = vsel %vm940_vm14, %v4622_v60, %v4659_v2  ;;  %v4993_v30 = vrot.slane %v4970_v34, 4 }
 0x43a   : > { %v4994_v56 = vrot.slane %v4972_v12, 4  ;;  %5461 = vrot.lane.b32.xlu1 %v11844_v25, %s9390_s20  ;;  %v8828_v51 = vcombine.low %v4658_v24, %v4660_v18  ;;  %v8829_v1 = vcombine.high %v4658_v24, %v4660_v18 }
 0x43b   : > { %5463 = vrot.lane.b32.xlu0 %v5424_v57, %s9390_s20 }
 0x43c   : > { %7403 = vmatprep.subr.bf16.mxu0 %v8829_v1  ;;  %v4974_v27 = vpop.permute.xlu1 %4973  ;;  %v5009_v17 = vsel %vm712_vm10, %v4993_v30, %v4994_v56 }
 0x43d   : > { %v4995_v47 = vrot.slane %v4974_v27, 4  ;;  %7404 = vmatpush2.bf16.msra.mxu0 %v8828_v51  ;;  %v4976_v0 = vpop.permute.xlu0 %4975  ;;  %v5010_v15 = vsel %vm1295_vm1, %v4970_v34, %v5009_v17 }
 0x43e   : > { %v4996_v28 = vrot.slane %v4976_v0, 4  ;;  %5177 = vrot.lane.b32.xlu1 %v11545_v54, %s12975_s23 }
 0x43f   : > { %5179 = vrot.lane.b32.xlu0 %v5146_v38, %s12975_s23  ;;  %v5766_v38 = vld [vmem:[#allocation3 + $0x168] sm:$0xf] }
 0x440   : > { %v5011_v29 = vsel %vm712_vm10, %v4995_v47, %v4996_v28  ;;  %v4610_v59 = vpop.permute.xlu1 %4609 }
 0x441   : > { %v4612_v31 = vpop.permute.xlu0 %4611  ;;  %v5012_v44 = vsel %vm1295_vm1, %v4974_v27, %v5011_v29  ;;  %v4637_v46 = vrot.slane %v4610_v59, 4 }
 0x442   : > { %v4638_v8 = vrot.slane %v4612_v31, 4  ;;  %5181 = vrot.lane.b32.xlu1 %v11547_v50, %s12975_s23  ;;  %v8892_v43 = vcombine.low %v5010_v15, %v5012_v44  ;;  %v8893_v37 = vcombine.high %v5010_v15, %v5012_v44  ;;  %v5768_v31 = vld [vmem:[#allocation3 + $0x178] sm:$0xf]  ;;  %v5890_v44 = vld [vmem:[#allocation3 + $0xcc] sm:$0xf] }
 0x443   : > { %5183 = vrot.lane.b32.xlu0 %v5148_v26, %s12975_s23 }
 0x444   : > { %7476 = vmatprep.subr.bf16.mxu1 %v8893_v37  ;;  %v4614_v54 = vpop.permute.xlu1 %4613  ;;  %v4653_v21 = vsel %vm712_vm10, %v4637_v46, %v4638_v8  ;;  %v9137_v46 = vld [vmem:[%s12858_s3] ss:$20 sps:$4 sm:$0xff]  }
 0x445   : > { %v4639_v6 = vrot.slane %v4614_v54, 4  ;;  %7477 = vmatpush2.bf16.msra.mxu1 %v8892_v43  ;;  %v4616_v3 = vpop.permute.xlu0 %4615  ;;  %v4654_v52 = vsel %vm940_vm14, %v4610_v59, %v4653_v21  ;;  %v9140_v37 = vld [vmem:[%s12858_s3 + $0x2c] ss:$20 sps:$4 sm:$0xff]   ;;  %v5892_v21 = vld [vmem:[#allocation3 + $0xdc] sm:$0xf] }
 0x446   : > { %v4640_v61 = vrot.slane %v4616_v3, 4  ;;  %5449 = vrot.lane.b32.xlu1 %v11861_v33, %s9390_s20 }
 0x447   : > { %5451 = vrot.lane.b32.xlu0 %v5418_v39, %s9390_s20 }
 0x448   : > { %v4655_v50 = vsel %vm712_vm10, %v4639_v6, %v4640_v61  ;;  %v4962_v48 = vpop.permute.xlu1 %4961 }
 0x449   : > { %v4964_v42 = vpop.permute.xlu0 %4963  ;;  %v4656_v40 = vsel %vm940_vm14, %v4614_v54, %v4655_v50  ;;  %v4989_v62 = vrot.slane %v4962_v48, 4 }
 0x44a   : > { %v4990_v5 = vrot.slane %v4964_v42, 4  ;;  %5453 = vrot.lane.b32.xlu1 %v11868_v14, %s9390_s20  ;;  %v8824_v53 = vcombine.low %v4654_v52, %v4656_v40  ;;  %v8825_v19 = vcombine.high %v4654_v52, %v4656_v40  ;;  %v9261_v40 = vld [vmem:[#allocation3 + $0xd4] sm:$0xff] }
 0x44b   : > { %5455 = vrot.lane.b32.xlu0 %v5420_v4, %s9390_s20  ;;  %v9142_v4 = vld [vmem:[%s12858_s3 + $0x28] ss:$20 sps:$4 sm:$0xff]   ;;  %s13009_s20 = sshll.u32 %s9547_s11, 8 }
 0x44c   : > { %7405 = vmatprep.subr.bf16.mxu0 %v8825_v19  ;;  %v4966_v16 = vpop.permute.xlu1 %4965  ;;  %v5005_v20 = vsel %vm712_vm10, %v4989_v62, %v4990_v5  ;;  %v9134_v5 = vld [vmem:[%s12858_s3 + $0x8] ss:$20 sps:$4 sm:$0xff]   ;;  %s12715_s18 = scalar_lea.vmem [#allocation7], %s13009_s20 }
 0x44d   : > { %v4991_v9 = vrot.slane %v4966_v16, 4  ;;  %7406 = vmatpush2.bf16.msra.mxu0 %v8824_v53  ;;  %v4968_v60 = vpop.permute.xlu0 %4967  ;;  %v5006_v34 = vsel %vm1295_vm1, %v4962_v48, %v5005_v20  ;;  %v5762_v20 = vld [vmem:[#allocation3 + $0x148] sm:$0xf]  ;;  %s8401_s26 = sshll.u32 %s12715_s18, 4  ;;  %s12807_s26 = int_to_ptr.vmem [resolvable:$true] %s8401_s26 }
 0x44e   : > { %v4992_v35 = vrot.slane %v4968_v60, 4  ;;  %5937 = vrot.lane.b32.xlu1 %v11660_v32, %s9394_s17  ;;  %p9327_p5 = scmp.lt.s32.totalorder %s12807_s26, %s9325_s14 }
 0x44f   : > { %5939 = vrot.lane.b32.xlu0 %v5894_v11, %s9394_s17  ;;  %v9150_v11 = vld [vmem:[%s12858_s3 + $0x34] ss:$20 sps:$4 sm:$0xff]  }
 0x450   : > { %v5007_v45 = vsel %vm712_vm10, %v4991_v9, %v4992_v35  ;;  %v4602_v41 = vpop.permute.xlu1 %4601 }
 0x451   : > { %v4604_v2 = vpop.permute.xlu0 %4603  ;;  %v5008_v12 = vsel %vm1295_vm1, %v4966_v16, %v5007_v45  ;;  %v4633_v18 = vrot.slane %v4602_v41, 4  ;;  %v9143_v16 = vld [vmem:[%s12858_s3 + $0x54] ss:$20 sps:$4 sm:$0xff]  }
 0x452   : > { %v4634_v24 = vrot.slane %v4604_v2, 4  ;;  %5941 = vrot.lane.b32.xlu1 %v11662_v58, %s9394_s17  ;;  %v8888_v30 = vcombine.low %v5006_v34, %v5008_v12  ;;  %v8889_v56 = vcombine.high %v5006_v34, %v5008_v12 }
 0x453   : > { %5943 = vrot.lane.b32.xlu0 %v5896_v63, %s9394_s17 }
 0x454   : > { %7478 = vmatprep.subr.bf16.mxu1 %v8889_v56  ;;  %v4606_v32 = vpop.permute.xlu1 %4605  ;;  %v4649_v1 = vsel %vm712_vm10, %v4633_v18, %v4634_v24  ;;  %v5764_v18 = vld [vmem:[#allocation3 + $0x158] sm:$0xf]  ;;  %v5886_v56 = vld [vmem:[#allocation3 + $0xac] sm:$0xf] }
 0x455   : > { %7479 = vmatpush2.bf16.msra.mxu1 %v8888_v30  ;;  %v4608_v57 = vpop.permute.xlu0 %4607  ;;  %v4635_v51 = vrot.slane %v4606_v32, 4  ;;  %v4650_v0 = vsel %vm940_vm14, %v4602_v41, %v4649_v1 }
 0x456   : > { %v4636_v27 = vrot.slane %v4608_v57, 4  ;;  %5809 = vrot.lane.b32.xlu1 %v11790_v55, %s9393_s16  ;;  %v9152_v57 = vld [vmem:[%s12858_s3 + $0x30] ss:$20 sps:$4 sm:$0xff]  }
 0x457   : > { %5811 = vrot.lane.b32.xlu0 %v5766_v38, %s9393_s16 }
 0x458   : > { %v4651_v58 = vsel %vm712_vm10, %v4635_v51, %v4636_v27  ;;  %v4954_v47 = vpop.permute.xlu1 %4953  ;;  %v9154_v27 = vld [vmem:[%s12858_s3 + $0x5c] ss:$20 sps:$4 sm:$0xff]  }
 0x459   : > { %v4652_v17 = vsel %vm940_vm14, %v4606_v32, %v4651_v58  ;;  %v4956_v28 = vpop.permute.xlu0 %4955  ;;  %v4985_v26 = vrot.slane %v4954_v47, 4  ;;  %v9145_v32 = vld [vmem:[%s12858_s3 + $0x50] ss:$20 sps:$4 sm:$0xff]  }
 0x45a   : > { %v8820_v29 = vcombine.low %v4650_v0, %v4652_v17  ;;  %v4986_v59 = vrot.slane %v4956_v28, 4  ;;  %5813 = vrot.lane.b32.xlu1 %v11798_v36, %s9393_s16  ;;  %v8821_v15 = vcombine.high %v4650_v0, %v4652_v17  ;;  %v5888_v28 = vld [vmem:[#allocation3 + $0xbc] sm:$0xf] }
 0x45b   : > { %5815 = vrot.lane.b32.xlu0 %v5768_v31, %s9393_s16 }
 0x45c   : > { %7407 = vmatprep.subr.bf16.mxu0 %v8821_v15  ;;  %v4958_v55 = vpop.permute.xlu1 %4957  ;;  %v5001_v54 = vsel %vm712_vm10, %v4985_v26, %v4986_v59 }
 0x45d   : > { %v4960_v8 = vpop.permute.xlu0 %4959  ;;  %7408 = vmatpush2.bf16.msra.mxu0 %v8820_v29  ;;  %v4987_v43 = vrot.slane %v4958_v55, 4  ;;  %v5002_v61 = vsel %vm1295_vm1, %v4954_v47, %v5001_v54  ;;  %v9262_v47 = vld [vmem:[#allocation3 + $0xa4] sm:$0xff] }
 0x45e   : > { %v4988_v36 = vrot.slane %v4960_v8, 4  ;;  %5929 = vrot.lane.b32.xlu1 %v11634_v13, %s9394_s17 }
 0x45f   : > { %5931 = vrot.lane.b32.xlu0 %v5890_v44, %s9394_s17  ;;  %v9263_v44 = vld [vmem:[#allocation3 + $0xb4] sm:$0xff] }
 0x460   : > { %v5003_v6 = vsel %vm712_vm10, %v4987_v43, %v4988_v36  ;;  %v5586_v3 = vpop.permute.xlu1 %5585  ;;  %7410 = vmatmul.mubr.bf16.vlgmr.msra.gmra.mxu0 %v9137_v46  ;;  %v9148_v43 = vld [vmem:[%s12858_s3 + $0x78] ss:$20 sps:$4 sm:$0xff]  }
 0x461   : > { %v5004_v39 = vsel %vm1295_vm1, %v4958_v55, %v5003_v6  ;;  %v5588_v50 = vpop.permute.xlu0 %5587  ;;  %7419 = vmatprep.mubr.bf16.mxu0 %v9140_v37  ;;  %v5605_v52 = vrot.slane %v5586_v3, 4  ;;  %v9156_v37 = vld [vmem:[%s12858_s3 + $0x58] ss:$20 sps:$4 sm:$0xff]  }
 0x462   : > { %v8884_v48 = vcombine.low %v5002_v61, %v5004_v39  ;;  %v5606_v42 = vrot.slane %v5588_v50, 4  ;;  %5933 = vrot.lane.b32.xlu1 %v9261_v40, %s9394_s17  ;;  %v8885_v13 = vcombine.high %v5002_v61, %v5004_v39  ;;  %v9158_v6 = vld [vmem:[%s12858_s3 + $0x84] ss:$20 sps:$4 sm:$0xff]   ;;  %v5758_v61 = vld [vmem:[#allocation3 + $0x128] sm:$0xf] }
 0x463   : > { %5935 = vrot.lane.b32.xlu0 %v5892_v21, %s9394_s17 }
 0x464   : > { %7480 = vmatprep.subr.bf16.mxu1 %v8885_v13  ;;  %v5590_v62 = vpop.permute.xlu1 %5589  ;;  %v5621_v9 = vsel %vm712_vm10, %v5605_v52, %v5606_v42 }
 0x465   : > { %v5592_v53 = vpop.permute.xlu0 %5591  ;;  %7481 = vmatpush2.bf16.msra.mxu1 %v8884_v48  ;;  %v5607_v19 = vrot.slane %v5590_v62, 4  ;;  %v5622_v41 = vsel %vm827_vm11, %v5586_v3, %v5621_v9 }
 0x466   : > { %v5608_v60 = vrot.slane %v5592_v53, 4  ;;  %5801 = vrot.lane.b32.xlu1 %v11814_v7, %s9393_s16  ;;  %v5882_v53 = vld [vmem:[#allocation3 + $0x8c] sm:$0xf] }
 0x467   : > { %5803 = vrot.lane.b32.xlu0 %v5762_v20, %s9393_s16  ;;  %v9264_v20 = vld [vmem:[#allocation3 + $0x84] sm:$0xff] }
 0x468   : > { %v5623_v35 = vsel %vm712_vm10, %v5607_v19, %v5608_v60  ;;  %v5578_v45 = vpop.permute.xlu1 %5577  ;;  %7483 = vmatmul.mubr.bf16.vlgmr.msra.gmra.mxu1 %v9134_v5  ;;  %7420 = vmatmul.mubr.bf16.gmra.mxu0 %v9142_v4  ;;  %v5760_v5 = vld [vmem:[#allocation3 + $0x138] sm:$0xf]  ;;  %v9160_v19 = vld [vmem:[%s12858_s3 + $0x80] ss:$20 sps:$4 sm:$0xff]  }
 0x469   : > { %v5624_v63 = vsel %vm827_vm11, %v5590_v62, %v5623_v35  ;;  %v5580_v2 = vpop.permute.xlu0 %5579  ;;  %7429 = vmatprep.mubr.bf16.mxu0 %v9143_v16  ;;  %7492 = vmatprep.mubr.bf16.mxu1 %v9150_v11  ;;  %v5601_v24 = vrot.slane %v5578_v45, 4 }
 0x46a   : > { %v8818_v34 = vcombine.low %v5622_v41, %v5624_v63  ;;  %v5602_v12 = vrot.slane %v5580_v2, 4  ;;  %5805 = vrot.lane.b32.xlu1 %v11822_v22, %s9393_s16  ;;  %v8819_v7 = vcombine.high %v5622_v41, %v5624_v63  ;;  %v9146_v22 = vld [vmem:[%s12858_s3 + $0x7c] ss:$20 sps:$4 sm:$0xff]  }
 0x46b   : > { %5807 = vrot.lane.b32.xlu0 %v5764_v18, %s9393_s16  ;;  %v9265_v18 = vld [vmem:[#allocation3 + $0x94] sm:$0xff] }
 0x46c   : > { %7596 = vmatprep.subr.bf16.mxu1 %v8819_v7  ;;  %v5582_v30 = vpop.permute.xlu1 %5581  ;;  %v5617_v38 = vsel %vm712_vm10, %v5601_v24, %v5602_v12 }
 0x46d   : > { %v5584_v51 = vpop.permute.xlu0 %5583  ;;  %7597 = vmatpush1.bf16.msra.mxu1 %v8818_v34  ;;  %v5603_v1 = vrot.slane %v5582_v30, 4  ;;  %v5618_v29 = vsel %vm827_vm11, %v5578_v45, %v5617_v38  ;;  %v5884_v45 = vld [vmem:[#allocation3 + $0x9c] sm:$0xf] }
 0x46e   : > { %v5604_v58 = vrot.slane %v5584_v51, 4  ;;  %5921 = vrot.lane.b32.xlu1 %v9262_v47, %s9394_s17 }
 0x46f   : > { %5923 = vrot.lane.b32.xlu0 %v5886_v56, %s9394_s17 }
 0x470   : > { %v5619_v0 = vsel %vm712_vm10, %v5603_v1, %v5604_v58  ;;  %v5570_v17 = vpop.permute.xlu1 %5569  ;;  %7430 = vmatmul.mubr.bf16.gmra.mxu0 %v9145_v32  ;;  %7493 = vmatmul.mubr.bf16.gmra.mxu1 %v9152_v57  ;;  %v5754_v1 = vld [vmem:[#allocation3 + $0x108] sm:$0xf] }
 0x471   : > { %v5620_v59 = vsel %vm827_vm11, %v5582_v30, %v5619_v0  ;;  %v5572_v26 = vpop.permute.xlu0 %5571  ;;  %7439 = vmatprep.mubr.bf16.mxu0 %v9146_v22  ;;  %7502 = vmatprep.mubr.bf16.mxu1 %v9154_v27  ;;  %v5597_v55 = vrot.slane %v5570_v17, 4 }
 0x472   : > { %v8814_v31 = vcombine.low %v5618_v29, %v5620_v59  ;;  %v5598_v15 = vrot.slane %v5572_v26, 4  ;;  %5925 = vrot.lane.b32.xlu1 %v9263_v44, %s9394_s17  ;;  %v8815_v46 = vcombine.high %v5618_v29, %v5620_v59  ;;  %v5654_v44 = vld [vmem:[#allocation3 + $0xe8] sm:$0xf] }
 0x473   : > { %5927 = vrot.lane.b32.xlu0 %v5888_v28, %s9394_s17  ;;  %v5756_v28 = vld [vmem:[#allocation3 + $0x118] sm:$0xf] }
 0x474   : > { %7598 = vmatprep.subr.bf16.mxu1 %v8815_v46  ;;  %v5574_v8 = vpop.permute.xlu1 %5573  ;;  %v5613_v3 = vsel %vm712_vm10, %v5597_v55, %v5598_v15 }
 0x475   : > { %v5576_v54 = vpop.permute.xlu0 %5575  ;;  %7599 = vmatpush1.bf16.msra.mxu1 %v8814_v31  ;;  %v5599_v36 = vrot.slane %v5574_v8, 4  ;;  %v5614_v48 = vsel %vm827_vm11, %v5570_v17, %v5613_v3  ;;  %v5653_v31 = vld [vmem:[#allocation3 + $0xe0] sm:$0xff] }
 0x476   : > { %v5600_v21 = vrot.slane %v5576_v54, 4  ;;  %5793 = vrot.lane.b32.xlu1 %v11837_v10, %s9393_s16  ;;  %v5655_v54 = vld [vmem:[#allocation3 + $0xf0] sm:$0xff] }
 0x477   : > { %5795 = vrot.lane.b32.xlu0 %v5758_v61, %s9393_s16 }
 0x478   : > { %v5615_v39 = vsel %vm712_vm10, %v5599_v36, %v5600_v21  ;;  %v5562_v50 = vpop.permute.xlu1 %5561  ;;  %7440 = vmatmul.mubr.bf16.gmra.mxu0 %v9148_v43  ;;  %7503 = vmatmul.mubr.bf16.gmra.mxu1 %v9156_v37  ;;  %v5656_v21 = vld [vmem:[#allocation3 + $0xf8] sm:$0xf] }
 0x479   : > { %v5616_v42 = vsel %vm827_vm11, %v5574_v8, %v5615_v39  ;;  %v5564_v52 = vpop.permute.xlu0 %5563  ;;  %7555 = vmatprep.mubr.bf16.mxu0 %v12969_v49  ;;  %7512 = vmatprep.mubr.bf16.mxu1 %v9158_v6  ;;  %v5593_v62 = vrot.slane %v5562_v50, 4 }
 0x47a   : > { %v8810_v40 = vcombine.low %v5614_v48, %v5616_v42  ;;  %v5594_v13 = vrot.slane %v5564_v52, 4  ;;  %5797 = vrot.lane.b32.xlu1 %v11844_v25, %s9393_s16  ;;  %v8811_v10 = vcombine.high %v5614_v48, %v5616_v42  ;;  %v5649_v42 = vld [vmem:[#allocation3 + $0xc0] sm:$0xff] }
 0x47b   : > { %5799 = vrot.lane.b32.xlu0 %v5760_v5, %s9393_s16 }
 0x47c   : > { %7600 = vmatprep.subr.bf16.mxu1 %v8811_v10  ;;  %v5566_v4 = vpop.permute.xlu1 %5565  ;;  %v5609_v9 = vsel %vm712_vm10, %v5593_v62, %v5594_v13  ;;  %v5650_v13 = vld [vmem:[#allocation3 + $0xc8] sm:$0xf] }
 0x47d   : > { %v5568_v16 = vpop.permute.xlu0 %5567  ;;  %7601 = vmatpush1.bf16.msra.mxu1 %v8810_v40  ;;  %v5595_v11 = vrot.slane %v5566_v4, 4  ;;  %v5610_v41 = vsel %vm827_vm11, %v5562_v50, %v5609_v9 }
 0x47e   : > { %v5596_v60 = vrot.slane %v5568_v16, 4  ;;  %5913 = vrot.lane.b32.xlu1 %v9264_v20, %s9394_s17 }
 0x47f   : > { %5915 = vrot.lane.b32.xlu0 %v5882_v53, %s9394_s17 }
 0x480   : > { %v5611_v25 = vsel %vm712_vm10, %v5595_v11, %v5596_v60  ;;  %v5202_v35 = vpop.permute.xlu1 %5201  ;;  %7513 = vmatmul.mubr.bf16.gmra.mxu1 %v9160_v19  ;;  %v5651_v19 = vld [vmem:[#allocation3 + $0xd0] sm:$0xff]  ;;  %v5652_v60 = vld [vmem:[#allocation3 + $0xd8] sm:$0xf] }
 0x481   : > { %v5612_v63 = vsel %vm827_vm11, %v5566_v4, %v5611_v25  ;;  %v5204_v2 = vpop.permute.xlu0 %5203  ;;  %7628 = vmatprep.mubr.bf16.mxu1 %v11777_v23  ;;  %v5221_v24 = vrot.slane %v5202_v35, 4 }
 0x482   : > { %v8806_v34 = vcombine.low %v5610_v41, %v5612_v63  ;;  %v5222_v12 = vrot.slane %v5204_v2, 4  ;;  %5917 = vrot.lane.b32.xlu1 %v9265_v18, %s9394_s17  ;;  %v8807_v7 = vcombine.high %v5610_v41, %v5612_v63  ;;  %v5645_v41 = vld [vmem:[#allocation3 + $0xa0] sm:$0xff] }
 0x483   : > { %5919 = vrot.lane.b32.xlu0 %v5884_v45, %s9394_s17  ;;  %s12976_s17 = smov 15  }
 0x484   : > { %7602 = vmatprep.subr.bf16.mxu1 %v8807_v7  ;;  %v5206_v30 = vpop.permute.xlu1 %5205  ;;  %v5237_v57 = vsel %vm712_vm10, %v5221_v24, %v5222_v12 }
 0x485   : > { %v5208_v56 = vpop.permute.xlu0 %5207  ;;  %7603 = vmatpush1.bf16.msra.mxu1 %v8806_v34  ;;  %v5223_v32 = vrot.slane %v5206_v30, 4  ;;  %v5238_v27 = vsel %vm1521_vm2, %v5202_v35, %v5237_v57  ;;  %v5646_v34 = vld [vmem:[#allocation3 + $0xa8] sm:$0xf] }
 0x486   : > { %v5224_v51 = vrot.slane %v5208_v56, 4  ;;  %5785 = vrot.lane.b32.xlu1 %v11861_v33, %s9393_s16  ;;  %v5647_v56 = vld [vmem:[#allocation3 + $0xb0] sm:$0xff] }
 0x487   : > { %5787 = vrot.lane.b32.xlu0 %v5754_v1, %s9393_s16  ;;  %v5648_v1 = vld [vmem:[#allocation3 + $0xb8] sm:$0xf] }
 0x488   : > { %v5239_v23 = vsel %vm712_vm10, %v5223_v32, %v5224_v51  ;;  %v5474_v22 = vpop.permute.xlu1 %5473 }
 0x489   : > { %v5240_v38 = vsel %vm1521_vm2, %v5206_v30, %v5239_v23  ;;  %v5476_v58 = vpop.permute.xlu0 %5475  ;;  %v5493_v17 = vrot.slane %v5474_v22, 4 }
 0x48a   : > { %v8928_v47 = vcombine.low %v5238_v27, %v5240_v38  ;;  %v5494_v0 = vrot.slane %v5476_v58, 4  ;;  %5789 = vrot.lane.b32.xlu1 %v11868_v14, %s9393_s16  ;;  %v8929_v29 = vcombine.high %v5238_v27, %v5240_v38  ;;  %v5641_v58 = vld [vmem:[#allocation3 + $0x80] sm:$0xff] }
 0x48b   : > { %5791 = vrot.lane.b32.xlu0 %v5756_v28, %s9393_s16  ;;  %s12977_s16 = smov 112  }
 0x48c   : > { %7531 = vmatprep.subr.bf16.mxu0 %v8929_v29  ;;  %v5478_v33 = vpop.permute.xlu1 %5477  ;;  %v5509_v15 = vsel %vm712_vm10, %v5493_v17, %v5494_v0  ;;  %v5642_v17 = vld [vmem:[#allocation3 + $0x88] sm:$0xf] }
 0x48d   : > { %v5480_v59 = vpop.permute.xlu0 %5479  ;;  %7532 = vmatpush1.bf16.msra.mxu0 %v8928_v47  ;;  %v5495_v26 = vrot.slane %v5478_v33, 4  ;;  %v5510_v8 = vsel %vm714_vm12, %v5474_v22, %v5509_v15 }
 0x48e   : > { %v5496_v55 = vrot.slane %v5480_v59, 4  ;;  %5697 = vrot.lane.b32.xlu1 %v5653_v31, %s12976_s17  ;;  %v5643_v31 = vld [vmem:[#allocation3 + $0x90] sm:$0xff] }
 0x48f   : > { %5699 = vrot.lane.b32.xlu0 %v5654_v44, %s12976_s17 }
 0x490   : > { %v5511_v46 = vsel %vm712_vm10, %v5495_v26, %v5496_v55  ;;  %v5194_v14 = vpop.permute.xlu1 %5193 }
 0x491   : > { %v5512_v43 = vsel %vm714_vm12, %v5478_v33, %v5511_v46  ;;  %v5196_v37 = vpop.permute.xlu0 %5195  ;;  %v5217_v3 = vrot.slane %v5194_v14, 4  ;;  %v5644_v46 = vld [vmem:[#allocation3 + $0x98] sm:$0xf] }
 0x492   : > { %v8802_v36 = vcombine.low %v5510_v8, %v5512_v43  ;;  %v5218_v6 = vrot.slane %v5196_v37, 4  ;;  %5701 = vrot.lane.b32.xlu1 %v5655_v54, %s12976_s17  ;;  %v8803_v61 = vcombine.high %v5510_v8, %v5512_v43  ;;  %v6118_v43 = vld [vmem:[#allocation3 + $0x6c] sm:$0xf] }
 0x493   : > { %5703 = vrot.lane.b32.xlu0 %v5656_v21, %s12976_s17 }
 0x494   : > { %7604 = vmatprep.subr.bf16.mxu1 %v8803_v61  ;;  %v5198_v39 = vpop.permute.xlu1 %5197  ;;  %v5233_v52 = vsel %vm712_vm10, %v5217_v3, %v5218_v6 }
 0x495   : > { %v5200_v50 = vpop.permute.xlu0 %5199  ;;  %7605 = vmatpush1.bf16.msra.mxu1 %v8802_v36  ;;  %v5219_v48 = vrot.slane %v5198_v39, 4  ;;  %v5234_v10 = vsel %vm1521_vm2, %v5194_v14, %v5233_v52  ;;  %v12026_v36 = vld [vmem:[#allocation3 + $0x64] sm:$0xff]  ;;  %v12035_v52 = vld [vmem:[#allocation3 + $0x74] sm:$0xff] }
 0x496   : > { %v5220_v40 = vrot.slane %v5200_v50, 4  ;;  %5689 = vrot.lane.b32.xlu1 %v5649_v42, %s12976_s17 }
 0x497   : > { %5691 = vrot.lane.b32.xlu0 %v5650_v13, %s12976_s17 }
 0x498   : > { %v5235_v62 = vsel %vm712_vm10, %v5219_v48, %v5220_v40  ;;  %v5466_v5 = vpop.permute.xlu1 %5465 }
 0x499   : > { %v5236_v4 = vsel %vm1521_vm2, %v5198_v39, %v5235_v62  ;;  %v5468_v53 = vpop.permute.xlu0 %5467  ;;  %v5489_v9 = vrot.slane %v5466_v5, 4  ;;  %v6120_v39 = vld [vmem:[#allocation3 + $0x7c] sm:$0xf] }
 0x49a   : > { %v8924_v16 = vcombine.low %v5234_v10, %v5236_v4  ;;  %v5490_v11 = vrot.slane %v5468_v53, 4  ;;  %5693 = vrot.lane.b32.xlu1 %v5651_v19, %s12976_s17  ;;  %v8925_v20 = vcombine.high %v5234_v10, %v5236_v4  ;;  %v6114_v4 = vld [vmem:[#allocation3 + $0x4c] sm:$0xf] }
 0x49b   : > { %5695 = vrot.lane.b32.xlu0 %v5652_v60, %s12976_s17 }
 0x49c   : > { %7533 = vmatprep.subr.bf16.mxu0 %v8925_v20  ;;  %v5470_v25 = vpop.permute.xlu1 %5469  ;;  %v5505_v63 = vsel %vm712_vm10, %v5489_v9, %v5490_v11 }
 0x49d   : > { %v5472_v35 = vpop.permute.xlu0 %5471  ;;  %7534 = vmatpush1.bf16.msra.mxu0 %v8924_v16  ;;  %v5491_v45 = vrot.slane %v5470_v25, 4  ;;  %v5506_v18 = vsel %vm714_vm12, %v5466_v5, %v5505_v63  ;;  %v12040_v16 = vld [vmem:[#allocation3 + $0x44] sm:$0xff]  ;;  %v12049_v63 = vld [vmem:[#allocation3 + $0x54] sm:$0xff] }
 0x49e   : > { %v5492_v2 = vrot.slane %v5472_v35, 4  ;;  %5681 = vrot.lane.b32.xlu1 %v5645_v41, %s12976_s17 }
 0x49f   : > { %5683 = vrot.lane.b32.xlu0 %v5646_v34, %s12976_s17 }
 0x4a0   : > { %v5507_v12 = vsel %vm712_vm10, %v5491_v45, %v5492_v2  ;;  %v5186_v24 = vpop.permute.xlu1 %5185 }
 0x4a1   : > { %v5508_v7 = vsel %vm714_vm12, %v5470_v25, %v5507_v12  ;;  %v5188_v30 = vpop.permute.xlu0 %5187  ;;  %v5213_v51 = vrot.slane %v5186_v24, 4  ;;  %v6116_v25 = vld [vmem:[#allocation3 + $0x5c] sm:$0xf] }
 0x4a2   : > { %v8798_v32 = vcombine.low %v5506_v18, %v5508_v7  ;;  %v5214_v57 = vrot.slane %v5188_v30, 4  ;;  %5685 = vrot.lane.b32.xlu1 %v5647_v56, %s12976_s17  ;;  %v8799_v23 = vcombine.high %v5506_v18, %v5508_v7  ;;  %v6110_v7 = vld [vmem:[#allocation3 + $0x2c] sm:$0xf]  ;;  %v9149_v30 = vld [vmem:[%s12858_s3 + $0x10] ss:$20 sps:$4 sm:$0xff]  }
 0x4a3   : > { %5687 = vrot.lane.b32.xlu0 %v5648_v1, %s12976_s17 }
 0x4a4   : > { %7606 = vmatprep.subr.bf16.mxu1 %v8799_v23  ;;  %v5190_v22 = vpop.permute.xlu1 %5189  ;;  %v5229_v47 = vsel %vm712_vm10, %v5213_v51, %v5214_v57  ;;  %v12057_v57 = vld [vmem:[#allocation3 + $0x24] sm:$0xff] }
 0x4a5   : > { %v5192_v27 = vpop.permute.xlu0 %5191  ;;  %7607 = vmatpush1.bf16.msra.mxu1 %v8798_v32  ;;  %v5215_v38 = vrot.slane %v5190_v22, 4  ;;  %v5230_v33 = vsel %vm1521_vm2, %v5186_v24, %v5229_v47 }
 0x4a6   : > { %v5216_v0 = vrot.slane %v5192_v27, 4  ;;  %5673 = vrot.lane.b32.xlu1 %v5641_v58, %s12976_s17  ;;  %v6112_v27 = vld [vmem:[#allocation3 + $0x3c] sm:$0xf] }
 0x4a7   : > { %5675 = vrot.lane.b32.xlu0 %v5642_v17, %s12976_s17 }
 0x4a8   : > { %v5231_v28 = vsel %vm712_vm10, %v5215_v38, %v5216_v0  ;;  %v5458_v29 = vpop.permute.xlu1 %5457  ;;  %v12067_v0 = vld [vmem:[#allocation3 + $0x34] sm:$0xff] }
 0x4a9   : > { %v5232_v59 = vsel %vm1521_vm2, %v5190_v22, %v5231_v28  ;;  %v5460_v26 = vpop.permute.xlu0 %5459  ;;  %v5485_v44 = vrot.slane %v5458_v29, 4 }
 0x4aa   : > { %v8920_v15 = vcombine.low %v5230_v33, %v5232_v59  ;;  %v5486_v55 = vrot.slane %v5460_v26, 4  ;;  %5677 = vrot.lane.b32.xlu1 %v5643_v31, %s12976_s17  ;;  %v8921_v14 = vcombine.high %v5230_v33, %v5232_v59  ;;  %v6106_v26 = vld [vmem:[#allocation3 + $0xc] sm:$0xf] }
 0x4ab   : > { %5679 = vrot.lane.b32.xlu0 %v5644_v46, %s12976_s17  ;;  %v9153_v31 = vld [vmem:[%s12858_s3 + $0x38] ss:$20 sps:$4 sm:$0xff]   ;;  %s12805_s17 = scalar_lea.hbm %s12864_s9, %s9029_s25 }
 0x4ac   : > { %7535 = vmatprep.subr.bf16.mxu0 %v8921_v14  ;;  %v5462_v8 = vpop.permute.xlu1 %5461  ;;  %v5501_v6 = vsel %vm712_vm10, %v5485_v44, %v5486_v55  ;;  %v12076_v44 = vld [vmem:[#allocation3 + $0x4] sm:$0xff] }
 0x4ad   : > { %v5464_v37 = vpop.permute.xlu0 %5463  ;;  %7536 = vmatpush1.bf16.msra.mxu0 %v8920_v15  ;;  %v5487_v54 = vrot.slane %v5462_v8, 4  ;;  %v5502_v50 = vsel %vm714_vm12, %v5458_v29, %v5501_v6 }
 0x4ae   : > { %v5488_v3 = vrot.slane %v5464_v37, 4  ;;  %6161 = vrot.lane.b32.xlu1 %v12026_v36, %s12977_s16  ;;  %v6108_v37 = vld [vmem:[#allocation3 + $0x1c] sm:$0xf] }
 0x4af   : > { %6163 = vrot.lane.b32.xlu0 %v6118_v43, %s12977_s16 }
 0x4b0   : > { %v5503_v21 = vsel %vm712_vm10, %v5487_v54, %v5488_v3  ;;  %v5178_v61 = vpop.permute.xlu1 %5177 }
 0x4b1   : > { %v5504_v48 = vsel %vm714_vm12, %v5462_v8, %v5503_v21  ;;  %v5180_v42 = vpop.permute.xlu0 %5179  ;;  %v5209_v62 = vrot.slane %v5178_v61, 4  ;;  %v12086_v21 = vld [vmem:[#allocation3 + $0x14] sm:$0xff] }
 0x4b2   : > { %v8794_v40 = vcombine.low %v5502_v50, %v5504_v48  ;;  %v5210_v13 = vrot.slane %v5180_v42, 4  ;;  %6165 = vrot.lane.b32.xlu1 %v12035_v52, %s12977_s16  ;;  %v8795_v5 = vcombine.high %v5502_v50, %v5504_v48 }
 0x4b3   : > { %6167 = vrot.lane.b32.xlu0 %v6120_v39, %s12977_s16 }
 0x4b4   : > { %7608 = vmatprep.subr.bf16.mxu1 %v8795_v5  ;;  %v5182_v10 = vpop.permute.xlu1 %5181  ;;  %v5225_v11 = vsel %vm712_vm10, %v5209_v62, %v5210_v13  ;;  %v9157_v13 = vld [vmem:[%s12858_s3 + $0x60] ss:$20 sps:$4 sm:$0xff]  }
 0x4b5   : > { %v5184_v53 = vpop.permute.xlu0 %5183  ;;  %7609 = vmatpush1.bf16.msra.mxu1 %v8794_v40  ;;  %v5211_v19 = vrot.slane %v5182_v10, 4  ;;  %v5226_v35 = vsel %vm1521_vm2, %v5178_v61, %v5225_v11  ;;  %v6006_v40 = vld [vmem:[#allocation3 + $0x16c] sm:$0xf] }
 0x4b6   : > { %v5212_v9 = vrot.slane %v5184_v53, 4  ;;  %6153 = vrot.lane.b32.xlu1 %v12040_v16, %s12977_s16 }
 0x4b7   : > { %6155 = vrot.lane.b32.xlu0 %v6114_v4, %s12977_s16 }
 0x4b8   : > { %v5227_v60 = vsel %vm712_vm10, %v5211_v19, %v5212_v9  ;;  %v5450_v20 = vpop.permute.xlu1 %5449  ;;  %v6008_v9 = vld [vmem:[#allocation3 + $0x17c] sm:$0xf] }
 0x4b9   : > { %v5228_v45 = vsel %vm1521_vm2, %v5182_v10, %v5227_v60  ;;  %v5452_v41 = vpop.permute.xlu0 %5451  ;;  %v5481_v12 = vrot.slane %v5450_v20, 4  ;;  %v6005_v10 = vld [vmem:[#allocation3 + $0x164] sm:$0xff] }
 0x4ba   : > { %v8916_v2 = vcombine.low %v5226_v35, %v5228_v45  ;;  %v5482_v34 = vrot.slane %v5452_v41, 4  ;;  %6157 = vrot.lane.b32.xlu1 %v12049_v63, %s12977_s16  ;;  %v8917_v24 = vcombine.high %v5226_v35, %v5228_v45  ;;  %v6007_v35 = vld [vmem:[#allocation3 + $0x174] sm:$0xff] }
 0x4bb   : > { %6159 = vrot.lane.b32.xlu0 %v6116_v25, %s12977_s16 }
 0x4bc   : > { %7537 = vmatprep.subr.bf16.mxu0 %v8917_v24  ;;  %v5454_v18 = vpop.permute.xlu1 %5453  ;;  %v5497_v51 = vsel %vm712_vm10, %v5481_v12, %v5482_v34  ;;  %v6230_v24 = vld [vmem:[#allocation3 + $0xec] sm:$0xf] }
 0x4bd   : > { %v5456_v56 = vpop.permute.xlu0 %5455  ;;  %7538 = vmatpush1.bf16.msra.mxu0 %v8916_v2  ;;  %v5483_v32 = vrot.slane %v5454_v18, 4  ;;  %v5498_v38 = vsel %vm714_vm12, %v5450_v20, %v5497_v51 }
 0x4be   : > { %v5484_v1 = vrot.slane %v5456_v56, 4  ;;  %6145 = vrot.lane.b32.xlu1 %v12057_v57, %s12977_s16  ;;  %v6229_v56 = vld [vmem:[#allocation3 + $0xe4] sm:$0xff] }
 0x4bf   : > { %6147 = vrot.lane.b32.xlu0 %v6110_v7, %s12977_s16 }
 0x4c0   : > { %v5499_v23 = vsel %vm712_vm10, %v5483_v32, %v5484_v1  ;;  %8932 = vmatmul.mubr.msk.bf16.vlgmr.msra.gmra.mxu0 %vm3686_vm3, %v9149_v30  ;;  %v5938_v22 = vpop.permute.xlu1 %5937 }
 0x4c1   : > { %v5500_v58 = vsel %vm714_vm12, %v5454_v18, %v5499_v23  ;;  %v5940_v47 = vpop.permute.xlu0 %5939  ;;  %7565 = vmatprep.mubr.bf16.mxu0 %v12969_v49  ;;  %v5957_v29 = vrot.slane %v5938_v22, 4  ;;  %v12108_v18 = vld [vmem:[%s12858_s3 + $0x88] ss:$20 sps:$4 sm:$0xff]  }
 0x4c2   : > { %v8790_v17 = vcombine.low %v5498_v38, %v5500_v58  ;;  %v5958_v28 = vrot.slane %v5940_v47, 4  ;;  %6149 = vrot.lane.b32.xlu1 %v12067_v0, %s12977_s16  ;;  %v8791_v33 = vcombine.high %v5498_v38, %v5500_v58  ;;  %v6231_v47 = vld [vmem:[#allocation3 + $0xf4] sm:$0xff] }
 0x4c3   : > { %6151 = vrot.lane.b32.xlu0 %v6112_v27, %s12977_s16 }
 0x4c4   : > { %7610 = vmatprep.subr.bf16.mxu1 %v8791_v33  ;;  %v5942_v59 = vpop.permute.xlu1 %5941  ;;  %v5973_v46 = vsel %vm712_vm10, %v5957_v29, %v5958_v28 }
 0x4c5   : > { %v5944_v15 = vpop.permute.xlu0 %5943  ;;  %7611 = vmatpush1.bf16.msra.mxu1 %v8790_v17  ;;  %v5959_v55 = vrot.slane %v5942_v59, 4  ;;  %v5974_v54 = vsel %vm1182_vm15, %v5938_v22, %v5973_v46  ;;  %v6232_v22 = vld [vmem:[#allocation3 + $0xfc] sm:$0xf]  ;;  %v9266_v17 = vld [vmem:[%s12858_s3 + $0xc] ss:$20 sps:$4 sm:$0xff]   ;;  %v6001_v46 = vld [vmem:[#allocation3 + $0x144] sm:$0xff] }
 0x4c6   : > { %v5960_v14 = vrot.slane %v5944_v15, 4  ;;  %6137 = vrot.lane.b32.xlu1 %v12076_v44, %s12977_s16 }
 0x4c7   : > { %6139 = vrot.lane.b32.xlu0 %v6106_v26, %s12977_s16 }
 0x4c8   : > { %v5975_v8 = vsel %vm712_vm10, %v5959_v55, %v5960_v14  ;;  %8933 = vmatmul.mubr.msk.bf16.gmra.mxu0 %vm3686_vm3, %v9153_v31  ;;  %v5810_v43 = vpop.permute.xlu1 %5809  ;;  %v6002_v31 = vld [vmem:[#allocation3 + $0x14c] sm:$0xf] }
 0x4c9   : > { %v5976_v6 = vsel %vm1182_vm15, %v5942_v59, %v5975_v8  ;;  %v5812_v3 = vpop.permute.xlu0 %5811  ;;  %7575 = vmatprep.mubr.bf16.mxu0 %v12969_v49  ;;  %v5829_v50 = vrot.slane %v5810_v43, 4 }
 0x4ca   : > { %v8882_v61 = vcombine.low %v5974_v54, %v5976_v6  ;;  %v5830_v39 = vrot.slane %v5812_v3, 4  ;;  %6141 = vrot.lane.b32.xlu1 %v12086_v21, %s12977_s16  ;;  %v8883_v48 = vcombine.high %v5974_v54, %v5976_v6  ;;  %v6004_v54 = vld [vmem:[#allocation3 + $0x15c] sm:$0xf] }
 0x4cb   : > { %6143 = vrot.lane.b32.xlu0 %v6108_v37, %s12977_s16  ;;  %s8387_s16 = scalar_lea.sflag [#allocation6], %s9547_s11 }
 0x4cc   : > { %7669 = vmatprep.subr.bf16.mxu0 %v8883_v48  ;;  %v5814_v42 = vpop.permute.xlu1 %5813  ;;  %v5845_v4 = vsel %vm712_vm10, %v5829_v50, %v5830_v39  ;;  %v6003_v39 = vld [vmem:[#allocation3 + $0x154] sm:$0xff] }
 0x4cd   : > { %v5816_v62 = vpop.permute.xlu0 %5815  ;;  %7670 = vmatpush1.bf16.msra.mxu0 %v8882_v61  ;;  %v5831_v5 = vrot.slane %v5814_v42, 4  ;;  %v5846_v60 = vsel %vm1053_vm13, %v5810_v43, %v5845_v4  ;;  %v6225_v4 = vld [vmem:[#allocation3 + $0xc4] sm:$0xff] }
 0x4ce   : > { %v5832_v53 = vrot.slane %v5816_v62, 4  ;;  %6049 = vrot.lane.b32.xlu1 %v6005_v10, %s12974_s24  ;;  %v6226_v62 = vld [vmem:[#allocation3 + $0xcc] sm:$0xf] }
 0x4cf   : > { %6051 = vrot.lane.b32.xlu0 %v6006_v40, %s12974_s24 }
 0x4d0   : > { %v5847_v19 = vsel %vm712_vm10, %v5831_v5, %v5832_v53  ;;  %8934 = vmatmul.mubr.msk.bf16.gmra.mxu0 %vm3686_vm3, %v9157_v13  ;;  %v5930_v11 = vpop.permute.xlu1 %5929 }
 0x4d1   : > { %v5848_v20 = vsel %vm1053_vm13, %v5814_v42, %v5847_v19  ;;  %v5932_v25 = vpop.permute.xlu0 %5931  ;;  %7585 = vmatprep.mubr.bf16.mxu0 %v12969_v49  ;;  %v5953_v2 = vrot.slane %v5930_v11, 4 }
 0x4d2   : > { %v8850_v45 = vcombine.low %v5846_v60, %v5848_v20  ;;  %v5954_v41 = vrot.slane %v5932_v25, 4  ;;  %6053 = vrot.lane.b32.xlu1 %v6007_v35, %s12974_s24  ;;  %v8851_v34 = vcombine.high %v5846_v60, %v5848_v20  ;;  %v6228_v60 = vld [vmem:[#allocation3 + $0xdc] sm:$0xf] }
 0x4d3   : > { %6055 = vrot.lane.b32.xlu0 %v6008_v9, %s12974_s24 }
 0x4d4   : > { %7612 = vmatprep.subr.bf16.mxu1 %v8851_v34  ;;  %v5934_v12 = vpop.permute.xlu1 %5933  ;;  %v5969_v32 = vsel %vm712_vm10, %v5953_v2, %v5954_v41 }
 0x4d5   : > { %v5936_v7 = vpop.permute.xlu0 %5935  ;;  %7613 = vmatpush2.bf16.msra.mxu1 %v8850_v45  ;;  %v5955_v30 = vrot.slane %v5934_v12, 4  ;;  %v5970_v27 = vsel %vm1182_vm15, %v5930_v11, %v5969_v32  ;;  %v6227_v45 = vld [vmem:[#allocation3 + $0xd4] sm:$0xff]  ;;  %v5997_v32 = vld [vmem:[#allocation3 + $0x124] sm:$0xff] }
 0x4d6   : > { %v5956_v51 = vrot.slane %v5936_v7, 4  ;;  %6273 = vrot.lane.b32.xlu1 %v6229_v56, %s12975_s23  ;;  %v5998_v7 = vld [vmem:[#allocation3 + $0x12c] sm:$0xf] }
 0x4d7   : > { %6275 = vrot.lane.b32.xlu0 %v6230_v24, %s12975_s23 }
 0x4d8   : > { %v5971_v1 = vsel %vm712_vm10, %v5955_v30, %v5956_v51  ;;  %8935 = vmatmul.mubr.msk.bf16.gmra.mxu0 %vm3686_vm3, %v12108_v18  ;;  %v5802_v23 = vpop.permute.xlu1 %5801 }
 0x4d9   : > { %v5972_v38 = vsel %vm1182_vm15, %v5934_v12, %v5971_v1  ;;  %v5804_v58 = vpop.permute.xlu0 %5803  ;;  %7701 = vmatprep.mubr.bf16.mxu0 %v9266_v17  ;;  %v5825_v33 = vrot.slane %v5802_v23, 4  ;;  %v5999_v17 = vld [vmem:[#allocation3 + $0x134] sm:$0xff] }
 0x4da   : > { %v8878_v28 = vcombine.low %v5970_v27, %v5972_v38  ;;  %v5826_v29 = vrot.slane %v5804_v58, 4  ;;  %6277 = vrot.lane.b32.xlu1 %v6231_v47, %s12975_s23  ;;  %v8879_v59 = vcombine.high %v5970_v27, %v5972_v38  ;;  %v6000_v27 = vld [vmem:[#allocation3 + $0x13c] sm:$0xf] }
 0x4db   : > { %6279 = vrot.lane.b32.xlu0 %v6232_v22, %s12975_s23 }
 0x4dc   : > { %7671 = vmatprep.subr.bf16.mxu0 %v8879_v59  ;;  %v5806_v26 = vpop.permute.xlu1 %5805  ;;  %v5841_v14 = vsel %vm712_vm10, %v5825_v33, %v5826_v29 }
 0x4dd   : > { %v5808_v15 = vpop.permute.xlu0 %5807  ;;  %7672 = vmatpush1.bf16.msra.mxu0 %v8878_v28  ;;  %v5827_v55 = vrot.slane %v5806_v26, 4  ;;  %v5842_v6 = vsel %vm1053_vm13, %v5802_v23, %v5841_v14 }
 0x4de   : > { %v5828_v8 = vrot.slane %v5808_v15, 4  ;;  %6041 = vrot.lane.b32.xlu1 %v6001_v46, %s12974_s24  ;;  %v6221_v46 = vld [vmem:[#allocation3 + $0xa4] sm:$0xff] }
 0x4df   : > { %6043 = vrot.lane.b32.xlu0 %v6002_v31, %s12974_s24  ;;  %v6222_v31 = vld [vmem:[#allocation3 + $0xac] sm:$0xf] }
 0x4e0   : > { %v5843_v43 = vsel %vm712_vm10, %v5827_v55, %v5828_v8  ;;  %v5922_v37 = vpop.permute.xlu1 %5921 }
 0x4e1   : > { %v5844_v3 = vsel %vm1053_vm13, %v5806_v26, %v5843_v43  ;;  %v5924_v61 = vpop.permute.xlu0 %5923  ;;  %v5949_v42 = vrot.slane %v5922_v37, 4 }
 0x4e2   : > { %v8846_v50 = vcombine.low %v5842_v6, %v5844_v3  ;;  %v5950_v48 = vrot.slane %v5924_v61, 4  ;;  %6045 = vrot.lane.b32.xlu1 %v6003_v39, %s12974_s24  ;;  %v8847_v40 = vcombine.high %v5842_v6, %v5844_v3  ;;  %v6223_v39 = vld [vmem:[#allocation3 + $0xb4] sm:$0xff] }
 0x4e3   : > { %6047 = vrot.lane.b32.xlu0 %v6004_v54, %s12974_s24  ;;  %v6224_v54 = vld [vmem:[#allocation3 + $0xbc] sm:$0xf] }
 0x4e4   : > { %7614 = vmatprep.subr.bf16.mxu1 %v8847_v40  ;;  %v5926_v13 = vpop.permute.xlu1 %5925  ;;  %v5965_v53 = vsel %vm712_vm10, %v5949_v42, %v5950_v48 }
 0x4e5   : > { %v5928_v5 = vpop.permute.xlu0 %5927  ;;  %7615 = vmatpush2.bf16.msra.mxu1 %v8846_v50  ;;  %v5951_v10 = vrot.slane %v5926_v13, 4  ;;  %v5966_v20 = vsel %vm1182_vm15, %v5922_v37, %v5965_v53  ;;  %v5993_v53 = vld [vmem:[#allocation3 + $0x104] sm:$0xff] }
 0x4e6   : > { %v5952_v19 = vrot.slane %v5928_v5, 4  ;;  %6265 = vrot.lane.b32.xlu1 %v6225_v4, %s12975_s23  ;;  %v5994_v5 = vld [vmem:[#allocation3 + $0x10c] sm:$0xf] }
 0x4e7   : > { %6267 = vrot.lane.b32.xlu0 %v6226_v62, %s12975_s23  ;;  %v8867_v62 = vcombine.high %v12026_v36, %v12035_v52 }
 0x4e8   : > { %v5967_v11 = vsel %vm712_vm10, %v5951_v10, %v5952_v19  ;;  %v5794_v9 = vpop.permute.xlu1 %5793 }
 0x4e9   : > { %v5968_v25 = vsel %vm1182_vm15, %v5926_v13, %v5967_v11  ;;  %v5796_v35 = vpop.permute.xlu0 %5795  ;;  %v5821_v34 = vrot.slane %v5794_v9, 4 }
 0x4ea   : > { %v8874_v41 = vcombine.low %v5966_v20, %v5968_v25  ;;  %v5822_v2 = vrot.slane %v5796_v35, 4  ;;  %6269 = vrot.lane.b32.xlu1 %v6227_v45, %s12975_s23  ;;  %v8875_v12 = vcombine.high %v5966_v20, %v5968_v25  ;;  %v8863_v25 = vcombine.high %v12040_v16, %v12049_v63  ;;  %v5996_v35 = vld [vmem:[#allocation3 + $0x11c] sm:$0xf] }
 0x4eb   : > { %6271 = vrot.lane.b32.xlu0 %v6228_v60, %s12975_s23 }
 0x4ec   : > { %7673 = vmatprep.subr.bf16.mxu0 %v8875_v12  ;;  %v5798_v24 = vpop.permute.xlu1 %5797  ;;  %v5837_v51 = vsel %vm712_vm10, %v5821_v34, %v5822_v2  ;;  %v5995_v34 = vld [vmem:[#allocation3 + $0x114] sm:$0xff] }
 0x4ed   : > { %v5800_v30 = vpop.permute.xlu0 %5799  ;;  %7674 = vmatpush1.bf16.msra.mxu0 %v8874_v41  ;;  %v5823_v56 = vrot.slane %v5798_v24, 4  ;;  %v5838_v38 = vsel %vm1053_vm13, %v5794_v9, %v5837_v51  ;;  %v8866_v9 = vcombine.low %v12026_v36, %v12035_v52  ;;  %v8862_v52 = vcombine.low %v12040_v16, %v12049_v63 }
 0x4ee   : > { %v5824_v1 = vrot.slane %v5800_v30, 4  ;;  %6033 = vrot.lane.b32.xlu1 %v5997_v32, %s12974_s24  ;;  %v6218_v32 = vld [vmem:[#allocation3 + $0x8c] sm:$0xf]  ;;  %v8858_v16 = vcombine.low %v12057_v57, %v12067_v0 }
 0x4ef   : > { %6035 = vrot.lane.b32.xlu0 %v5998_v7, %s12974_s24 }
 0x4f0   : > { %v5839_v23 = vsel %vm712_vm10, %v5823_v56, %v5824_v1  ;;  %v5914_v22 = vpop.permute.xlu1 %5913  ;;  %v8859_v56 = vcombine.high %v12057_v57, %v12067_v0  ;;  %v8854_v0 = vcombine.low %v12076_v44, %v12086_v21 }
 0x4f1   : > { %v5840_v58 = vsel %vm1053_vm13, %v5798_v24, %v5839_v23  ;;  %v5916_v47 = vpop.permute.xlu0 %5915  ;;  %v5945_v33 = vrot.slane %v5914_v22, 4  ;;  %v6217_v23 = vld [vmem:[#allocation3 + $0x84] sm:$0xff] }
 0x4f2   : > { %v8842_v28 = vcombine.low %v5838_v38, %v5840_v58  ;;  %v5946_v29 = vrot.slane %v5916_v47, 4  ;;  %6037 = vrot.lane.b32.xlu1 %v5999_v17, %s12974_s24  ;;  %v8843_v59 = vcombine.high %v5838_v38, %v5840_v58  ;;  %v8855_v58 = vcombine.high %v12076_v44, %v12086_v21  ;;  %v6220_v47 = vld [vmem:[#allocation3 + $0x9c] sm:$0xf]  ;;  %v6499_v44 = vld [vmem:[%s12859_s4 + $0x10] sm:$0xff] }
 0x4f3   : > { %6039 = vrot.lane.b32.xlu0 %v6000_v27, %s12974_s24 }
 0x4f4   : > { %7616 = vmatprep.subr.bf16.mxu1 %v8843_v59  ;;  %v5918_v26 = vpop.permute.xlu1 %5917  ;;  %v5961_v14 = vsel %vm712_vm10, %v5945_v33, %v5946_v29  ;;  %v6219_v33 = vld [vmem:[#allocation3 + $0x94] sm:$0xff] }
 0x4f5   : > { %v5920_v15 = vpop.permute.xlu0 %5919  ;;  %7617 = vmatpush2.bf16.msra.mxu1 %v8842_v28  ;;  %v5947_v55 = vrot.slane %v5918_v26, 4  ;;  %v5962_v6 = vsel %vm1182_vm15, %v5914_v22, %v5961_v14 }
 0x4f6   : > { %v5948_v8 = vrot.slane %v5920_v15, 4  ;;  %6257 = vrot.lane.b32.xlu1 %v6221_v46, %s12975_s23  ;;  %v6497_v15 = vld [vmem:[%s12859_s4] sm:$0xff]  ;;  %v6498_v46 = vld [vmem:[%s12859_s4 + $0x8] sm:$0xff] }
 0x4f7   : > { %6259 = vrot.lane.b32.xlu0 %v6222_v31, %s12975_s23 }
 0x4f8   : > { %v5963_v43 = vsel %vm712_vm10, %v5947_v55, %v5948_v8  ;;  %v5786_v37 = vpop.permute.xlu1 %5785 }
 0x4f9   : > { %v5964_v3 = vsel %vm1182_vm15, %v5918_v26, %v5963_v43  ;;  %v5788_v61 = vpop.permute.xlu0 %5787  ;;  %v5817_v42 = vrot.slane %v5786_v37, 4 }
 0x4fa   : > { %v8870_v50 = vcombine.low %v5962_v6, %v5964_v3  ;;  %v5818_v48 = vrot.slane %v5788_v61, 4  ;;  %6261 = vrot.lane.b32.xlu1 %v6223_v39, %s12975_s23  ;;  %v8871_v40 = vcombine.high %v5962_v6, %v5964_v3  ;;  %v6500_v6 = vld [vmem:[%s12859_s4 + $0x18] sm:$0xff] }
 0x4fb   : > { %6263 = vrot.lane.b32.xlu0 %v6224_v54, %s12975_s23 }
 0x4fc   : > { %7675 = vmatprep.subr.bf16.mxu0 %v8871_v40  ;;  %v5790_v13 = vpop.permute.xlu1 %5789  ;;  %v5833_v19 = vsel %vm712_vm10, %v5817_v42, %v5818_v48 }
 0x4fd   : > { %v5792_v10 = vpop.permute.xlu0 %5791  ;;  %7676 = vmatpush1.bf16.msra.mxu0 %v8870_v50  ;;  %v5819_v4 = vrot.slane %v5790_v13, 4  ;;  %v5834_v45 = vsel %vm1053_vm13, %v5786_v37, %v5833_v19 }
 0x4fe   : > { %v5820_v11 = vrot.slane %v5792_v10, 4  ;;  %7677 = vmatprep.subr.bf16.mxu0 %v8867_v62  ;;  %6025 = vrot.lane.b32.xlu1 %v5993_v53, %s12974_s24 }
 0x4ff   : > { %6027 = vrot.lane.b32.xlu0 %v5994_v5, %s12974_s24  ;;  %v6502_v5 = vld [vmem:[%s12859_s4 + $0x28] sm:$0xff] }
 0x500   : > { %v5835_v60 = vsel %vm712_vm10, %v5819_v4, %v5820_v11  ;;  %v5698_v20 = vpop.permute.xlu1 %5697  ;;  %v6503_v11 = vld [vmem:[%s12859_s4 + $0x30] sm:$0xff] }
 0x501   : > { %v5836_v41 = vsel %vm1053_vm13, %v5790_v13, %v5835_v60  ;;  %v5700_v2 = vpop.permute.xlu0 %5699  ;;  %7678 = vmatpush1.bf16.msra.mxu0 %v8866_v9  ;;  %v5717_v7 = vrot.slane %v5698_v20, 4  ;;  %v6501_v13 = vld [vmem:[%s12859_s4 + $0x20] sm:$0xff] }
 0x502   : > { %v8838_v12 = vcombine.low %v5834_v45, %v5836_v41  ;;  %v5718_v24 = vrot.slane %v5700_v2, 4  ;;  %7679 = vmatprep.subr.bf16.mxu0 %v8863_v25  ;;  %6029 = vrot.lane.b32.xlu1 %v5995_v34, %s12974_s24  ;;  %v8839_v36 = vcombine.high %v5834_v45, %v5836_v41 }
 0x503   : > { %6031 = vrot.lane.b32.xlu0 %v5996_v35, %s12974_s24  ;;  %s9320_s24 = scalar_lea.vmem %s12807_s26, 4096 }
 0x504   : > { %7618 = vmatprep.subr.bf16.mxu1 %v8839_v36  ;;  %v5702_v30 = vpop.permute.xlu1 %5701  ;;  %v5733_v22 = vsel %vm712_vm10, %v5717_v7, %v5718_v24  ;;  %p9321_p11 = scmp.ne.s32.totalorder %s12807_s26, %s9320_s24  ;;  %p9328_p7 = scmp.lt.s32.totalorder %s9326_s29, %s9320_s24 }
 0x505   : > { %v5704_v51 = vpop.permute.xlu0 %5703  ;;  %7619 = vmatpush2.bf16.msra.mxu1 %v8838_v12  ;;  %7680 = vmatpush1.bf16.msra.mxu0 %v8862_v52  ;;  %v5719_v1 = vrot.slane %v5702_v30, 4  ;;  %v5734_v17 = vsel %vm940_vm14, %v5698_v20, %v5733_v22  ;;  %v6504_v20 = vld [vmem:[%s12859_s4 + $0x38] sm:$0xff] }
 0x506   : > { %v5720_v27 = vrot.slane %v5704_v51, 4  ;;  %7681 = vmatprep.subr.bf16.mxu0 %v8859_v56  ;;  %6249 = vrot.lane.b32.xlu1 %v6217_v23, %s12975_s23  ;;  %p9322_p13 = pnand %p9321_p11, %p13010_p12  ;;  %p9329_p8 = por %p9328_p7, %p9327_p5 }
 0x507   : > { %6251 = vrot.lane.b32.xlu0 %v6218_v32, %s12975_s23 }
 0x508   : > { %v5735_v63 = vsel %vm712_vm10, %v5719_v1, %v5720_v27  ;;  %v5690_v38 = vpop.permute.xlu1 %5689  ;;  %p9323_p4 = pneg %p9322_p13 }
 0x509   : > { %v5736_v28 = vsel %vm940_vm14, %v5702_v30, %v5735_v63  ;;  %v5692_v29 = vpop.permute.xlu0 %5691  ;;  %7682 = vmatpush1.bf16.msra.mxu0 %v8858_v16  ;;  %v5713_v31 = vrot.slane %v5690_v38, 4 }
 0x50a   : > { %v8834_v59 = vcombine.low %v5734_v17, %v5736_v28  ;;  %v5714_v26 = vrot.slane %v5692_v29, 4  ;;  %7683 = vmatprep.subr.bf16.mxu0 %v8855_v58  ;;  %6253 = vrot.lane.b32.xlu1 %v6219_v33, %s12975_s23  ;;  %v8835_v57 = vcombine.high %v5734_v17, %v5736_v28  ;;  %v9267_v33 = vld [vmem:[%s12858_s3] ss:$20 sps:$4 sm:$0xff]   ;;  %p9330_p10 = pnand %p9329_p8, %p9323_p4 }
 0x50b   : > { %6255 = vrot.lane.b32.xlu0 %v6220_v47, %s12975_s23 }
 0x50c   : > { %7620 = vmatprep.subr.bf16.mxu1 %v8835_v57  ;;  %v5694_v55 = vpop.permute.xlu1 %5693  ;;  %v5729_v43 = vsel %vm712_vm10, %v5713_v31, %v5714_v26 }
 0x50d   : > { %v5696_v14 = vpop.permute.xlu0 %5695  ;;  %7621 = vmatpush2.bf16.msra.mxu1 %v8834_v59  ;;  %7684 = vmatpush1.bf16.msra.mxu0 %v8854_v0  ;;  %v5715_v8 = vrot.slane %v5694_v55, 4  ;;  %v5730_v3 = vsel %vm940_vm14, %v5690_v38, %v5729_v43  ;;  %v9268_v0 = vld [vmem:[%s12858_s3 + $0x2c] ss:$20 sps:$4 sm:$0xff]  }
 0x50e   : > { %v5716_v37 = vrot.slane %v5696_v14, 4  ;;  %6507 = vperm.xlu1 %9089, %v6497_v15  }
 0x50f   : > { %6512 = vperm.xlu0 %9088, %v6498_v46  }
 0x510   : > { %v5731_v21 = vsel %vm712_vm10, %v5715_v8, %v5716_v37  ;;  %v5682_v54 = vpop.permute.xlu1 %5681 }
 0x511   : > { %v5732_v61 = vsel %vm940_vm14, %v5694_v55, %v5731_v21  ;;  %v5684_v39 = vpop.permute.xlu0 %5683  ;;  %v5709_v42 = vrot.slane %v5682_v54, 4 }
 0x512   : > { %v8830_v50 = vcombine.low %v5730_v3, %v5732_v61  ;;  %v5710_v48 = vrot.slane %v5684_v39, 4  ;;  %6517 = vperm.xlu1 %9089, %v6499_v44   ;;  %v8831_v40 = vcombine.high %v5730_v3, %v5732_v61 }
 0x513   : > { %6522 = vperm.xlu0 %9088, %v6500_v6   ;;  %v9269_v6 = vld [vmem:[%s12858_s3 + $0x28] ss:$20 sps:$4 sm:$0xff]  }
 0x514   : > { %7622 = vmatprep.subr.bf16.mxu1 %v8831_v40  ;;  %v5686_v62 = vpop.permute.xlu1 %5685  ;;  %v5725_v53 = vsel %vm712_vm10, %v5709_v42, %v5710_v48  ;;  %v9270_v48 = vld [vmem:[%s12858_s3 + $0x54] ss:$20 sps:$4 sm:$0xff]  }
 0x515   : > { %v5688_v10 = vpop.permute.xlu0 %5687  ;;  %7623 = vmatpush2.bf16.msra.mxu1 %v8830_v50  ;;  %v5711_v4 = vrot.slane %v5686_v62, 4  ;;  %v5726_v25 = vsel %vm940_vm14, %v5682_v54, %v5725_v53 }
 0x516   : > { %v5712_v19 = vrot.slane %v5688_v10, 4  ;;  %6527 = vperm.xlu1 %9089, %v6501_v13  }
 0x517   : > { %6532 = vperm.xlu0 %9088, %v6502_v5  }
 0x518   : > { %v5727_v9 = vsel %vm712_vm10, %v5711_v4, %v5712_v19  ;;  %v5674_v60 = vpop.permute.xlu1 %5673 }
 0x519   : > { %v5728_v35 = vsel %vm940_vm14, %v5686_v62, %v5727_v9  ;;  %v5676_v45 = vpop.permute.xlu0 %5675  ;;  %v5705_v34 = vrot.slane %v5674_v60, 4  ;;  %v9271_v9 = vld [vmem:[%s12858_s3 + $0x50] ss:$20 sps:$4 sm:$0xff]  }
 0x51a   : > { %v8826_v41 = vcombine.low %v5726_v25, %v5728_v35  ;;  %v5706_v2 = vrot.slane %v5676_v45, 4  ;;  %6537 = vperm.xlu1 %9089, %v6503_v11   ;;  %v8827_v12 = vcombine.high %v5726_v25, %v5728_v35  ;;  %v9272_v45 = vld [vmem:[%s12858_s3 + $0x7c] ss:$20 sps:$4 sm:$0xff]  }
 0x51b   : > { %6542 = vperm.xlu0 %9088, %v6504_v20  }
 0x51c   : > { %7624 = vmatprep.subr.bf16.mxu1 %v8827_v12  ;;  %v5678_v24 = vpop.permute.xlu1 %5677  ;;  %v5721_v52 = vsel %vm712_vm10, %v5705_v34, %v5706_v2 }
 0x51d   : > { %7625 = vmatpush2.bf16.msra.mxu1 %v8826_v41  ;;  %v5680_v7 = vpop.permute.xlu0 %5679  ;;  %v5707_v36 = vrot.slane %v5678_v24, 4  ;;  %v5722_v51 = vsel %vm940_vm14, %v5674_v60, %v5721_v52 }
 0x51e   : > { %v5708_v30 = vrot.slane %v5680_v7, 4 }
 0x520   : > { %v5723_v56 = vsel %vm712_vm10, %v5707_v36, %v5708_v30  ;;  %v6162_v32 = vpop.permute.xlu1 %6161 }
 0x521   : > { %v5724_v1 = vsel %vm940_vm14, %v5678_v24, %v5723_v56  ;;  %v6164_v23 = vpop.permute.xlu0 %6163  ;;  %v6181_v16 = vrot.slane %v6162_v32, 4 }
 0x522   : > { %v8822_v22 = vcombine.low %v5722_v51, %v5724_v1  ;;  %v6182_v27 = vrot.slane %v6164_v23, 4  ;;  %v8823_v63 = vcombine.high %v5722_v51, %v5724_v1 }
 0x524   : > { %7626 = vmatprep.subr.bf16.mxu1 %v8823_v63  ;;  %v6166_v38 = vpop.permute.xlu1 %6165  ;;  %v6197_v17 = vsel %vm712_vm10, %v6181_v16, %v6182_v27 }
 0x525   : > { %v6168_v58 = vpop.permute.xlu0 %6167  ;;  %7627 = vmatpush2.bf16.msra.mxu1 %v8822_v22  ;;  %v6183_v47 = vrot.slane %v6166_v38, 4  ;;  %v6198_v26 = vsel %vm1408_vm0, %v6162_v32, %v6197_v17  ;;  %v9273_v32 = vld [vmem:[%s12858_s3 + $0x78] ss:$20 sps:$4 sm:$0xff]  }
 0x526   : > { %v6184_v28 = vrot.slane %v6168_v58, 4  ;;  %v12261_v58 = vpop.f32.mrf.mxu0 }
 0x528   : > { %v6199_v29 = vsel %vm712_vm10, %v6183_v47, %v6184_v28  ;;  %7629 = vmatmul.mubr.bf16.vlgmr.msra.gmra.mxu1 %v9267_v33  ;;  %v6154_v59 = vpop.permute.xlu1 %6153 }
 0x529   : > { %v6200_v31 = vsel %vm1408_vm0, %v6166_v38, %v6199_v29  ;;  %v6156_v57 = vpop.permute.xlu0 %6155  ;;  %7638 = vmatprep.mubr.bf16.mxu1 %v9268_v0  ;;  %v6177_v46 = vrot.slane %v6154_v59, 4 }
 0x52a   : > { %v8914_v15 = vcombine.low %v6198_v26, %v6200_v31  ;;  %v6178_v55 = vrot.slane %v6156_v57, 4  ;;  %v8915_v14 = vcombine.high %v6198_v26, %v6200_v31 }
 0x52c   : > { %7685 = vmatprep.subr.bf16.mxu0 %v8915_v14  ;;  %v6158_v8 = vpop.permute.xlu1 %6157  ;;  %v6193_v44 = vsel %vm712_vm10, %v6177_v46, %v6178_v55 }
 0x52d   : > { %v6160_v43 = vpop.permute.xlu0 %6159  ;;  %7686 = vmatpush2.bf16.msra.mxu0 %v8914_v15  ;;  %v6179_v37 = vrot.slane %v6158_v8, 4  ;;  %v6194_v61 = vsel %vm1408_vm0, %v6154_v59, %v6193_v44  ;;  %v12264_v59 = vpop.f32.mrf.mxu0 }
 0x52e   : > { %v6180_v21 = vrot.slane %v6160_v43, 4 }
 0x52f   : > { %v12269_v43 = vpop.f32.mrf.mxu0 }
 0x530   : > { %v6195_v54 = vsel %vm712_vm10, %v6179_v37, %v6180_v21  ;;  %7639 = vmatmul.mubr.bf16.gmra.mxu1 %v9269_v6  ;;  %v6146_v3 = vpop.permute.xlu1 %6145 }
 0x531   : > { %v6196_v39 = vsel %vm1408_vm0, %v6158_v8, %v6195_v54  ;;  %v6148_v50 = vpop.permute.xlu0 %6147  ;;  %7648 = vmatprep.mubr.bf16.mxu1 %v9270_v48  ;;  %v6173_v62 = vrot.slane %v6146_v3, 4 }
 0x532   : > { %v8910_v42 = vcombine.low %v6194_v61, %v6196_v39  ;;  %v8911_v40 = vcombine.high %v6194_v61, %v6196_v39  ;;  %v6174_v13 = vrot.slane %v6148_v50, 4 }
 0x534   : > { %7687 = vmatprep.subr.bf16.mxu0 %v8911_v40  ;;  %v6150_v5 = vpop.permute.xlu1 %6149  ;;  %v6189_v53 = vsel %vm712_vm10, %v6173_v62, %v6174_v13 }
 0x535   : > { %v6152_v10 = vpop.permute.xlu0 %6151  ;;  %7688 = vmatpush2.bf16.msra.mxu0 %v8910_v42  ;;  %v6175_v4 = vrot.slane %v6150_v5, 4  ;;  %v6190_v20 = vsel %vm1408_vm0, %v6146_v3, %v6189_v53  ;;  %v12272_v3 = vpop.f32.mrf.mxu0 }
 0x536   : > { %v6176_v19 = vrot.slane %v6152_v10, 4 }
 0x537   : > { %v12277_v10 = vpop.f32.mrf.mxu0 }
 0x538   : > { %v6191_v11 = vsel %vm712_vm10, %v6175_v4, %v6176_v19  ;;  %7649 = vmatmul.mubr.bf16.gmra.mxu1 %v9271_v9  ;;  %v6138_v60 = vpop.permute.xlu1 %6137 }
 0x539   : > { %v6192_v25 = vsel %vm1408_vm0, %v6150_v5, %v6191_v11  ;;  %v6140_v35 = vpop.permute.xlu0 %6139  ;;  %7658 = vmatprep.mubr.bf16.mxu1 %v9272_v45  ;;  %v6169_v12 = vrot.slane %v6138_v60, 4 }
 0x53a   : > { %v8906_v41 = vcombine.low %v6190_v20, %v6192_v25  ;;  %v8907_v2 = vcombine.high %v6190_v20, %v6192_v25  ;;  %v6170_v34 = vrot.slane %v6140_v35, 4 }
 0x53c   : > { %7689 = vmatprep.subr.bf16.mxu0 %v8907_v2  ;;  %v6142_v24 = vpop.permute.xlu1 %6141  ;;  %v6185_v52 = vsel %vm712_vm10, %v6169_v12, %v6170_v34 }
 0x53d   : > { %v6144_v7 = vpop.permute.xlu0 %6143  ;;  %7690 = vmatpush2.bf16.msra.mxu0 %v8906_v41  ;;  %v6171_v36 = vrot.slane %v6142_v24, 4  ;;  %v6186_v1 = vsel %vm1408_vm0, %v6138_v60, %v6185_v52  ;;  %v12280_v60 = vpop.f32.mrf.mxu0 }
 0x53e   : > { %v6172_v30 = vrot.slane %v6144_v7, 4 }
 0x53f   : > { %v12285_v7 = vpop.f32.mrf.mxu0 }
 0x540   : > { %v6187_v56 = vsel %vm712_vm10, %v6171_v36, %v6172_v30  ;;  %7659 = vmatmul.mubr.bf16.gmra.mxu1 %v9273_v32  ;;  %v6050_v51 = vpop.permute.xlu1 %6049 }
 0x541   : > { %v6188_v23 = vsel %vm1408_vm0, %v6142_v24, %v6187_v56  ;;  %v6052_v22 = vpop.permute.xlu0 %6051  ;;  %7774 = vmatprep.mubr.bf16.mxu1 %v12969_v49  ;;  %v6069_v38 = vrot.slane %v6050_v51, 4 }
 0x542   : > { %v8902_v27 = vcombine.low %v6186_v1, %v6188_v23  ;;  %v8903_v16 = vcombine.high %v6186_v1, %v6188_v23  ;;  %v6070_v63 = vrot.slane %v6052_v22, 4 }
 0x544   : > { %7691 = vmatprep.subr.bf16.mxu0 %v8903_v16  ;;  %v6054_v47 = vpop.permute.xlu1 %6053  ;;  %v6085_v29 = vsel %vm712_vm10, %v6069_v38, %v6070_v63 }
 0x545   : > { %v6056_v17 = vpop.permute.xlu0 %6055  ;;  %7692 = vmatpush2.bf16.msra.mxu0 %v8902_v27  ;;  %v6071_v28 = vrot.slane %v6054_v47, 4  ;;  %v6086_v57 = vsel %vm1295_vm1, %v6050_v51, %v6085_v29  ;;  %v12288_v51 = vpop.f32.mrf.mxu0 }
 0x546   : > { %v6072_v33 = vrot.slane %v6056_v17, 4 }
 0x548   : > { %v6087_v26 = vsel %vm712_vm10, %v6071_v28, %v6072_v33  ;;  %v6274_v31 = vpop.permute.xlu1 %6273  ;;  %v12293_v28 = vpop.f32.mrf.mxu0 }
 0x549   : > { %v6088_v0 = vsel %vm1295_vm1, %v6054_v47, %v6087_v26  ;;  %v6276_v15 = vpop.permute.xlu0 %6275  ;;  %v6293_v8 = vrot.slane %v6274_v31, 4 }
 0x54a   : > { %v8898_v55 = vcombine.low %v6086_v57, %v6088_v0  ;;  %v8899_v46 = vcombine.high %v6086_v57, %v6088_v0  ;;  %v6294_v14 = vrot.slane %v6276_v15, 4  ;;  %v12296_v0 = vpop.f32.mrf.mxu0 }
 0x54c   : > { %7693 = vmatprep.subr.bf16.mxu0 %v8899_v46  ;;  %v6278_v37 = vpop.permute.xlu1 %6277  ;;  %v6309_v54 = vsel %vm712_vm10, %v6293_v8, %v6294_v14 }
 0x54d   : > { %v6280_v44 = vpop.permute.xlu0 %6279  ;;  %7694 = vmatpush2.bf16.msra.mxu0 %v8898_v55  ;;  %v6295_v21 = vrot.slane %v6278_v37, 4  ;;  %v6310_v50 = vsel %vm1521_vm2, %v6274_v31, %v6309_v54 }
 0x54e   : > { %v6296_v6 = vrot.slane %v6280_v44, 4 }
 0x550   : > { %v6311_v61 = vsel %vm712_vm10, %v6295_v21, %v6296_v6  ;;  %v6042_v39 = vpop.permute.xlu1 %6041  ;;  %v12301_v6 = vpop.f32.mrf.mxu0 }
 0x551   : > { %v6312_v48 = vsel %vm1521_vm2, %v6278_v37, %v6311_v61  ;;  %v6044_v42 = vpop.permute.xlu0 %6043  ;;  %v6065_v5 = vrot.slane %v6042_v39, 4 }
 0x552   : > { %v8930_v40 = vcombine.low %v6310_v50, %v6312_v48  ;;  %v8931_v13 = vcombine.high %v6310_v50, %v6312_v48  ;;  %v6066_v62 = vrot.slane %v6044_v42, 4 }
 0x554   : > { %7750 = vmatprep.subr.bf16.mxu1 %v8931_v13  ;;  %v6046_v4 = vpop.permute.xlu1 %6045  ;;  %v6081_v11 = vsel %vm712_vm10, %v6065_v5, %v6066_v62 }
 0x555   : > { %v6048_v53 = vpop.permute.xlu0 %6047  ;;  %7751 = vmatpush1.bf16.msra.mxu1 %v8930_v40  ;;  %v6067_v19 = vrot.slane %v6046_v4, 4  ;;  %v6082_v35 = vsel %vm1295_vm1, %v6042_v39, %v6081_v11  ;;  %v12304_v40 = vpop.f32.mrf.mxu0 }
 0x556   : > { %v6068_v9 = vrot.slane %v6048_v53, 4 }
 0x558   : > { %v6083_v20 = vsel %vm712_vm10, %v6067_v19, %v6068_v9  ;;  %v6266_v25 = vpop.permute.xlu1 %6265 }
 0x559   : > { %v6084_v45 = vsel %vm1295_vm1, %v6046_v4, %v6083_v20  ;;  %v6268_v41 = vpop.permute.xlu0 %6267  ;;  %v6289_v24 = vrot.slane %v6266_v25, 4 }
 0x55a   : > { %v8894_v2 = vcombine.low %v6082_v35, %v6084_v45  ;;  %v8895_v34 = vcombine.high %v6082_v35, %v6084_v45  ;;  %v6290_v12 = vrot.slane %v6268_v41, 4 }
 0x55c   : > { %7695 = vmatprep.subr.bf16.mxu0 %v8895_v34  ;;  %v6270_v36 = vpop.permute.xlu1 %6269  ;;  %v6305_v56 = vsel %vm712_vm10, %v6289_v24, %v6290_v12 }
 0x55d   : > { %v6272_v52 = vpop.permute.xlu0 %6271  ;;  %7696 = vmatpush2.bf16.msra.mxu0 %v8894_v2  ;;  %v6291_v30 = vrot.slane %v6270_v36, 4  ;;  %v6306_v22 = vsel %vm1521_vm2, %v6266_v25, %v6305_v56  ;;  %v12309_v25 = vpop.f32.mrf.mxu0 }
 0x55e   : > { %v6292_v32 = vrot.slane %v6272_v52, 4 }
 0x55f   : > { %v12312_v12 = vpop.f32.mrf.mxu0 }
 0x560   : > { %v6307_v1 = vsel %vm712_vm10, %v6291_v30, %v6292_v32  ;;  %v6034_v23 = vpop.permute.xlu1 %6033 }
 0x561   : > { %v6308_v27 = vsel %vm1521_vm2, %v6270_v36, %v6307_v1  ;;  %v6036_v16 = vpop.permute.xlu0 %6035  ;;  %v6061_v17 = vrot.slane %v6034_v23, 4 }
 0x562   : > { %v8926_v63 = vcombine.low %v6306_v22, %v6308_v27  ;;  %v8927_v38 = vcombine.high %v6306_v22, %v6308_v27  ;;  %v6062_v47 = vrot.slane %v6036_v16, 4  ;;  %v12317_v27 = vpop.f32.mrf.mxu0 }
 0x563   : > { %12978 = vst [vmem:[#allocation30_spill] sm:$0xff] %v12317_v27 }
 0x564   : > { %7752 = vmatprep.subr.bf16.mxu1 %v8927_v38  ;;  %v6038_v29 = vpop.permute.xlu1 %6037  ;;  %v6077_v31 = vsel %vm712_vm10, %v6061_v17, %v6062_v47 }
 0x565   : > { %v6040_v33 = vpop.permute.xlu0 %6039  ;;  %7753 = vmatpush1.bf16.msra.mxu1 %v8926_v63  ;;  %v6063_v26 = vrot.slane %v6038_v29, 4  ;;  %v6078_v46 = vsel %vm1295_vm1, %v6034_v23, %v6077_v31  ;;  %v9274_v31 = vld [vmem:[%s12858_s3 + $0x8] ss:$20 sps:$4 sm:$0xff]  }
 0x566   : > { %v6064_v57 = vrot.slane %v6040_v33, 4  ;;  %v7484_v33 = vpop.f32.mrf.mxu1 }
 0x568   : > { %v6079_v15 = vsel %vm712_vm10, %v6063_v26, %v6064_v57  ;;  %v6258_v55 = vpop.permute.xlu1 %6257 }
 0x569   : > { %v6080_v14 = vsel %vm1295_vm1, %v6038_v29, %v6079_v15  ;;  %v6260_v8 = vpop.permute.xlu0 %6259  ;;  %v6285_v54 = vrot.slane %v6258_v55, 4  ;;  %v12320_v29 = vpop.f32.mrf.mxu0 }
 0x56a   : > { %v8890_v37 = vcombine.low %v6078_v46, %v6080_v14  ;;  %v8891_v44 = vcombine.high %v6078_v46, %v6080_v14  ;;  %v6286_v21 = vrot.slane %v6260_v8, 4 }
 0x56c   : > { %7697 = vmatprep.subr.bf16.mxu0 %v8891_v44  ;;  %v6262_v61 = vpop.permute.xlu1 %6261  ;;  %v6301_v48 = vsel %vm712_vm10, %v6285_v54, %v6286_v21  ;;  %v9276_v54 = vld [vmem:[%s12858_s3 + $0x30] ss:$20 sps:$4 sm:$0xff]  }
 0x56d   : > { %v6264_v39 = vpop.permute.xlu0 %6263  ;;  %7698 = vmatpush2.bf16.msra.mxu0 %v8890_v37  ;;  %v6287_v50 = vrot.slane %v6262_v61, 4  ;;  %v6302_v5 = vsel %vm1521_vm2, %v6258_v55, %v6301_v48  ;;  %v9275_v55 = vld [vmem:[%s12858_s3 + $0x34] ss:$20 sps:$4 sm:$0xff]   ;;  %v7486_v37 = vpop.f32.mrf.mxu1 }
 0x56e   : > { %v6288_v42 = vrot.slane %v6264_v39, 4 }
 0x56f   : > { %v7488_v21 = vpop.f32.mrf.mxu1 }
 0x570   : > { %v6303_v13 = vsel %vm712_vm10, %v6287_v50, %v6288_v42  ;;  %v6026_v62 = vpop.permute.xlu1 %6025  ;;  %v9278_v50 = vld [vmem:[%s12858_s3 + $0x5c] ss:$20 sps:$4 sm:$0xff]  }
 0x571   : > { %v6304_v4 = vsel %vm1521_vm2, %v6262_v61, %v6303_v13  ;;  %v6028_v53 = vpop.permute.xlu0 %6027  ;;  %v6057_v20 = vrot.slane %v6026_v62, 4  ;;  %v9277_v61 = vld [vmem:[%s12858_s3 + $0x10] ss:$20 sps:$4 sm:$0xff]  }
 0x572   : > { %v8922_v19 = vcombine.low %v6302_v5, %v6304_v4  ;;  %v8923_v11 = vcombine.high %v6302_v5, %v6304_v4  ;;  %v6058_v9 = vrot.slane %v6028_v53, 4  ;;  %v7490_v53 = vpop.f32.mrf.mxu1 }
 0x574   : > { %7754 = vmatprep.subr.bf16.mxu1 %v8923_v11  ;;  %v6030_v35 = vpop.permute.xlu1 %6029  ;;  %v6073_v2 = vsel %vm712_vm10, %v6057_v20, %v6058_v9 }
 0x575   : > { %v6032_v45 = vpop.permute.xlu0 %6031  ;;  %7755 = vmatpush1.bf16.msra.mxu1 %v8922_v19  ;;  %v6059_v41 = vrot.slane %v6030_v35, 4  ;;  %v6074_v52 = vsel %vm1295_vm1, %v6026_v62, %v6073_v2 }
 0x576   : > { %v6060_v34 = vrot.slane %v6032_v45, 4 }
 0x578   : > { %v6075_v24 = vsel %vm712_vm10, %v6059_v41, %v6060_v34  ;;  %v6250_v36 = vpop.permute.xlu1 %6249 }
 0x579   : > { %v6076_v30 = vsel %vm1295_vm1, %v6030_v35, %v6075_v24  ;;  %v6252_v56 = vpop.permute.xlu0 %6251  ;;  %v6281_v22 = vrot.slane %v6250_v36, 4  ;;  %v9281_v24 = vld [vmem:[%s12858_s3 + $0x84] ss:$20 sps:$4 sm:$0xff]  }
 0x57a   : > { %v8886_v32 = vcombine.low %v6074_v52, %v6076_v30  ;;  %v8887_v1 = vcombine.high %v6074_v52, %v6076_v30  ;;  %v6282_v23 = vrot.slane %v6252_v56, 4  ;;  %v9283_v52 = vld [vmem:[%s12858_s3 + $0x60] ss:$20 sps:$4 sm:$0xff]   ;;  %v7494_v30 = vpop.f32.mrf.mxu1 }
 0x57c   : > { %7699 = vmatprep.subr.bf16.mxu0 %v8887_v1  ;;  %v6254_v16 = vpop.permute.xlu1 %6253  ;;  %v6297_v47 = vsel %vm712_vm10, %v6281_v22, %v6282_v23  ;;  %v7496_v56 = vpop.f32.mrf.mxu1 }
 0x57d   : > { %v6256_v63 = vpop.permute.xlu0 %6255  ;;  %7700 = vmatpush2.bf16.msra.mxu0 %v8886_v32  ;;  %v6283_v38 = vrot.slane %v6254_v16, 4  ;;  %v6298_v57 = vsel %vm1521_vm2, %v6250_v36, %v6297_v47  ;;  %v9282_v36 = vld [vmem:[%s12858_s3 + $0x80] ss:$20 sps:$4 sm:$0xff]  }
 0x57e   : > { %v6284_v17 = vrot.slane %v6256_v63, 4  ;;  %v7498_v32 = vpop.f32.mrf.mxu1 }
 0x580   : > { %v6299_v26 = vsel %vm712_vm10, %v6283_v38, %v6284_v17  ;;  %7702 = vmatmul.mubr.bf16.vlgmr.msra.gmra.mxu0 %v9274_v31  ;;  %v7557_v8 = vpop.f32.mrf.mxu0  ;;  %v12387_v1 = vpop.f32.mrf.mxu1 }
 0x581   : > { %v6300_v15 = vsel %vm1521_vm2, %v6254_v16, %v6299_v26  ;;  %7711 = vmatprep.mubr.bf16.mxu0 %v9275_v55 }
 0x582   : > { %v8918_v46 = vcombine.low %v6298_v57, %v6300_v15  ;;  %v8919_v14 = vcombine.high %v6298_v57, %v6300_v15  ;;  %v7559_v44 = vpop.f32.mrf.mxu0  ;;  %v12389_v23 = vpop.f32.mrf.mxu1 }
 0x584   : > { %7756 = vmatprep.subr.bf16.mxu1 %v8919_v14  ;;  %v7561_v48 = vpop.f32.mrf.mxu0  ;;  %v12391_v22 = vpop.f32.mrf.mxu1 }
 0x585   : > { %7757 = vmatpush1.bf16.msra.mxu1 %v8918_v46 }
 0x586   : > { %v7563_v35 = vpop.f32.mrf.mxu0  ;;  %v12393_v16 = vpop.f32.mrf.mxu1 }
 0x588   : > { %7712 = vmatmul.mubr.bf16.gmra.mxu0 %v9276_v54  ;;  %8936 = vmatmul.mubr.msk.bf16.vlgmr.msra.gmra.mxu1 %vm3686_vm3, %v9277_v61  ;;  %v12395_v63 = vpop.f32.mrf.mxu1  ;;  %v7567_v26 = vpop.f32.mrf.mxu0 }
 0x589   : > { %v12338_v39 = vpop.permute.xlu1 %6507  ;;  %7721 = vmatprep.mubr.bf16.mxu0 %v9278_v50  ;;  %7784 = vmatprep.mubr.bf16.mxu1 %v12969_v49 }
 0x58a   : > { %v12344_v42 = vpop.permute.xlu0 %6512  ;;  %v7412_v13 = vadd.f32 %v12261_v58, %v12338_v39  ;;  %v7414_v62 = vadd.f32 %v12264_v59, %v12338_v39  ;;  %v9279_v59 = vld [vmem:[%s12858_s3 + $0x58] ss:$20 sps:$4 sm:$0xff]   ;;  %v12397_v38 = vpop.f32.mrf.mxu1 }
 0x58b   : > { %v7416_v5 = vadd.f32 %v12269_v43, %v12344_v42  ;;  %v7418_v4 = vadd.f32 %v12272_v3, %v12344_v42  ;;  %v9280_v43 = vld [vmem:[%s12858_s3 + $0x38] ss:$20 sps:$4 sm:$0xff]   ;;  %v7569_v57 = vpop.f32.mrf.mxu0 }
 0x58c   : > { %v7485_v19 = vadd.f32 %v7484_v33, %v7412_v13  ;;  %v7487_v11 = vadd.f32 %v7486_v37, %v7414_v62  ;;  %v12399_v47 = vpop.f32.mrf.mxu1 }
 0x58d   : > { %v7489_v9 = vadd.f32 %v7488_v21, %v7416_v5  ;;  %v7491_v20 = vadd.f32 %v7490_v53, %v7418_v4  ;;  %v12405_v55 = vpop.f32.mrf.mxu0 }
 0x58e   : > { %v12354_v45 = vadd.f32 %v7557_v8, %v7485_v19  ;;  %v12356_v41 = vadd.f32 %v7559_v44, %v7487_v11 }
 0x58f   : > { %v12358_v58 = vadd.f32 %v7561_v48, %v7489_v9  ;;  %v12360_v2 = vadd.f32 %v7563_v35, %v7491_v20  ;;  %v12407_v14 = vpop.f32.mrf.mxu0 }
 0x590   : > { %12979 = vst [vmem:[#allocation31_spill] sm:$0xff] %v12354_v45  ;;  %12980 = vst [vmem:[#allocation32_spill] sm:$0xff] %v12356_v41  ;;  %7722 = vmatmul.mubr.bf16.gmra.mxu0 %v9279_v59  ;;  %8937 = vmatmul.mubr.msk.bf16.gmra.mxu1 %vm3686_vm3, %v9280_v43  ;;  %v7815_v3 = vadd.f32 %v12356_v41, %v12354_v45  ;;  %v6518_v59 = vpop.permute.xlu1 %6517 }
 0x591   : > { %12981 = vst [vmem:[#allocation33_spill] sm:$0xff] %v12358_v58  ;;  %12982 = vst [vmem:[#allocation26_spill] sm:$0xff] %v12360_v2  ;;  %v7818_v34 = vadd.f32 %v12360_v2, %v12358_v58  ;;  %7731 = vmatprep.mubr.bf16.mxu0 %v9281_v24  ;;  %7794 = vmatprep.mubr.bf16.mxu1 %v12969_v49  ;;  %v12409_v37 = vpop.f32.mrf.mxu0  ;;  %v7422_v24 = vadd.f32 %v12277_v10, %v6518_v59 }
 0x592   : > { %7816 = vadd.xlane.f32.xlu1 %v7815_v3 }
 0x593   : > { %7819 = vadd.xlane.f32.xlu0 %v7818_v34  ;;  %v12413_v21 = vpop.f32.mrf.mxu0  ;;  %v6523_v34 = vpop.permute.xlu0 %6522 }
 0x594   : > { %v7426_v2 = vadd.f32 %v12285_v7, %v6523_v34 }
 0x595   : > { %v12417_v61 = vpop.f32.mrf.mxu0 }
 0x597   : > { %v12421_v48 = vpop.f32.mrf.mxu0 }
 0x598   : > { %7732 = vmatmul.mubr.bf16.gmra.mxu0 %v9282_v36  ;;  %8938 = vmatmul.mubr.msk.bf16.gmra.mxu1 %vm3686_vm3, %v9283_v52  ;;  %v7424_v52 = vadd.f32 %v12280_v60, %v6518_v59  ;;  %v7499_v60 = vadd.f32 %v7498_v32, %v7426_v2 }
 0x599   : > { %7804 = vmatprep.mubr.bf16.mxu1 %v12969_v49  ;;  %v12401_v49 = vpop.f32.mrf.mxu1  ;;  %v12425_v62 = vpop.f32.mrf.mxu0 }
 0x59a   : > { %12983 = vst [vmem:[#allocation13_spill] sm:$0xff] %v12401_v49  ;;  %12985 = vst [vmem:[#allocation22_spill] sm:$0xff] %v12425_v62  ;;  %v7495_v49 = vadd.f32 %v7494_v30, %v7422_v24  ;;  %v12453_v62 = vpop.permute.xlu0 %6532 }
 0x59b   : > { %v12429_v4 = vpop.f32.mrf.mxu0 }
 0x59c   : > { %12986 = vst [vmem:[#allocation25_spill] sm:$0xff] %v12429_v4 }
 0x59d   : > { %v12433_v19 = vpop.f32.mrf.mxu0 }
 0x59e   : > { %12987 = vst [vmem:[#allocation17_spill] sm:$0xff] %v12433_v19 }
 0x59f   : > { %v12437_v9 = vpop.f32.mrf.mxu0 }
 0x5a0   : > { %8939 = vmatmul.mubr.msk.bf16.gmra.mxu1 %vm3686_vm3, %v12108_v18  ;;  %v12403_v18 = vpop.f32.mrf.mxu1  ;;  %12989 = vst [vmem:[#allocation16_spill] sm:$0xff] %v12437_v9  ;;  %v7428_v9 = vadd.f32 %v12288_v51, %v6523_v34 }
 0x5a1   : > { %12984 = vst [vmem:[#allocation34_spill] sm:$0xff] %v12403_v18  ;;  %v12451_v18 = vpop.permute.xlu1 %6527 }
 0x5a2   : > { %v7501_v30 = vadd.f32 %v12387_v1, %v7428_v9 }
 0x5e8   : > { %v7630_v17 = vpop.f32.mrf.mxu1 }
 0x5e9   : > { %v7631_v45 = vadd.f32 %v7630_v17, %v12338_v39 }
 0x5ea   : > { %v7632_v33 = vpop.f32.mrf.mxu1 }
 0x5eb   : > { %v7633_v19 = vadd.f32 %v7632_v33, %v12338_v39  ;;  %v12466_v33 = vadd.f32 %v7567_v26, %v7495_v49 }
 0x5ec   : > { %v7634_v31 = vpop.f32.mrf.mxu1 }
 0x5ee   : > { %v7636_v15 = vpop.f32.mrf.mxu1 }
 0x5ef   : > { %v7637_v17 = vadd.f32 %v7636_v15, %v12344_v42 }
 0x5f0   : > { %v7640_v46 = vpop.f32.mrf.mxu1 }
 0x5f2   : > { %v7642_v8 = vpop.f32.mrf.mxu1 }
 0x5f4   : > { %v12411_v44 = vpop.f32.mrf.mxu1 }
 0x5f6   : > { %v12415_v54 = vpop.f32.mrf.mxu1 }
 0x5f8   : > { %v12419_v50 = vpop.f32.mrf.mxu1 }
 0x5fa   : > { %v12423_v13 = vpop.f32.mrf.mxu1 }
 0x5fc   : > { %v12427_v5 = vpop.f32.mrf.mxu1 }
 0x5fe   : > { %v12431_v53 = vpop.f32.mrf.mxu1 }
 0x600   : > { %v12435_v11 = vpop.f32.mrf.mxu1 }
 0x601   : > { %12988 = vst [vmem:[#allocation20_spill] sm:$0xff] %v12435_v11  ;;  %v7497_v11 = vadd.f32 %v7496_v56, %v7424_v52  ;;  %v7432_v56 = vadd.f32 %v12293_v28, %v12451_v18  ;;  %v7438_v28 = vadd.f32 %v12304_v40, %v12453_v62  ;;  %v12486_v40 = vadd.f32 %v12407_v14, %v7501_v30 }
 0x602   : > { %v12439_v20 = vpop.f32.mrf.mxu1  ;;  %v7647_v14 = vadd.f32 %v12415_v54, %v6523_v34 }
 0x603   : > { %12990 = vst [vmem:[#allocation29_spill] sm:$0xff] %v12439_v20  ;;  %v12470_v15 = vadd.f32 %v7569_v57, %v7497_v11  ;;  %v12488_v11 = vpop.permute.xlu1 %6537 }
 0x604   : > { %v12441_v43 = vpop.f32.mrf.mxu1 }
 0x605   : > { %12991 = vst [vmem:[#allocation28_spill] sm:$0xff] %v12441_v43 }
 0x606   : > { %v12446_v58 = vpop.f32.mrf.mxu1 }
 0x607   : > { %12992 = vst [vmem:[#allocation24_spill] sm:$0xff] %v12446_v58  ;;  %v7635_v58 = vadd.f32 %v7634_v31, %v12344_v42 }
 0x640   : > { %v7703_v35 = vpop.f32.mrf.mxu0 }
 0x641   : > { %v7704_v10 = vadd.f32 %v7703_v35, %v7631_v45  ;;  %v7434_v45 = vadd.f32 %v12296_v0, %v12451_v18  ;;  %v7641_v0 = vadd.f32 %v7640_v46, %v6518_v59 }
 0x642   : > { %v7705_v3 = vpop.f32.mrf.mxu0 }
 0x643   : > { %v7706_v27 = vadd.f32 %v7705_v3, %v7633_v19  ;;  %v7511_v3 = vadd.f32 %v12395_v63, %v7438_v28 }
 0x644   : > { %v7707_v36 = vpop.f32.mrf.mxu0 }
 0x645   : > { %v7708_v19 = vadd.f32 %v7707_v36, %v7635_v58  ;;  %v7507_v58 = vadd.f32 %v12391_v22, %v7434_v45  ;;  %v7653_v45 = vadd.f32 %v12423_v13, %v12451_v18 }
 0x646   : > { %v7709_v41 = vpop.f32.mrf.mxu0 }
 0x647   : > { %v7710_v31 = vadd.f32 %v7709_v41, %v7637_v17  ;;  %v7505_v41 = vadd.f32 %v12389_v23, %v7432_v56  ;;  %v7821_v23 = vadd.f32 %v12470_v15, %v12466_v33  ;;  %v12514_v17 = vadd.f32 %v12413_v21, %v7507_v58  ;;  %v6543_v56 = vpop.permute.xlu0 %6542  ;;  %v12994_v58 = vld [vmem:[#allocation25_spill] sm:$0xff] }
 0x648   : > { %v7713_v43 = vpop.f32.mrf.mxu0  ;;  %v7776_v20 = vpop.f32.mrf.mxu1  ;;  %v12528_v21 = vadd.f32 %v12421_v48, %v7511_v3  ;;  %v7655_v48 = vadd.f32 %v12427_v5, %v12453_v62 }
 0x649   : > { %v12457_v39 = vadd.f32 %v7776_v20, %v7704_v10  ;;  %v7643_v20 = vadd.f32 %v7642_v8, %v6518_v59  ;;  %v7714_v46 = vadd.f32 %v7713_v43, %v7641_v0 }
 0x64a   : > { %v7715_v4 = vpop.f32.mrf.mxu0  ;;  %v7778_v7 = vpop.f32.mrf.mxu1 }
 0x64b   : > { %v12459_v51 = vadd.f32 %v7778_v7, %v7706_v27  ;;  %v7436_v27 = vadd.f32 %v12301_v6, %v12453_v62  ;;  %v12483_v6 = vadd.f32 %v12405_v55, %v7499_v60  ;;  %v7716_v8 = vadd.f32 %v7715_v4, %v7643_v20  ;;  %v12993_v20 = vld [vmem:[#allocation22_spill] sm:$0xff] }
 0x64c   : > { %v7717_v2 = vpop.f32.mrf.mxu0  ;;  %v7780_v32 = vpop.f32.mrf.mxu1  ;;  %v7645_v55 = vadd.f32 %v12411_v44, %v6523_v34  ;;  %v7442_v4 = vadd.f32 %v12309_v25, %v12488_v11  ;;  %v12509_v60 = vadd.f32 %v12409_v37, %v7505_v41  ;;  %v7651_v25 = vadd.f32 %v12419_v50, %v12451_v18 }
 0x64d   : > { %v8101_v42 = vadd.f32 %v12459_v51, %v12457_v39  ;;  %v12476_v35 = vadd.f32 %v7780_v32, %v7708_v19  ;;  %v7509_v22 = vadd.f32 %v12393_v16, %v7436_v27  ;;  %v7444_v16 = vadd.f32 %v12312_v12, %v12488_v11 }
 0x64e   : > { %v7719_v1 = vpop.f32.mrf.mxu0  ;;  %v7782_v9 = vpop.f32.mrf.mxu1  ;;  %v7824_v44 = vadd.f32 %v12486_v40, %v12483_v6  ;;  %v7718_v54 = vadd.f32 %v7717_v2, %v7645_v55  ;;  %v7515_v50 = vadd.f32 %v12397_v38, %v7442_v4  ;;  %v7827_v28 = vadd.f32 %v12514_v17, %v12509_v60 }
 0x64f   : > { %v12478_v49 = vadd.f32 %v7782_v9, %v7710_v31  ;;  %8102 = vadd.xlane.f32.xlu0 %v8101_v42  ;;  %v7720_v34 = vadd.f32 %v7719_v1, %v7647_v14  ;;  %v12525_v2 = vadd.f32 %v12417_v61, %v7509_v22  ;;  %v7517_v19 = vadd.f32 %v12399_v47, %v7444_v16  ;;  %v12997_v22 = vld [vmem:[#allocation20_spill] sm:$0xff] }
 0x650   : > { %v7723_v26 = vpop.f32.mrf.mxu0  ;;  %v7786_v57 = vpop.f32.mrf.mxu1  ;;  %v7448_v61 = vadd.f32 %v12320_v29, %v6543_v56  ;;  %v7657_v38 = vadd.f32 %v12431_v53, %v12453_v62  ;;  %v12546_v41 = vadd.f32 %v12993_v20, %v7515_v50  ;;  %v12995_v29 = vld [vmem:[#allocation30_spill] sm:$0xff]  ;;  %v7661_v3 = vadd.f32 %v12997_v22, %v12488_v11  ;;  %v13002_v50 = vld [vmem:[#allocation28_spill] sm:$0xff]  ;;  %v7849_v22 = vld [vmem:[%s12860_s5 + $0x8] sm:$0xff] }
 0x651   : > { %v8104_v59 = vadd.f32 %v12478_v49, %v12476_v35  ;;  %v12498_v52 = vadd.f32 %v7786_v57, %v7714_v46  ;;  %v7724_v27 = vadd.f32 %v7723_v26, %v7651_v25  ;;  %v12549_v26 = vadd.f32 %v12994_v58, %v7517_v19 }
 0x652   : > { %v7725_v24 = vpop.f32.mrf.mxu0  ;;  %v7788_v36 = vpop.f32.mrf.mxu1  ;;  %v7446_v57 = vadd.f32 %v12995_v29, %v6543_v56  ;;  %v7830_v46 = vadd.f32 %v12528_v21, %v12525_v2  ;;  %v7665_v19 = vadd.f32 %v13002_v50, %v6543_v56 }
 0x653   : > { %v12500_v43 = vadd.f32 %v7788_v36, %v7716_v8  ;;  %8105 = vadd.xlane.f32.xlu1 %v8104_v59  ;;  %7822 = vadd.xlane.f32.xlu0 %v7821_v23  ;;  %v7726_v18 = vadd.f32 %v7725_v24, %v7653_v45  ;;  %v12996_v59 = vld [vmem:[#allocation34_spill] sm:$0xff]  ;;  %v12998_v36 = vld [vmem:[#allocation29_spill] sm:$0xff] }
 0x654   : > { %v7727_v10 = vpop.f32.mrf.mxu0  ;;  %v7790_v63 = vpop.f32.mrf.mxu1  ;;  %v7521_v23 = vadd.f32 %v12996_v59, %v7448_v61  ;;  %v7663_v14 = vadd.f32 %v12998_v36, %v12488_v11 }
 0x655   : > { %v8107_v7 = vadd.f32 %v12500_v43, %v12498_v52  ;;  %v12520_v32 = vadd.f32 %v7790_v63, %v7718_v54  ;;  %v7728_v8 = vadd.f32 %v7727_v10, %v7655_v48  ;;  %v7833_v10 = vadd.f32 %v12549_v26, %v12546_v41  ;;  %v12999_v63 = vld [vmem:[#allocation13_spill] sm:$0xff] }
 0x656   : > { %v7729_v12 = vpop.f32.mrf.mxu0  ;;  %v7792_v30 = vpop.f32.mrf.mxu1 }
 0x657   : > { %v12522_v37 = vadd.f32 %v7792_v30, %v7720_v34  ;;  %8108 = vadd.xlane.f32.xlu1 %v8107_v7  ;;  %7825 = vadd.xlane.f32.xlu0 %v7824_v44  ;;  %v7730_v62 = vadd.f32 %v7729_v12, %v7657_v38  ;;  %v7519_v44 = vadd.f32 %v12999_v63, %v7446_v57  ;;  %v13000_v34 = vld [vmem:[#allocation16_spill] sm:$0xff]  ;;  %v13001_v30 = vld [vmem:[#allocation17_spill] sm:$0xff]  ;;  %v7820_v57 = vpop.xlane.xlu0 %7819 }
 0x658   : > { %v7733_v31 = vpop.f32.mrf.mxu0  ;;  %v7796_v42 = vpop.f32.mrf.mxu1  ;;  %v12569_v7 = vadd.f32 %v13000_v34, %v7521_v23  ;;  %v7841_v59 = vmul.f32 0.00390625, %v7820_v57  ;;  %v7848_v23 = vld [vmem:[%s12860_s5] sm:$0xff]  ;;  %v7851_v34 = vld [vmem:[%s12860_s5 + $0x18] sm:$0xff] }
 0x659   : > { %v8110_v13 = vadd.f32 %v12522_v37, %v12520_v32  ;;  %v12541_v47 = vadd.f32 %v7796_v42, %v7724_v27  ;;  %v7734_v25 = vadd.f32 %v7733_v31, %v7661_v3  ;;  %v12574_v45 = vadd.f32 %v13001_v30, %v7519_v44 }
 0x65a   : > { %v7735_v1 = vpop.f32.mrf.mxu0  ;;  %v7798_v9 = vpop.f32.mrf.mxu1 }
 0x65b   : > { %v12543_v0 = vadd.f32 %v7798_v9, %v7726_v18  ;;  %8111 = vadd.xlane.f32.xlu1 %v8110_v13  ;;  %7828 = vadd.xlane.f32.xlu0 %v7827_v28  ;;  %v7736_v12 = vadd.f32 %v7735_v1, %v7663_v14  ;;  %v13003_v18 = vld [vmem:[#allocation24_spill] sm:$0xff]  ;;  %v7836_v48 = vadd.f32 %v12569_v7, %v12574_v45  ;;  %v7850_v14 = vld [vmem:[%s12860_s5 + $0x10] sm:$0xff] }
 0x65c   : > { %v7800_v5 = vpop.f32.mrf.mxu1  ;;  %v7737_v55 = vpop.f32.mrf.mxu0  ;;  %v7667_v13 = vadd.f32 %v13003_v18, %v6543_v56 }
 0x65d   : > { %v8113_v53 = vadd.f32 %v12543_v0, %v12541_v47  ;;  %v12561_v4 = vadd.f32 %v7800_v5, %v7728_v8  ;;  %v7738_v1 = vadd.f32 %v7737_v55, %v7665_v19  ;;  %v7817_v5 = vpop.xlane.xlu1 %7816 }
 0x65e   : > { %v7802_v24 = vpop.f32.mrf.mxu1  ;;  %v7739_v42 = vpop.f32.mrf.mxu0 }
 0x65f   : > { %v12563_v16 = vadd.f32 %v7802_v24, %v7730_v62  ;;  %8114 = vadd.xlane.f32.xlu1 %v8113_v53  ;;  %7831 = vadd.xlane.f32.xlu0 %v7830_v46  ;;  %v7740_v9 = vadd.f32 %v7739_v42, %v7667_v13  ;;  %v7840_v53 = vmul.f32 0.00390625, %v7817_v5  ;;  %v7852_v42 = vld [vmem:[%s12860_s5 + $0x20] sm:$0xff] }
 0x660   : > { %v7806_v54 = vpop.f32.mrf.mxu1 }
 0x661   : > { %v8116_v11 = vadd.f32 %v12563_v16, %v12561_v4  ;;  %v12578_v28 = vadd.f32 %v7806_v54, %v7734_v25  ;;  %v7856_v36 = vmul.f32 %v7848_v23, %v7840_v53 }
 0x662   : > { %v7808_v27 = vpop.f32.mrf.mxu1 }
 0x663   : > { %v12580_v61 = vadd.f32 %v7808_v27, %v7736_v12  ;;  %8117 = vadd.xlane.f32.xlu1 %v8116_v11  ;;  %7834 = vadd.xlane.f32.xlu0 %v7833_v10  ;;  %v7857_v10 = vmul.f32 %v7849_v22, %v7841_v59  ;;  %v7865_v19 = vsel %vm7864_vm4, %v7856_v36, 0.0 }
 0x664   : > { %v7810_v31 = vpop.f32.mrf.mxu1 }
 0x665   : > { %v8119_v38 = vadd.f32 %v12580_v61, %v12578_v28  ;;  %v12586_v58 = vadd.f32 %v7810_v31, %v7738_v1  ;;  %v7866_v27 = vsel %vm7864_vm4, %v7857_v10, 0.0 }
 0x666   : > { %v7812_v20 = vpop.f32.mrf.mxu1 }
 0x667   : > { %v12588_v29 = vadd.f32 %v7812_v20, %v7740_v9  ;;  %8120 = vadd.xlane.f32.xlu1 %v8119_v38  ;;  %7837 = vadd.xlane.f32.xlu0 %v7836_v48  ;;  %v7853_v9 = vld [vmem:[%s12860_s5 + $0x28] sm:$0xff] }
 0x669   : > { %v8122_v56 = vadd.f32 %v12588_v29, %v12586_v58 }
 0x66b   : > { %8123 = vadd.xlane.f32.xlu1 %v8122_v56 }
 0x6d8   : > { %v8103_v46 = vpop.xlane.xlu0 %8102 }
 0x6d9   : > { %v8125_v54 = vmul.f32 0.00390625, %v8103_v46 }
 0x6db   : > { %v8141_v48 = vmul.f32 %v8125_v54, %v7848_v23 }
 0x6dc   : > { %v7823_v8 = vpop.xlane.xlu0 %7822  ;;  %v8106_v62 = vpop.xlane.xlu1 %8105 }
 0x6dd   : > { %v7842_v24 = vmul.f32 0.00390625, %v7823_v8  ;;  %v8126_v63 = vmul.f32 0.00390625, %v8106_v62  ;;  %v7867_v8 = vadd.f32 %v7866_v27, %v7865_v19  ;;  %v8149_v23 = vsel %vm7864_vm4, %v8141_v48, 0.0 }
 0x6df   : > { %v7858_v30 = vmul.f32 %v7850_v14, %v7842_v24  ;;  %v8142_v18 = vmul.f32 %v8126_v63, %v7849_v22  ;;  %v7854_v24 = vld [vmem:[%s12860_s5 + $0x30] sm:$0xff] }
 0x6e0   : > { %v7826_v3 = vpop.xlane.xlu0 %7825  ;;  %v8109_v55 = vpop.xlane.xlu1 %8108 }
 0x6e1   : > { %v7843_v44 = vmul.f32 0.00390625, %v7826_v3  ;;  %v8127_v25 = vmul.f32 0.00390625, %v8109_v55  ;;  %v7868_v56 = vsel %vm7864_vm4, %v7858_v30, 0.0  ;;  %v8150_v62 = vsel %vm7864_vm4, %v8142_v18, 0.0  ;;  %v7855_v18 = vld [vmem:[%s12860_s5 + $0x38] sm:$0xff] }
 0x6e2   : > { %v7869_v3 = vadd.f32 %v7868_v56, %v7867_v8 }
 0x6e3   : > { %v7859_v13 = vmul.f32 %v7851_v34, %v7843_v44  ;;  %v8143_v1 = vmul.f32 %v8127_v25, %v7850_v14  ;;  %v8151_v25 = vadd.f32 %v8150_v62, %v8149_v23 }
 0x6e4   : > { %v7829_v12 = vpop.xlane.xlu0 %7828  ;;  %v8112_v11 = vpop.xlane.xlu1 %8111 }
 0x6e5   : > { %v7844_v50 = vmul.f32 0.00390625, %v7829_v12  ;;  %v8128_v31 = vmul.f32 0.00390625, %v8112_v11  ;;  %v7870_v53 = vsel %vm7864_vm4, %v7859_v13, 0.0  ;;  %v8152_v55 = vsel %vm7864_vm4, %v8143_v1, 0.0 }
 0x6e6   : > { %v7871_v12 = vadd.f32 %v7870_v53, %v7869_v3  ;;  %v8153_v19 = vadd.f32 %v8152_v55, %v8151_v25 }
 0x6e7   : > { %v7860_v57 = vmul.f32 %v7852_v42, %v7844_v50  ;;  %v8144_v59 = vmul.f32 %v8128_v31, %v7851_v34 }
 0x6e8   : > { %v7832_v38 = vpop.xlane.xlu0 %7831  ;;  %v8115_v20 = vpop.xlane.xlu1 %8114 }
 0x6e9   : > { %v7845_v5 = vmul.f32 0.00390625, %v7832_v38  ;;  %v8129_v46 = vmul.f32 0.00390625, %v8115_v20  ;;  %v7872_v10 = vsel %vm7864_vm4, %v7860_v57, 0.0  ;;  %v8154_v34 = vsel %vm7864_vm4, %v8144_v59, 0.0 }
 0x6ea   : > { %v7873_v27 = vadd.f32 %v7872_v10, %v7871_v12  ;;  %v8155_v20 = vadd.f32 %v8154_v34, %v8153_v19 }
 0x6eb   : > { %v7861_v22 = vmul.f32 %v7853_v9, %v7845_v5  ;;  %v8145_v63 = vmul.f32 %v8129_v46, %v7852_v42 }
 0x6ec   : > { %v7835_v36 = vpop.xlane.xlu0 %7834  ;;  %v8118_v14 = vpop.xlane.xlu1 %8117 }
 0x6ed   : > { %v7846_v44 = vmul.f32 0.00390625, %v7835_v36  ;;  %v8130_v54 = vmul.f32 0.00390625, %v8118_v14  ;;  %v7874_v11 = vsel %vm7864_vm4, %v7861_v22, 0.0  ;;  %v8156_v42 = vsel %vm7864_vm4, %v8145_v63, 0.0 }
 0x6ee   : > { %v7875_v56 = vadd.f32 %v7874_v11, %v7873_v27  ;;  %v8157_v46 = vadd.f32 %v8156_v42, %v8155_v20  ;;  %v7890_v42 = vld [vmem:[%s12862_s7 + $0x8] sm:$0xff]  ;;  %v8170_v20 = vld [vmem:[%s12861_s6] sm:$0x1] }
 0x6ef   : > { %v7862_v30 = vmul.f32 %v7854_v24, %v7846_v44  ;;  %v8146_v50 = vmul.f32 %v8130_v54, %v7853_v9 }
 0x6f0   : > { %v7838_v13 = vpop.xlane.xlu0 %7837  ;;  %v8121_v31 = vpop.xlane.xlu1 %8120 }
 0x6f1   : > { %v7876_v48 = vsel %vm7864_vm4, %v7862_v30, 0.0  ;;  %v7847_v1 = vmul.f32 0.00390625, %v7838_v13  ;;  %v8131_v38 = vmul.f32 0.00390625, %v8121_v31  ;;  %v8158_v57 = vsel %vm7864_vm4, %v8146_v50, 0.0  ;;  %v7886_v30 = vld [vmem:[%s12861_s6] sm:$0x1] }
 0x6f2   : > { %v7877_v8 = vadd.f32 %v7876_v48, %v7875_v56  ;;  %v8159_v23 = vadd.f32 %v8158_v57, %v8157_v46  ;;  %v7889_v48 = vld [vmem:[%s12862_s7] sm:$0xff]  ;;  %v7892_v56 = vld [vmem:[%s12862_s7 + $0x18] sm:$0xff]  ;;  %v7891_v57 = vld [vmem:[%s12862_s7 + $0x10] sm:$0xff] }
 0x6f3   : > { %v7863_v5 = vmul.f32 %v7855_v18, %v7847_v1  ;;  %v8147_v9 = vmul.f32 %v8131_v38, %v7854_v24  ;;  %v13004_v1 = vld [vmem:[#allocation12_spill] sm:$0xff] }
 0x6f4   : > { %v8124_v62 = vpop.xlane.xlu1 %8123 }
 0x6f5   : > { %v7878_v53 = vsel %vm7864_vm4, %v7863_v5, 0.0  ;;  %v8160_v59 = vsel %vm7864_vm4, %v8147_v9, 0.0  ;;  %v8132_v22 = vmul.f32 0.00390625, %v8124_v62 }
 0x6f6   : > { %v7879_v3 = vadd.f32 %v7878_v53, %v7877_v8  ;;  %v8161_v14 = vadd.f32 %v8160_v59, %v8159_v23  ;;  %v7893_v23 = vld [vmem:[%s12862_s7 + $0x20] sm:$0xff] }
 0x6f7   : > { %v8148_v55 = vmul.f32 %v8132_v22, %v7855_v18  ;;  %v7894_v22 = vld [vmem:[%s12862_s7 + $0x28] sm:$0xff] }
 0x6f8   : > { %v7880_v36 = vrot.slane %v7879_v3, 4 }
 0x6f9   : > { %v8162_v10 = vsel %vm7864_vm4, %v8148_v55, 0.0 }
 0x6fa   : > { %v7881_v63 = vadd.f32 %v7880_v36, %v7879_v3  ;;  %v8163_v44 = vadd.f32 %v8162_v10, %v8161_v14 }
 0x6fc   : > { %v7882_v54 = vrot.slane %v7881_v63, 2  ;;  %v8164_v25 = vrot.slane %v8163_v44, 4 }
 0x6fe   : > { %v7883_v24 = vadd.f32 %v7882_v54, %v7881_v63  ;;  %v8165_v12 = vadd.f32 %v8164_v25, %v8163_v44  ;;  %v7896_v63 = vld [vmem:[%s12862_s7 + $0x38] sm:$0xff]  ;;  %v7895_v44 = vld [vmem:[%s12862_s7 + $0x30] sm:$0xff] }
 0x700   : > { %v7884_v34 = vrot.slane %v7883_v24, 1  ;;  %v8166_v11 = vrot.slane %v8165_v12, 2 }
 0x702   : > { %v7885_v50 = vadd.f32 %v7884_v34, %v7883_v24  ;;  %v8167_v19 = vadd.f32 %v8166_v11, %v8165_v12 }
 0x704   : > { %v7887_v27 = vadd.f32 %v7886_v30, %v7885_v50  ;;  %v8168_v18 = vrot.slane %v8167_v19, 1 }
 0x706   : > { %v7888_v13 = vmax.f32 %v7887_v27, 0.0  ;;  %v8169_v31 = vadd.f32 %v8168_v18, %v8167_v19 }
 0x708   : > { %v7900_v38 = vrot.slane %v7888_v13, %v13004_v1  ;;  %v8171_v46 = vadd.f32 %v8170_v20, %v8169_v31 }
 0x70a   : > { %v7902_v5 = vmul.f32 %v7900_v38, %v7890_v42  ;;  %v7901_v9 = vmul.f32 %v7900_v38, %v7889_v48  ;;  %v7904_v53 = vmul.f32 %v7900_v38, %v7892_v56  ;;  %v7903_v59 = vmul.f32 %v7900_v38, %v7891_v57 }
 0x70b   : > { %v8172_v3 = vmax.f32 %v8171_v46, 0.0  ;;  %v7906_v14 = vmul.f32 %v7900_v38, %v7894_v22  ;;  %v7905_v10 = vmul.f32 %v7900_v38, %v7893_v23  ;;  %v7908_v54 = vmul.f32 %v7900_v38, %v7896_v63 }
 0x70c   : > { %v7912_v8 = vsel %vm7864_vm4, %v7902_v5, 0.0  ;;  %v7909_v62 = vsel %vm7864_vm4, %v7901_v9, 0.0  ;;  %v7918_v55 = vsel %vm7864_vm4, %v7904_v53, 0.0  ;;  %v7915_v36 = vsel %vm7864_vm4, %v7903_v59, 0.0 }
 0x70d   : > { %7913 = vadd.xlane.f32.xlu1 %v7912_v8  ;;  %7910 = vadd.xlane.f32.xlu0 %v7909_v62  ;;  %v8184_v25 = vrot.slane %v8172_v3, %v13004_v1  ;;  %v7924_v24 = vsel %vm7864_vm4, %v7906_v14, 0.0  ;;  %v7921_v12 = vsel %vm7864_vm4, %v7905_v10, 0.0  ;;  %v7907_v34 = vmul.f32 %v7900_v38, %v7895_v44  ;;  %v7933_v8 = vld [vmem:[%s12863_s8] sm:$0xff]  ;;  %v7934_v62 = vld [vmem:[%s12863_s8 + $0x8] sm:$0xff]  ;;  %v7935_v3 = vld [vmem:[%s12863_s8 + $0x10] sm:$0xff] }
 0x70e   : > { %v7930_v11 = vsel %vm7864_vm4, %v7908_v54, 0.0 }
 0x70f   : > { %v7927_v30 = vsel %vm7864_vm4, %v7907_v34, 0.0  ;;  %v8186_v50 = vmul.f32 %v8184_v25, %v7890_v42  ;;  %v8185_v19 = vmul.f32 %v8184_v25, %v7889_v48  ;;  %v8188_v13 = vmul.f32 %v8184_v25, %v7892_v56 }
 0x710   : > { %v8187_v31 = vmul.f32 %v8184_v25, %v7891_v57  ;;  %v8190_v20 = vmul.f32 %v8184_v25, %v7894_v22  ;;  %v8189_v5 = vmul.f32 %v8184_v25, %v7893_v23  ;;  %v8192_v9 = vmul.f32 %v8184_v25, %v7896_v63 }
 0x711   : > { %7919 = vadd.xlane.f32.xlu1 %v7918_v55  ;;  %7916 = vadd.xlane.f32.xlu0 %v7915_v36  ;;  %v8196_v27 = vsel %vm7864_vm4, %v8186_v50, 0.0  ;;  %v8193_v18 = vsel %vm7864_vm4, %v8185_v19, 0.0  ;;  %v8202_v1 = vsel %vm7864_vm4, %v8188_v13, 0.0  ;;  %v8191_v46 = vmul.f32 %v8184_v25, %v7895_v44  ;;  %v7936_v55 = vld [vmem:[%s12863_s8 + $0x18] sm:$0xff]  ;;  %v7937_v25 = vld [vmem:[%s12863_s8 + $0x20] sm:$0xff] }
 0x712   : > { %v8199_v38 = vsel %vm7864_vm4, %v8187_v31, 0.0  ;;  %v8208_v42 = vsel %vm7864_vm4, %v8190_v20, 0.0  ;;  %v8205_v48 = vsel %vm7864_vm4, %v8189_v5, 0.0  ;;  %v8214_v56 = vsel %vm7864_vm4, %v8192_v9, 0.0 }
 0x713   : > { %v8211_v57 = vsel %vm7864_vm4, %v8191_v46, 0.0 }
 0x715   : > { %7925 = vadd.xlane.f32.xlu1 %v7924_v24  ;;  %7922 = vadd.xlane.f32.xlu0 %v7921_v12  ;;  %v7938_v24 = vld [vmem:[%s12863_s8 + $0x28] sm:$0xff] }
 0x719   : > { %7931 = vadd.xlane.f32.xlu1 %v7930_v11  ;;  %7928 = vadd.xlane.f32.xlu0 %v7927_v30 }
 0x71d   : > { %8197 = vadd.xlane.f32.xlu1 %v8196_v27  ;;  %8194 = vadd.xlane.f32.xlu0 %v8193_v18  ;;  %v7939_v27 = vld [vmem:[%s12863_s8 + $0x30] sm:$0xff]  ;;  %v7940_v18 = vld [vmem:[%s12863_s8 + $0x38] sm:$0xff] }
 0x721   : > { %8203 = vadd.xlane.f32.xlu1 %v8202_v1  ;;  %8200 = vadd.xlane.f32.xlu0 %v8199_v38 }
 0x725   : > { %8209 = vadd.xlane.f32.xlu1 %v8208_v42  ;;  %8206 = vadd.xlane.f32.xlu0 %v8205_v48 }
 0x729   : > { %8215 = vadd.xlane.f32.xlu1 %v8214_v56  ;;  %8212 = vadd.xlane.f32.xlu0 %v8211_v57 }
 0x796   : > { %v7911_v53 = vpop.xlane.xlu0 %7910  ;;  %v7914_v59 = vpop.xlane.xlu1 %7913 }
 0x797   : > { %v7941_v22 = vadd.f32 %v7933_v8, %v7911_v53  ;;  %v7942_v23 = vadd.f32 %v7934_v62, %v7914_v59 }
 0x799   : > { %v8940_v36 = vmul.f32 -1.442695, %v7941_v22  ;;  %v8941_v14 = vmul.f32 -1.442695, %v7942_v23 }
 0x79a   : > { %v7917_v10 = vpop.xlane.xlu0 %7916  ;;  %v7920_v63 = vpop.xlane.xlu1 %7919 }
 0x79b   : > { %9170 = vpow2.f32 %v8940_v36  ;;  %v7943_v44 = vadd.f32 %v7935_v3, %v7917_v10  ;;  %v7944_v54 = vadd.f32 %v7936_v55, %v7920_v63 }
 0x79c   : > { %9172 = vpow2.f32 %v8941_v14 }
 0x79d   : > { %v8942_v12 = vmul.f32 -1.442695, %v7943_v44  ;;  %v8943_v34 = vmul.f32 -1.442695, %v7944_v54 }
 0x79e   : > { %v7923_v11 = vpop.xlane.xlu0 %7922  ;;  %v7926_v30 = vpop.xlane.xlu1 %7925 }
 0x79f   : > { %9174 = vpow2.f32 %v8942_v12  ;;  %v7945_v50 = vadd.f32 %v7937_v25, %v7923_v11  ;;  %v7946_v19 = vadd.f32 %v7938_v24, %v7926_v30 }
 0x7a0   : > { %9176 = vpow2.f32 %v8943_v34 }
 0x7a1   : > { %v8944_v13 = vmul.f32 -1.442695, %v7945_v50  ;;  %v8945_v31 = vmul.f32 -1.442695, %v7946_v19 }
 0x7a2   : > { %v7929_v1 = vpop.xlane.xlu0 %7928  ;;  %v7932_v38 = vpop.xlane.xlu1 %7931 }
 0x7a3   : > { %9178 = vpow2.f32 %v8944_v13  ;;  %v7947_v20 = vadd.f32 %v7939_v27, %v7929_v1  ;;  %v7948_v5 = vadd.f32 %v7940_v18, %v7932_v38 }
 0x7a4   : > { %9180 = vpow2.f32 %v8945_v31 }
 0x7a5   : > { %v8946_v42 = vmul.f32 -1.442695, %v7947_v20  ;;  %v8947_v48 = vmul.f32 -1.442695, %v7948_v5 }
 0x7a6   : > { %v8195_v9 = vpop.xlane.xlu0 %8194  ;;  %v8198_v46 = vpop.xlane.xlu1 %8197 }
 0x7a7   : > { %9182 = vpow2.f32 %v8946_v42  ;;  %v8225_v56 = vadd.f32 %v8195_v9, %v7933_v8  ;;  %v8226_v57 = vadd.f32 %v8198_v46, %v7934_v62 }
 0x7a8   : > { %v9171_v53 = vpop.eup %9170  ;;  %9184 = vpow2.f32 %v8947_v48 }
 0x7a9   : > { %v9173_v59 = vpop.eup %9172  ;;  %v7973_v22 = vadd.f32 1.0, %v9171_v53  ;;  %v8948_v23 = vmul.f32 -1.442695, %v8225_v56  ;;  %v8949_v14 = vmul.f32 -1.442695, %v8226_v57 }
 0x7aa   : > { %v7974_v36 = vadd.f32 1.0, %v9173_v59  ;;  %v8201_v10 = vpop.xlane.xlu0 %8200  ;;  %v8204_v63 = vpop.xlane.xlu1 %8203 }
 0x7ab   : > { %9186 = vrcp.f32 %v7973_v22  ;;  %v8227_v44 = vadd.f32 %v8201_v10, %v7935_v3  ;;  %v8228_v54 = vadd.f32 %v8204_v63, %v7936_v55 }
 0x7ac   : > { %v9175_v12 = vpop.eup %9174  ;;  %9188 = vrcp.f32 %v7974_v36 }
 0x7ad   : > { %v9177_v34 = vpop.eup %9176  ;;  %v7975_v11 = vadd.f32 1.0, %v9175_v12  ;;  %9190 = vpow2.f32 %v8948_v23  ;;  %v8950_v30 = vmul.f32 -1.442695, %v8227_v44  ;;  %v8951_v62 = vmul.f32 -1.442695, %v8228_v54 }
 0x7ae   : > { %v7976_v8 = vadd.f32 1.0, %v9177_v34  ;;  %9192 = vpow2.f32 %v8949_v14  ;;  %v8207_v50 = vpop.xlane.xlu0 %8206  ;;  %v8210_v19 = vpop.xlane.xlu1 %8209 }
 0x7af   : > { %9194 = vrcp.f32 %v7975_v11  ;;  %v8229_v13 = vadd.f32 %v8207_v50, %v7937_v25  ;;  %v8230_v31 = vadd.f32 %v8210_v19, %v7938_v24 }
 0x7b0   : > { %v9179_v1 = vpop.eup %9178  ;;  %9196 = vrcp.f32 %v7976_v8 }
 0x7b1   : > { %v9181_v38 = vpop.eup %9180  ;;  %v7977_v20 = vadd.f32 1.0, %v9179_v1  ;;  %9198 = vpow2.f32 %v8950_v30  ;;  %v8952_v3 = vmul.f32 -1.442695, %v8229_v13  ;;  %v8953_v5 = vmul.f32 -1.442695, %v8230_v31 }
 0x7b2   : > { %v7978_v55 = vadd.f32 1.0, %v9181_v38  ;;  %9200 = vpow2.f32 %v8951_v62  ;;  %v8213_v42 = vpop.xlane.xlu0 %8212  ;;  %v8216_v48 = vpop.xlane.xlu1 %8215 }
 0x7b3   : > { %9202 = vrcp.f32 %v7977_v20  ;;  %v8231_v9 = vadd.f32 %v8213_v42, %v7939_v27  ;;  %v8232_v46 = vadd.f32 %v8216_v48, %v7940_v18 }
 0x7b4   : > { %v9183_v56 = vpop.eup %9182  ;;  %9204 = vrcp.f32 %v7978_v55 }
 0x7b5   : > { %v9185_v57 = vpop.eup %9184  ;;  %v7979_v53 = vadd.f32 1.0, %v9183_v56  ;;  %9206 = vpow2.f32 %v8952_v3  ;;  %v8954_v25 = vmul.f32 -1.442695, %v8231_v9  ;;  %v8955_v59 = vmul.f32 -1.442695, %v8232_v46 }
 0x7b6   : > { %v7980_v24 = vadd.f32 1.0, %v9185_v57  ;;  %9208 = vpow2.f32 %v8953_v5 }
 0x7b7   : > { %9210 = vrcp.f32 %v7979_v53  ;;  %v8053_v53 = vld [vmem:[%s9553_s27] sm:$0xff] }
 0x7b8   : > { %v9187_v22 = vpop.eup %9186  ;;  %9212 = vrcp.f32 %v7980_v24 }
 0x7b9   : > { %v9189_v23 = vpop.eup %9188  ;;  %9214 = vpow2.f32 %v8954_v25  ;;  %7999 = vperm.xlu0 %9088, %v9187_v22   ;;  %v8054_v25 = vld [vmem:[%s9553_s27 + $0x8] sm:$0xff] }
 0x7ba   : > { %v9191_v36 = vpop.eup %9190  ;;  %9216 = vpow2.f32 %v8955_v59  ;;  %8004 = vperm.xlu1 %9089, %v9189_v23   ;;  %v13005_v59 = vld [vmem:[#allocation31_spill] sm:$0xff]  ;;  %v13006_v23 = vld [vmem:[#allocation32_spill] sm:$0xff] }
 0x7bb   : > { %v9193_v27 = vpop.eup %9192  ;;  %v8257_v18 = vadd.f32 1.0, %v9191_v36 }
 0x7bc   : > { %v9195_v14 = vpop.eup %9194  ;;  %v8258_v10 = vadd.f32 1.0, %v9193_v27  ;;  %v8055_v27 = vld [vmem:[%s9553_s27 + $0x10] sm:$0xff] }
 0x7bd   : > { %v9197_v63 = vpop.eup %9196  ;;  %9218 = vrcp.f32 %v8257_v18  ;;  %v8056_v18 = vld [vmem:[%s9553_s27 + $0x18] sm:$0xff] }
 0x7be   : > { %v9199_v44 = vpop.eup %9198  ;;  %9220 = vrcp.f32 %v8258_v10  ;;  %8009 = vperm.xlu1 %9089, %v9195_v14   ;;  %8014 = vperm.xlu0 %9088, %v9197_v63   ;;  %v13007_v10 = vld [vmem:[#allocation33_spill] sm:$0xff] }
 0x7bf   : > { %v9201_v54 = vpop.eup %9200  ;;  %v8259_v12 = vadd.f32 1.0, %v9199_v44  ;;  %v13008_v44 = vld [vmem:[#allocation26_spill] sm:$0xff] }
 0x7c0   : > { %v9203_v34 = vpop.eup %9202  ;;  %v8260_v11 = vadd.f32 1.0, %v9201_v54 }
 0x7c1   : > { %v9205_v30 = vpop.eup %9204  ;;  %9222 = vrcp.f32 %v8259_v12 }
 0x7c2   : > { %v9207_v8 = vpop.eup %9206  ;;  %9224 = vrcp.f32 %v8260_v11  ;;  %8019 = vperm.xlu1 %9089, %v9203_v34   ;;  %8024 = vperm.xlu0 %9088, %v9205_v30  }
 0x7c3   : > { %v9209_v62 = vpop.eup %9208  ;;  %v8261_v50 = vadd.f32 1.0, %v9207_v8  ;;  %v8059_v8 = vld [vmem:[%s9553_s27 + $0x30] sm:$0xff] }
 0x7c4   : > { %v9211_v19 = vpop.eup %9210  ;;  %v8262_v13 = vadd.f32 1.0, %v9209_v62  ;;  %v8060_v62 = vld [vmem:[%s9553_s27 + $0x38] sm:$0xff] }
 0x7c5   : > { %v9213_v31 = vpop.eup %9212  ;;  %9226 = vrcp.f32 %v8261_v50 }
 0x7c6   : > { %v9215_v1 = vpop.eup %9214  ;;  %9228 = vrcp.f32 %v8262_v13  ;;  %8029 = vperm.xlu1 %9089, %v9211_v19   ;;  %8034 = vperm.xlu0 %9088, %v9213_v31   ;;  %v8057_v19 = vld [vmem:[%s9553_s27 + $0x20] sm:$0xff]  ;;  %v8058_v13 = vld [vmem:[%s9553_s27 + $0x28] sm:$0xff] }
 0x7c7   : > { %v9217_v38 = vpop.eup %9216  ;;  %v8263_v20 = vadd.f32 1.0, %v9215_v1 }
 0x7c8   : > { %v8264_v3 = vadd.f32 1.0, %v9217_v38 }
 0x7c9   : > { %9230 = vrcp.f32 %v8263_v20 }
 0x7ca   : > { %v9219_v55 = vpop.eup %9218  ;;  %9232 = vrcp.f32 %v8264_v3 }
 0x7cb   : > { %v9221_v5 = vpop.eup %9220  ;;  %8283 = vperm.xlu1 %9089, %v9219_v55  }
 0x7cc   : > { %8288 = vperm.xlu0 %9088, %v9221_v5  }
 0x7ce   : > { %v9223_v42 = vpop.eup %9222 }
 0x7cf   : > { %v9225_v48 = vpop.eup %9224  ;;  %8293 = vperm.xlu1 %9089, %v9223_v42  }
 0x7d0   : > { %8298 = vperm.xlu0 %9088, %v9225_v48  }
 0x7d2   : > { %v9227_v9 = vpop.eup %9226 }
 0x7d3   : > { %v9229_v46 = vpop.eup %9228  ;;  %8303 = vperm.xlu1 %9089, %v9227_v9   ;;  %v8063_v9 = vld [vmem:[%s9553_s27 + $0x50] sm:$0xff] }
 0x7d4   : > { %8308 = vperm.xlu0 %9088, %v9229_v46   ;;  %v8064_v46 = vld [vmem:[%s9553_s27 + $0x58] sm:$0xff] }
 0x7d6   : > { %v9231_v56 = vpop.eup %9230 }
 0x7d7   : > { %v9233_v57 = vpop.eup %9232  ;;  %8313 = vperm.xlu1 %9089, %v9231_v56  }
 0x7d8   : > { %8318 = vperm.xlu0 %9088, %v9233_v57   ;;  %v8061_v57 = vld [vmem:[%s9553_s27 + $0x40] sm:$0xff] }
 0x834   : > { %v8000_v24 = vpop.permute.xlu0 %7999 }
 0x835   : > { %v8037_v22 = vmul.f32 %v8000_v24, %v13005_v59  ;;  %v8038_v36 = vmul.f32 %v8000_v24, %v13006_v23  ;;  %v8005_v14 = vpop.permute.xlu1 %8004 }
 0x836   : > { %v8039_v63 = vmul.f32 %v8005_v14, %v13007_v10  ;;  %v8040_v54 = vmul.f32 %v8005_v14, %v13008_v44  ;;  %v8065_v14 = vld [vmem:[%s9553_s27 + $0x60] sm:$0xff]  ;;  %v8066_v10 = vld [vmem:[%s9553_s27 + $0x68] sm:$0xff] }
 0x837   : > { %v8069_v12 = vadd.f32 %v8053_v53, %v8037_v22  ;;  %v8070_v34 = vadd.f32 %v8054_v25, %v8038_v36  ;;  %v8062_v53 = vld [vmem:[%s9553_s27 + $0x48] sm:$0xff]  ;;  %v8067_v36 = vld [vmem:[%s9553_s27 + $0x70] sm:$0xff] }
 0x838   : > { %v8071_v11 = vadd.f32 %v8055_v27, %v8039_v63  ;;  %v8072_v30 = vadd.f32 %v8056_v18, %v8040_v54  ;;  %v8068_v27 = vld [vmem:[%s9553_s27 + $0x78] sm:$0xff] }
 0x839   : > { %8085 = vst [vmem:[%s12715_s18] sm:$0xff] %v8069_v12  ;;  %8086 = vst [vmem:[%s12715_s18 + $0x8] sm:$0xff] %v8070_v34  ;;  %v8015_v50 = vpop.permute.xlu0 %8014  ;;  %v8010_v31 = vpop.permute.xlu1 %8009 }
 0x83a   : > { %8087 = vst [vmem:[%s12715_s18 + $0x10] sm:$0xff] %v8071_v11  ;;  %8088 = vst [vmem:[%s12715_s18 + $0x18] sm:$0xff] %v8072_v30  ;;  %v8043_v1 = vmul.f32 %v8015_v50, %v12483_v6  ;;  %v8044_v38 = vmul.f32 %v8015_v50, %v12486_v40  ;;  %v8041_v20 = vmul.f32 %v8010_v31, %v12466_v33  ;;  %v8956_v11 = vld [vmem:[%s9553_s27 + $0x80] sm:$0xff]  ;;  %v8957_v30 = vld [vmem:[%s9553_s27 + $0x88] sm:$0xff] }
 0x83b   : > { %v8042_v3 = vmul.f32 %v8010_v31, %v12470_v15 }
 0x83c   : > { %v8075_v55 = vadd.f32 %v8059_v8, %v8043_v1  ;;  %v8076_v5 = vadd.f32 %v8060_v62, %v8044_v38  ;;  %v8073_v42 = vadd.f32 %v8057_v19, %v8041_v20  ;;  %v8960_v20 = vld [vmem:[%s9553_s27 + $0xa0] sm:$0xff] }
 0x83d   : > { %v8074_v48 = vadd.f32 %v8058_v13, %v8042_v3  ;;  %v8025_v56 = vpop.permute.xlu0 %8024  ;;  %v8020_v6 = vpop.permute.xlu1 %8019  ;;  %v8961_v3 = vld [vmem:[%s9553_s27 + $0xa8] sm:$0xff] }
 0x83e   : > { %8091 = vst [vmem:[%s12715_s18 + $0x30] sm:$0xff] %v8075_v55  ;;  %8092 = vst [vmem:[%s12715_s18 + $0x38] sm:$0xff] %v8076_v5  ;;  %v8047_v33 = vmul.f32 %v8025_v56, %v12525_v2  ;;  %v8048_v15 = vmul.f32 %v8025_v56, %v12528_v21  ;;  %v8045_v40 = vmul.f32 %v8020_v6, %v12509_v60 }
 0x83f   : > { %8089 = vst [vmem:[%s12715_s18 + $0x20] sm:$0xff] %v8073_v42  ;;  %8090 = vst [vmem:[%s12715_s18 + $0x28] sm:$0xff] %v8074_v48  ;;  %v8046_v25 = vmul.f32 %v8020_v6, %v12514_v17  ;;  %v8965_v6 = vld [vmem:[%s9553_s27 + $0xc8] sm:$0xff] }
 0x840   : > { %v8079_v24 = vadd.f32 %v8063_v9, %v8047_v33  ;;  %v8080_v59 = vadd.f32 %v8064_v46, %v8048_v15  ;;  %v8077_v22 = vadd.f32 %v8061_v57, %v8045_v40 }
 0x841   : > { %v8078_v23 = vadd.f32 %v8062_v53, %v8046_v25  ;;  %v8035_v18 = vpop.permute.xlu0 %8034  ;;  %v8030_v2 = vpop.permute.xlu1 %8029  ;;  %v8964_v53 = vld [vmem:[%s9553_s27 + $0xc0] sm:$0xff] }
 0x842   : > { %8095 = vst [vmem:[%s12715_s18 + $0x50] sm:$0xff] %v8079_v24  ;;  %8096 = vst [vmem:[%s12715_s18 + $0x58] sm:$0xff] %v8080_v59  ;;  %v8051_v60 = vmul.f32 %v8035_v18, %v12574_v45  ;;  %v8052_v17 = vmul.f32 %v8035_v18, %v12569_v7  ;;  %v8049_v21 = vmul.f32 %v8030_v2, %v12546_v41  ;;  %v8958_v7 = vld [vmem:[%s9553_s27 + $0x90] sm:$0xff]  ;;  %v8959_v41 = vld [vmem:[%s9553_s27 + $0x98] sm:$0xff] }
 0x843   : > { %8093 = vst [vmem:[%s12715_s18 + $0x40] sm:$0xff] %v8077_v22  ;;  %8094 = vst [vmem:[%s12715_s18 + $0x48] sm:$0xff] %v8078_v23  ;;  %v8050_v63 = vmul.f32 %v8030_v2, %v12549_v26  ;;  %v8971_v18 = vld [vmem:[%s9553_s27 + $0xf8] sm:$0xff] }
 0x844   : > { %v8083_v44 = vadd.f32 %v8067_v36, %v8051_v60  ;;  %v8084_v54 = vadd.f32 %v8068_v27, %v8052_v17  ;;  %v8081_v12 = vadd.f32 %v8065_v14, %v8049_v21  ;;  %v8968_v36 = vld [vmem:[%s9553_s27 + $0xe0] sm:$0xff]  ;;  %v8969_v27 = vld [vmem:[%s9553_s27 + $0xe8] sm:$0xff] }
 0x845   : > { %v8082_v34 = vadd.f32 %v8066_v10, %v8050_v63 }
 0x846   : > { %8099 = vst [vmem:[%s12715_s18 + $0x70] sm:$0xff] %v8083_v44  ;;  %8100 = vst [vmem:[%s12715_s18 + $0x78] sm:$0xff] %v8084_v54  ;;  %v8284_v45 = vpop.permute.xlu1 %8283 }
 0x847   : > { %8097 = vst [vmem:[%s12715_s18 + $0x60] sm:$0xff] %v8081_v12  ;;  %8098 = vst [vmem:[%s12715_s18 + $0x68] sm:$0xff] %v8082_v34  ;;  %v8289_v26 = vpop.permute.xlu0 %8288  ;;  %v8321_v8 = vmul.f32 %v8284_v45, %v12457_v39  ;;  %v8322_v62 = vmul.f32 %v8284_v45, %v12459_v51  ;;  %v8962_v39 = vld [vmem:[%s9553_s27 + $0xb0] sm:$0xff]  ;;  %v8963_v51 = vld [vmem:[%s9553_s27 + $0xb8] sm:$0xff] }
 0x848   : > { %v8323_v50 = vmul.f32 %v8289_v26, %v12476_v35  ;;  %v8324_v19 = vmul.f32 %v8289_v26, %v12478_v49 }
 0x849   : > { %v8353_v13 = vadd.f32 %v8956_v11, %v8321_v8  ;;  %v8354_v31 = vadd.f32 %v8957_v30, %v8322_v62 }
 0x84a   : > { %v8355_v1 = vadd.f32 %v8958_v7, %v8323_v50  ;;  %v8356_v38 = vadd.f32 %v8959_v41, %v8324_v19  ;;  %v8294_v55 = vpop.permute.xlu1 %8293 }
 0x84b   : > { %8972 = vst [vmem:[%s12715_s18 + $0x80] sm:$0xff] %v8353_v13  ;;  %8973 = vst [vmem:[%s12715_s18 + $0x88] sm:$0xff] %v8354_v31  ;;  %v8299_v35 = vpop.permute.xlu0 %8298  ;;  %v8325_v49 = vmul.f32 %v8294_v55, %v12498_v52  ;;  %v8326_v5 = vmul.f32 %v8294_v55, %v12500_v43  ;;  %v8966_v52 = vld [vmem:[%s9553_s27 + $0xd0] sm:$0xff]  ;;  %v8967_v43 = vld [vmem:[%s9553_s27 + $0xd8] sm:$0xff] }
 0x84c   : > { %8974 = vst [vmem:[%s12715_s18 + $0x90] sm:$0xff] %v8355_v1  ;;  %8975 = vst [vmem:[%s12715_s18 + $0x98] sm:$0xff] %v8356_v38  ;;  %v8327_v42 = vmul.f32 %v8299_v35, %v12520_v32  ;;  %v8328_v48 = vmul.f32 %v8299_v35, %v12522_v37 }
 0x84d   : > { %v8357_v9 = vadd.f32 %v8960_v20, %v8325_v49  ;;  %v8358_v46 = vadd.f32 %v8961_v3, %v8326_v5 }
 0x84e   : > { %v8359_v56 = vadd.f32 %v8962_v39, %v8327_v42  ;;  %v8360_v57 = vadd.f32 %v8963_v51, %v8328_v48  ;;  %v8304_v33 = vpop.permute.xlu1 %8303 }
 0x84f   : > { %8976 = vst [vmem:[%s12715_s18 + $0xa0] sm:$0xff] %v8357_v9  ;;  %8977 = vst [vmem:[%s12715_s18 + $0xa8] sm:$0xff] %v8358_v46  ;;  %v8309_v32 = vpop.permute.xlu0 %8308  ;;  %v8329_v37 = vmul.f32 %v8304_v33, %v12541_v47  ;;  %v8330_v15 = vmul.f32 %v8304_v33, %v12543_v0  ;;  %v8970_v0 = vld [vmem:[%s9553_s27 + $0xf0] sm:$0xff] }
 0x850   : > { %8978 = vst [vmem:[%s12715_s18 + $0xb0] sm:$0xff] %v8359_v56  ;;  %8979 = vst [vmem:[%s12715_s18 + $0xb8] sm:$0xff] %v8360_v57  ;;  %v8331_v40 = vmul.f32 %v8309_v32, %v12561_v4  ;;  %v8332_v25 = vmul.f32 %v8309_v32, %v12563_v16 }
 0x851   : > { %v8361_v24 = vadd.f32 %v8964_v53, %v8329_v37  ;;  %v8362_v59 = vadd.f32 %v8965_v6, %v8330_v15 }
 0x852   : > { %v8363_v22 = vadd.f32 %v8966_v52, %v8331_v40  ;;  %v8364_v23 = vadd.f32 %v8967_v43, %v8332_v25  ;;  %v8314_v47 = vpop.permute.xlu1 %8313 }
 0x853   : > { %8980 = vst [vmem:[%s12715_s18 + $0xc0] sm:$0xff] %v8361_v24  ;;  %8981 = vst [vmem:[%s12715_s18 + $0xc8] sm:$0xff] %v8362_v59  ;;  %v8319_v4 = vpop.permute.xlu0 %8318  ;;  %v8333_v16 = vmul.f32 %v8314_v47, %v12578_v28  ;;  %v8334_v14 = vmul.f32 %v8314_v47, %v12580_v61 }
 0x854   : > { %8982 = vst [vmem:[%s12715_s18 + $0xd0] sm:$0xff] %v8363_v22  ;;  %8983 = vst [vmem:[%s12715_s18 + $0xd8] sm:$0xff] %v8364_v23  ;;  %v8335_v10 = vmul.f32 %v8319_v4, %v12586_v58  ;;  %v8336_v2 = vmul.f32 %v8319_v4, %v12588_v29 }
 0x855   : > { %v8365_v60 = vadd.f32 %v8968_v36, %v8333_v16  ;;  %v8366_v17 = vadd.f32 %v8969_v27, %v8334_v14 }
 0x856   : > { %v8367_v28 = vadd.f32 %v8970_v0, %v8335_v10  ;;  %v8368_v21 = vadd.f32 %v8971_v18, %v8336_v2 }
 0x857   : > { %8984 = vst [vmem:[%s12715_s18 + $0xe0] sm:$0xff] %v8365_v60  ;;  %8985 = vst [vmem:[%s12715_s18 + $0xe8] sm:$0xff] %v8366_v17 }
 0x858   : > { %8986 = vst [vmem:[%s12715_s18 + $0xf0] sm:$0xff] %v8367_v28  ;;  %8987 = vst [vmem:[%s12715_s18 + $0xf8] sm:$0xff] %v8368_v21 }
 0x859   : > { %9333 = shalt.err (!%p9330_p10)
}
 0x85a   : > { %s9334_s23 = scalar_lea.hbm %s12805_s17, 4096  ;;  %s9338_s18 = scalar_lea.hbm %s12864_s9, 8192 }
 0x85b   : > { %p9335_p0 = scmp.ne.s32.totalorder %s12805_s17, %s9334_s23  ;;  %p9339_p1 = scmp.lt.s32.totalorder %s12805_s17, %s12864_s9 }
 0x85c   : > { %p9340_p3 = scmp.lt.s32.totalorder %s9338_s18, %s9334_s23 }
 0x85d   : > { %p9336_p2 = pnand %p9335_p0, %p13010_p12 }
 0x85e   : > { %p9341_p6 = por %p9340_p3, %p9339_p1 }
 0x85f   : > { %p9337_p9 = pneg %p9336_p2 }
 0x861   : > { %p9342_p11 = pnand %p9341_p6, %p9337_p9 }
 0x863   : > { %9345 = shalt.err (!%p9342_p11)
}
 0x864   : > { %s9399_s27 = smov 256   ;;  %s13011_s24 = smov 16  }
 0x865   : > { %9032 = dma.vmem_to_hbm [thread:$0]  (%p13010_p12), %s12807_s26, 4096, %s12805_s17, %s8387_s16, %s9399_s27, %s9399_s27, %s13011_s24  }
 0x866 PF: > { %s8416_s28 = sand.u32 1, %s9372_s30   ;;  %p13012_p13 = scmp.ne.s32.totalorder %s12915_s22, 0 }
 0x867   : > { %p13013_p4 = scmp.ge.s32.totalorder %s9384_s12, 2  ;;  %s8417_s14 = scalar_lea.sflag [#allocation6], %s8416_s28 }
 0x869   : > { %p9039_p5 = pnand %p13013_p4, %p13012_p13 }
 0x86b   : > { %p9040_p7 = pneg %p9039_p5 }
 0x86d   : > { %9367 = dma.done.wait (%p9040_p7), %s8417_s14, 4096  }
 0x86e   : > { %9369 = vsyncadd (%p9040_p7), %s8417_s14, 4294963200  ;;  %s13014_s21 = sld [smem:[#allocation10_spill]]  ;;  %p22_p8 = scmp.ge.s32.totalorder %s9475_s15, 4  }
 0x86f   : > { %s13015_s11 = sld [smem:[#allocation11_spill]]  ;;  %s13016_s30 = smov %s9376_s10 }
 0x870   : > { %s13018_s12 = smov %s9475_s15  ;;  %24 = sbr.rel (!%p22_p8) target bundleno = 5 (0x5), region = 105 }
 0x874   : > { %s13017_s10 = smov %s13014_s21 }
 0x875   :  { %8422 = vsyncpa [#allocation5], 1 }
 0x876   :  { %8424 = vsyncpa [#allocation5 + $0x1], 1 }
 0x877   :  { %8425 = vsyncpa [#allocation6], 1 }
 0x878   :  { %8427 = vsyncpa [#allocation6 + $0x1], 1 }

</bundles_post_ra>
